<compile_context>
chip_gen: v7x
topology: tpu7x:2x2x1
jax: 0.10.0
libtpu: 0.0.40
codegen_flags: <defaults>
</compile_context>

<pallas_src>
import jax
import jax.numpy as jnp
from jax import lax
from jax.experimental import pallas as pl
from jax.experimental.pallas import tpu as pltpu


# ---------------------------------------------------------------------------
# Static shape derivation (all Python ints)
# ---------------------------------------------------------------------------
def _derive_dims(params, H, W):
    K1, s1, C1 = params['c1']
    kp1, sp1 = params['p1']
    K2, s2, C2 = params['c2']
    kp2, sp2 = params['p2']
    F1_in, F1_out = params['f1']
    F2_in, F2_out = params['f2']

    # stride-1 conv extents (kernel computes these; stride is folded into pooling selectors)
    Hf1, Wf1 = H - K1 + 1, W - K1 + 1
    Hc1, Wc1 = (H - K1) // s1 + 1, (W - K1) // s1 + 1
    Hp1, Wp1 = (Hc1 - kp1) // sp1 + 1, (Wc1 - kp1) // sp1 + 1

    Hf2, Wf2 = Hp1 - K2 + 1, Wp1 - K2 + 1
    Hc2, Wc2 = (Hp1 - K2) // s2 + 1, (Wp1 - K2) // s2 + 1
    Hp2, Wp2 = (Hc2 - kp2) // sp2 + 1, (Wc2 - kp2) // sp2 + 1

    assert F1_in == C2 * Hp2 * Wp2, "params['f1'][0] must equal C2*Hp2*Wp2"
    assert F2_in == F1_out, "params['f2'][0] must equal params['f1'][1]"

    return dict(K1=K1, s1=s1, C1=C1, kp1=kp1, sp1=sp1,
                K2=K2, s2=s2, C2=C2, kp2=kp2, sp2=sp2,
                F1_out=F1_out, F2_out=F2_out,
                Hf1=Hf1, Wf1=Wf1, Hp1=Hp1, Wp1=Wp1,
                Hf2=Hf2, Wf2=Wf2, Hp2=Hp2, Wp2=Wp2, H=H, W=W)


def _pool_selectors(C, Hf, Wf, s, kp, sp, Hp, Wp, dtype=jnp.float32):
    """Exact 0/1 selection matrices implementing (conv stride s) + max-pool (kp, sp).

    Column selectors Qw[pw]: (Wf, Wp)      -> picks stride-1 conv column (j*sp+pw)*s.
    Row selectors    P[ph] : (C*Hp, C*Hf)  -> block-diagonal, picks row (i*sp+ph)*s
                                              inside each channel's packed row block.
    """
    jj = jnp.arange(Wp)
    cc = jnp.arange(Wf)
    qw = jnp.stack([(cc[:, None] == (jj[None, :] * sp + pw) * s).astype(dtype)
                    for pw in range(kp)])                                   # (kp, Wf, Wp)

    ii = jnp.arange(Hp)
    rr = jnp.arange(Hf)
    eye = jnp.eye(C, dtype=dtype)
    p = jnp.stack([jnp.kron(eye, (rr[None, :] == (ii[:, None] * sp + ph) * s).astype(dtype))
                   for ph in range(kp)])                                    # (kp, C*Hp, C*Hf)
    return qw, p


def prepare_fused_weights(params, weights, image_hw):
    """One-time preprocessing of torch-layout weights into kernel operands."""
    H, W = image_hw
    d = _derive_dims(params, H, W)
    f32 = jnp.float32
    qw1, p1 = _pool_selectors(d['C1'], d['Hf1'], d['Wf1'], d['s1'],
                              d['kp1'], d['sp1'], d['Hp1'], d['Wp1'])
    qw2, p2 = _pool_selectors(d['C2'], d['Hf2'], d['Wf2'], d['s2'],
                              d['kp2'], d['sp2'], d['Hp2'], d['Wp2'])
    return {
        # conv weights flattened to (Cout, Cin*K*K) scalars for SMEM broadcast-FMA
        'w1f': weights['w_conv1'].reshape(d['C1'], -1).astype(f32),
        'w2f': weights['w_conv2'].reshape(d['C2'], -1).astype(f32),
        # per-row conv biases for the packed (C*Hp, Wp) pooled layout
        'b1r': jnp.repeat(weights['b_conv1'], d['Hp1'])[:, None].astype(f32),
        'b2r': jnp.repeat(weights['b_conv2'], d['Hp2'])[:, None].astype(f32),
        # pooling selectors
        'qw1': qw1, 'p1': p1, 'qw2': qw2, 'p2': p2,
        # fc1 weight split per feature column j (torch flatten index k = row*Wp2 + j)
        'a1': jnp.stack([weights['w_fc1'][:, j::d['Wp2']]
                         for j in range(d['Wp2'])]).astype(f32),            # (Wp2, F1o, C2*Hp2)
        'bf1': weights['b_fc1'][:, None].astype(f32),                       # (F1_out, 1)
        'wf2': weights['w_fc2'].astype(f32),                                # (F2_out, F1_out)
        'bf2': weights['b_fc2'][:, None].astype(f32),                       # (F2_out, 1)
    }


# ---------------------------------------------------------------------------
# Fused forward pass: one pallas_call, grid over batch
# ---------------------------------------------------------------------------
def cnn_cpcpff_forward(x, params, fused):
    N, Cin, H, W = x.shape
    assert Cin == 1, "CNN_cpcpff uses nn.Conv2d(1, ...): single input channel"
    d = _derive_dims(params, H, W)
    K1, C1, kp1 = d['K1'], d['C1'], d['kp1']
    K2, C2, kp2 = d['K2'], d['C2'], d['kp2']
    Hf1, Wf1, Hp1, Wp1 = d['Hf1'], d['Wf1'], d['Hp1'], d['Wp1']
    Hf2, Wf2, Hp2, Wp2 = d['Hf2'], d['Wf2'], d['Hp2'], d['Wp2']
    F1_out, F2_out = d['F1_out'], d['F2_out']
    T1, T2 = K1 * K1, C1 * K2 * K2

    def kernel(x_ref, w1_ref, w2_ref, qw1_ref, p1_ref, b1_ref,
               qw2_ref, p2_ref, b2_ref, a1_ref, bf1_ref, wf2_ref, bf2_ref,
               o_ref, z1_s, z2_s):
        f32 = jnp.float32
        img = x_ref[0, 0]                                            # (H, W) in VMEM

        # ---- conv1: static shifted slices + SMEM-scalar broadcast FMAs (VPU) ----
        xs = [img[kh:kh + Hf1, kw:kw + Wf1]
              for kh in range(K1) for kw in range(K1)]
        for co in range(C1):
            acc = xs[0] * w1_ref[co, 0]
            for t in range(1, T1):
                acc = acc + xs[t] * w1_ref[co, t]
            z1_s[pl.ds(co * Hf1, Hf1), :] = acc                      # packed (C1*Hf1, Wf1)

        # ---- pool1 (and conv1 stride) via exact selection matmuls, then bias+relu ----
        z1 = z1_s[...]
        mw = jnp.dot(z1, qw1_ref[0], preferred_element_type=f32)
        for pw in range(1, kp1):
            mw = jnp.maximum(mw, jnp.dot(z1, qw1_ref[pw], preferred_element_type=f32))
        pooled = jnp.dot(p1_ref[0], mw, preferred_element_type=f32)
        for ph in range(1, kp1):
            pooled = jnp.maximum(pooled, jnp.dot(p1_ref[ph], mw, preferred_element_type=f32))
        y1 = jnp.maximum(pooled + b1_ref[...], 0.0)                  # (C1*Hp1, Wp1)

        # ---- conv2 on the packed activations ----
        ys = [y1[ci * Hp1 + kh: ci * Hp1 + kh + Hf2, kw: kw + Wf2]
              for ci in range(C1) for kh in range(K2) for kw in range(K2)]
        for co in range(C2):
            acc = ys[0] * w2_ref[co, 0]
            for t in range(1, T2):
                acc = acc + ys[t] * w2_ref[co, t]
            z2_s[pl.ds(co * Hf2, Hf2), :] = acc                      # packed (C2*Hf2, Wf2)

        # ---- pool2 + bias + relu -> features already in torch .view(N, -1) row order ----
        z2 = z2_s[...]
        mw2 = jnp.dot(z2, qw2_ref[0], preferred_element_type=f32)
        for pw in range(1, kp2):
            mw2 = jnp.maximum(mw2, jnp.dot(z2, qw2_ref[pw], preferred_element_type=f32))
        pooled2 = jnp.dot(p2_ref[0], mw2, preferred_element_type=f32)
        for ph in range(1, kp2):
            pooled2 = jnp.maximum(pooled2, jnp.dot(p2_ref[ph], mw2, preferred_element_type=f32))
        feat = jnp.maximum(pooled2 + b2_ref[...], 0.0)               # (C2*Hp2, Wp2)

        # ---- fc1 + relu (fc1 weight pre-split per feature column: no flatten needed) ----
        h = jnp.dot(a1_ref[0], feat[:, 0:1], preferred_element_type=f32)
        for j in range(1, Wp2):
            h = h + jnp.dot(a1_ref[j], feat[:, j:j + 1], preferred_element_type=f32)
        h = jnp.maximum(h + bf1_ref[...], 0.0)                       # (F1_out, 1)

        # ---- fc2 + relu ----
        o = jnp.dot(wf2_ref[...], h, preferred_element_type=f32) + bf2_ref[...]
        o = jnp.maximum(o, 0.0)                                      # (F2_out, 1)

        # ---- softmax over the class column (exact divide; classes unrolled) ----
        rows = [o[c:c + 1, :] for c in range(F2_out)]
        m = rows[0]
        for c in range(1, F2_out):
            m = jnp.maximum(m, rows[c])
        es = [jnp.exp(r - m) for r in rows]
        ssum = es[0]
        for c in range(1, F2_out):
            ssum = ssum + es[c]
        inv = 1.0 / ssum
        for c in range(F2_out):
            o_ref[0, c:c + 1, :] = es[c] * inv

    out3 = pl.pallas_call(
        kernel,
        out_shape=jax.ShapeDtypeStruct((N, F2_out, 1), jnp.float32),
        grid=(N,),
        in_specs=[
            pl.BlockSpec((1, 1, H, W), lambda n: (n, 0, 0, 0)),              # image (streamed)
            pl.BlockSpec(memory_space=pltpu.MemorySpace.SMEM),               # conv1 w scalars
            pl.BlockSpec(memory_space=pltpu.MemorySpace.SMEM),               # conv2 w scalars
            pl.BlockSpec((kp1, Wf1, Wp1), lambda n: (0, 0, 0)),              # pool1 col sel
            pl.BlockSpec((kp1, C1 * Hp1, C1 * Hf1), lambda n: (0, 0, 0)),    # pool1 row sel
            pl.BlockSpec((C1 * Hp1, 1), lambda n: (0, 0)),                   # conv1 bias rows
            pl.BlockSpec((kp2, Wf2, Wp2), lambda n: (0, 0, 0)),              # pool2 col sel
            pl.BlockSpec((kp2, C2 * Hp2, C2 * Hf2), lambda n: (0, 0, 0)),    # pool2 row sel
            pl.BlockSpec((C2 * Hp2, 1), lambda n: (0, 0)),                   # conv2 bias rows
            pl.BlockSpec((Wp2, F1_out, C2 * Hp2), lambda n: (0, 0, 0)),      # fc1 weight split
            pl.BlockSpec((F1_out, 1), lambda n: (0, 0)),                     # fc1 bias
            pl.BlockSpec((F2_out, F1_out), lambda n: (0, 0)),                # fc2 weight
            pl.BlockSpec((F2_out, 1), lambda n: (0, 0)),                     # fc2 bias
        ],
        out_specs=pl.BlockSpec((1, F2_out, 1), lambda n: (n, 0, 0)),
        scratch_shapes=[pltpu.VMEM((C1 * Hf1, Wf1), jnp.float32),            # packed conv1 out
                        pltpu.VMEM((C2 * Hf2, Wf2), jnp.float32)],           # packed conv2 out
        compiler_params=pltpu.CompilerParams(
            dimension_semantics=("parallel",)),                              # megacore: split batch
    )(x.astype(jnp.float32), fused['w1f'], fused['w2f'], fused['qw1'], fused['p1'],
      fused['b1r'], fused['qw2'], fused['p2'], fused['b2r'], fused['a1'], fused['bf1'],
      fused['wf2'], fused['bf2'])
    return out3[:, :, 0]


# ---------------------------------------------------------------------------
# Deterministic parameter init (mimics init_norm_auto: normal(0, 1/sqrt(fan_in)))
# ---------------------------------------------------------------------------
def make_weights(params, key):
    K1, _, C1 = params['c1']
    K2, _, C2 = params['c2']
    F1_in, F1_out = params['f1']
    F2_in, F2_out = params['f2']
    Cin1 = 1

    ks = jax.random.split(key, 8)
    std1 = 1.0 / (Cin1 * K1 * K1) ** 0.5
    std2 = 1.0 / (C1 * K2 * K2) ** 0.5
    stdf1 = 1.0 / F1_in ** 0.5
    stdf2 = 1.0 / F2_in ** 0.5

    return {
        'w_conv1': std1 * jax.random.normal(ks[0], (C1, Cin1, K1, K1), jnp.float32),
        'b_conv1': std1 * jax.random.normal(ks[1], (C1,), jnp.float32),
        'w_conv2': std2 * jax.random.normal(ks[2], (C2, C1, K2, K2), jnp.float32),
        'b_conv2': std2 * jax.random.normal(ks[3], (C2,), jnp.float32),
        'w_fc1': stdf1 * jax.random.normal(ks[4], (F1_out, F1_in), jnp.float32),   # torch (out,in)
        'b_fc1': stdf1 * jax.random.normal(ks[5], (F1_out,), jnp.float32),
        'w_fc2': stdf2 * jax.random.normal(ks[6], (F2_out, F2_in), jnp.float32),
        'b_fc2': stdf2 * jax.random.normal(ks[7], (F2_out,), jnp.float32),
    }


# ---------------------------------------------------------------------------
# Pure-XLA reference (mirrors the PyTorch forward) for a correctness check
# ---------------------------------------------------------------------------
def reference_forward(x, params, weights):
    K1, s1, C1 = params['c1']
    kp1, sp1 = params['p1']
    K2, s2, C2 = params['c2']
    kp2, sp2 = params['p2']
    dn = ('NCHW', 'OIHW', 'NCHW')
    hp = lax.Precision.HIGHEST
    neg_inf = jnp.float32(-jnp.inf)

    z1 = lax.conv_general_dilated(x, weights['w_conv1'], (s1, s1), 'VALID',
                                  dimension_numbers=dn, precision=hp)
    z1 = jnp.maximum(z1 + weights['b_conv1'][None, :, None, None], 0.0)
    y1 = lax.reduce_window(z1, neg_inf, lax.max,
                           (1, 1, kp1, kp1), (1, 1, sp1, sp1), 'VALID')
    z2 = lax.conv_general_dilated(y1, weights['w_conv2'], (s2, s2), 'VALID',
                                  dimension_numbers=dn, precision=hp)
    z2 = jnp.maximum(z2 + weights['b_conv2'][None, :, None, None], 0.0)
    y2 = lax.reduce_window(z2, neg_inf, lax.max,
                           (1, 1, kp2, kp2), (1, 1, sp2, sp2), 'VALID')
    feat = y2.reshape(y2.shape[0], -1)
    h = jnp.maximum(jnp.dot(feat, weights['w_fc1'].T, precision=hp) + weights['b_fc1'], 0.0)
    o = jnp.maximum(jnp.dot(h, weights['w_fc2'].T, precision=hp) + weights['b_fc2'], 0.0)
    return jax.nn.softmax(o, axis=1)


if __name__ == "__main__":
    # Small shapes consistent with the module:
    #   16x16 single-channel input, c1=[3,1,4], p1=[2,2], c2=[3,1,8], p2=[2,2]
    #   -> conv1: 14x14 -> pool1: 7x7 -> conv2: 5x5 -> pool2: 2x2 -> flatten 8*2*2 = 32
    params = {
        'c1': [3, 1, 4],
        'p1': [2, 2],
        'c2': [3, 1, 8],
        'p2': [2, 2],
        'f1': [32, 16],
        'f2': [16, 2],
    }

    key = jax.random.PRNGKey(0)
    kx, kw = jax.random.split(key)
    x = jax.random.normal(kx, (2, 1, 16, 16), jnp.float32)   # NCHW, like PyTorch
    weights = make_weights(params, kw)

    # one-time weight preprocessing (selection matrices, flattened conv weights, fc split)
    fused = prepare_fused_weights(params, weights, image_hw=(16, 16))

    fwd = jax.jit(lambda xx, ff: cnn_cpcpff_forward(xx, params, ff))
    out = jax.block_until_ready(fwd(x, fused))

    ref = reference_forward(x, params, weights)

    assert out.shape == (2, 2)
    assert bool(jnp.all(jnp.isfinite(out)))
    assert bool(jnp.all(out >= 0.0))
    assert bool(jnp.allclose(jnp.sum(out, axis=1), 1.0, atol=1e-5))
    # loose tolerance only to cover MXU f32-matmul pass differences vs the XLA reference
    assert bool(jnp.allclose(out, ref, atol=2e-2)), (out, ref)
    print("KERNEL_OK")
</pallas_src>

<mosaic_0001>
module attributes {stable_mosaic.version = 11 : i64} {
  func.func @kernel(%arg0: i32, %arg1: memref<1x1x16x16xf32, #tpu.memory_space<vmem>>, %arg2: memref<4x9xf32, #tpu.memory_space<smem>>, %arg3: memref<8x36xf32, #tpu.memory_space<smem>>, %arg4: memref<2x14x7xf32, #tpu.memory_space<vmem>>, %arg5: memref<2x28x56xf32, #tpu.memory_space<vmem>>, %arg6: memref<28x1xf32, #tpu.memory_space<vmem>>, %arg7: memref<2x5x2xf32, #tpu.memory_space<vmem>>, %arg8: memref<2x16x40xf32, #tpu.memory_space<vmem>>, %arg9: memref<16x1xf32, #tpu.memory_space<vmem>>, %arg10: memref<2x16x16xf32, #tpu.memory_space<vmem>>, %arg11: memref<16x1xf32, #tpu.memory_space<vmem>>, %arg12: memref<2x16xf32, #tpu.memory_space<vmem>>, %arg13: memref<2x1xf32, #tpu.memory_space<vmem>>, %arg14: memref<1x2x1xf32, #tpu.memory_space<vmem>>, %arg15: memref<56x14xf32, #tpu.memory_space<vmem>>, %arg16: memref<40x5xf32, #tpu.memory_space<vmem>>) attributes {dimension_semantics = [#tpu.dimension_semantics<parallel>], iteration_bounds = array<i64: 2>, scalar_prefetch = 0 : i64, scratch_operands = 2 : i64, tpu.core_type = #tpu.core_type<tc>, window_params = [{transform_indices = @transform_0, window_bounds = array<i64: 1, 1, 16, 16>}, {transform_indices = @transform_1, window_bounds = array<i64: 4, 9>}, {transform_indices = @transform_2, window_bounds = array<i64: 8, 36>}, {pipeline_mode = #tpu.pipeline_mode<synchronous>, transform_indices = @transform_3, window_bounds = array<i64: 2, 14, 7>}, {pipeline_mode = #tpu.pipeline_mode<synchronous>, transform_indices = @transform_4, window_bounds = array<i64: 2, 28, 56>}, {pipeline_mode = #tpu.pipeline_mode<synchronous>, transform_indices = @transform_5, window_bounds = array<i64: 28, 1>}, {pipeline_mode = #tpu.pipeline_mode<synchronous>, transform_indices = @transform_6, window_bounds = array<i64: 2, 5, 2>}, {pipeline_mode = #tpu.pipeline_mode<synchronous>, transform_indices = @transform_7, window_bounds = array<i64: 2, 16, 40>}, {pipeline_mode = #tpu.pipeline_mode<synchronous>, transform_indices = @transform_8, window_bounds = array<i64: 16, 1>}, {pipeline_mode = #tpu.pipeline_mode<synchronous>, transform_indices = @transform_9, window_bounds = array<i64: 2, 16, 16>}, {pipeline_mode = #tpu.pipeline_mode<synchronous>, transform_indices = @transform_10, window_bounds = array<i64: 16, 1>}, {pipeline_mode = #tpu.pipeline_mode<synchronous>, transform_indices = @transform_11, window_bounds = array<i64: 2, 16>}, {pipeline_mode = #tpu.pipeline_mode<synchronous>, transform_indices = @transform_12, window_bounds = array<i64: 2, 1>}, {transform_indices = @transform_13, window_bounds = array<i64: 1, 2, 1>}]} {
    %c0 = arith.constant 0 : index
    %c0_0 = arith.constant 0 : index
    %c0_1 = arith.constant 0 : index
    %c0_2 = arith.constant 0 : index
    %0 = vector.load %arg1[%c0, %c0_0, %c0_1, %c0_2] : memref<1x1x16x16xf32, #tpu.memory_space<vmem>>, vector<1x1x16x16xf32>
    %1 = vector.shape_cast %0 : vector<1x1x16x16xf32> to vector<16x16xf32>
    %2 = vector.extract_strided_slice %1 {offsets = [0, 0], sizes = [14, 14], strides = [1, 1]} : vector<16x16xf32> to vector<14x14xf32>
    %3 = vector.extract_strided_slice %1 {offsets = [0, 1], sizes = [14, 14], strides = [1, 1]} : vector<16x16xf32> to vector<14x14xf32>
    %4 = vector.extract_strided_slice %1 {offsets = [0, 2], sizes = [14, 14], strides = [1, 1]} : vector<16x16xf32> to vector<14x14xf32>
    %5 = vector.extract_strided_slice %1 {offsets = [1, 0], sizes = [14, 14], strides = [1, 1]} : vector<16x16xf32> to vector<14x14xf32>
    %6 = vector.extract_strided_slice %1 {offsets = [1, 1], sizes = [14, 14], strides = [1, 1]} : vector<16x16xf32> to vector<14x14xf32>
    %7 = vector.extract_strided_slice %1 {offsets = [1, 2], sizes = [14, 14], strides = [1, 1]} : vector<16x16xf32> to vector<14x14xf32>
    %8 = vector.extract_strided_slice %1 {offsets = [2, 0], sizes = [14, 14], strides = [1, 1]} : vector<16x16xf32> to vector<14x14xf32>
    %9 = vector.extract_strided_slice %1 {offsets = [2, 1], sizes = [14, 14], strides = [1, 1]} : vector<16x16xf32> to vector<14x14xf32>
    %10 = vector.extract_strided_slice %1 {offsets = [2, 2], sizes = [14, 14], strides = [1, 1]} : vector<16x16xf32> to vector<14x14xf32>
    %c0_3 = arith.constant 0 : index
    %c0_4 = arith.constant 0 : index
    %11 = memref.load %arg2[%c0_3, %c0_4] : memref<4x9xf32, #tpu.memory_space<smem>>
    %12 = vector.broadcast %11 : f32 to vector<14x14xf32>
    %13 = arith.mulf %2, %12 : vector<14x14xf32>
    %c0_5 = arith.constant 0 : index
    %c1 = arith.constant 1 : index
    %14 = memref.load %arg2[%c0_5, %c1] : memref<4x9xf32, #tpu.memory_space<smem>>
    %15 = vector.broadcast %14 : f32 to vector<14x14xf32>
    %16 = arith.mulf %3, %15 : vector<14x14xf32>
    %17 = arith.addf %13, %16 : vector<14x14xf32>
    %c0_6 = arith.constant 0 : index
    %c2 = arith.constant 2 : index
    %18 = memref.load %arg2[%c0_6, %c2] : memref<4x9xf32, #tpu.memory_space<smem>>
    %19 = vector.broadcast %18 : f32 to vector<14x14xf32>
    %20 = arith.mulf %4, %19 : vector<14x14xf32>
    %21 = arith.addf %17, %20 : vector<14x14xf32>
    %c0_7 = arith.constant 0 : index
    %c3 = arith.constant 3 : index
    %22 = memref.load %arg2[%c0_7, %c3] : memref<4x9xf32, #tpu.memory_space<smem>>
    %23 = vector.broadcast %22 : f32 to vector<14x14xf32>
    %24 = arith.mulf %5, %23 : vector<14x14xf32>
    %25 = arith.addf %21, %24 : vector<14x14xf32>
    %c0_8 = arith.constant 0 : index
    %c4 = arith.constant 4 : index
    %26 = memref.load %arg2[%c0_8, %c4] : memref<4x9xf32, #tpu.memory_space<smem>>
    %27 = vector.broadcast %26 : f32 to vector<14x14xf32>
    %28 = arith.mulf %6, %27 : vector<14x14xf32>
    %29 = arith.addf %25, %28 : vector<14x14xf32>
    %c0_9 = arith.constant 0 : index
    %c5 = arith.constant 5 : index
    %30 = memref.load %arg2[%c0_9, %c5] : memref<4x9xf32, #tpu.memory_space<smem>>
    %31 = vector.broadcast %30 : f32 to vector<14x14xf32>
    %32 = arith.mulf %7, %31 : vector<14x14xf32>
    %33 = arith.addf %29, %32 : vector<14x14xf32>
    %c0_10 = arith.constant 0 : index
    %c6 = arith.constant 6 : index
    %34 = memref.load %arg2[%c0_10, %c6] : memref<4x9xf32, #tpu.memory_space<smem>>
    %35 = vector.broadcast %34 : f32 to vector<14x14xf32>
    %36 = arith.mulf %8, %35 : vector<14x14xf32>
    %37 = arith.addf %33, %36 : vector<14x14xf32>
    %c0_11 = arith.constant 0 : index
    %c7 = arith.constant 7 : index
    %38 = memref.load %arg2[%c0_11, %c7] : memref<4x9xf32, #tpu.memory_space<smem>>
    %39 = vector.broadcast %38 : f32 to vector<14x14xf32>
    %40 = arith.mulf %9, %39 : vector<14x14xf32>
    %41 = arith.addf %37, %40 : vector<14x14xf32>
    %c0_12 = arith.constant 0 : index
    %c8 = arith.constant 8 : index
    %42 = memref.load %arg2[%c0_12, %c8] : memref<4x9xf32, #tpu.memory_space<smem>>
    %43 = vector.broadcast %42 : f32 to vector<14x14xf32>
    %44 = arith.mulf %10, %43 : vector<14x14xf32>
    %45 = arith.addf %41, %44 : vector<14x14xf32>
    %c0_13 = arith.constant 0 : index
    %c0_14 = arith.constant 0 : index
    %46 = vector.load %arg15[%c0_13, %c0_14] : memref<56x14xf32, #tpu.memory_space<vmem>>, vector<14x14xf32>
    tpu.vector_store %arg15[%c0_13, %c0_14], %45 {strides = array<i32>} : memref<56x14xf32, #tpu.memory_space<vmem>>, vector<14x14xf32>,
    %c1_15 = arith.constant 1 : index
    %c0_16 = arith.constant 0 : index
    %47 = memref.load %arg2[%c1_15, %c0_16] : memref<4x9xf32, #tpu.memory_space<smem>>
    %48 = vector.broadcast %47 : f32 to vector<14x14xf32>
    %49 = arith.mulf %2, %48 : vector<14x14xf32>
    %c1_17 = arith.constant 1 : index
    %c1_18 = arith.constant 1 : index
    %50 = memref.load %arg2[%c1_17, %c1_18] : memref<4x9xf32, #tpu.memory_space<smem>>
    %51 = vector.broadcast %50 : f32 to vector<14x14xf32>
    %52 = arith.mulf %3, %51 : vector<14x14xf32>
    %53 = arith.addf %49, %52 : vector<14x14xf32>
    %c1_19 = arith.constant 1 : index
    %c2_20 = arith.constant 2 : index
    %54 = memref.load %arg2[%c1_19, %c2_20] : memref<4x9xf32, #tpu.memory_space<smem>>
    %55 = vector.broadcast %54 : f32 to vector<14x14xf32>
    %56 = arith.mulf %4, %55 : vector<14x14xf32>
    %57 = arith.addf %53, %56 : vector<14x14xf32>
    %c1_21 = arith.constant 1 : index
    %c3_22 = arith.constant 3 : index
    %58 = memref.load %arg2[%c1_21, %c3_22] : memref<4x9xf32, #tpu.memory_space<smem>>
    %59 = vector.broadcast %58 : f32 to vector<14x14xf32>
    %60 = arith.mulf %5, %59 : vector<14x14xf32>
    %61 = arith.addf %57, %60 : vector<14x14xf32>
    %c1_23 = arith.constant 1 : index
    %c4_24 = arith.constant 4 : index
    %62 = memref.load %arg2[%c1_23, %c4_24] : memref<4x9xf32, #tpu.memory_space<smem>>
    %63 = vector.broadcast %62 : f32 to vector<14x14xf32>
    %64 = arith.mulf %6, %63 : vector<14x14xf32>
    %65 = arith.addf %61, %64 : vector<14x14xf32>
    %c1_25 = arith.constant 1 : index
    %c5_26 = arith.constant 5 : index
    %66 = memref.load %arg2[%c1_25, %c5_26] : memref<4x9xf32, #tpu.memory_space<smem>>
    %67 = vector.broadcast %66 : f32 to vector<14x14xf32>
    %68 = arith.mulf %7, %67 : vector<14x14xf32>
    %69 = arith.addf %65, %68 : vector<14x14xf32>
    %c1_27 = arith.constant 1 : index
    %c6_28 = arith.constant 6 : index
    %70 = memref.load %arg2[%c1_27, %c6_28] : memref<4x9xf32, #tpu.memory_space<smem>>
    %71 = vector.broadcast %70 : f32 to vector<14x14xf32>
    %72 = arith.mulf %8, %71 : vector<14x14xf32>
    %73 = arith.addf %69, %72 : vector<14x14xf32>
    %c1_29 = arith.constant 1 : index
    %c7_30 = arith.constant 7 : index
    %74 = memref.load %arg2[%c1_29, %c7_30] : memref<4x9xf32, #tpu.memory_space<smem>>
    %75 = vector.broadcast %74 : f32 to vector<14x14xf32>
    %76 = arith.mulf %9, %75 : vector<14x14xf32>
    %77 = arith.addf %73, %76 : vector<14x14xf32>
    %c1_31 = arith.constant 1 : index
    %c8_32 = arith.constant 8 : index
    %78 = memref.load %arg2[%c1_31, %c8_32] : memref<4x9xf32, #tpu.memory_space<smem>>
    %79 = vector.broadcast %78 : f32 to vector<14x14xf32>
    %80 = arith.mulf %10, %79 : vector<14x14xf32>
    %81 = arith.addf %77, %80 : vector<14x14xf32>
    %c14 = arith.constant 14 : index
    %c0_33 = arith.constant 0 : index
    %82 = vector.load %arg15[%c14, %c0_33] : memref<56x14xf32, #tpu.memory_space<vmem>>, vector<14x14xf32>
    tpu.vector_store %arg15[%c14, %c0_33], %81 {strides = array<i32>} : memref<56x14xf32, #tpu.memory_space<vmem>>, vector<14x14xf32>,
    %c2_34 = arith.constant 2 : index
    %c0_35 = arith.constant 0 : index
    %83 = memref.load %arg2[%c2_34, %c0_35] : memref<4x9xf32, #tpu.memory_space<smem>>
    %84 = vector.broadcast %83 : f32 to vector<14x14xf32>
    %85 = arith.mulf %2, %84 : vector<14x14xf32>
    %c2_36 = arith.constant 2 : index
    %c1_37 = arith.constant 1 : index
    %86 = memref.load %arg2[%c2_36, %c1_37] : memref<4x9xf32, #tpu.memory_space<smem>>
    %87 = vector.broadcast %86 : f32 to vector<14x14xf32>
    %88 = arith.mulf %3, %87 : vector<14x14xf32>
    %89 = arith.addf %85, %88 : vector<14x14xf32>
    %c2_38 = arith.constant 2 : index
    %c2_39 = arith.constant 2 : index
    %90 = memref.load %arg2[%c2_38, %c2_39] : memref<4x9xf32, #tpu.memory_space<smem>>
    %91 = vector.broadcast %90 : f32 to vector<14x14xf32>
    %92 = arith.mulf %4, %91 : vector<14x14xf32>
    %93 = arith.addf %89, %92 : vector<14x14xf32>
    %c2_40 = arith.constant 2 : index
    %c3_41 = arith.constant 3 : index
    %94 = memref.load %arg2[%c2_40, %c3_41] : memref<4x9xf32, #tpu.memory_space<smem>>
    %95 = vector.broadcast %94 : f32 to vector<14x14xf32>
    %96 = arith.mulf %5, %95 : vector<14x14xf32>
    %97 = arith.addf %93, %96 : vector<14x14xf32>
    %c2_42 = arith.constant 2 : index
    %c4_43 = arith.constant 4 : index
    %98 = memref.load %arg2[%c2_42, %c4_43] : memref<4x9xf32, #tpu.memory_space<smem>>
    %99 = vector.broadcast %98 : f32 to vector<14x14xf32>
    %100 = arith.mulf %6, %99 : vector<14x14xf32>
    %101 = arith.addf %97, %100 : vector<14x14xf32>
    %c2_44 = arith.constant 2 : index
    %c5_45 = arith.constant 5 : index
    %102 = memref.load %arg2[%c2_44, %c5_45] : memref<4x9xf32, #tpu.memory_space<smem>>
    %103 = vector.broadcast %102 : f32 to vector<14x14xf32>
    %104 = arith.mulf %7, %103 : vector<14x14xf32>
    %105 = arith.addf %101, %104 : vector<14x14xf32>
    %c2_46 = arith.constant 2 : index
    %c6_47 = arith.constant 6 : index
    %106 = memref.load %arg2[%c2_46, %c6_47] : memref<4x9xf32, #tpu.memory_space<smem>>
    %107 = vector.broadcast %106 : f32 to vector<14x14xf32>
    %108 = arith.mulf %8, %107 : vector<14x14xf32>
    %109 = arith.addf %105, %108 : vector<14x14xf32>
    %c2_48 = arith.constant 2 : index
    %c7_49 = arith.constant 7 : index
    %110 = memref.load %arg2[%c2_48, %c7_49] : memref<4x9xf32, #tpu.memory_space<smem>>
    %111 = vector.broadcast %110 : f32 to vector<14x14xf32>
    %112 = arith.mulf %9, %111 : vector<14x14xf32>
    %113 = arith.addf %109, %112 : vector<14x14xf32>
    %c2_50 = arith.constant 2 : index
    %c8_51 = arith.constant 8 : index
    %114 = memref.load %arg2[%c2_50, %c8_51] : memref<4x9xf32, #tpu.memory_space<smem>>
    %115 = vector.broadcast %114 : f32 to vector<14x14xf32>
    %116 = arith.mulf %10, %115 : vector<14x14xf32>
    %117 = arith.addf %113, %116 : vector<14x14xf32>
    %c28 = arith.constant 28 : index
    %c0_52 = arith.constant 0 : index
    %118 = vector.load %arg15[%c28, %c0_52] : memref<56x14xf32, #tpu.memory_space<vmem>>, vector<14x14xf32>
    tpu.vector_store %arg15[%c28, %c0_52], %117 {strides = array<i32>} : memref<56x14xf32, #tpu.memory_space<vmem>>, vector<14x14xf32>,
    %c3_53 = arith.constant 3 : index
    %c0_54 = arith.constant 0 : index
    %119 = memref.load %arg2[%c3_53, %c0_54] : memref<4x9xf32, #tpu.memory_space<smem>>
    %120 = vector.broadcast %119 : f32 to vector<14x14xf32>
    %121 = arith.mulf %2, %120 : vector<14x14xf32>
    %c3_55 = arith.constant 3 : index
    %c1_56 = arith.constant 1 : index
    %122 = memref.load %arg2[%c3_55, %c1_56] : memref<4x9xf32, #tpu.memory_space<smem>>
    %123 = vector.broadcast %122 : f32 to vector<14x14xf32>
    %124 = arith.mulf %3, %123 : vector<14x14xf32>
    %125 = arith.addf %121, %124 : vector<14x14xf32>
    %c3_57 = arith.constant 3 : index
    %c2_58 = arith.constant 2 : index
    %126 = memref.load %arg2[%c3_57, %c2_58] : memref<4x9xf32, #tpu.memory_space<smem>>
    %127 = vector.broadcast %126 : f32 to vector<14x14xf32>
    %128 = arith.mulf %4, %127 : vector<14x14xf32>
    %129 = arith.addf %125, %128 : vector<14x14xf32>
    %c3_59 = arith.constant 3 : index
    %c3_60 = arith.constant 3 : index
    %130 = memref.load %arg2[%c3_59, %c3_60] : memref<4x9xf32, #tpu.memory_space<smem>>
    %131 = vector.broadcast %130 : f32 to vector<14x14xf32>
    %132 = arith.mulf %5, %131 : vector<14x14xf32>
    %133 = arith.addf %129, %132 : vector<14x14xf32>
    %c3_61 = arith.constant 3 : index
    %c4_62 = arith.constant 4 : index
    %134 = memref.load %arg2[%c3_61, %c4_62] : memref<4x9xf32, #tpu.memory_space<smem>>
    %135 = vector.broadcast %134 : f32 to vector<14x14xf32>
    %136 = arith.mulf %6, %135 : vector<14x14xf32>
    %137 = arith.addf %133, %136 : vector<14x14xf32>
    %c3_63 = arith.constant 3 : index
    %c5_64 = arith.constant 5 : index
    %138 = memref.load %arg2[%c3_63, %c5_64] : memref<4x9xf32, #tpu.memory_space<smem>>
    %139 = vector.broadcast %138 : f32 to vector<14x14xf32>
    %140 = arith.mulf %7, %139 : vector<14x14xf32>
    %141 = arith.addf %137, %140 : vector<14x14xf32>
    %c3_65 = arith.constant 3 : index
    %c6_66 = arith.constant 6 : index
    %142 = memref.load %arg2[%c3_65, %c6_66] : memref<4x9xf32, #tpu.memory_space<smem>>
    %143 = vector.broadcast %142 : f32 to vector<14x14xf32>
    %144 = arith.mulf %8, %143 : vector<14x14xf32>
    %145 = arith.addf %141, %144 : vector<14x14xf32>
    %c3_67 = arith.constant 3 : index
    %c7_68 = arith.constant 7 : index
    %146 = memref.load %arg2[%c3_67, %c7_68] : memref<4x9xf32, #tpu.memory_space<smem>>
    %147 = vector.broadcast %146 : f32 to vector<14x14xf32>
    %148 = arith.mulf %9, %147 : vector<14x14xf32>
    %149 = arith.addf %145, %148 : vector<14x14xf32>
    %c3_69 = arith.constant 3 : index
    %c8_70 = arith.constant 8 : index
    %150 = memref.load %arg2[%c3_69, %c8_70] : memref<4x9xf32, #tpu.memory_space<smem>>
    %151 = vector.broadcast %150 : f32 to vector<14x14xf32>
    %152 = arith.mulf %10, %151 : vector<14x14xf32>
    %153 = arith.addf %149, %152 : vector<14x14xf32>
    %c42 = arith.constant 42 : index
    %c0_71 = arith.constant 0 : index
    %154 = vector.load %arg15[%c42, %c0_71] : memref<56x14xf32, #tpu.memory_space<vmem>>, vector<14x14xf32>
    tpu.vector_store %arg15[%c42, %c0_71], %153 {strides = array<i32>} : memref<56x14xf32, #tpu.memory_space<vmem>>, vector<14x14xf32>,
    %c0_72 = arith.constant 0 : index
    %c0_73 = arith.constant 0 : index
    %155 = vector.load %arg15[%c0_72, %c0_73] : memref<56x14xf32, #tpu.memory_space<vmem>>, vector<56x14xf32>
    %c0_74 = arith.constant 0 : index
    %c0_75 = arith.constant 0 : index
    %c0_76 = arith.constant 0 : index
    %156 = vector.load %arg4[%c0_74, %c0_75, %c0_76] : memref<2x14x7xf32, #tpu.memory_space<vmem>>, vector<1x14x7xf32>
    %157 = vector.shape_cast %156 : vector<1x14x7xf32> to vector<14x7xf32>
    %cst = arith.constant dense<0.000000e+00> : vector<56x7xf32>
    %158 = tpu.matmul %155, %157, %cst {dimension_numbers = #tpu.dot_dimension_numbers<[1], [0], [0], [1], [0, 0, 1, 1], [], []>} : vector<56x14xf32>, vector<14x7xf32>, vector<56x7xf32> -> vector<56x7xf32>
    %c1_77 = arith.constant 1 : index
    %c0_78 = arith.constant 0 : index
    %c0_79 = arith.constant 0 : index
    %159 = vector.load %arg4[%c1_77, %c0_78, %c0_79] : memref<2x14x7xf32, #tpu.memory_space<vmem>>, vector<1x14x7xf32>
    %160 = vector.shape_cast %159 : vector<1x14x7xf32> to vector<14x7xf32>
    %cst_80 = arith.constant dense<0.000000e+00> : vector<56x7xf32>
    %161 = tpu.matmul %155, %160, %cst_80 {dimension_numbers = #tpu.dot_dimension_numbers<[1], [0], [0], [1], [0, 0, 1, 1], [], []>} : vector<56x14xf32>, vector<14x7xf32>, vector<56x7xf32> -> vector<56x7xf32>
    %162 = arith.maximumf %158, %161 : vector<56x7xf32>
    %c0_81 = arith.constant 0 : index
    %c0_82 = arith.constant 0 : index
    %c0_83 = arith.constant 0 : index
    %163 = vector.load %arg5[%c0_81, %c0_82, %c0_83] : memref<2x28x56xf32, #tpu.memory_space<vmem>>, vector<1x28x56xf32>
    %164 = vector.shape_cast %163 : vector<1x28x56xf32> to vector<28x56xf32>
    %cst_84 = arith.constant dense<0.000000e+00> : vector<28x7xf32>
    %165 = tpu.matmul %164, %162, %cst_84 {dimension_numbers = #tpu.dot_dimension_numbers<[1], [0], [0], [1], [0, 0, 1, 1], [], []>} : vector<28x56xf32>, vector<56x7xf32>, vector<28x7xf32> -> vector<28x7xf32>
    %c1_85 = arith.constant 1 : index
    %c0_86 = arith.constant 0 : index
    %c0_87 = arith.constant 0 : index
    %166 = vector.load %arg5[%c1_85, %c0_86, %c0_87] : memref<2x28x56xf32, #tpu.memory_space<vmem>>, vector<1x28x56xf32>
    %167 = vector.shape_cast %166 : vector<1x28x56xf32> to vector<28x56xf32>
    %cst_88 = arith.constant dense<0.000000e+00> : vector<28x7xf32>
    %168 = tpu.matmul %167, %162, %cst_88 {dimension_numbers = #tpu.dot_dimension_numbers<[1], [0], [0], [1], [0, 0, 1, 1], [], []>} : vector<28x56xf32>, vector<56x7xf32>, vector<28x7xf32> -> vector<28x7xf32>
    %169 = arith.maximumf %165, %168 : vector<28x7xf32>
    %c0_89 = arith.constant 0 : index
    %c0_90 = arith.constant 0 : index
    %170 = vector.load %arg6[%c0_89, %c0_90] : memref<28x1xf32, #tpu.memory_space<vmem>>, vector<28x1xf32>
    %171 = vector.broadcast %170 : vector<28x1xf32> to vector<28x7xf32>
    %172 = arith.addf %169, %171 : vector<28x7xf32>
    %cst_91 = arith.constant 0.000000e+00 : f32
    %173 = vector.broadcast %cst_91 : f32 to vector<28x7xf32>
    %174 = arith.maximumf %172, %173 : vector<28x7xf32>
    %175 = vector.extract_strided_slice %174 {offsets = [0, 0], sizes = [5, 5], strides = [1, 1]} : vector<28x7xf32> to vector<5x5xf32>
    %176 = vector.extract_strided_slice %174 {offsets = [0, 1], sizes = [5, 5], strides = [1, 1]} : vector<28x7xf32> to vector<5x5xf32>
    %177 = vector.extract_strided_slice %174 {offsets = [0, 2], sizes = [5, 5], strides = [1, 1]} : vector<28x7xf32> to vector<5x5xf32>
    %178 = vector.extract_strided_slice %174 {offsets = [1, 0], sizes = [5, 5], strides = [1, 1]} : vector<28x7xf32> to vector<5x5xf32>
    %179 = vector.extract_strided_slice %174 {offsets = [1, 1], sizes = [5, 5], strides = [1, 1]} : vector<28x7xf32> to vector<5x5xf32>
    %180 = vector.extract_strided_slice %174 {offsets = [1, 2], sizes = [5, 5], strides = [1, 1]} : vector<28x7xf32> to vector<5x5xf32>
    %181 = vector.extract_strided_slice %174 {offsets = [2, 0], sizes = [5, 5], strides = [1, 1]} : vector<28x7xf32> to vector<5x5xf32>
    %182 = vector.extract_strided_slice %174 {offsets = [2, 1], sizes = [5, 5], strides = [1, 1]} : vector<28x7xf32> to vector<5x5xf32>
    %183 = vector.extract_strided_slice %174 {offsets = [2, 2], sizes = [5, 5], strides = [1, 1]} : vector<28x7xf32> to vector<5x5xf32>
    %184 = vector.extract_strided_slice %174 {offsets = [7, 0], sizes = [5, 5], strides = [1, 1]} : vector<28x7xf32> to vector<5x5xf32>
    %185 = vector.extract_strided_slice %174 {offsets = [7, 1], sizes = [5, 5], strides = [1, 1]} : vector<28x7xf32> to vector<5x5xf32>
    %186 = vector.extract_strided_slice %174 {offsets = [7, 2], sizes = [5, 5], strides = [1, 1]} : vector<28x7xf32> to vector<5x5xf32>
    %187 = vector.extract_strided_slice %174 {offsets = [8, 0], sizes = [5, 5], strides = [1, 1]} : vector<28x7xf32> to vector<5x5xf32>
    %188 = vector.extract_strided_slice %174 {offsets = [8, 1], sizes = [5, 5], strides = [1, 1]} : vector<28x7xf32> to vector<5x5xf32>
    %189 = vector.extract_strided_slice %174 {offsets = [8, 2], sizes = [5, 5], strides = [1, 1]} : vector<28x7xf32> to vector<5x5xf32>
    %190 = vector.extract_strided_slice %174 {offsets = [9, 0], sizes = [5, 5], strides = [1, 1]} : vector<28x7xf32> to vector<5x5xf32>
    %191 = vector.extract_strided_slice %174 {offsets = [9, 1], sizes = [5, 5], strides = [1, 1]} : vector<28x7xf32> to vector<5x5xf32>
    %192 = vector.extract_strided_slice %174 {offsets = [9, 2], sizes = [5, 5], strides = [1, 1]} : vector<28x7xf32> to vector<5x5xf32>
    %193 = vector.extract_strided_slice %174 {offsets = [14, 0], sizes = [5, 5], strides = [1, 1]} : vector<28x7xf32> to vector<5x5xf32>
    %194 = vector.extract_strided_slice %174 {offsets = [14, 1], sizes = [5, 5], strides = [1, 1]} : vector<28x7xf32> to vector<5x5xf32>
    %195 = vector.extract_strided_slice %174 {offsets = [14, 2], sizes = [5, 5], strides = [1, 1]} : vector<28x7xf32> to vector<5x5xf32>
    %196 = vector.extract_strided_slice %174 {offsets = [15, 0], sizes = [5, 5], strides = [1, 1]} : vector<28x7xf32> to vector<5x5xf32>
    %197 = vector.extract_strided_slice %174 {offsets = [15, 1], sizes = [5, 5], strides = [1, 1]} : vector<28x7xf32> to vector<5x5xf32>
    %198 = vector.extract_strided_slice %174 {offsets = [15, 2], sizes = [5, 5], strides = [1, 1]} : vector<28x7xf32> to vector<5x5xf32>
    %199 = vector.extract_strided_slice %174 {offsets = [16, 0], sizes = [5, 5], strides = [1, 1]} : vector<28x7xf32> to vector<5x5xf32>
    %200 = vector.extract_strided_slice %174 {offsets = [16, 1], sizes = [5, 5], strides = [1, 1]} : vector<28x7xf32> to vector<5x5xf32>
    %201 = vector.extract_strided_slice %174 {offsets = [16, 2], sizes = [5, 5], strides = [1, 1]} : vector<28x7xf32> to vector<5x5xf32>
    %202 = vector.extract_strided_slice %174 {offsets = [21, 0], sizes = [5, 5], strides = [1, 1]} : vector<28x7xf32> to vector<5x5xf32>
    %203 = vector.extract_strided_slice %174 {offsets = [21, 1], sizes = [5, 5], strides = [1, 1]} : vector<28x7xf32> to vector<5x5xf32>
    %204 = vector.extract_strided_slice %174 {offsets = [21, 2], sizes = [5, 5], strides = [1, 1]} : vector<28x7xf32> to vector<5x5xf32>
    %205 = vector.extract_strided_slice %174 {offsets = [22, 0], sizes = [5, 5], strides = [1, 1]} : vector<28x7xf32> to vector<5x5xf32>
    %206 = vector.extract_strided_slice %174 {offsets = [22, 1], sizes = [5, 5], strides = [1, 1]} : vector<28x7xf32> to vector<5x5xf32>
    %207 = vector.extract_strided_slice %174 {offsets = [22, 2], sizes = [5, 5], strides = [1, 1]} : vector<28x7xf32> to vector<5x5xf32>
    %208 = vector.extract_strided_slice %174 {offsets = [23, 0], sizes = [5, 5], strides = [1, 1]} : vector<28x7xf32> to vector<5x5xf32>
    %209 = vector.extract_strided_slice %174 {offsets = [23, 1], sizes = [5, 5], strides = [1, 1]} : vector<28x7xf32> to vector<5x5xf32>
    %210 = vector.extract_strided_slice %174 {offsets = [23, 2], sizes = [5, 5], strides = [1, 1]} : vector<28x7xf32> to vector<5x5xf32>
    %c0_92 = arith.constant 0 : index
    %c0_93 = arith.constant 0 : index
    %211 = memref.load %arg3[%c0_92, %c0_93] : memref<8x36xf32, #tpu.memory_space<smem>>
    %212 = vector.broadcast %211 : f32 to vector<5x5xf32>
    %213 = arith.mulf %175, %212 : vector<5x5xf32>
    %c0_94 = arith.constant 0 : index
    %c1_95 = arith.constant 1 : index
    %214 = memref.load %arg3[%c0_94, %c1_95] : memref<8x36xf32, #tpu.memory_space<smem>>
    %215 = vector.broadcast %214 : f32 to vector<5x5xf32>
    %216 = arith.mulf %176, %215 : vector<5x5xf32>
    %217 = arith.addf %213, %216 : vector<5x5xf32>
    %c0_96 = arith.constant 0 : index
    %c2_97 = arith.constant 2 : index
    %218 = memref.load %arg3[%c0_96, %c2_97] : memref<8x36xf32, #tpu.memory_space<smem>>
    %219 = vector.broadcast %218 : f32 to vector<5x5xf32>
    %220 = arith.mulf %177, %219 : vector<5x5xf32>
    %221 = arith.addf %217, %220 : vector<5x5xf32>
    %c0_98 = arith.constant 0 : index
    %c3_99 = arith.constant 3 : index
    %222 = memref.load %arg3[%c0_98, %c3_99] : memref<8x36xf32, #tpu.memory_space<smem>>
    %223 = vector.broadcast %222 : f32 to vector<5x5xf32>
    %224 = arith.mulf %178, %223 : vector<5x5xf32>
    %225 = arith.addf %221, %224 : vector<5x5xf32>
    %c0_100 = arith.constant 0 : index
    %c4_101 = arith.constant 4 : index
    %226 = memref.load %arg3[%c0_100, %c4_101] : memref<8x36xf32, #tpu.memory_space<smem>>
    %227 = vector.broadcast %226 : f32 to vector<5x5xf32>
    %228 = arith.mulf %179, %227 : vector<5x5xf32>
    %229 = arith.addf %225, %228 : vector<5x5xf32>
    %c0_102 = arith.constant 0 : index
    %c5_103 = arith.constant 5 : index
    %230 = memref.load %arg3[%c0_102, %c5_103] : memref<8x36xf32, #tpu.memory_space<smem>>
    %231 = vector.broadcast %230 : f32 to vector<5x5xf32>
    %232 = arith.mulf %180, %231 : vector<5x5xf32>
    %233 = arith.addf %229, %232 : vector<5x5xf32>
    %c0_104 = arith.constant 0 : index
    %c6_105 = arith.constant 6 : index
    %234 = memref.load %arg3[%c0_104, %c6_105] : memref<8x36xf32, #tpu.memory_space<smem>>
    %235 = vector.broadcast %234 : f32 to vector<5x5xf32>
    %236 = arith.mulf %181, %235 : vector<5x5xf32>
    %237 = arith.addf %233, %236 : vector<5x5xf32>
    %c0_106 = arith.constant 0 : index
    %c7_107 = arith.constant 7 : index
    %238 = memref.load %arg3[%c0_106, %c7_107] : memref<8x36xf32, #tpu.memory_space<smem>>
    %239 = vector.broadcast %238 : f32 to vector<5x5xf32>
    %240 = arith.mulf %182, %239 : vector<5x5xf32>
    %241 = arith.addf %237, %240 : vector<5x5xf32>
    %c0_108 = arith.constant 0 : index
    %c8_109 = arith.constant 8 : index
    %242 = memref.load %arg3[%c0_108, %c8_109] : memref<8x36xf32, #tpu.memory_space<smem>>
    %243 = vector.broadcast %242 : f32 to vector<5x5xf32>
    %244 = arith.mulf %183, %243 : vector<5x5xf32>
    %245 = arith.addf %241, %244 : vector<5x5xf32>
    %c0_110 = arith.constant 0 : index
    %c9 = arith.constant 9 : index
    %246 = memref.load %arg3[%c0_110, %c9] : memref<8x36xf32, #tpu.memory_space<smem>>
    %247 = vector.broadcast %246 : f32 to vector<5x5xf32>
    %248 = arith.mulf %184, %247 : vector<5x5xf32>
    %249 = arith.addf %245, %248 : vector<5x5xf32>
    %c0_111 = arith.constant 0 : index
    %c10 = arith.constant 10 : index
    %250 = memref.load %arg3[%c0_111, %c10] : memref<8x36xf32, #tpu.memory_space<smem>>
    %251 = vector.broadcast %250 : f32 to vector<5x5xf32>
    %252 = arith.mulf %185, %251 : vector<5x5xf32>
    %253 = arith.addf %249, %252 : vector<5x5xf32>
    %c0_112 = arith.constant 0 : index
    %c11 = arith.constant 11 : index
    %254 = memref.load %arg3[%c0_112, %c11] : memref<8x36xf32, #tpu.memory_space<smem>>
    %255 = vector.broadcast %254 : f32 to vector<5x5xf32>
    %256 = arith.mulf %186, %255 : vector<5x5xf32>
    %257 = arith.addf %253, %256 : vector<5x5xf32>
    %c0_113 = arith.constant 0 : index
    %c12 = arith.constant 12 : index
    %258 = memref.load %arg3[%c0_113, %c12] : memref<8x36xf32, #tpu.memory_space<smem>>
    %259 = vector.broadcast %258 : f32 to vector<5x5xf32>
    %260 = arith.mulf %187, %259 : vector<5x5xf32>
    %261 = arith.addf %257, %260 : vector<5x5xf32>
    %c0_114 = arith.constant 0 : index
    %c13 = arith.constant 13 : index
    %262 = memref.load %arg3[%c0_114, %c13] : memref<8x36xf32, #tpu.memory_space<smem>>
    %263 = vector.broadcast %262 : f32 to vector<5x5xf32>
    %264 = arith.mulf %188, %263 : vector<5x5xf32>
    %265 = arith.addf %261, %264 : vector<5x5xf32>
    %c0_115 = arith.constant 0 : index
    %c14_116 = arith.constant 14 : index
    %266 = memref.load %arg3[%c0_115, %c14_116] : memref<8x36xf32, #tpu.memory_space<smem>>
    %267 = vector.broadcast %266 : f32 to vector<5x5xf32>
    %268 = arith.mulf %189, %267 : vector<5x5xf32>
    %269 = arith.addf %265, %268 : vector<5x5xf32>
    %c0_117 = arith.constant 0 : index
    %c15 = arith.constant 15 : index
    %270 = memref.load %arg3[%c0_117, %c15] : memref<8x36xf32, #tpu.memory_space<smem>>
    %271 = vector.broadcast %270 : f32 to vector<5x5xf32>
    %272 = arith.mulf %190, %271 : vector<5x5xf32>
    %273 = arith.addf %269, %272 : vector<5x5xf32>
    %c0_118 = arith.constant 0 : index
    %c16 = arith.constant 16 : index
    %274 = memref.load %arg3[%c0_118, %c16] : memref<8x36xf32, #tpu.memory_space<smem>>
    %275 = vector.broadcast %274 : f32 to vector<5x5xf32>
    %276 = arith.mulf %191, %275 : vector<5x5xf32>
    %277 = arith.addf %273, %276 : vector<5x5xf32>
    %c0_119 = arith.constant 0 : index
    %c17 = arith.constant 17 : index
    %278 = memref.load %arg3[%c0_119, %c17] : memref<8x36xf32, #tpu.memory_space<smem>>
    %279 = vector.broadcast %278 : f32 to vector<5x5xf32>
    %280 = arith.mulf %192, %279 : vector<5x5xf32>
    %281 = arith.addf %277, %280 : vector<5x5xf32>
    %c0_120 = arith.constant 0 : index
    %c18 = arith.constant 18 : index
    %282 = memref.load %arg3[%c0_120, %c18] : memref<8x36xf32, #tpu.memory_space<smem>>
    %283 = vector.broadcast %282 : f32 to vector<5x5xf32>
    %284 = arith.mulf %193, %283 : vector<5x5xf32>
    %285 = arith.addf %281, %284 : vector<5x5xf32>
    %c0_121 = arith.constant 0 : index
    %c19 = arith.constant 19 : index
    %286 = memref.load %arg3[%c0_121, %c19] : memref<8x36xf32, #tpu.memory_space<smem>>
    %287 = vector.broadcast %286 : f32 to vector<5x5xf32>
    %288 = arith.mulf %194, %287 : vector<5x5xf32>
    %289 = arith.addf %285, %288 : vector<5x5xf32>
    %c0_122 = arith.constant 0 : index
    %c20 = arith.constant 20 : index
    %290 = memref.load %arg3[%c0_122, %c20] : memref<8x36xf32, #tpu.memory_space<smem>>
    %291 = vector.broadcast %290 : f32 to vector<5x5xf32>
    %292 = arith.mulf %195, %291 : vector<5x5xf32>
    %293 = arith.addf %289, %292 : vector<5x5xf32>
    %c0_123 = arith.constant 0 : index
    %c21 = arith.constant 21 : index
    %294 = memref.load %arg3[%c0_123, %c21] : memref<8x36xf32, #tpu.memory_space<smem>>
    %295 = vector.broadcast %294 : f32 to vector<5x5xf32>
    %296 = arith.mulf %196, %295 : vector<5x5xf32>
    %297 = arith.addf %293, %296 : vector<5x5xf32>
    %c0_124 = arith.constant 0 : index
    %c22 = arith.constant 22 : index
    %298 = memref.load %arg3[%c0_124, %c22] : memref<8x36xf32, #tpu.memory_space<smem>>
    %299 = vector.broadcast %298 : f32 to vector<5x5xf32>
    %300 = arith.mulf %197, %299 : vector<5x5xf32>
    %301 = arith.addf %297, %300 : vector<5x5xf32>
    %c0_125 = arith.constant 0 : index
    %c23 = arith.constant 23 : index
    %302 = memref.load %arg3[%c0_125, %c23] : memref<8x36xf32, #tpu.memory_space<smem>>
    %303 = vector.broadcast %302 : f32 to vector<5x5xf32>
    %304 = arith.mulf %198, %303 : vector<5x5xf32>
    %305 = arith.addf %301, %304 : vector<5x5xf32>
    %c0_126 = arith.constant 0 : index
    %c24 = arith.constant 24 : index
    %306 = memref.load %arg3[%c0_126, %c24] : memref<8x36xf32, #tpu.memory_space<smem>>
    %307 = vector.broadcast %306 : f32 to vector<5x5xf32>
    %308 = arith.mulf %199, %307 : vector<5x5xf32>
    %309 = arith.addf %305, %308 : vector<5x5xf32>
    %c0_127 = arith.constant 0 : index
    %c25 = arith.constant 25 : index
    %310 = memref.load %arg3[%c0_127, %c25] : memref<8x36xf32, #tpu.memory_space<smem>>
    %311 = vector.broadcast %310 : f32 to vector<5x5xf32>
    %312 = arith.mulf %200, %311 : vector<5x5xf32>
    %313 = arith.addf %309, %312 : vector<5x5xf32>
    %c0_128 = arith.constant 0 : index
    %c26 = arith.constant 26 : index
    %314 = memref.load %arg3[%c0_128, %c26] : memref<8x36xf32, #tpu.memory_space<smem>>
    %315 = vector.broadcast %314 : f32 to vector<5x5xf32>
    %316 = arith.mulf %201, %315 : vector<5x5xf32>
    %317 = arith.addf %313, %316 : vector<5x5xf32>
    %c0_129 = arith.constant 0 : index
    %c27 = arith.constant 27 : index
    %318 = memref.load %arg3[%c0_129, %c27] : memref<8x36xf32, #tpu.memory_space<smem>>
    %319 = vector.broadcast %318 : f32 to vector<5x5xf32>
    %320 = arith.mulf %202, %319 : vector<5x5xf32>
    %321 = arith.addf %317, %320 : vector<5x5xf32>
    %c0_130 = arith.constant 0 : index
    %c28_131 = arith.constant 28 : index
    %322 = memref.load %arg3[%c0_130, %c28_131] : memref<8x36xf32, #tpu.memory_space<smem>>
    %323 = vector.broadcast %322 : f32 to vector<5x5xf32>
    %324 = arith.mulf %203, %323 : vector<5x5xf32>
    %325 = arith.addf %321, %324 : vector<5x5xf32>
    %c0_132 = arith.constant 0 : index
    %c29 = arith.constant 29 : index
    %326 = memref.load %arg3[%c0_132, %c29] : memref<8x36xf32, #tpu.memory_space<smem>>
    %327 = vector.broadcast %326 : f32 to vector<5x5xf32>
    %328 = arith.mulf %204, %327 : vector<5x5xf32>
    %329 = arith.addf %325, %328 : vector<5x5xf32>
    %c0_133 = arith.constant 0 : index
    %c30 = arith.constant 30 : index
    %330 = memref.load %arg3[%c0_133, %c30] : memref<8x36xf32, #tpu.memory_space<smem>>
    %331 = vector.broadcast %330 : f32 to vector<5x5xf32>
    %332 = arith.mulf %205, %331 : vector<5x5xf32>
    %333 = arith.addf %329, %332 : vector<5x5xf32>
    %c0_134 = arith.constant 0 : index
    %c31 = arith.constant 31 : index
    %334 = memref.load %arg3[%c0_134, %c31] : memref<8x36xf32, #tpu.memory_space<smem>>
    %335 = vector.broadcast %334 : f32 to vector<5x5xf32>
    %336 = arith.mulf %206, %335 : vector<5x5xf32>
    %337 = arith.addf %333, %336 : vector<5x5xf32>
    %c0_135 = arith.constant 0 : index
    %c32 = arith.constant 32 : index
    %338 = memref.load %arg3[%c0_135, %c32] : memref<8x36xf32, #tpu.memory_space<smem>>
    %339 = vector.broadcast %338 : f32 to vector<5x5xf32>
    %340 = arith.mulf %207, %339 : vector<5x5xf32>
    %341 = arith.addf %337, %340 : vector<5x5xf32>
    %c0_136 = arith.constant 0 : index
    %c33 = arith.constant 33 : index
    %342 = memref.load %arg3[%c0_136, %c33] : memref<8x36xf32, #tpu.memory_space<smem>>
    %343 = vector.broadcast %342 : f32 to vector<5x5xf32>
    %344 = arith.mulf %208, %343 : vector<5x5xf32>
    %345 = arith.addf %341, %344 : vector<5x5xf32>
    %c0_137 = arith.constant 0 : index
    %c34 = arith.constant 34 : index
    %346 = memref.load %arg3[%c0_137, %c34] : memref<8x36xf32, #tpu.memory_space<smem>>
    %347 = vector.broadcast %346 : f32 to vector<5x5xf32>
    %348 = arith.mulf %209, %347 : vector<5x5xf32>
    %349 = arith.addf %345, %348 : vector<5x5xf32>
    %c0_138 = arith.constant 0 : index
    %c35 = arith.constant 35 : index
    %350 = memref.load %arg3[%c0_138, %c35] : memref<8x36xf32, #tpu.memory_space<smem>>
    %351 = vector.broadcast %350 : f32 to vector<5x5xf32>
    %352 = arith.mulf %210, %351 : vector<5x5xf32>
    %353 = arith.addf %349, %352 : vector<5x5xf32>
    %c0_139 = arith.constant 0 : index
    %c0_140 = arith.constant 0 : index
    %354 = vector.load %arg16[%c0_139, %c0_140] : memref<40x5xf32, #tpu.memory_space<vmem>>, vector<5x5xf32>
    tpu.vector_store %arg16[%c0_139, %c0_140], %353 {strides = array<i32>} : memref<40x5xf32, #tpu.memory_space<vmem>>, vector<5x5xf32>,
    %c1_141 = arith.constant 1 : index
    %c0_142 = arith.constant 0 : index
    %355 = memref.load %arg3[%c1_141, %c0_142] : memref<8x36xf32, #tpu.memory_space<smem>>
    %356 = vector.broadcast %355 : f32 to vector<5x5xf32>
    %357 = arith.mulf %175, %356 : vector<5x5xf32>
    %c1_143 = arith.constant 1 : index
    %c1_144 = arith.constant 1 : index
    %358 = memref.load %arg3[%c1_143, %c1_144] : memref<8x36xf32, #tpu.memory_space<smem>>
    %359 = vector.broadcast %358 : f32 to vector<5x5xf32>
    %360 = arith.mulf %176, %359 : vector<5x5xf32>
    %361 = arith.addf %357, %360 : vector<5x5xf32>
    %c1_145 = arith.constant 1 : index
    %c2_146 = arith.constant 2 : index
    %362 = memref.load %arg3[%c1_145, %c2_146] : memref<8x36xf32, #tpu.memory_space<smem>>
    %363 = vector.broadcast %362 : f32 to vector<5x5xf32>
    %364 = arith.mulf %177, %363 : vector<5x5xf32>
    %365 = arith.addf %361, %364 : vector<5x5xf32>
    %c1_147 = arith.constant 1 : index
    %c3_148 = arith.constant 3 : index
    %366 = memref.load %arg3[%c1_147, %c3_148] : memref<8x36xf32, #tpu.memory_space<smem>>
    %367 = vector.broadcast %366 : f32 to vector<5x5xf32>
    %368 = arith.mulf %178, %367 : vector<5x5xf32>
    %369 = arith.addf %365, %368 : vector<5x5xf32>
    %c1_149 = arith.constant 1 : index
    %c4_150 = arith.constant 4 : index
    %370 = memref.load %arg3[%c1_149, %c4_150] : memref<8x36xf32, #tpu.memory_space<smem>>
    %371 = vector.broadcast %370 : f32 to vector<5x5xf32>
    %372 = arith.mulf %179, %371 : vector<5x5xf32>
    %373 = arith.addf %369, %372 : vector<5x5xf32>
    %c1_151 = arith.constant 1 : index
    %c5_152 = arith.constant 5 : index
    %374 = memref.load %arg3[%c1_151, %c5_152] : memref<8x36xf32, #tpu.memory_space<smem>>
    %375 = vector.broadcast %374 : f32 to vector<5x5xf32>
    %376 = arith.mulf %180, %375 : vector<5x5xf32>
    %377 = arith.addf %373, %376 : vector<5x5xf32>
    %c1_153 = arith.constant 1 : index
    %c6_154 = arith.constant 6 : index
    %378 = memref.load %arg3[%c1_153, %c6_154] : memref<8x36xf32, #tpu.memory_space<smem>>
    %379 = vector.broadcast %378 : f32 to vector<5x5xf32>
    %380 = arith.mulf %181, %379 : vector<5x5xf32>
    %381 = arith.addf %377, %380 : vector<5x5xf32>
    %c1_155 = arith.constant 1 : index
    %c7_156 = arith.constant 7 : index
    %382 = memref.load %arg3[%c1_155, %c7_156] : memref<8x36xf32, #tpu.memory_space<smem>>
    %383 = vector.broadcast %382 : f32 to vector<5x5xf32>
    %384 = arith.mulf %182, %383 : vector<5x5xf32>
    %385 = arith.addf %381, %384 : vector<5x5xf32>
    %c1_157 = arith.constant 1 : index
    %c8_158 = arith.constant 8 : index
    %386 = memref.load %arg3[%c1_157, %c8_158] : memref<8x36xf32, #tpu.memory_space<smem>>
    %387 = vector.broadcast %386 : f32 to vector<5x5xf32>
    %388 = arith.mulf %183, %387 : vector<5x5xf32>
    %389 = arith.addf %385, %388 : vector<5x5xf32>
    %c1_159 = arith.constant 1 : index
    %c9_160 = arith.constant 9 : index
    %390 = memref.load %arg3[%c1_159, %c9_160] : memref<8x36xf32, #tpu.memory_space<smem>>
    %391 = vector.broadcast %390 : f32 to vector<5x5xf32>
    %392 = arith.mulf %184, %391 : vector<5x5xf32>
    %393 = arith.addf %389, %392 : vector<5x5xf32>
    %c1_161 = arith.constant 1 : index
    %c10_162 = arith.constant 10 : index
    %394 = memref.load %arg3[%c1_161, %c10_162] : memref<8x36xf32, #tpu.memory_space<smem>>
    %395 = vector.broadcast %394 : f32 to vector<5x5xf32>
    %396 = arith.mulf %185, %395 : vector<5x5xf32>
    %397 = arith.addf %393, %396 : vector<5x5xf32>
    %c1_163 = arith.constant 1 : index
    %c11_164 = arith.constant 11 : index
    %398 = memref.load %arg3[%c1_163, %c11_164] : memref<8x36xf32, #tpu.memory_space<smem>>
    %399 = vector.broadcast %398 : f32 to vector<5x5xf32>
    %400 = arith.mulf %186, %399 : vector<5x5xf32>
    %401 = arith.addf %397, %400 : vector<5x5xf32>
    %c1_165 = arith.constant 1 : index
    %c12_166 = arith.constant 12 : index
    %402 = memref.load %arg3[%c1_165, %c12_166] : memref<8x36xf32, #tpu.memory_space<smem>>
    %403 = vector.broadcast %402 : f32 to vector<5x5xf32>
    %404 = arith.mulf %187, %403 : vector<5x5xf32>
    %405 = arith.addf %401, %404 : vector<5x5xf32>
    %c1_167 = arith.constant 1 : index
    %c13_168 = arith.constant 13 : index
    %406 = memref.load %arg3[%c1_167, %c13_168] : memref<8x36xf32, #tpu.memory_space<smem>>
    %407 = vector.broadcast %406 : f32 to vector<5x5xf32>
    %408 = arith.mulf %188, %407 : vector<5x5xf32>
    %409 = arith.addf %405, %408 : vector<5x5xf32>
    %c1_169 = arith.constant 1 : index
    %c14_170 = arith.constant 14 : index
    %410 = memref.load %arg3[%c1_169, %c14_170] : memref<8x36xf32, #tpu.memory_space<smem>>
    %411 = vector.broadcast %410 : f32 to vector<5x5xf32>
    %412 = arith.mulf %189, %411 : vector<5x5xf32>
    %413 = arith.addf %409, %412 : vector<5x5xf32>
    %c1_171 = arith.constant 1 : index
    %c15_172 = arith.constant 15 : index
    %414 = memref.load %arg3[%c1_171, %c15_172] : memref<8x36xf32, #tpu.memory_space<smem>>
    %415 = vector.broadcast %414 : f32 to vector<5x5xf32>
    %416 = arith.mulf %190, %415 : vector<5x5xf32>
    %417 = arith.addf %413, %416 : vector<5x5xf32>
    %c1_173 = arith.constant 1 : index
    %c16_174 = arith.constant 16 : index
    %418 = memref.load %arg3[%c1_173, %c16_174] : memref<8x36xf32, #tpu.memory_space<smem>>
    %419 = vector.broadcast %418 : f32 to vector<5x5xf32>
    %420 = arith.mulf %191, %419 : vector<5x5xf32>
    %421 = arith.addf %417, %420 : vector<5x5xf32>
    %c1_175 = arith.constant 1 : index
    %c17_176 = arith.constant 17 : index
    %422 = memref.load %arg3[%c1_175, %c17_176] : memref<8x36xf32, #tpu.memory_space<smem>>
    %423 = vector.broadcast %422 : f32 to vector<5x5xf32>
    %424 = arith.mulf %192, %423 : vector<5x5xf32>
    %425 = arith.addf %421, %424 : vector<5x5xf32>
    %c1_177 = arith.constant 1 : index
    %c18_178 = arith.constant 18 : index
    %426 = memref.load %arg3[%c1_177, %c18_178] : memref<8x36xf32, #tpu.memory_space<smem>>
    %427 = vector.broadcast %426 : f32 to vector<5x5xf32>
    %428 = arith.mulf %193, %427 : vector<5x5xf32>
    %429 = arith.addf %425, %428 : vector<5x5xf32>
    %c1_179 = arith.constant 1 : index
    %c19_180 = arith.constant 19 : index
    %430 = memref.load %arg3[%c1_179, %c19_180] : memref<8x36xf32, #tpu.memory_space<smem>>
    %431 = vector.broadcast %430 : f32 to vector<5x5xf32>
    %432 = arith.mulf %194, %431 : vector<5x5xf32>
    %433 = arith.addf %429, %432 : vector<5x5xf32>
    %c1_181 = arith.constant 1 : index
    %c20_182 = arith.constant 20 : index
    %434 = memref.load %arg3[%c1_181, %c20_182] : memref<8x36xf32, #tpu.memory_space<smem>>
    %435 = vector.broadcast %434 : f32 to vector<5x5xf32>
    %436 = arith.mulf %195, %435 : vector<5x5xf32>
    %437 = arith.addf %433, %436 : vector<5x5xf32>
    %c1_183 = arith.constant 1 : index
    %c21_184 = arith.constant 21 : index
    %438 = memref.load %arg3[%c1_183, %c21_184] : memref<8x36xf32, #tpu.memory_space<smem>>
    %439 = vector.broadcast %438 : f32 to vector<5x5xf32>
    %440 = arith.mulf %196, %439 : vector<5x5xf32>
    %441 = arith.addf %437, %440 : vector<5x5xf32>
    %c1_185 = arith.constant 1 : index
    %c22_186 = arith.constant 22 : index
    %442 = memref.load %arg3[%c1_185, %c22_186] : memref<8x36xf32, #tpu.memory_space<smem>>
    %443 = vector.broadcast %442 : f32 to vector<5x5xf32>
    %444 = arith.mulf %197, %443 : vector<5x5xf32>
    %445 = arith.addf %441, %444 : vector<5x5xf32>
    %c1_187 = arith.constant 1 : index
    %c23_188 = arith.constant 23 : index
    %446 = memref.load %arg3[%c1_187, %c23_188] : memref<8x36xf32, #tpu.memory_space<smem>>
    %447 = vector.broadcast %446 : f32 to vector<5x5xf32>
    %448 = arith.mulf %198, %447 : vector<5x5xf32>
    %449 = arith.addf %445, %448 : vector<5x5xf32>
    %c1_189 = arith.constant 1 : index
    %c24_190 = arith.constant 24 : index
    %450 = memref.load %arg3[%c1_189, %c24_190] : memref<8x36xf32, #tpu.memory_space<smem>>
    %451 = vector.broadcast %450 : f32 to vector<5x5xf32>
    %452 = arith.mulf %199, %451 : vector<5x5xf32>
    %453 = arith.addf %449, %452 : vector<5x5xf32>
    %c1_191 = arith.constant 1 : index
    %c25_192 = arith.constant 25 : index
    %454 = memref.load %arg3[%c1_191, %c25_192] : memref<8x36xf32, #tpu.memory_space<smem>>
    %455 = vector.broadcast %454 : f32 to vector<5x5xf32>
    %456 = arith.mulf %200, %455 : vector<5x5xf32>
    %457 = arith.addf %453, %456 : vector<5x5xf32>
    %c1_193 = arith.constant 1 : index
    %c26_194 = arith.constant 26 : index
    %458 = memref.load %arg3[%c1_193, %c26_194] : memref<8x36xf32, #tpu.memory_space<smem>>
    %459 = vector.broadcast %458 : f32 to vector<5x5xf32>
    %460 = arith.mulf %201, %459 : vector<5x5xf32>
    %461 = arith.addf %457, %460 : vector<5x5xf32>
    %c1_195 = arith.constant 1 : index
    %c27_196 = arith.constant 27 : index
    %462 = memref.load %arg3[%c1_195, %c27_196] : memref<8x36xf32, #tpu.memory_space<smem>>
    %463 = vector.broadcast %462 : f32 to vector<5x5xf32>
    %464 = arith.mulf %202, %463 : vector<5x5xf32>
    %465 = arith.addf %461, %464 : vector<5x5xf32>
    %c1_197 = arith.constant 1 : index
    %c28_198 = arith.constant 28 : index
    %466 = memref.load %arg3[%c1_197, %c28_198] : memref<8x36xf32, #tpu.memory_space<smem>>
    %467 = vector.broadcast %466 : f32 to vector<5x5xf32>
    %468 = arith.mulf %203, %467 : vector<5x5xf32>
    %469 = arith.addf %465, %468 : vector<5x5xf32>
    %c1_199 = arith.constant 1 : index
    %c29_200 = arith.constant 29 : index
    %470 = memref.load %arg3[%c1_199, %c29_200] : memref<8x36xf32, #tpu.memory_space<smem>>
    %471 = vector.broadcast %470 : f32 to vector<5x5xf32>
    %472 = arith.mulf %204, %471 : vector<5x5xf32>
    %473 = arith.addf %469, %472 : vector<5x5xf32>
    %c1_201 = arith.constant 1 : index
    %c30_202 = arith.constant 30 : index
    %474 = memref.load %arg3[%c1_201, %c30_202] : memref<8x36xf32, #tpu.memory_space<smem>>
    %475 = vector.broadcast %474 : f32 to vector<5x5xf32>
    %476 = arith.mulf %205, %475 : vector<5x5xf32>
    %477 = arith.addf %473, %476 : vector<5x5xf32>
    %c1_203 = arith.constant 1 : index
    %c31_204 = arith.constant 31 : index
    %478 = memref.load %arg3[%c1_203, %c31_204] : memref<8x36xf32, #tpu.memory_space<smem>>
    %479 = vector.broadcast %478 : f32 to vector<5x5xf32>
    %480 = arith.mulf %206, %479 : vector<5x5xf32>
    %481 = arith.addf %477, %480 : vector<5x5xf32>
    %c1_205 = arith.constant 1 : index
    %c32_206 = arith.constant 32 : index
    %482 = memref.load %arg3[%c1_205, %c32_206] : memref<8x36xf32, #tpu.memory_space<smem>>
    %483 = vector.broadcast %482 : f32 to vector<5x5xf32>
    %484 = arith.mulf %207, %483 : vector<5x5xf32>
    %485 = arith.addf %481, %484 : vector<5x5xf32>
    %c1_207 = arith.constant 1 : index
    %c33_208 = arith.constant 33 : index
    %486 = memref.load %arg3[%c1_207, %c33_208] : memref<8x36xf32, #tpu.memory_space<smem>>
    %487 = vector.broadcast %486 : f32 to vector<5x5xf32>
    %488 = arith.mulf %208, %487 : vector<5x5xf32>
    %489 = arith.addf %485, %488 : vector<5x5xf32>
    %c1_209 = arith.constant 1 : index
    %c34_210 = arith.constant 34 : index
    %490 = memref.load %arg3[%c1_209, %c34_210] : memref<8x36xf32, #tpu.memory_space<smem>>
    %491 = vector.broadcast %490 : f32 to vector<5x5xf32>
    %492 = arith.mulf %209, %491 : vector<5x5xf32>
    %493 = arith.addf %489, %492 : vector<5x5xf32>
    %c1_211 = arith.constant 1 : index
    %c35_212 = arith.constant 35 : index
    %494 = memref.load %arg3[%c1_211, %c35_212] : memref<8x36xf32, #tpu.memory_space<smem>>
    %495 = vector.broadcast %494 : f32 to vector<5x5xf32>
    %496 = arith.mulf %210, %495 : vector<5x5xf32>
    %497 = arith.addf %493, %496 : vector<5x5xf32>
    %c5_213 = arith.constant 5 : index
    %c0_214 = arith.constant 0 : index
    %498 = vector.load %arg16[%c5_213, %c0_214] : memref<40x5xf32, #tpu.memory_space<vmem>>, vector<5x5xf32>
    tpu.vector_store %arg16[%c5_213, %c0_214], %497 {strides = array<i32>} : memref<40x5xf32, #tpu.memory_space<vmem>>, vector<5x5xf32>,
    %c2_215 = arith.constant 2 : index
    %c0_216 = arith.constant 0 : index
    %499 = memref.load %arg3[%c2_215, %c0_216] : memref<8x36xf32, #tpu.memory_space<smem>>
    %500 = vector.broadcast %499 : f32 to vector<5x5xf32>
    %501 = arith.mulf %175, %500 : vector<5x5xf32>
    %c2_217 = arith.constant 2 : index
    %c1_218 = arith.constant 1 : index
    %502 = memref.load %arg3[%c2_217, %c1_218] : memref<8x36xf32, #tpu.memory_space<smem>>
    %503 = vector.broadcast %502 : f32 to vector<5x5xf32>
    %504 = arith.mulf %176, %503 : vector<5x5xf32>
    %505 = arith.addf %501, %504 : vector<5x5xf32>
    %c2_219 = arith.constant 2 : index
    %c2_220 = arith.constant 2 : index
    %506 = memref.load %arg3[%c2_219, %c2_220] : memref<8x36xf32, #tpu.memory_space<smem>>
    %507 = vector.broadcast %506 : f32 to vector<5x5xf32>
    %508 = arith.mulf %177, %507 : vector<5x5xf32>
    %509 = arith.addf %505, %508 : vector<5x5xf32>
    %c2_221 = arith.constant 2 : index
    %c3_222 = arith.constant 3 : index
    %510 = memref.load %arg3[%c2_221, %c3_222] : memref<8x36xf32, #tpu.memory_space<smem>>
    %511 = vector.broadcast %510 : f32 to vector<5x5xf32>
    %512 = arith.mulf %178, %511 : vector<5x5xf32>
    %513 = arith.addf %509, %512 : vector<5x5xf32>
    %c2_223 = arith.constant 2 : index
    %c4_224 = arith.constant 4 : index
    %514 = memref.load %arg3[%c2_223, %c4_224] : memref<8x36xf32, #tpu.memory_space<smem>>
    %515 = vector.broadcast %514 : f32 to vector<5x5xf32>
    %516 = arith.mulf %179, %515 : vector<5x5xf32>
    %517 = arith.addf %513, %516 : vector<5x5xf32>
    %c2_225 = arith.constant 2 : index
    %c5_226 = arith.constant 5 : index
    %518 = memref.load %arg3[%c2_225, %c5_226] : memref<8x36xf32, #tpu.memory_space<smem>>
    %519 = vector.broadcast %518 : f32 to vector<5x5xf32>
    %520 = arith.mulf %180, %519 : vector<5x5xf32>
    %521 = arith.addf %517, %520 : vector<5x5xf32>
    %c2_227 = arith.constant 2 : index
    %c6_228 = arith.constant 6 : index
    %522 = memref.load %arg3[%c2_227, %c6_228] : memref<8x36xf32, #tpu.memory_space<smem>>
    %523 = vector.broadcast %522 : f32 to vector<5x5xf32>
    %524 = arith.mulf %181, %523 : vector<5x5xf32>
    %525 = arith.addf %521, %524 : vector<5x5xf32>
    %c2_229 = arith.constant 2 : index
    %c7_230 = arith.constant 7 : index
    %526 = memref.load %arg3[%c2_229, %c7_230] : memref<8x36xf32, #tpu.memory_space<smem>>
    %527 = vector.broadcast %526 : f32 to vector<5x5xf32>
    %528 = arith.mulf %182, %527 : vector<5x5xf32>
    %529 = arith.addf %525, %528 : vector<5x5xf32>
    %c2_231 = arith.constant 2 : index
    %c8_232 = arith.constant 8 : index
    %530 = memref.load %arg3[%c2_231, %c8_232] : memref<8x36xf32, #tpu.memory_space<smem>>
    %531 = vector.broadcast %530 : f32 to vector<5x5xf32>
    %532 = arith.mulf %183, %531 : vector<5x5xf32>
    %533 = arith.addf %529, %532 : vector<5x5xf32>
    %c2_233 = arith.constant 2 : index
    %c9_234 = arith.constant 9 : index
    %534 = memref.load %arg3[%c2_233, %c9_234] : memref<8x36xf32, #tpu.memory_space<smem>>
    %535 = vector.broadcast %534 : f32 to vector<5x5xf32>
    %536 = arith.mulf %184, %535 : vector<5x5xf32>
    %537 = arith.addf %533, %536 : vector<5x5xf32>
    %c2_235 = arith.constant 2 : index
    %c10_236 = arith.constant 10 : index
    %538 = memref.load %arg3[%c2_235, %c10_236] : memref<8x36xf32, #tpu.memory_space<smem>>
    %539 = vector.broadcast %538 : f32 to vector<5x5xf32>
    %540 = arith.mulf %185, %539 : vector<5x5xf32>
    %541 = arith.addf %537, %540 : vector<5x5xf32>
    %c2_237 = arith.constant 2 : index
    %c11_238 = arith.constant 11 : index
    %542 = memref.load %arg3[%c2_237, %c11_238] : memref<8x36xf32, #tpu.memory_space<smem>>
    %543 = vector.broadcast %542 : f32 to vector<5x5xf32>
    %544 = arith.mulf %186, %543 : vector<5x5xf32>
    %545 = arith.addf %541, %544 : vector<5x5xf32>
    %c2_239 = arith.constant 2 : index
    %c12_240 = arith.constant 12 : index
    %546 = memref.load %arg3[%c2_239, %c12_240] : memref<8x36xf32, #tpu.memory_space<smem>>
    %547 = vector.broadcast %546 : f32 to vector<5x5xf32>
    %548 = arith.mulf %187, %547 : vector<5x5xf32>
    %549 = arith.addf %545, %548 : vector<5x5xf32>
    %c2_241 = arith.constant 2 : index
    %c13_242 = arith.constant 13 : index
    %550 = memref.load %arg3[%c2_241, %c13_242] : memref<8x36xf32, #tpu.memory_space<smem>>
    %551 = vector.broadcast %550 : f32 to vector<5x5xf32>
    %552 = arith.mulf %188, %551 : vector<5x5xf32>
    %553 = arith.addf %549, %552 : vector<5x5xf32>
    %c2_243 = arith.constant 2 : index
    %c14_244 = arith.constant 14 : index
    %554 = memref.load %arg3[%c2_243, %c14_244] : memref<8x36xf32, #tpu.memory_space<smem>>
    %555 = vector.broadcast %554 : f32 to vector<5x5xf32>
    %556 = arith.mulf %189, %555 : vector<5x5xf32>
    %557 = arith.addf %553, %556 : vector<5x5xf32>
    %c2_245 = arith.constant 2 : index
    %c15_246 = arith.constant 15 : index
    %558 = memref.load %arg3[%c2_245, %c15_246] : memref<8x36xf32, #tpu.memory_space<smem>>
    %559 = vector.broadcast %558 : f32 to vector<5x5xf32>
    %560 = arith.mulf %190, %559 : vector<5x5xf32>
    %561 = arith.addf %557, %560 : vector<5x5xf32>
    %c2_247 = arith.constant 2 : index
    %c16_248 = arith.constant 16 : index
    %562 = memref.load %arg3[%c2_247, %c16_248] : memref<8x36xf32, #tpu.memory_space<smem>>
    %563 = vector.broadcast %562 : f32 to vector<5x5xf32>
    %564 = arith.mulf %191, %563 : vector<5x5xf32>
    %565 = arith.addf %561, %564 : vector<5x5xf32>
    %c2_249 = arith.constant 2 : index
    %c17_250 = arith.constant 17 : index
    %566 = memref.load %arg3[%c2_249, %c17_250] : memref<8x36xf32, #tpu.memory_space<smem>>
    %567 = vector.broadcast %566 : f32 to vector<5x5xf32>
    %568 = arith.mulf %192, %567 : vector<5x5xf32>
    %569 = arith.addf %565, %568 : vector<5x5xf32>
    %c2_251 = arith.constant 2 : index
    %c18_252 = arith.constant 18 : index
    %570 = memref.load %arg3[%c2_251, %c18_252] : memref<8x36xf32, #tpu.memory_space<smem>>
    %571 = vector.broadcast %570 : f32 to vector<5x5xf32>
    %572 = arith.mulf %193, %571 : vector<5x5xf32>
    %573 = arith.addf %569, %572 : vector<5x5xf32>
    %c2_253 = arith.constant 2 : index
    %c19_254 = arith.constant 19 : index
    %574 = memref.load %arg3[%c2_253, %c19_254] : memref<8x36xf32, #tpu.memory_space<smem>>
    %575 = vector.broadcast %574 : f32 to vector<5x5xf32>
    %576 = arith.mulf %194, %575 : vector<5x5xf32>
    %577 = arith.addf %573, %576 : vector<5x5xf32>
    %c2_255 = arith.constant 2 : index
    %c20_256 = arith.constant 20 : index
    %578 = memref.load %arg3[%c2_255, %c20_256] : memref<8x36xf32, #tpu.memory_space<smem>>
    %579 = vector.broadcast %578 : f32 to vector<5x5xf32>
    %580 = arith.mulf %195, %579 : vector<5x5xf32>
    %581 = arith.addf %577, %580 : vector<5x5xf32>
    %c2_257 = arith.constant 2 : index
    %c21_258 = arith.constant 21 : index
    %582 = memref.load %arg3[%c2_257, %c21_258] : memref<8x36xf32, #tpu.memory_space<smem>>
    %583 = vector.broadcast %582 : f32 to vector<5x5xf32>
    %584 = arith.mulf %196, %583 : vector<5x5xf32>
    %585 = arith.addf %581, %584 : vector<5x5xf32>
    %c2_259 = arith.constant 2 : index
    %c22_260 = arith.constant 22 : index
    %586 = memref.load %arg3[%c2_259, %c22_260] : memref<8x36xf32, #tpu.memory_space<smem>>
    %587 = vector.broadcast %586 : f32 to vector<5x5xf32>
    %588 = arith.mulf %197, %587 : vector<5x5xf32>
    %589 = arith.addf %585, %588 : vector<5x5xf32>
    %c2_261 = arith.constant 2 : index
    %c23_262 = arith.constant 23 : index
    %590 = memref.load %arg3[%c2_261, %c23_262] : memref<8x36xf32, #tpu.memory_space<smem>>
    %591 = vector.broadcast %590 : f32 to vector<5x5xf32>
    %592 = arith.mulf %198, %591 : vector<5x5xf32>
    %593 = arith.addf %589, %592 : vector<5x5xf32>
    %c2_263 = arith.constant 2 : index
    %c24_264 = arith.constant 24 : index
    %594 = memref.load %arg3[%c2_263, %c24_264] : memref<8x36xf32, #tpu.memory_space<smem>>
    %595 = vector.broadcast %594 : f32 to vector<5x5xf32>
    %596 = arith.mulf %199, %595 : vector<5x5xf32>
    %597 = arith.addf %593, %596 : vector<5x5xf32>
    %c2_265 = arith.constant 2 : index
    %c25_266 = arith.constant 25 : index
    %598 = memref.load %arg3[%c2_265, %c25_266] : memref<8x36xf32, #tpu.memory_space<smem>>
    %599 = vector.broadcast %598 : f32 to vector<5x5xf32>
    %600 = arith.mulf %200, %599 : vector<5x5xf32>
    %601 = arith.addf %597, %600 : vector<5x5xf32>
    %c2_267 = arith.constant 2 : index
    %c26_268 = arith.constant 26 : index
    %602 = memref.load %arg3[%c2_267, %c26_268] : memref<8x36xf32, #tpu.memory_space<smem>>
    %603 = vector.broadcast %602 : f32 to vector<5x5xf32>
    %604 = arith.mulf %201, %603 : vector<5x5xf32>
    %605 = arith.addf %601, %604 : vector<5x5xf32>
    %c2_269 = arith.constant 2 : index
    %c27_270 = arith.constant 27 : index
    %606 = memref.load %arg3[%c2_269, %c27_270] : memref<8x36xf32, #tpu.memory_space<smem>>
    %607 = vector.broadcast %606 : f32 to vector<5x5xf32>
    %608 = arith.mulf %202, %607 : vector<5x5xf32>
    %609 = arith.addf %605, %608 : vector<5x5xf32>
    %c2_271 = arith.constant 2 : index
    %c28_272 = arith.constant 28 : index
    %610 = memref.load %arg3[%c2_271, %c28_272] : memref<8x36xf32, #tpu.memory_space<smem>>
    %611 = vector.broadcast %610 : f32 to vector<5x5xf32>
    %612 = arith.mulf %203, %611 : vector<5x5xf32>
    %613 = arith.addf %609, %612 : vector<5x5xf32>
    %c2_273 = arith.constant 2 : index
    %c29_274 = arith.constant 29 : index
    %614 = memref.load %arg3[%c2_273, %c29_274] : memref<8x36xf32, #tpu.memory_space<smem>>
    %615 = vector.broadcast %614 : f32 to vector<5x5xf32>
    %616 = arith.mulf %204, %615 : vector<5x5xf32>
    %617 = arith.addf %613, %616 : vector<5x5xf32>
    %c2_275 = arith.constant 2 : index
    %c30_276 = arith.constant 30 : index
    %618 = memref.load %arg3[%c2_275, %c30_276] : memref<8x36xf32, #tpu.memory_space<smem>>
    %619 = vector.broadcast %618 : f32 to vector<5x5xf32>
    %620 = arith.mulf %205, %619 : vector<5x5xf32>
    %621 = arith.addf %617, %620 : vector<5x5xf32>
    %c2_277 = arith.constant 2 : index
    %c31_278 = arith.constant 31 : index
    %622 = memref.load %arg3[%c2_277, %c31_278] : memref<8x36xf32, #tpu.memory_space<smem>>
    %623 = vector.broadcast %622 : f32 to vector<5x5xf32>
    %624 = arith.mulf %206, %623 : vector<5x5xf32>
    %625 = arith.addf %621, %624 : vector<5x5xf32>
    %c2_279 = arith.constant 2 : index
    %c32_280 = arith.constant 32 : index
    %626 = memref.load %arg3[%c2_279, %c32_280] : memref<8x36xf32, #tpu.memory_space<smem>>
    %627 = vector.broadcast %626 : f32 to vector<5x5xf32>
    %628 = arith.mulf %207, %627 : vector<5x5xf32>
    %629 = arith.addf %625, %628 : vector<5x5xf32>
    %c2_281 = arith.constant 2 : index
    %c33_282 = arith.constant 33 : index
    %630 = memref.load %arg3[%c2_281, %c33_282] : memref<8x36xf32, #tpu.memory_space<smem>>
    %631 = vector.broadcast %630 : f32 to vector<5x5xf32>
    %632 = arith.mulf %208, %631 : vector<5x5xf32>
    %633 = arith.addf %629, %632 : vector<5x5xf32>
    %c2_283 = arith.constant 2 : index
    %c34_284 = arith.constant 34 : index
    %634 = memref.load %arg3[%c2_283, %c34_284] : memref<8x36xf32, #tpu.memory_space<smem>>
    %635 = vector.broadcast %634 : f32 to vector<5x5xf32>
    %636 = arith.mulf %209, %635 : vector<5x5xf32>
    %637 = arith.addf %633, %636 : vector<5x5xf32>
    %c2_285 = arith.constant 2 : index
    %c35_286 = arith.constant 35 : index
    %638 = memref.load %arg3[%c2_285, %c35_286] : memref<8x36xf32, #tpu.memory_space<smem>>
    %639 = vector.broadcast %638 : f32 to vector<5x5xf32>
    %640 = arith.mulf %210, %639 : vector<5x5xf32>
    %641 = arith.addf %637, %640 : vector<5x5xf32>
    %c10_287 = arith.constant 10 : index
    %c0_288 = arith.constant 0 : index
    %642 = vector.load %arg16[%c10_287, %c0_288] : memref<40x5xf32, #tpu.memory_space<vmem>>, vector<5x5xf32>
    tpu.vector_store %arg16[%c10_287, %c0_288], %641 {strides = array<i32>} : memref<40x5xf32, #tpu.memory_space<vmem>>, vector<5x5xf32>,
    %c3_289 = arith.constant 3 : index
    %c0_290 = arith.constant 0 : index
    %643 = memref.load %arg3[%c3_289, %c0_290] : memref<8x36xf32, #tpu.memory_space<smem>>
    %644 = vector.broadcast %643 : f32 to vector<5x5xf32>
    %645 = arith.mulf %175, %644 : vector<5x5xf32>
    %c3_291 = arith.constant 3 : index
    %c1_292 = arith.constant 1 : index
    %646 = memref.load %arg3[%c3_291, %c1_292] : memref<8x36xf32, #tpu.memory_space<smem>>
    %647 = vector.broadcast %646 : f32 to vector<5x5xf32>
    %648 = arith.mulf %176, %647 : vector<5x5xf32>
    %649 = arith.addf %645, %648 : vector<5x5xf32>
    %c3_293 = arith.constant 3 : index
    %c2_294 = arith.constant 2 : index
    %650 = memref.load %arg3[%c3_293, %c2_294] : memref<8x36xf32, #tpu.memory_space<smem>>
    %651 = vector.broadcast %650 : f32 to vector<5x5xf32>
    %652 = arith.mulf %177, %651 : vector<5x5xf32>
    %653 = arith.addf %649, %652 : vector<5x5xf32>
    %c3_295 = arith.constant 3 : index
    %c3_296 = arith.constant 3 : index
    %654 = memref.load %arg3[%c3_295, %c3_296] : memref<8x36xf32, #tpu.memory_space<smem>>
    %655 = vector.broadcast %654 : f32 to vector<5x5xf32>
    %656 = arith.mulf %178, %655 : vector<5x5xf32>
    %657 = arith.addf %653, %656 : vector<5x5xf32>
    %c3_297 = arith.constant 3 : index
    %c4_298 = arith.constant 4 : index
    %658 = memref.load %arg3[%c3_297, %c4_298] : memref<8x36xf32, #tpu.memory_space<smem>>
    %659 = vector.broadcast %658 : f32 to vector<5x5xf32>
    %660 = arith.mulf %179, %659 : vector<5x5xf32>
    %661 = arith.addf %657, %660 : vector<5x5xf32>
    %c3_299 = arith.constant 3 : index
    %c5_300 = arith.constant 5 : index
    %662 = memref.load %arg3[%c3_299, %c5_300] : memref<8x36xf32, #tpu.memory_space<smem>>
    %663 = vector.broadcast %662 : f32 to vector<5x5xf32>
    %664 = arith.mulf %180, %663 : vector<5x5xf32>
    %665 = arith.addf %661, %664 : vector<5x5xf32>
    %c3_301 = arith.constant 3 : index
    %c6_302 = arith.constant 6 : index
    %666 = memref.load %arg3[%c3_301, %c6_302] : memref<8x36xf32, #tpu.memory_space<smem>>
    %667 = vector.broadcast %666 : f32 to vector<5x5xf32>
    %668 = arith.mulf %181, %667 : vector<5x5xf32>
    %669 = arith.addf %665, %668 : vector<5x5xf32>
    %c3_303 = arith.constant 3 : index
    %c7_304 = arith.constant 7 : index
    %670 = memref.load %arg3[%c3_303, %c7_304] : memref<8x36xf32, #tpu.memory_space<smem>>
    %671 = vector.broadcast %670 : f32 to vector<5x5xf32>
    %672 = arith.mulf %182, %671 : vector<5x5xf32>
    %673 = arith.addf %669, %672 : vector<5x5xf32>
    %c3_305 = arith.constant 3 : index
    %c8_306 = arith.constant 8 : index
    %674 = memref.load %arg3[%c3_305, %c8_306] : memref<8x36xf32, #tpu.memory_space<smem>>
    %675 = vector.broadcast %674 : f32 to vector<5x5xf32>
    %676 = arith.mulf %183, %675 : vector<5x5xf32>
    %677 = arith.addf %673, %676 : vector<5x5xf32>
    %c3_307 = arith.constant 3 : index
    %c9_308 = arith.constant 9 : index
    %678 = memref.load %arg3[%c3_307, %c9_308] : memref<8x36xf32, #tpu.memory_space<smem>>
    %679 = vector.broadcast %678 : f32 to vector<5x5xf32>
    %680 = arith.mulf %184, %679 : vector<5x5xf32>
    %681 = arith.addf %677, %680 : vector<5x5xf32>
    %c3_309 = arith.constant 3 : index
    %c10_310 = arith.constant 10 : index
    %682 = memref.load %arg3[%c3_309, %c10_310] : memref<8x36xf32, #tpu.memory_space<smem>>
    %683 = vector.broadcast %682 : f32 to vector<5x5xf32>
    %684 = arith.mulf %185, %683 : vector<5x5xf32>
    %685 = arith.addf %681, %684 : vector<5x5xf32>
    %c3_311 = arith.constant 3 : index
    %c11_312 = arith.constant 11 : index
    %686 = memref.load %arg3[%c3_311, %c11_312] : memref<8x36xf32, #tpu.memory_space<smem>>
    %687 = vector.broadcast %686 : f32 to vector<5x5xf32>
    %688 = arith.mulf %186, %687 : vector<5x5xf32>
    %689 = arith.addf %685, %688 : vector<5x5xf32>
    %c3_313 = arith.constant 3 : index
    %c12_314 = arith.constant 12 : index
    %690 = memref.load %arg3[%c3_313, %c12_314] : memref<8x36xf32, #tpu.memory_space<smem>>
    %691 = vector.broadcast %690 : f32 to vector<5x5xf32>
    %692 = arith.mulf %187, %691 : vector<5x5xf32>
    %693 = arith.addf %689, %692 : vector<5x5xf32>
    %c3_315 = arith.constant 3 : index
    %c13_316 = arith.constant 13 : index
    %694 = memref.load %arg3[%c3_315, %c13_316] : memref<8x36xf32, #tpu.memory_space<smem>>
    %695 = vector.broadcast %694 : f32 to vector<5x5xf32>
    %696 = arith.mulf %188, %695 : vector<5x5xf32>
    %697 = arith.addf %693, %696 : vector<5x5xf32>
    %c3_317 = arith.constant 3 : index
    %c14_318 = arith.constant 14 : index
    %698 = memref.load %arg3[%c3_317, %c14_318] : memref<8x36xf32, #tpu.memory_space<smem>>
    %699 = vector.broadcast %698 : f32 to vector<5x5xf32>
    %700 = arith.mulf %189, %699 : vector<5x5xf32>
    %701 = arith.addf %697, %700 : vector<5x5xf32>
    %c3_319 = arith.constant 3 : index
    %c15_320 = arith.constant 15 : index
    %702 = memref.load %arg3[%c3_319, %c15_320] : memref<8x36xf32, #tpu.memory_space<smem>>
    %703 = vector.broadcast %702 : f32 to vector<5x5xf32>
    %704 = arith.mulf %190, %703 : vector<5x5xf32>
    %705 = arith.addf %701, %704 : vector<5x5xf32>
    %c3_321 = arith.constant 3 : index
    %c16_322 = arith.constant 16 : index
    %706 = memref.load %arg3[%c3_321, %c16_322] : memref<8x36xf32, #tpu.memory_space<smem>>
    %707 = vector.broadcast %706 : f32 to vector<5x5xf32>
    %708 = arith.mulf %191, %707 : vector<5x5xf32>
    %709 = arith.addf %705, %708 : vector<5x5xf32>
    %c3_323 = arith.constant 3 : index
    %c17_324 = arith.constant 17 : index
    %710 = memref.load %arg3[%c3_323, %c17_324] : memref<8x36xf32, #tpu.memory_space<smem>>
    %711 = vector.broadcast %710 : f32 to vector<5x5xf32>
    %712 = arith.mulf %192, %711 : vector<5x5xf32>
    %713 = arith.addf %709, %712 : vector<5x5xf32>
    %c3_325 = arith.constant 3 : index
    %c18_326 = arith.constant 18 : index
    %714 = memref.load %arg3[%c3_325, %c18_326] : memref<8x36xf32, #tpu.memory_space<smem>>
    %715 = vector.broadcast %714 : f32 to vector<5x5xf32>
    %716 = arith.mulf %193, %715 : vector<5x5xf32>
    %717 = arith.addf %713, %716 : vector<5x5xf32>
    %c3_327 = arith.constant 3 : index
    %c19_328 = arith.constant 19 : index
    %718 = memref.load %arg3[%c3_327, %c19_328] : memref<8x36xf32, #tpu.memory_space<smem>>
    %719 = vector.broadcast %718 : f32 to vector<5x5xf32>
    %720 = arith.mulf %194, %719 : vector<5x5xf32>
    %721 = arith.addf %717, %720 : vector<5x5xf32>
    %c3_329 = arith.constant 3 : index
    %c20_330 = arith.constant 20 : index
    %722 = memref.load %arg3[%c3_329, %c20_330] : memref<8x36xf32, #tpu.memory_space<smem>>
    %723 = vector.broadcast %722 : f32 to vector<5x5xf32>
    %724 = arith.mulf %195, %723 : vector<5x5xf32>
    %725 = arith.addf %721, %724 : vector<5x5xf32>
    %c3_331 = arith.constant 3 : index
    %c21_332 = arith.constant 21 : index
    %726 = memref.load %arg3[%c3_331, %c21_332] : memref<8x36xf32, #tpu.memory_space<smem>>
    %727 = vector.broadcast %726 : f32 to vector<5x5xf32>
    %728 = arith.mulf %196, %727 : vector<5x5xf32>
    %729 = arith.addf %725, %728 : vector<5x5xf32>
    %c3_333 = arith.constant 3 : index
    %c22_334 = arith.constant 22 : index
    %730 = memref.load %arg3[%c3_333, %c22_334] : memref<8x36xf32, #tpu.memory_space<smem>>
    %731 = vector.broadcast %730 : f32 to vector<5x5xf32>
    %732 = arith.mulf %197, %731 : vector<5x5xf32>
    %733 = arith.addf %729, %732 : vector<5x5xf32>
    %c3_335 = arith.constant 3 : index
    %c23_336 = arith.constant 23 : index
    %734 = memref.load %arg3[%c3_335, %c23_336] : memref<8x36xf32, #tpu.memory_space<smem>>
    %735 = vector.broadcast %734 : f32 to vector<5x5xf32>
    %736 = arith.mulf %198, %735 : vector<5x5xf32>
    %737 = arith.addf %733, %736 : vector<5x5xf32>
    %c3_337 = arith.constant 3 : index
    %c24_338 = arith.constant 24 : index
    %738 = memref.load %arg3[%c3_337, %c24_338] : memref<8x36xf32, #tpu.memory_space<smem>>
    %739 = vector.broadcast %738 : f32 to vector<5x5xf32>
    %740 = arith.mulf %199, %739 : vector<5x5xf32>
    %741 = arith.addf %737, %740 : vector<5x5xf32>
    %c3_339 = arith.constant 3 : index
    %c25_340 = arith.constant 25 : index
    %742 = memref.load %arg3[%c3_339, %c25_340] : memref<8x36xf32, #tpu.memory_space<smem>>
    %743 = vector.broadcast %742 : f32 to vector<5x5xf32>
    %744 = arith.mulf %200, %743 : vector<5x5xf32>
    %745 = arith.addf %741, %744 : vector<5x5xf32>
    %c3_341 = arith.constant 3 : index
    %c26_342 = arith.constant 26 : index
    %746 = memref.load %arg3[%c3_341, %c26_342] : memref<8x36xf32, #tpu.memory_space<smem>>
    %747 = vector.broadcast %746 : f32 to vector<5x5xf32>
    %748 = arith.mulf %201, %747 : vector<5x5xf32>
    %749 = arith.addf %745, %748 : vector<5x5xf32>
    %c3_343 = arith.constant 3 : index
    %c27_344 = arith.constant 27 : index
    %750 = memref.load %arg3[%c3_343, %c27_344] : memref<8x36xf32, #tpu.memory_space<smem>>
    %751 = vector.broadcast %750 : f32 to vector<5x5xf32>
    %752 = arith.mulf %202, %751 : vector<5x5xf32>
    %753 = arith.addf %749, %752 : vector<5x5xf32>
    %c3_345 = arith.constant 3 : index
    %c28_346 = arith.constant 28 : index
    %754 = memref.load %arg3[%c3_345, %c28_346] : memref<8x36xf32, #tpu.memory_space<smem>>
    %755 = vector.broadcast %754 : f32 to vector<5x5xf32>
    %756 = arith.mulf %203, %755 : vector<5x5xf32>
    %757 = arith.addf %753, %756 : vector<5x5xf32>
    %c3_347 = arith.constant 3 : index
    %c29_348 = arith.constant 29 : index
    %758 = memref.load %arg3[%c3_347, %c29_348] : memref<8x36xf32, #tpu.memory_space<smem>>
    %759 = vector.broadcast %758 : f32 to vector<5x5xf32>
    %760 = arith.mulf %204, %759 : vector<5x5xf32>
    %761 = arith.addf %757, %760 : vector<5x5xf32>
    %c3_349 = arith.constant 3 : index
    %c30_350 = arith.constant 30 : index
    %762 = memref.load %arg3[%c3_349, %c30_350] : memref<8x36xf32, #tpu.memory_space<smem>>
    %763 = vector.broadcast %762 : f32 to vector<5x5xf32>
    %764 = arith.mulf %205, %763 : vector<5x5xf32>
    %765 = arith.addf %761, %764 : vector<5x5xf32>
    %c3_351 = arith.constant 3 : index
    %c31_352 = arith.constant 31 : index
    %766 = memref.load %arg3[%c3_351, %c31_352] : memref<8x36xf32, #tpu.memory_space<smem>>
    %767 = vector.broadcast %766 : f32 to vector<5x5xf32>
    %768 = arith.mulf %206, %767 : vector<5x5xf32>
    %769 = arith.addf %765, %768 : vector<5x5xf32>
    %c3_353 = arith.constant 3 : index
    %c32_354 = arith.constant 32 : index
    %770 = memref.load %arg3[%c3_353, %c32_354] : memref<8x36xf32, #tpu.memory_space<smem>>
    %771 = vector.broadcast %770 : f32 to vector<5x5xf32>
    %772 = arith.mulf %207, %771 : vector<5x5xf32>
    %773 = arith.addf %769, %772 : vector<5x5xf32>
    %c3_355 = arith.constant 3 : index
    %c33_356 = arith.constant 33 : index
    %774 = memref.load %arg3[%c3_355, %c33_356] : memref<8x36xf32, #tpu.memory_space<smem>>
    %775 = vector.broadcast %774 : f32 to vector<5x5xf32>
    %776 = arith.mulf %208, %775 : vector<5x5xf32>
    %777 = arith.addf %773, %776 : vector<5x5xf32>
    %c3_357 = arith.constant 3 : index
    %c34_358 = arith.constant 34 : index
    %778 = memref.load %arg3[%c3_357, %c34_358] : memref<8x36xf32, #tpu.memory_space<smem>>
    %779 = vector.broadcast %778 : f32 to vector<5x5xf32>
    %780 = arith.mulf %209, %779 : vector<5x5xf32>
    %781 = arith.addf %777, %780 : vector<5x5xf32>
    %c3_359 = arith.constant 3 : index
    %c35_360 = arith.constant 35 : index
    %782 = memref.load %arg3[%c3_359, %c35_360] : memref<8x36xf32, #tpu.memory_space<smem>>
    %783 = vector.broadcast %782 : f32 to vector<5x5xf32>
    %784 = arith.mulf %210, %783 : vector<5x5xf32>
    %785 = arith.addf %781, %784 : vector<5x5xf32>
    %c15_361 = arith.constant 15 : index
    %c0_362 = arith.constant 0 : index
    %786 = vector.load %arg16[%c15_361, %c0_362] : memref<40x5xf32, #tpu.memory_space<vmem>>, vector<5x5xf32>
    tpu.vector_store %arg16[%c15_361, %c0_362], %785 {strides = array<i32>} : memref<40x5xf32, #tpu.memory_space<vmem>>, vector<5x5xf32>,
    %c4_363 = arith.constant 4 : index
    %c0_364 = arith.constant 0 : index
    %787 = memref.load %arg3[%c4_363, %c0_364] : memref<8x36xf32, #tpu.memory_space<smem>>
    %788 = vector.broadcast %787 : f32 to vector<5x5xf32>
    %789 = arith.mulf %175, %788 : vector<5x5xf32>
    %c4_365 = arith.constant 4 : index
    %c1_366 = arith.constant 1 : index
    %790 = memref.load %arg3[%c4_365, %c1_366] : memref<8x36xf32, #tpu.memory_space<smem>>
    %791 = vector.broadcast %790 : f32 to vector<5x5xf32>
    %792 = arith.mulf %176, %791 : vector<5x5xf32>
    %793 = arith.addf %789, %792 : vector<5x5xf32>
    %c4_367 = arith.constant 4 : index
    %c2_368 = arith.constant 2 : index
    %794 = memref.load %arg3[%c4_367, %c2_368] : memref<8x36xf32, #tpu.memory_space<smem>>
    %795 = vector.broadcast %794 : f32 to vector<5x5xf32>
    %796 = arith.mulf %177, %795 : vector<5x5xf32>
    %797 = arith.addf %793, %796 : vector<5x5xf32>
    %c4_369 = arith.constant 4 : index
    %c3_370 = arith.constant 3 : index
    %798 = memref.load %arg3[%c4_369, %c3_370] : memref<8x36xf32, #tpu.memory_space<smem>>
    %799 = vector.broadcast %798 : f32 to vector<5x5xf32>
    %800 = arith.mulf %178, %799 : vector<5x5xf32>
    %801 = arith.addf %797, %800 : vector<5x5xf32>
    %c4_371 = arith.constant 4 : index
    %c4_372 = arith.constant 4 : index
    %802 = memref.load %arg3[%c4_371, %c4_372] : memref<8x36xf32, #tpu.memory_space<smem>>
    %803 = vector.broadcast %802 : f32 to vector<5x5xf32>
    %804 = arith.mulf %179, %803 : vector<5x5xf32>
    %805 = arith.addf %801, %804 : vector<5x5xf32>
    %c4_373 = arith.constant 4 : index
    %c5_374 = arith.constant 5 : index
    %806 = memref.load %arg3[%c4_373, %c5_374] : memref<8x36xf32, #tpu.memory_space<smem>>
    %807 = vector.broadcast %806 : f32 to vector<5x5xf32>
    %808 = arith.mulf %180, %807 : vector<5x5xf32>
    %809 = arith.addf %805, %808 : vector<5x5xf32>
    %c4_375 = arith.constant 4 : index
    %c6_376 = arith.constant 6 : index
    %810 = memref.load %arg3[%c4_375, %c6_376] : memref<8x36xf32, #tpu.memory_space<smem>>
    %811 = vector.broadcast %810 : f32 to vector<5x5xf32>
    %812 = arith.mulf %181, %811 : vector<5x5xf32>
    %813 = arith.addf %809, %812 : vector<5x5xf32>
    %c4_377 = arith.constant 4 : index
    %c7_378 = arith.constant 7 : index
    %814 = memref.load %arg3[%c4_377, %c7_378] : memref<8x36xf32, #tpu.memory_space<smem>>
    %815 = vector.broadcast %814 : f32 to vector<5x5xf32>
    %816 = arith.mulf %182, %815 : vector<5x5xf32>
    %817 = arith.addf %813, %816 : vector<5x5xf32>
    %c4_379 = arith.constant 4 : index
    %c8_380 = arith.constant 8 : index
    %818 = memref.load %arg3[%c4_379, %c8_380] : memref<8x36xf32, #tpu.memory_space<smem>>
    %819 = vector.broadcast %818 : f32 to vector<5x5xf32>
    %820 = arith.mulf %183, %819 : vector<5x5xf32>
    %821 = arith.addf %817, %820 : vector<5x5xf32>
    %c4_381 = arith.constant 4 : index
    %c9_382 = arith.constant 9 : index
    %822 = memref.load %arg3[%c4_381, %c9_382] : memref<8x36xf32, #tpu.memory_space<smem>>
    %823 = vector.broadcast %822 : f32 to vector<5x5xf32>
    %824 = arith.mulf %184, %823 : vector<5x5xf32>
    %825 = arith.addf %821, %824 : vector<5x5xf32>
    %c4_383 = arith.constant 4 : index
    %c10_384 = arith.constant 10 : index
    %826 = memref.load %arg3[%c4_383, %c10_384] : memref<8x36xf32, #tpu.memory_space<smem>>
    %827 = vector.broadcast %826 : f32 to vector<5x5xf32>
    %828 = arith.mulf %185, %827 : vector<5x5xf32>
    %829 = arith.addf %825, %828 : vector<5x5xf32>
    %c4_385 = arith.constant 4 : index
    %c11_386 = arith.constant 11 : index
    %830 = memref.load %arg3[%c4_385, %c11_386] : memref<8x36xf32, #tpu.memory_space<smem>>
    %831 = vector.broadcast %830 : f32 to vector<5x5xf32>
    %832 = arith.mulf %186, %831 : vector<5x5xf32>
    %833 = arith.addf %829, %832 : vector<5x5xf32>
    %c4_387 = arith.constant 4 : index
    %c12_388 = arith.constant 12 : index
    %834 = memref.load %arg3[%c4_387, %c12_388] : memref<8x36xf32, #tpu.memory_space<smem>>
    %835 = vector.broadcast %834 : f32 to vector<5x5xf32>
    %836 = arith.mulf %187, %835 : vector<5x5xf32>
    %837 = arith.addf %833, %836 : vector<5x5xf32>
    %c4_389 = arith.constant 4 : index
    %c13_390 = arith.constant 13 : index
    %838 = memref.load %arg3[%c4_389, %c13_390] : memref<8x36xf32, #tpu.memory_space<smem>>
    %839 = vector.broadcast %838 : f32 to vector<5x5xf32>
    %840 = arith.mulf %188, %839 : vector<5x5xf32>
    %841 = arith.addf %837, %840 : vector<5x5xf32>
    %c4_391 = arith.constant 4 : index
    %c14_392 = arith.constant 14 : index
    %842 = memref.load %arg3[%c4_391, %c14_392] : memref<8x36xf32, #tpu.memory_space<smem>>
    %843 = vector.broadcast %842 : f32 to vector<5x5xf32>
    %844 = arith.mulf %189, %843 : vector<5x5xf32>
    %845 = arith.addf %841, %844 : vector<5x5xf32>
    %c4_393 = arith.constant 4 : index
    %c15_394 = arith.constant 15 : index
    %846 = memref.load %arg3[%c4_393, %c15_394] : memref<8x36xf32, #tpu.memory_space<smem>>
    %847 = vector.broadcast %846 : f32 to vector<5x5xf32>
    %848 = arith.mulf %190, %847 : vector<5x5xf32>
    %849 = arith.addf %845, %848 : vector<5x5xf32>
    %c4_395 = arith.constant 4 : index
    %c16_396 = arith.constant 16 : index
    %850 = memref.load %arg3[%c4_395, %c16_396] : memref<8x36xf32, #tpu.memory_space<smem>>
    %851 = vector.broadcast %850 : f32 to vector<5x5xf32>
    %852 = arith.mulf %191, %851 : vector<5x5xf32>
    %853 = arith.addf %849, %852 : vector<5x5xf32>
    %c4_397 = arith.constant 4 : index
    %c17_398 = arith.constant 17 : index
    %854 = memref.load %arg3[%c4_397, %c17_398] : memref<8x36xf32, #tpu.memory_space<smem>>
    %855 = vector.broadcast %854 : f32 to vector<5x5xf32>
    %856 = arith.mulf %192, %855 : vector<5x5xf32>
    %857 = arith.addf %853, %856 : vector<5x5xf32>
    %c4_399 = arith.constant 4 : index
    %c18_400 = arith.constant 18 : index
    %858 = memref.load %arg3[%c4_399, %c18_400] : memref<8x36xf32, #tpu.memory_space<smem>>
    %859 = vector.broadcast %858 : f32 to vector<5x5xf32>
    %860 = arith.mulf %193, %859 : vector<5x5xf32>
    %861 = arith.addf %857, %860 : vector<5x5xf32>
    %c4_401 = arith.constant 4 : index
    %c19_402 = arith.constant 19 : index
    %862 = memref.load %arg3[%c4_401, %c19_402] : memref<8x36xf32, #tpu.memory_space<smem>>
    %863 = vector.broadcast %862 : f32 to vector<5x5xf32>
    %864 = arith.mulf %194, %863 : vector<5x5xf32>
    %865 = arith.addf %861, %864 : vector<5x5xf32>
    %c4_403 = arith.constant 4 : index
    %c20_404 = arith.constant 20 : index
    %866 = memref.load %arg3[%c4_403, %c20_404] : memref<8x36xf32, #tpu.memory_space<smem>>
    %867 = vector.broadcast %866 : f32 to vector<5x5xf32>
    %868 = arith.mulf %195, %867 : vector<5x5xf32>
    %869 = arith.addf %865, %868 : vector<5x5xf32>
    %c4_405 = arith.constant 4 : index
    %c21_406 = arith.constant 21 : index
    %870 = memref.load %arg3[%c4_405, %c21_406] : memref<8x36xf32, #tpu.memory_space<smem>>
    %871 = vector.broadcast %870 : f32 to vector<5x5xf32>
    %872 = arith.mulf %196, %871 : vector<5x5xf32>
    %873 = arith.addf %869, %872 : vector<5x5xf32>
    %c4_407 = arith.constant 4 : index
    %c22_408 = arith.constant 22 : index
    %874 = memref.load %arg3[%c4_407, %c22_408] : memref<8x36xf32, #tpu.memory_space<smem>>
    %875 = vector.broadcast %874 : f32 to vector<5x5xf32>
    %876 = arith.mulf %197, %875 : vector<5x5xf32>
    %877 = arith.addf %873, %876 : vector<5x5xf32>
    %c4_409 = arith.constant 4 : index
    %c23_410 = arith.constant 23 : index
    %878 = memref.load %arg3[%c4_409, %c23_410] : memref<8x36xf32, #tpu.memory_space<smem>>
    %879 = vector.broadcast %878 : f32 to vector<5x5xf32>
    %880 = arith.mulf %198, %879 : vector<5x5xf32>
    %881 = arith.addf %877, %880 : vector<5x5xf32>
    %c4_411 = arith.constant 4 : index
    %c24_412 = arith.constant 24 : index
    %882 = memref.load %arg3[%c4_411, %c24_412] : memref<8x36xf32, #tpu.memory_space<smem>>
    %883 = vector.broadcast %882 : f32 to vector<5x5xf32>
    %884 = arith.mulf %199, %883 : vector<5x5xf32>
    %885 = arith.addf %881, %884 : vector<5x5xf32>
    %c4_413 = arith.constant 4 : index
    %c25_414 = arith.constant 25 : index
    %886 = memref.load %arg3[%c4_413, %c25_414] : memref<8x36xf32, #tpu.memory_space<smem>>
    %887 = vector.broadcast %886 : f32 to vector<5x5xf32>
    %888 = arith.mulf %200, %887 : vector<5x5xf32>
    %889 = arith.addf %885, %888 : vector<5x5xf32>
    %c4_415 = arith.constant 4 : index
    %c26_416 = arith.constant 26 : index
    %890 = memref.load %arg3[%c4_415, %c26_416] : memref<8x36xf32, #tpu.memory_space<smem>>
    %891 = vector.broadcast %890 : f32 to vector<5x5xf32>
    %892 = arith.mulf %201, %891 : vector<5x5xf32>
    %893 = arith.addf %889, %892 : vector<5x5xf32>
    %c4_417 = arith.constant 4 : index
    %c27_418 = arith.constant 27 : index
    %894 = memref.load %arg3[%c4_417, %c27_418] : memref<8x36xf32, #tpu.memory_space<smem>>
    %895 = vector.broadcast %894 : f32 to vector<5x5xf32>
    %896 = arith.mulf %202, %895 : vector<5x5xf32>
    %897 = arith.addf %893, %896 : vector<5x5xf32>
    %c4_419 = arith.constant 4 : index
    %c28_420 = arith.constant 28 : index
    %898 = memref.load %arg3[%c4_419, %c28_420] : memref<8x36xf32, #tpu.memory_space<smem>>
    %899 = vector.broadcast %898 : f32 to vector<5x5xf32>
    %900 = arith.mulf %203, %899 : vector<5x5xf32>
    %901 = arith.addf %897, %900 : vector<5x5xf32>
    %c4_421 = arith.constant 4 : index
    %c29_422 = arith.constant 29 : index
    %902 = memref.load %arg3[%c4_421, %c29_422] : memref<8x36xf32, #tpu.memory_space<smem>>
    %903 = vector.broadcast %902 : f32 to vector<5x5xf32>
    %904 = arith.mulf %204, %903 : vector<5x5xf32>
    %905 = arith.addf %901, %904 : vector<5x5xf32>
    %c4_423 = arith.constant 4 : index
    %c30_424 = arith.constant 30 : index
    %906 = memref.load %arg3[%c4_423, %c30_424] : memref<8x36xf32, #tpu.memory_space<smem>>
    %907 = vector.broadcast %906 : f32 to vector<5x5xf32>
    %908 = arith.mulf %205, %907 : vector<5x5xf32>
    %909 = arith.addf %905, %908 : vector<5x5xf32>
    %c4_425 = arith.constant 4 : index
    %c31_426 = arith.constant 31 : index
    %910 = memref.load %arg3[%c4_425, %c31_426] : memref<8x36xf32, #tpu.memory_space<smem>>
    %911 = vector.broadcast %910 : f32 to vector<5x5xf32>
    %912 = arith.mulf %206, %911 : vector<5x5xf32>
    %913 = arith.addf %909, %912 : vector<5x5xf32>
    %c4_427 = arith.constant 4 : index
    %c32_428 = arith.constant 32 : index
    %914 = memref.load %arg3[%c4_427, %c32_428] : memref<8x36xf32, #tpu.memory_space<smem>>
    %915 = vector.broadcast %914 : f32 to vector<5x5xf32>
    %916 = arith.mulf %207, %915 : vector<5x5xf32>
    %917 = arith.addf %913, %916 : vector<5x5xf32>
    %c4_429 = arith.constant 4 : index
    %c33_430 = arith.constant 33 : index
    %918 = memref.load %arg3[%c4_429, %c33_430] : memref<8x36xf32, #tpu.memory_space<smem>>
    %919 = vector.broadcast %918 : f32 to vector<5x5xf32>
    %920 = arith.mulf %208, %919 : vector<5x5xf32>
    %921 = arith.addf %917, %920 : vector<5x5xf32>
    %c4_431 = arith.constant 4 : index
    %c34_432 = arith.constant 34 : index
    %922 = memref.load %arg3[%c4_431, %c34_432] : memref<8x36xf32, #tpu.memory_space<smem>>
    %923 = vector.broadcast %922 : f32 to vector<5x5xf32>
    %924 = arith.mulf %209, %923 : vector<5x5xf32>
    %925 = arith.addf %921, %924 : vector<5x5xf32>
    %c4_433 = arith.constant 4 : index
    %c35_434 = arith.constant 35 : index
    %926 = memref.load %arg3[%c4_433, %c35_434] : memref<8x36xf32, #tpu.memory_space<smem>>
    %927 = vector.broadcast %926 : f32 to vector<5x5xf32>
    %928 = arith.mulf %210, %927 : vector<5x5xf32>
    %929 = arith.addf %925, %928 : vector<5x5xf32>
    %c20_435 = arith.constant 20 : index
    %c0_436 = arith.constant 0 : index
    %930 = vector.load %arg16[%c20_435, %c0_436] : memref<40x5xf32, #tpu.memory_space<vmem>>, vector<5x5xf32>
    tpu.vector_store %arg16[%c20_435, %c0_436], %929 {strides = array<i32>} : memref<40x5xf32, #tpu.memory_space<vmem>>, vector<5x5xf32>,
    %c5_437 = arith.constant 5 : index
    %c0_438 = arith.constant 0 : index
    %931 = memref.load %arg3[%c5_437, %c0_438] : memref<8x36xf32, #tpu.memory_space<smem>>
    %932 = vector.broadcast %931 : f32 to vector<5x5xf32>
    %933 = arith.mulf %175, %932 : vector<5x5xf32>
    %c5_439 = arith.constant 5 : index
    %c1_440 = arith.constant 1 : index
    %934 = memref.load %arg3[%c5_439, %c1_440] : memref<8x36xf32, #tpu.memory_space<smem>>
    %935 = vector.broadcast %934 : f32 to vector<5x5xf32>
    %936 = arith.mulf %176, %935 : vector<5x5xf32>
    %937 = arith.addf %933, %936 : vector<5x5xf32>
    %c5_441 = arith.constant 5 : index
    %c2_442 = arith.constant 2 : index
    %938 = memref.load %arg3[%c5_441, %c2_442] : memref<8x36xf32, #tpu.memory_space<smem>>
    %939 = vector.broadcast %938 : f32 to vector<5x5xf32>
    %940 = arith.mulf %177, %939 : vector<5x5xf32>
    %941 = arith.addf %937, %940 : vector<5x5xf32>
    %c5_443 = arith.constant 5 : index
    %c3_444 = arith.constant 3 : index
    %942 = memref.load %arg3[%c5_443, %c3_444] : memref<8x36xf32, #tpu.memory_space<smem>>
    %943 = vector.broadcast %942 : f32 to vector<5x5xf32>
    %944 = arith.mulf %178, %943 : vector<5x5xf32>
    %945 = arith.addf %941, %944 : vector<5x5xf32>
    %c5_445 = arith.constant 5 : index
    %c4_446 = arith.constant 4 : index
    %946 = memref.load %arg3[%c5_445, %c4_446] : memref<8x36xf32, #tpu.memory_space<smem>>
    %947 = vector.broadcast %946 : f32 to vector<5x5xf32>
    %948 = arith.mulf %179, %947 : vector<5x5xf32>
    %949 = arith.addf %945, %948 : vector<5x5xf32>
    %c5_447 = arith.constant 5 : index
    %c5_448 = arith.constant 5 : index
    %950 = memref.load %arg3[%c5_447, %c5_448] : memref<8x36xf32, #tpu.memory_space<smem>>
    %951 = vector.broadcast %950 : f32 to vector<5x5xf32>
    %952 = arith.mulf %180, %951 : vector<5x5xf32>
    %953 = arith.addf %949, %952 : vector<5x5xf32>
    %c5_449 = arith.constant 5 : index
    %c6_450 = arith.constant 6 : index
    %954 = memref.load %arg3[%c5_449, %c6_450] : memref<8x36xf32, #tpu.memory_space<smem>>
    %955 = vector.broadcast %954 : f32 to vector<5x5xf32>
    %956 = arith.mulf %181, %955 : vector<5x5xf32>
    %957 = arith.addf %953, %956 : vector<5x5xf32>
    %c5_451 = arith.constant 5 : index
    %c7_452 = arith.constant 7 : index
    %958 = memref.load %arg3[%c5_451, %c7_452] : memref<8x36xf32, #tpu.memory_space<smem>>
    %959 = vector.broadcast %958 : f32 to vector<5x5xf32>
    %960 = arith.mulf %182, %959 : vector<5x5xf32>
    %961 = arith.addf %957, %960 : vector<5x5xf32>
    %c5_453 = arith.constant 5 : index
    %c8_454 = arith.constant 8 : index
    %962 = memref.load %arg3[%c5_453, %c8_454] : memref<8x36xf32, #tpu.memory_space<smem>>
    %963 = vector.broadcast %962 : f32 to vector<5x5xf32>
    %964 = arith.mulf %183, %963 : vector<5x5xf32>
    %965 = arith.addf %961, %964 : vector<5x5xf32>
    %c5_455 = arith.constant 5 : index
    %c9_456 = arith.constant 9 : index
    %966 = memref.load %arg3[%c5_455, %c9_456] : memref<8x36xf32, #tpu.memory_space<smem>>
    %967 = vector.broadcast %966 : f32 to vector<5x5xf32>
    %968 = arith.mulf %184, %967 : vector<5x5xf32>
    %969 = arith.addf %965, %968 : vector<5x5xf32>
    %c5_457 = arith.constant 5 : index
    %c10_458 = arith.constant 10 : index
    %970 = memref.load %arg3[%c5_457, %c10_458] : memref<8x36xf32, #tpu.memory_space<smem>>
    %971 = vector.broadcast %970 : f32 to vector<5x5xf32>
    %972 = arith.mulf %185, %971 : vector<5x5xf32>
    %973 = arith.addf %969, %972 : vector<5x5xf32>
    %c5_459 = arith.constant 5 : index
    %c11_460 = arith.constant 11 : index
    %974 = memref.load %arg3[%c5_459, %c11_460] : memref<8x36xf32, #tpu.memory_space<smem>>
    %975 = vector.broadcast %974 : f32 to vector<5x5xf32>
    %976 = arith.mulf %186, %975 : vector<5x5xf32>
    %977 = arith.addf %973, %976 : vector<5x5xf32>
    %c5_461 = arith.constant 5 : index
    %c12_462 = arith.constant 12 : index
    %978 = memref.load %arg3[%c5_461, %c12_462] : memref<8x36xf32, #tpu.memory_space<smem>>
    %979 = vector.broadcast %978 : f32 to vector<5x5xf32>
    %980 = arith.mulf %187, %979 : vector<5x5xf32>
    %981 = arith.addf %977, %980 : vector<5x5xf32>
    %c5_463 = arith.constant 5 : index
    %c13_464 = arith.constant 13 : index
    %982 = memref.load %arg3[%c5_463, %c13_464] : memref<8x36xf32, #tpu.memory_space<smem>>
    %983 = vector.broadcast %982 : f32 to vector<5x5xf32>
    %984 = arith.mulf %188, %983 : vector<5x5xf32>
    %985 = arith.addf %981, %984 : vector<5x5xf32>
    %c5_465 = arith.constant 5 : index
    %c14_466 = arith.constant 14 : index
    %986 = memref.load %arg3[%c5_465, %c14_466] : memref<8x36xf32, #tpu.memory_space<smem>>
    %987 = vector.broadcast %986 : f32 to vector<5x5xf32>
    %988 = arith.mulf %189, %987 : vector<5x5xf32>
    %989 = arith.addf %985, %988 : vector<5x5xf32>
    %c5_467 = arith.constant 5 : index
    %c15_468 = arith.constant 15 : index
    %990 = memref.load %arg3[%c5_467, %c15_468] : memref<8x36xf32, #tpu.memory_space<smem>>
    %991 = vector.broadcast %990 : f32 to vector<5x5xf32>
    %992 = arith.mulf %190, %991 : vector<5x5xf32>
    %993 = arith.addf %989, %992 : vector<5x5xf32>
    %c5_469 = arith.constant 5 : index
    %c16_470 = arith.constant 16 : index
    %994 = memref.load %arg3[%c5_469, %c16_470] : memref<8x36xf32, #tpu.memory_space<smem>>
    %995 = vector.broadcast %994 : f32 to vector<5x5xf32>
    %996 = arith.mulf %191, %995 : vector<5x5xf32>
    %997 = arith.addf %993, %996 : vector<5x5xf32>
    %c5_471 = arith.constant 5 : index
    %c17_472 = arith.constant 17 : index
    %998 = memref.load %arg3[%c5_471, %c17_472] : memref<8x36xf32, #tpu.memory_space<smem>>
    %999 = vector.broadcast %998 : f32 to vector<5x5xf32>
    %1000 = arith.mulf %192, %999 : vector<5x5xf32>
    %1001 = arith.addf %997, %1000 : vector<5x5xf32>
    %c5_473 = arith.constant 5 : index
    %c18_474 = arith.constant 18 : index
    %1002 = memref.load %arg3[%c5_473, %c18_474] : memref<8x36xf32, #tpu.memory_space<smem>>
    %1003 = vector.broadcast %1002 : f32 to vector<5x5xf32>
    %1004 = arith.mulf %193, %1003 : vector<5x5xf32>
    %1005 = arith.addf %1001, %1004 : vector<5x5xf32>
    %c5_475 = arith.constant 5 : index
    %c19_476 = arith.constant 19 : index
    %1006 = memref.load %arg3[%c5_475, %c19_476] : memref<8x36xf32, #tpu.memory_space<smem>>
    %1007 = vector.broadcast %1006 : f32 to vector<5x5xf32>
    %1008 = arith.mulf %194, %1007 : vector<5x5xf32>
    %1009 = arith.addf %1005, %1008 : vector<5x5xf32>
    %c5_477 = arith.constant 5 : index
    %c20_478 = arith.constant 20 : index
    %1010 = memref.load %arg3[%c5_477, %c20_478] : memref<8x36xf32, #tpu.memory_space<smem>>
    %1011 = vector.broadcast %1010 : f32 to vector<5x5xf32>
    %1012 = arith.mulf %195, %1011 : vector<5x5xf32>
    %1013 = arith.addf %1009, %1012 : vector<5x5xf32>
    %c5_479 = arith.constant 5 : index
    %c21_480 = arith.constant 21 : index
    %1014 = memref.load %arg3[%c5_479, %c21_480] : memref<8x36xf32, #tpu.memory_space<smem>>
    %1015 = vector.broadcast %1014 : f32 to vector<5x5xf32>
    %1016 = arith.mulf %196, %1015 : vector<5x5xf32>
    %1017 = arith.addf %1013, %1016 : vector<5x5xf32>
    %c5_481 = arith.constant 5 : index
    %c22_482 = arith.constant 22 : index
    %1018 = memref.load %arg3[%c5_481, %c22_482] : memref<8x36xf32, #tpu.memory_space<smem>>
    %1019 = vector.broadcast %1018 : f32 to vector<5x5xf32>
    %1020 = arith.mulf %197, %1019 : vector<5x5xf32>
    %1021 = arith.addf %1017, %1020 : vector<5x5xf32>
    %c5_483 = arith.constant 5 : index
    %c23_484 = arith.constant 23 : index
    %1022 = memref.load %arg3[%c5_483, %c23_484] : memref<8x36xf32, #tpu.memory_space<smem>>
    %1023 = vector.broadcast %1022 : f32 to vector<5x5xf32>
    %1024 = arith.mulf %198, %1023 : vector<5x5xf32>
    %1025 = arith.addf %1021, %1024 : vector<5x5xf32>
    %c5_485 = arith.constant 5 : index
    %c24_486 = arith.constant 24 : index
    %1026 = memref.load %arg3[%c5_485, %c24_486] : memref<8x36xf32, #tpu.memory_space<smem>>
    %1027 = vector.broadcast %1026 : f32 to vector<5x5xf32>
    %1028 = arith.mulf %199, %1027 : vector<5x5xf32>
    %1029 = arith.addf %1025, %1028 : vector<5x5xf32>
    %c5_487 = arith.constant 5 : index
    %c25_488 = arith.constant 25 : index
    %1030 = memref.load %arg3[%c5_487, %c25_488] : memref<8x36xf32, #tpu.memory_space<smem>>
    %1031 = vector.broadcast %1030 : f32 to vector<5x5xf32>
    %1032 = arith.mulf %200, %1031 : vector<5x5xf32>
    %1033 = arith.addf %1029, %1032 : vector<5x5xf32>
    %c5_489 = arith.constant 5 : index
    %c26_490 = arith.constant 26 : index
    %1034 = memref.load %arg3[%c5_489, %c26_490] : memref<8x36xf32, #tpu.memory_space<smem>>
    %1035 = vector.broadcast %1034 : f32 to vector<5x5xf32>
    %1036 = arith.mulf %201, %1035 : vector<5x5xf32>
    %1037 = arith.addf %1033, %1036 : vector<5x5xf32>
    %c5_491 = arith.constant 5 : index
    %c27_492 = arith.constant 27 : index
    %1038 = memref.load %arg3[%c5_491, %c27_492] : memref<8x36xf32, #tpu.memory_space<smem>>
    %1039 = vector.broadcast %1038 : f32 to vector<5x5xf32>
    %1040 = arith.mulf %202, %1039 : vector<5x5xf32>
    %1041 = arith.addf %1037, %1040 : vector<5x5xf32>
    %c5_493 = arith.constant 5 : index
    %c28_494 = arith.constant 28 : index
    %1042 = memref.load %arg3[%c5_493, %c28_494] : memref<8x36xf32, #tpu.memory_space<smem>>
    %1043 = vector.broadcast %1042 : f32 to vector<5x5xf32>
    %1044 = arith.mulf %203, %1043 : vector<5x5xf32>
    %1045 = arith.addf %1041, %1044 : vector<5x5xf32>
    %c5_495 = arith.constant 5 : index
    %c29_496 = arith.constant 29 : index
    %1046 = memref.load %arg3[%c5_495, %c29_496] : memref<8x36xf32, #tpu.memory_space<smem>>
    %1047 = vector.broadcast %1046 : f32 to vector<5x5xf32>
    %1048 = arith.mulf %204, %1047 : vector<5x5xf32>
    %1049 = arith.addf %1045, %1048 : vector<5x5xf32>
    %c5_497 = arith.constant 5 : index
    %c30_498 = arith.constant 30 : index
    %1050 = memref.load %arg3[%c5_497, %c30_498] : memref<8x36xf32, #tpu.memory_space<smem>>
    %1051 = vector.broadcast %1050 : f32 to vector<5x5xf32>
    %1052 = arith.mulf %205, %1051 : vector<5x5xf32>
    %1053 = arith.addf %1049, %1052 : vector<5x5xf32>
    %c5_499 = arith.constant 5 : index
    %c31_500 = arith.constant 31 : index
    %1054 = memref.load %arg3[%c5_499, %c31_500] : memref<8x36xf32, #tpu.memory_space<smem>>
    %1055 = vector.broadcast %1054 : f32 to vector<5x5xf32>
    %1056 = arith.mulf %206, %1055 : vector<5x5xf32>
    %1057 = arith.addf %1053, %1056 : vector<5x5xf32>
    %c5_501 = arith.constant 5 : index
    %c32_502 = arith.constant 32 : index
    %1058 = memref.load %arg3[%c5_501, %c32_502] : memref<8x36xf32, #tpu.memory_space<smem>>
    %1059 = vector.broadcast %1058 : f32 to vector<5x5xf32>
    %1060 = arith.mulf %207, %1059 : vector<5x5xf32>
    %1061 = arith.addf %1057, %1060 : vector<5x5xf32>
    %c5_503 = arith.constant 5 : index
    %c33_504 = arith.constant 33 : index
    %1062 = memref.load %arg3[%c5_503, %c33_504] : memref<8x36xf32, #tpu.memory_space<smem>>
    %1063 = vector.broadcast %1062 : f32 to vector<5x5xf32>
    %1064 = arith.mulf %208, %1063 : vector<5x5xf32>
    %1065 = arith.addf %1061, %1064 : vector<5x5xf32>
    %c5_505 = arith.constant 5 : index
    %c34_506 = arith.constant 34 : index
    %1066 = memref.load %arg3[%c5_505, %c34_506] : memref<8x36xf32, #tpu.memory_space<smem>>
    %1067 = vector.broadcast %1066 : f32 to vector<5x5xf32>
    %1068 = arith.mulf %209, %1067 : vector<5x5xf32>
    %1069 = arith.addf %1065, %1068 : vector<5x5xf32>
    %c5_507 = arith.constant 5 : index
    %c35_508 = arith.constant 35 : index
    %1070 = memref.load %arg3[%c5_507, %c35_508] : memref<8x36xf32, #tpu.memory_space<smem>>
    %1071 = vector.broadcast %1070 : f32 to vector<5x5xf32>
    %1072 = arith.mulf %210, %1071 : vector<5x5xf32>
    %1073 = arith.addf %1069, %1072 : vector<5x5xf32>
    %c25_509 = arith.constant 25 : index
    %c0_510 = arith.constant 0 : index
    %1074 = vector.load %arg16[%c25_509, %c0_510] : memref<40x5xf32, #tpu.memory_space<vmem>>, vector<5x5xf32>
    tpu.vector_store %arg16[%c25_509, %c0_510], %1073 {strides = array<i32>} : memref<40x5xf32, #tpu.memory_space<vmem>>, vector<5x5xf32>,
    %c6_511 = arith.constant 6 : index
    %c0_512 = arith.constant 0 : index
    %1075 = memref.load %arg3[%c6_511, %c0_512] : memref<8x36xf32, #tpu.memory_space<smem>>
    %1076 = vector.broadcast %1075 : f32 to vector<5x5xf32>
    %1077 = arith.mulf %175, %1076 : vector<5x5xf32>
    %c6_513 = arith.constant 6 : index
    %c1_514 = arith.constant 1 : index
    %1078 = memref.load %arg3[%c6_513, %c1_514] : memref<8x36xf32, #tpu.memory_space<smem>>
    %1079 = vector.broadcast %1078 : f32 to vector<5x5xf32>
    %1080 = arith.mulf %176, %1079 : vector<5x5xf32>
    %1081 = arith.addf %1077, %1080 : vector<5x5xf32>
    %c6_515 = arith.constant 6 : index
    %c2_516 = arith.constant 2 : index
    %1082 = memref.load %arg3[%c6_515, %c2_516] : memref<8x36xf32, #tpu.memory_space<smem>>
    %1083 = vector.broadcast %1082 : f32 to vector<5x5xf32>
    %1084 = arith.mulf %177, %1083 : vector<5x5xf32>
    %1085 = arith.addf %1081, %1084 : vector<5x5xf32>
    %c6_517 = arith.constant 6 : index
    %c3_518 = arith.constant 3 : index
    %1086 = memref.load %arg3[%c6_517, %c3_518] : memref<8x36xf32, #tpu.memory_space<smem>>
    %1087 = vector.broadcast %1086 : f32 to vector<5x5xf32>
    %1088 = arith.mulf %178, %1087 : vector<5x5xf32>
    %1089 = arith.addf %1085, %1088 : vector<5x5xf32>
    %c6_519 = arith.constant 6 : index
    %c4_520 = arith.constant 4 : index
    %1090 = memref.load %arg3[%c6_519, %c4_520] : memref<8x36xf32, #tpu.memory_space<smem>>
    %1091 = vector.broadcast %1090 : f32 to vector<5x5xf32>
    %1092 = arith.mulf %179, %1091 : vector<5x5xf32>
    %1093 = arith.addf %1089, %1092 : vector<5x5xf32>
    %c6_521 = arith.constant 6 : index
    %c5_522 = arith.constant 5 : index
    %1094 = memref.load %arg3[%c6_521, %c5_522] : memref<8x36xf32, #tpu.memory_space<smem>>
    %1095 = vector.broadcast %1094 : f32 to vector<5x5xf32>
    %1096 = arith.mulf %180, %1095 : vector<5x5xf32>
    %1097 = arith.addf %1093, %1096 : vector<5x5xf32>
    %c6_523 = arith.constant 6 : index
    %c6_524 = arith.constant 6 : index
    %1098 = memref.load %arg3[%c6_523, %c6_524] : memref<8x36xf32, #tpu.memory_space<smem>>
    %1099 = vector.broadcast %1098 : f32 to vector<5x5xf32>
    %1100 = arith.mulf %181, %1099 : vector<5x5xf32>
    %1101 = arith.addf %1097, %1100 : vector<5x5xf32>
    %c6_525 = arith.constant 6 : index
    %c7_526 = arith.constant 7 : index
    %1102 = memref.load %arg3[%c6_525, %c7_526] : memref<8x36xf32, #tpu.memory_space<smem>>
    %1103 = vector.broadcast %1102 : f32 to vector<5x5xf32>
    %1104 = arith.mulf %182, %1103 : vector<5x5xf32>
    %1105 = arith.addf %1101, %1104 : vector<5x5xf32>
    %c6_527 = arith.constant 6 : index
    %c8_528 = arith.constant 8 : index
    %1106 = memref.load %arg3[%c6_527, %c8_528] : memref<8x36xf32, #tpu.memory_space<smem>>
    %1107 = vector.broadcast %1106 : f32 to vector<5x5xf32>
    %1108 = arith.mulf %183, %1107 : vector<5x5xf32>
    %1109 = arith.addf %1105, %1108 : vector<5x5xf32>
    %c6_529 = arith.constant 6 : index
    %c9_530 = arith.constant 9 : index
    %1110 = memref.load %arg3[%c6_529, %c9_530] : memref<8x36xf32, #tpu.memory_space<smem>>
    %1111 = vector.broadcast %1110 : f32 to vector<5x5xf32>
    %1112 = arith.mulf %184, %1111 : vector<5x5xf32>
    %1113 = arith.addf %1109, %1112 : vector<5x5xf32>
    %c6_531 = arith.constant 6 : index
    %c10_532 = arith.constant 10 : index
    %1114 = memref.load %arg3[%c6_531, %c10_532] : memref<8x36xf32, #tpu.memory_space<smem>>
    %1115 = vector.broadcast %1114 : f32 to vector<5x5xf32>
    %1116 = arith.mulf %185, %1115 : vector<5x5xf32>
    %1117 = arith.addf %1113, %1116 : vector<5x5xf32>
    %c6_533 = arith.constant 6 : index
    %c11_534 = arith.constant 11 : index
    %1118 = memref.load %arg3[%c6_533, %c11_534] : memref<8x36xf32, #tpu.memory_space<smem>>
    %1119 = vector.broadcast %1118 : f32 to vector<5x5xf32>
    %1120 = arith.mulf %186, %1119 : vector<5x5xf32>
    %1121 = arith.addf %1117, %1120 : vector<5x5xf32>
    %c6_535 = arith.constant 6 : index
    %c12_536 = arith.constant 12 : index
    %1122 = memref.load %arg3[%c6_535, %c12_536] : memref<8x36xf32, #tpu.memory_space<smem>>
    %1123 = vector.broadcast %1122 : f32 to vector<5x5xf32>
    %1124 = arith.mulf %187, %1123 : vector<5x5xf32>
    %1125 = arith.addf %1121, %1124 : vector<5x5xf32>
    %c6_537 = arith.constant 6 : index
    %c13_538 = arith.constant 13 : index
    %1126 = memref.load %arg3[%c6_537, %c13_538] : memref<8x36xf32, #tpu.memory_space<smem>>
    %1127 = vector.broadcast %1126 : f32 to vector<5x5xf32>
    %1128 = arith.mulf %188, %1127 : vector<5x5xf32>
    %1129 = arith.addf %1125, %1128 : vector<5x5xf32>
    %c6_539 = arith.constant 6 : index
    %c14_540 = arith.constant 14 : index
    %1130 = memref.load %arg3[%c6_539, %c14_540] : memref<8x36xf32, #tpu.memory_space<smem>>
    %1131 = vector.broadcast %1130 : f32 to vector<5x5xf32>
    %1132 = arith.mulf %189, %1131 : vector<5x5xf32>
    %1133 = arith.addf %1129, %1132 : vector<5x5xf32>
    %c6_541 = arith.constant 6 : index
    %c15_542 = arith.constant 15 : index
    %1134 = memref.load %arg3[%c6_541, %c15_542] : memref<8x36xf32, #tpu.memory_space<smem>>
    %1135 = vector.broadcast %1134 : f32 to vector<5x5xf32>
    %1136 = arith.mulf %190, %1135 : vector<5x5xf32>
    %1137 = arith.addf %1133, %1136 : vector<5x5xf32>
    %c6_543 = arith.constant 6 : index
    %c16_544 = arith.constant 16 : index
    %1138 = memref.load %arg3[%c6_543, %c16_544] : memref<8x36xf32, #tpu.memory_space<smem>>
    %1139 = vector.broadcast %1138 : f32 to vector<5x5xf32>
    %1140 = arith.mulf %191, %1139 : vector<5x5xf32>
    %1141 = arith.addf %1137, %1140 : vector<5x5xf32>
    %c6_545 = arith.constant 6 : index
    %c17_546 = arith.constant 17 : index
    %1142 = memref.load %arg3[%c6_545, %c17_546] : memref<8x36xf32, #tpu.memory_space<smem>>
    %1143 = vector.broadcast %1142 : f32 to vector<5x5xf32>
    %1144 = arith.mulf %192, %1143 : vector<5x5xf32>
    %1145 = arith.addf %1141, %1144 : vector<5x5xf32>
    %c6_547 = arith.constant 6 : index
    %c18_548 = arith.constant 18 : index
    %1146 = memref.load %arg3[%c6_547, %c18_548] : memref<8x36xf32, #tpu.memory_space<smem>>
    %1147 = vector.broadcast %1146 : f32 to vector<5x5xf32>
    %1148 = arith.mulf %193, %1147 : vector<5x5xf32>
    %1149 = arith.addf %1145, %1148 : vector<5x5xf32>
    %c6_549 = arith.constant 6 : index
    %c19_550 = arith.constant 19 : index
    %1150 = memref.load %arg3[%c6_549, %c19_550] : memref<8x36xf32, #tpu.memory_space<smem>>
    %1151 = vector.broadcast %1150 : f32 to vector<5x5xf32>
    %1152 = arith.mulf %194, %1151 : vector<5x5xf32>
    %1153 = arith.addf %1149, %1152 : vector<5x5xf32>
    %c6_551 = arith.constant 6 : index
    %c20_552 = arith.constant 20 : index
    %1154 = memref.load %arg3[%c6_551, %c20_552] : memref<8x36xf32, #tpu.memory_space<smem>>
    %1155 = vector.broadcast %1154 : f32 to vector<5x5xf32>
    %1156 = arith.mulf %195, %1155 : vector<5x5xf32>
    %1157 = arith.addf %1153, %1156 : vector<5x5xf32>
    %c6_553 = arith.constant 6 : index
    %c21_554 = arith.constant 21 : index
    %1158 = memref.load %arg3[%c6_553, %c21_554] : memref<8x36xf32, #tpu.memory_space<smem>>
    %1159 = vector.broadcast %1158 : f32 to vector<5x5xf32>
    %1160 = arith.mulf %196, %1159 : vector<5x5xf32>
    %1161 = arith.addf %1157, %1160 : vector<5x5xf32>
    %c6_555 = arith.constant 6 : index
    %c22_556 = arith.constant 22 : index
    %1162 = memref.load %arg3[%c6_555, %c22_556] : memref<8x36xf32, #tpu.memory_space<smem>>
    %1163 = vector.broadcast %1162 : f32 to vector<5x5xf32>
    %1164 = arith.mulf %197, %1163 : vector<5x5xf32>
    %1165 = arith.addf %1161, %1164 : vector<5x5xf32>
    %c6_557 = arith.constant 6 : index
    %c23_558 = arith.constant 23 : index
    %1166 = memref.load %arg3[%c6_557, %c23_558] : memref<8x36xf32, #tpu.memory_space<smem>>
    %1167 = vector.broadcast %1166 : f32 to vector<5x5xf32>
    %1168 = arith.mulf %198, %1167 : vector<5x5xf32>
    %1169 = arith.addf %1165, %1168 : vector<5x5xf32>
    %c6_559 = arith.constant 6 : index
    %c24_560 = arith.constant 24 : index
    %1170 = memref.load %arg3[%c6_559, %c24_560] : memref<8x36xf32, #tpu.memory_space<smem>>
    %1171 = vector.broadcast %1170 : f32 to vector<5x5xf32>
    %1172 = arith.mulf %199, %1171 : vector<5x5xf32>
    %1173 = arith.addf %1169, %1172 : vector<5x5xf32>
    %c6_561 = arith.constant 6 : index
    %c25_562 = arith.constant 25 : index
    %1174 = memref.load %arg3[%c6_561, %c25_562] : memref<8x36xf32, #tpu.memory_space<smem>>
    %1175 = vector.broadcast %1174 : f32 to vector<5x5xf32>
    %1176 = arith.mulf %200, %1175 : vector<5x5xf32>
    %1177 = arith.addf %1173, %1176 : vector<5x5xf32>
    %c6_563 = arith.constant 6 : index
    %c26_564 = arith.constant 26 : index
    %1178 = memref.load %arg3[%c6_563, %c26_564] : memref<8x36xf32, #tpu.memory_space<smem>>
    %1179 = vector.broadcast %1178 : f32 to vector<5x5xf32>
    %1180 = arith.mulf %201, %1179 : vector<5x5xf32>
    %1181 = arith.addf %1177, %1180 : vector<5x5xf32>
    %c6_565 = arith.constant 6 : index
    %c27_566 = arith.constant 27 : index
    %1182 = memref.load %arg3[%c6_565, %c27_566] : memref<8x36xf32, #tpu.memory_space<smem>>
    %1183 = vector.broadcast %1182 : f32 to vector<5x5xf32>
    %1184 = arith.mulf %202, %1183 : vector<5x5xf32>
    %1185 = arith.addf %1181, %1184 : vector<5x5xf32>
    %c6_567 = arith.constant 6 : index
    %c28_568 = arith.constant 28 : index
    %1186 = memref.load %arg3[%c6_567, %c28_568] : memref<8x36xf32, #tpu.memory_space<smem>>
    %1187 = vector.broadcast %1186 : f32 to vector<5x5xf32>
    %1188 = arith.mulf %203, %1187 : vector<5x5xf32>
    %1189 = arith.addf %1185, %1188 : vector<5x5xf32>
    %c6_569 = arith.constant 6 : index
    %c29_570 = arith.constant 29 : index
    %1190 = memref.load %arg3[%c6_569, %c29_570] : memref<8x36xf32, #tpu.memory_space<smem>>
    %1191 = vector.broadcast %1190 : f32 to vector<5x5xf32>
    %1192 = arith.mulf %204, %1191 : vector<5x5xf32>
    %1193 = arith.addf %1189, %1192 : vector<5x5xf32>
    %c6_571 = arith.constant 6 : index
    %c30_572 = arith.constant 30 : index
    %1194 = memref.load %arg3[%c6_571, %c30_572] : memref<8x36xf32, #tpu.memory_space<smem>>
    %1195 = vector.broadcast %1194 : f32 to vector<5x5xf32>
    %1196 = arith.mulf %205, %1195 : vector<5x5xf32>
    %1197 = arith.addf %1193, %1196 : vector<5x5xf32>
    %c6_573 = arith.constant 6 : index
    %c31_574 = arith.constant 31 : index
    %1198 = memref.load %arg3[%c6_573, %c31_574] : memref<8x36xf32, #tpu.memory_space<smem>>
    %1199 = vector.broadcast %1198 : f32 to vector<5x5xf32>
    %1200 = arith.mulf %206, %1199 : vector<5x5xf32>
    %1201 = arith.addf %1197, %1200 : vector<5x5xf32>
    %c6_575 = arith.constant 6 : index
    %c32_576 = arith.constant 32 : index
    %1202 = memref.load %arg3[%c6_575, %c32_576] : memref<8x36xf32, #tpu.memory_space<smem>>
    %1203 = vector.broadcast %1202 : f32 to vector<5x5xf32>
    %1204 = arith.mulf %207, %1203 : vector<5x5xf32>
    %1205 = arith.addf %1201, %1204 : vector<5x5xf32>
    %c6_577 = arith.constant 6 : index
    %c33_578 = arith.constant 33 : index
    %1206 = memref.load %arg3[%c6_577, %c33_578] : memref<8x36xf32, #tpu.memory_space<smem>>
    %1207 = vector.broadcast %1206 : f32 to vector<5x5xf32>
    %1208 = arith.mulf %208, %1207 : vector<5x5xf32>
    %1209 = arith.addf %1205, %1208 : vector<5x5xf32>
    %c6_579 = arith.constant 6 : index
    %c34_580 = arith.constant 34 : index
    %1210 = memref.load %arg3[%c6_579, %c34_580] : memref<8x36xf32, #tpu.memory_space<smem>>
    %1211 = vector.broadcast %1210 : f32 to vector<5x5xf32>
    %1212 = arith.mulf %209, %1211 : vector<5x5xf32>
    %1213 = arith.addf %1209, %1212 : vector<5x5xf32>
    %c6_581 = arith.constant 6 : index
    %c35_582 = arith.constant 35 : index
    %1214 = memref.load %arg3[%c6_581, %c35_582] : memref<8x36xf32, #tpu.memory_space<smem>>
    %1215 = vector.broadcast %1214 : f32 to vector<5x5xf32>
    %1216 = arith.mulf %210, %1215 : vector<5x5xf32>
    %1217 = arith.addf %1213, %1216 : vector<5x5xf32>
    %c30_583 = arith.constant 30 : index
    %c0_584 = arith.constant 0 : index
    %1218 = vector.load %arg16[%c30_583, %c0_584] : memref<40x5xf32, #tpu.memory_space<vmem>>, vector<5x5xf32>
    tpu.vector_store %arg16[%c30_583, %c0_584], %1217 {strides = array<i32>} : memref<40x5xf32, #tpu.memory_space<vmem>>, vector<5x5xf32>,
    %c7_585 = arith.constant 7 : index
    %c0_586 = arith.constant 0 : index
    %1219 = memref.load %arg3[%c7_585, %c0_586] : memref<8x36xf32, #tpu.memory_space<smem>>
    %1220 = vector.broadcast %1219 : f32 to vector<5x5xf32>
    %1221 = arith.mulf %175, %1220 : vector<5x5xf32>
    %c7_587 = arith.constant 7 : index
    %c1_588 = arith.constant 1 : index
    %1222 = memref.load %arg3[%c7_587, %c1_588] : memref<8x36xf32, #tpu.memory_space<smem>>
    %1223 = vector.broadcast %1222 : f32 to vector<5x5xf32>
    %1224 = arith.mulf %176, %1223 : vector<5x5xf32>
    %1225 = arith.addf %1221, %1224 : vector<5x5xf32>
    %c7_589 = arith.constant 7 : index
    %c2_590 = arith.constant 2 : index
    %1226 = memref.load %arg3[%c7_589, %c2_590] : memref<8x36xf32, #tpu.memory_space<smem>>
    %1227 = vector.broadcast %1226 : f32 to vector<5x5xf32>
    %1228 = arith.mulf %177, %1227 : vector<5x5xf32>
    %1229 = arith.addf %1225, %1228 : vector<5x5xf32>
    %c7_591 = arith.constant 7 : index
    %c3_592 = arith.constant 3 : index
    %1230 = memref.load %arg3[%c7_591, %c3_592] : memref<8x36xf32, #tpu.memory_space<smem>>
    %1231 = vector.broadcast %1230 : f32 to vector<5x5xf32>
    %1232 = arith.mulf %178, %1231 : vector<5x5xf32>
    %1233 = arith.addf %1229, %1232 : vector<5x5xf32>
    %c7_593 = arith.constant 7 : index
    %c4_594 = arith.constant 4 : index
    %1234 = memref.load %arg3[%c7_593, %c4_594] : memref<8x36xf32, #tpu.memory_space<smem>>
    %1235 = vector.broadcast %1234 : f32 to vector<5x5xf32>
    %1236 = arith.mulf %179, %1235 : vector<5x5xf32>
    %1237 = arith.addf %1233, %1236 : vector<5x5xf32>
    %c7_595 = arith.constant 7 : index
    %c5_596 = arith.constant 5 : index
    %1238 = memref.load %arg3[%c7_595, %c5_596] : memref<8x36xf32, #tpu.memory_space<smem>>
    %1239 = vector.broadcast %1238 : f32 to vector<5x5xf32>
    %1240 = arith.mulf %180, %1239 : vector<5x5xf32>
    %1241 = arith.addf %1237, %1240 : vector<5x5xf32>
    %c7_597 = arith.constant 7 : index
    %c6_598 = arith.constant 6 : index
    %1242 = memref.load %arg3[%c7_597, %c6_598] : memref<8x36xf32, #tpu.memory_space<smem>>
    %1243 = vector.broadcast %1242 : f32 to vector<5x5xf32>
    %1244 = arith.mulf %181, %1243 : vector<5x5xf32>
    %1245 = arith.addf %1241, %1244 : vector<5x5xf32>
    %c7_599 = arith.constant 7 : index
    %c7_600 = arith.constant 7 : index
    %1246 = memref.load %arg3[%c7_599, %c7_600] : memref<8x36xf32, #tpu.memory_space<smem>>
    %1247 = vector.broadcast %1246 : f32 to vector<5x5xf32>
    %1248 = arith.mulf %182, %1247 : vector<5x5xf32>
    %1249 = arith.addf %1245, %1248 : vector<5x5xf32>
    %c7_601 = arith.constant 7 : index
    %c8_602 = arith.constant 8 : index
    %1250 = memref.load %arg3[%c7_601, %c8_602] : memref<8x36xf32, #tpu.memory_space<smem>>
    %1251 = vector.broadcast %1250 : f32 to vector<5x5xf32>
    %1252 = arith.mulf %183, %1251 : vector<5x5xf32>
    %1253 = arith.addf %1249, %1252 : vector<5x5xf32>
    %c7_603 = arith.constant 7 : index
    %c9_604 = arith.constant 9 : index
    %1254 = memref.load %arg3[%c7_603, %c9_604] : memref<8x36xf32, #tpu.memory_space<smem>>
    %1255 = vector.broadcast %1254 : f32 to vector<5x5xf32>
    %1256 = arith.mulf %184, %1255 : vector<5x5xf32>
    %1257 = arith.addf %1253, %1256 : vector<5x5xf32>
    %c7_605 = arith.constant 7 : index
    %c10_606 = arith.constant 10 : index
    %1258 = memref.load %arg3[%c7_605, %c10_606] : memref<8x36xf32, #tpu.memory_space<smem>>
    %1259 = vector.broadcast %1258 : f32 to vector<5x5xf32>
    %1260 = arith.mulf %185, %1259 : vector<5x5xf32>
    %1261 = arith.addf %1257, %1260 : vector<5x5xf32>
    %c7_607 = arith.constant 7 : index
    %c11_608 = arith.constant 11 : index
    %1262 = memref.load %arg3[%c7_607, %c11_608] : memref<8x36xf32, #tpu.memory_space<smem>>
    %1263 = vector.broadcast %1262 : f32 to vector<5x5xf32>
    %1264 = arith.mulf %186, %1263 : vector<5x5xf32>
    %1265 = arith.addf %1261, %1264 : vector<5x5xf32>
    %c7_609 = arith.constant 7 : index
    %c12_610 = arith.constant 12 : index
    %1266 = memref.load %arg3[%c7_609, %c12_610] : memref<8x36xf32, #tpu.memory_space<smem>>
    %1267 = vector.broadcast %1266 : f32 to vector<5x5xf32>
    %1268 = arith.mulf %187, %1267 : vector<5x5xf32>
    %1269 = arith.addf %1265, %1268 : vector<5x5xf32>
    %c7_611 = arith.constant 7 : index
    %c13_612 = arith.constant 13 : index
    %1270 = memref.load %arg3[%c7_611, %c13_612] : memref<8x36xf32, #tpu.memory_space<smem>>
    %1271 = vector.broadcast %1270 : f32 to vector<5x5xf32>
    %1272 = arith.mulf %188, %1271 : vector<5x5xf32>
    %1273 = arith.addf %1269, %1272 : vector<5x5xf32>
    %c7_613 = arith.constant 7 : index
    %c14_614 = arith.constant 14 : index
    %1274 = memref.load %arg3[%c7_613, %c14_614] : memref<8x36xf32, #tpu.memory_space<smem>>
    %1275 = vector.broadcast %1274 : f32 to vector<5x5xf32>
    %1276 = arith.mulf %189, %1275 : vector<5x5xf32>
    %1277 = arith.addf %1273, %1276 : vector<5x5xf32>
    %c7_615 = arith.constant 7 : index
    %c15_616 = arith.constant 15 : index
    %1278 = memref.load %arg3[%c7_615, %c15_616] : memref<8x36xf32, #tpu.memory_space<smem>>
    %1279 = vector.broadcast %1278 : f32 to vector<5x5xf32>
    %1280 = arith.mulf %190, %1279 : vector<5x5xf32>
    %1281 = arith.addf %1277, %1280 : vector<5x5xf32>
    %c7_617 = arith.constant 7 : index
    %c16_618 = arith.constant 16 : index
    %1282 = memref.load %arg3[%c7_617, %c16_618] : memref<8x36xf32, #tpu.memory_space<smem>>
    %1283 = vector.broadcast %1282 : f32 to vector<5x5xf32>
    %1284 = arith.mulf %191, %1283 : vector<5x5xf32>
    %1285 = arith.addf %1281, %1284 : vector<5x5xf32>
    %c7_619 = arith.constant 7 : index
    %c17_620 = arith.constant 17 : index
    %1286 = memref.load %arg3[%c7_619, %c17_620] : memref<8x36xf32, #tpu.memory_space<smem>>
    %1287 = vector.broadcast %1286 : f32 to vector<5x5xf32>
    %1288 = arith.mulf %192, %1287 : vector<5x5xf32>
    %1289 = arith.addf %1285, %1288 : vector<5x5xf32>
    %c7_621 = arith.constant 7 : index
    %c18_622 = arith.constant 18 : index
    %1290 = memref.load %arg3[%c7_621, %c18_622] : memref<8x36xf32, #tpu.memory_space<smem>>
    %1291 = vector.broadcast %1290 : f32 to vector<5x5xf32>
    %1292 = arith.mulf %193, %1291 : vector<5x5xf32>
    %1293 = arith.addf %1289, %1292 : vector<5x5xf32>
    %c7_623 = arith.constant 7 : index
    %c19_624 = arith.constant 19 : index
    %1294 = memref.load %arg3[%c7_623, %c19_624] : memref<8x36xf32, #tpu.memory_space<smem>>
    %1295 = vector.broadcast %1294 : f32 to vector<5x5xf32>
    %1296 = arith.mulf %194, %1295 : vector<5x5xf32>
    %1297 = arith.addf %1293, %1296 : vector<5x5xf32>
    %c7_625 = arith.constant 7 : index
    %c20_626 = arith.constant 20 : index
    %1298 = memref.load %arg3[%c7_625, %c20_626] : memref<8x36xf32, #tpu.memory_space<smem>>
    %1299 = vector.broadcast %1298 : f32 to vector<5x5xf32>
    %1300 = arith.mulf %195, %1299 : vector<5x5xf32>
    %1301 = arith.addf %1297, %1300 : vector<5x5xf32>
    %c7_627 = arith.constant 7 : index
    %c21_628 = arith.constant 21 : index
    %1302 = memref.load %arg3[%c7_627, %c21_628] : memref<8x36xf32, #tpu.memory_space<smem>>
    %1303 = vector.broadcast %1302 : f32 to vector<5x5xf32>
    %1304 = arith.mulf %196, %1303 : vector<5x5xf32>
    %1305 = arith.addf %1301, %1304 : vector<5x5xf32>
    %c7_629 = arith.constant 7 : index
    %c22_630 = arith.constant 22 : index
    %1306 = memref.load %arg3[%c7_629, %c22_630] : memref<8x36xf32, #tpu.memory_space<smem>>
    %1307 = vector.broadcast %1306 : f32 to vector<5x5xf32>
    %1308 = arith.mulf %197, %1307 : vector<5x5xf32>
    %1309 = arith.addf %1305, %1308 : vector<5x5xf32>
    %c7_631 = arith.constant 7 : index
    %c23_632 = arith.constant 23 : index
    %1310 = memref.load %arg3[%c7_631, %c23_632] : memref<8x36xf32, #tpu.memory_space<smem>>
    %1311 = vector.broadcast %1310 : f32 to vector<5x5xf32>
    %1312 = arith.mulf %198, %1311 : vector<5x5xf32>
    %1313 = arith.addf %1309, %1312 : vector<5x5xf32>
    %c7_633 = arith.constant 7 : index
    %c24_634 = arith.constant 24 : index
    %1314 = memref.load %arg3[%c7_633, %c24_634] : memref<8x36xf32, #tpu.memory_space<smem>>
    %1315 = vector.broadcast %1314 : f32 to vector<5x5xf32>
    %1316 = arith.mulf %199, %1315 : vector<5x5xf32>
    %1317 = arith.addf %1313, %1316 : vector<5x5xf32>
    %c7_635 = arith.constant 7 : index
    %c25_636 = arith.constant 25 : index
    %1318 = memref.load %arg3[%c7_635, %c25_636] : memref<8x36xf32, #tpu.memory_space<smem>>
    %1319 = vector.broadcast %1318 : f32 to vector<5x5xf32>
    %1320 = arith.mulf %200, %1319 : vector<5x5xf32>
    %1321 = arith.addf %1317, %1320 : vector<5x5xf32>
    %c7_637 = arith.constant 7 : index
    %c26_638 = arith.constant 26 : index
    %1322 = memref.load %arg3[%c7_637, %c26_638] : memref<8x36xf32, #tpu.memory_space<smem>>
    %1323 = vector.broadcast %1322 : f32 to vector<5x5xf32>
    %1324 = arith.mulf %201, %1323 : vector<5x5xf32>
    %1325 = arith.addf %1321, %1324 : vector<5x5xf32>
    %c7_639 = arith.constant 7 : index
    %c27_640 = arith.constant 27 : index
    %1326 = memref.load %arg3[%c7_639, %c27_640] : memref<8x36xf32, #tpu.memory_space<smem>>
    %1327 = vector.broadcast %1326 : f32 to vector<5x5xf32>
    %1328 = arith.mulf %202, %1327 : vector<5x5xf32>
    %1329 = arith.addf %1325, %1328 : vector<5x5xf32>
    %c7_641 = arith.constant 7 : index
    %c28_642 = arith.constant 28 : index
    %1330 = memref.load %arg3[%c7_641, %c28_642] : memref<8x36xf32, #tpu.memory_space<smem>>
    %1331 = vector.broadcast %1330 : f32 to vector<5x5xf32>
    %1332 = arith.mulf %203, %1331 : vector<5x5xf32>
    %1333 = arith.addf %1329, %1332 : vector<5x5xf32>
    %c7_643 = arith.constant 7 : index
    %c29_644 = arith.constant 29 : index
    %1334 = memref.load %arg3[%c7_643, %c29_644] : memref<8x36xf32, #tpu.memory_space<smem>>
    %1335 = vector.broadcast %1334 : f32 to vector<5x5xf32>
    %1336 = arith.mulf %204, %1335 : vector<5x5xf32>
    %1337 = arith.addf %1333, %1336 : vector<5x5xf32>
    %c7_645 = arith.constant 7 : index
    %c30_646 = arith.constant 30 : index
    %1338 = memref.load %arg3[%c7_645, %c30_646] : memref<8x36xf32, #tpu.memory_space<smem>>
    %1339 = vector.broadcast %1338 : f32 to vector<5x5xf32>
    %1340 = arith.mulf %205, %1339 : vector<5x5xf32>
    %1341 = arith.addf %1337, %1340 : vector<5x5xf32>
    %c7_647 = arith.constant 7 : index
    %c31_648 = arith.constant 31 : index
    %1342 = memref.load %arg3[%c7_647, %c31_648] : memref<8x36xf32, #tpu.memory_space<smem>>
    %1343 = vector.broadcast %1342 : f32 to vector<5x5xf32>
    %1344 = arith.mulf %206, %1343 : vector<5x5xf32>
    %1345 = arith.addf %1341, %1344 : vector<5x5xf32>
    %c7_649 = arith.constant 7 : index
    %c32_650 = arith.constant 32 : index
    %1346 = memref.load %arg3[%c7_649, %c32_650] : memref<8x36xf32, #tpu.memory_space<smem>>
    %1347 = vector.broadcast %1346 : f32 to vector<5x5xf32>
    %1348 = arith.mulf %207, %1347 : vector<5x5xf32>
    %1349 = arith.addf %1345, %1348 : vector<5x5xf32>
    %c7_651 = arith.constant 7 : index
    %c33_652 = arith.constant 33 : index
    %1350 = memref.load %arg3[%c7_651, %c33_652] : memref<8x36xf32, #tpu.memory_space<smem>>
    %1351 = vector.broadcast %1350 : f32 to vector<5x5xf32>
    %1352 = arith.mulf %208, %1351 : vector<5x5xf32>
    %1353 = arith.addf %1349, %1352 : vector<5x5xf32>
    %c7_653 = arith.constant 7 : index
    %c34_654 = arith.constant 34 : index
    %1354 = memref.load %arg3[%c7_653, %c34_654] : memref<8x36xf32, #tpu.memory_space<smem>>
    %1355 = vector.broadcast %1354 : f32 to vector<5x5xf32>
    %1356 = arith.mulf %209, %1355 : vector<5x5xf32>
    %1357 = arith.addf %1353, %1356 : vector<5x5xf32>
    %c7_655 = arith.constant 7 : index
    %c35_656 = arith.constant 35 : index
    %1358 = memref.load %arg3[%c7_655, %c35_656] : memref<8x36xf32, #tpu.memory_space<smem>>
    %1359 = vector.broadcast %1358 : f32 to vector<5x5xf32>
    %1360 = arith.mulf %210, %1359 : vector<5x5xf32>
    %1361 = arith.addf %1357, %1360 : vector<5x5xf32>
    %c35_657 = arith.constant 35 : index
    %c0_658 = arith.constant 0 : index
    %1362 = vector.load %arg16[%c35_657, %c0_658] : memref<40x5xf32, #tpu.memory_space<vmem>>, vector<5x5xf32>
    tpu.vector_store %arg16[%c35_657, %c0_658], %1361 {strides = array<i32>} : memref<40x5xf32, #tpu.memory_space<vmem>>, vector<5x5xf32>,
    %c0_659 = arith.constant 0 : index
    %c0_660 = arith.constant 0 : index
    %1363 = vector.load %arg16[%c0_659, %c0_660] : memref<40x5xf32, #tpu.memory_space<vmem>>, vector<40x5xf32>
    %c0_661 = arith.constant 0 : index
    %c0_662 = arith.constant 0 : index
    %c0_663 = arith.constant 0 : index
    %1364 = vector.load %arg7[%c0_661, %c0_662, %c0_663] : memref<2x5x2xf32, #tpu.memory_space<vmem>>, vector<1x5x2xf32>
    %1365 = vector.shape_cast %1364 : vector<1x5x2xf32> to vector<5x2xf32>
    %cst_664 = arith.constant dense<0.000000e+00> : vector<40x2xf32>
    %1366 = tpu.matmul %1363, %1365, %cst_664 {dimension_numbers = #tpu.dot_dimension_numbers<[1], [0], [0], [1], [0, 0, 1, 1], [], []>} : vector<40x5xf32>, vector<5x2xf32>, vector<40x2xf32> -> vector<40x2xf32>
    %c1_665 = arith.constant 1 : index
    %c0_666 = arith.constant 0 : index
    %c0_667 = arith.constant 0 : index
    %1367 = vector.load %arg7[%c1_665, %c0_666, %c0_667] : memref<2x5x2xf32, #tpu.memory_space<vmem>>, vector<1x5x2xf32>
    %1368 = vector.shape_cast %1367 : vector<1x5x2xf32> to vector<5x2xf32>
    %cst_668 = arith.constant dense<0.000000e+00> : vector<40x2xf32>
    %1369 = tpu.matmul %1363, %1368, %cst_668 {dimension_numbers = #tpu.dot_dimension_numbers<[1], [0], [0], [1], [0, 0, 1, 1], [], []>} : vector<40x5xf32>, vector<5x2xf32>, vector<40x2xf32> -> vector<40x2xf32>
    %1370 = arith.maximumf %1366, %1369 : vector<40x2xf32>
    %c0_669 = arith.constant 0 : index
    %c0_670 = arith.constant 0 : index
    %c0_671 = arith.constant 0 : index
    %1371 = vector.load %arg8[%c0_669, %c0_670, %c0_671] : memref<2x16x40xf32, #tpu.memory_space<vmem>>, vector<1x16x40xf32>
    %1372 = vector.shape_cast %1371 : vector<1x16x40xf32> to vector<16x40xf32>
    %cst_672 = arith.constant dense<0.000000e+00> : vector<16x2xf32>
    %1373 = tpu.matmul %1372, %1370, %cst_672 {dimension_numbers = #tpu.dot_dimension_numbers<[1], [0], [0], [1], [0, 0, 1, 1], [], []>} : vector<16x40xf32>, vector<40x2xf32>, vector<16x2xf32> -> vector<16x2xf32>
    %c1_673 = arith.constant 1 : index
    %c0_674 = arith.constant 0 : index
    %c0_675 = arith.constant 0 : index
    %1374 = vector.load %arg8[%c1_673, %c0_674, %c0_675] : memref<2x16x40xf32, #tpu.memory_space<vmem>>, vector<1x16x40xf32>
    %1375 = vector.shape_cast %1374 : vector<1x16x40xf32> to vector<16x40xf32>
    %cst_676 = arith.constant dense<0.000000e+00> : vector<16x2xf32>
    %1376 = tpu.matmul %1375, %1370, %cst_676 {dimension_numbers = #tpu.dot_dimension_numbers<[1], [0], [0], [1], [0, 0, 1, 1], [], []>} : vector<16x40xf32>, vector<40x2xf32>, vector<16x2xf32> -> vector<16x2xf32>
    %1377 = arith.maximumf %1373, %1376 : vector<16x2xf32>
    %c0_677 = arith.constant 0 : index
    %c0_678 = arith.constant 0 : index
    %1378 = vector.load %arg9[%c0_677, %c0_678] : memref<16x1xf32, #tpu.memory_space<vmem>>, vector<16x1xf32>
    %1379 = vector.broadcast %1378 : vector<16x1xf32> to vector<16x2xf32>
    %1380 = arith.addf %1377, %1379 : vector<16x2xf32>
    %cst_679 = arith.constant 0.000000e+00 : f32
    %1381 = vector.broadcast %cst_679 : f32 to vector<16x2xf32>
    %1382 = arith.maximumf %1380, %1381 : vector<16x2xf32>
    %c0_680 = arith.constant 0 : index
    %c0_681 = arith.constant 0 : index
    %c0_682 = arith.constant 0 : index
    %1383 = vector.load %arg10[%c0_680, %c0_681, %c0_682] : memref<2x16x16xf32, #tpu.memory_space<vmem>>, vector<1x16x16xf32>
    %1384 = vector.shape_cast %1383 : vector<1x16x16xf32> to vector<16x16xf32>
    %1385 = vector.extract_strided_slice %1382 {offsets = [0, 0], sizes = [16, 1], strides = [1, 1]} : vector<16x2xf32> to vector<16x1xf32>
    %cst_683 = arith.constant dense<0.000000e+00> : vector<16x1xf32>
    %1386 = tpu.matmul %1384, %1385, %cst_683 {dimension_numbers = #tpu.dot_dimension_numbers<[1], [0], [0], [1], [0, 0, 1, 1], [], []>} : vector<16x16xf32>, vector<16x1xf32>, vector<16x1xf32> -> vector<16x1xf32>
    %c1_684 = arith.constant 1 : index
    %c0_685 = arith.constant 0 : index
    %c0_686 = arith.constant 0 : index
    %1387 = vector.load %arg10[%c1_684, %c0_685, %c0_686] : memref<2x16x16xf32, #tpu.memory_space<vmem>>, vector<1x16x16xf32>
    %1388 = vector.shape_cast %1387 : vector<1x16x16xf32> to vector<16x16xf32>
    %1389 = vector.extract_strided_slice %1382 {offsets = [0, 1], sizes = [16, 1], strides = [1, 1]} : vector<16x2xf32> to vector<16x1xf32>
    %cst_687 = arith.constant dense<0.000000e+00> : vector<16x1xf32>
    %1390 = tpu.matmul %1388, %1389, %cst_687 {dimension_numbers = #tpu.dot_dimension_numbers<[1], [0], [0], [1], [0, 0, 1, 1], [], []>} : vector<16x16xf32>, vector<16x1xf32>, vector<16x1xf32> -> vector<16x1xf32>
    %1391 = arith.addf %1386, %1390 : vector<16x1xf32>
    %c0_688 = arith.constant 0 : index
    %c0_689 = arith.constant 0 : index
    %1392 = vector.load %arg11[%c0_688, %c0_689] : memref<16x1xf32, #tpu.memory_space<vmem>>, vector<16x1xf32>
    %1393 = arith.addf %1391, %1392 : vector<16x1xf32>
    %cst_690 = arith.constant 0.000000e+00 : f32
    %1394 = vector.broadcast %cst_690 : f32 to vector<16x1xf32>
    %1395 = arith.maximumf %1393, %1394 : vector<16x1xf32>
    %c0_691 = arith.constant 0 : index
    %c0_692 = arith.constant 0 : index
    %1396 = vector.load %arg12[%c0_691, %c0_692] : memref<2x16xf32, #tpu.memory_space<vmem>>, vector<2x16xf32>
    %cst_693 = arith.constant dense<0.000000e+00> : vector<2x1xf32>
    %1397 = tpu.matmul %1396, %1395, %cst_693 {dimension_numbers = #tpu.dot_dimension_numbers<[1], [0], [0], [1], [0, 0, 1, 1], [], []>} : vector<2x16xf32>, vector<16x1xf32>, vector<2x1xf32> -> vector<2x1xf32>
    %c0_694 = arith.constant 0 : index
    %c0_695 = arith.constant 0 : index
    %1398 = vector.load %arg13[%c0_694, %c0_695] : memref<2x1xf32, #tpu.memory_space<vmem>>, vector<2x1xf32>
    %1399 = arith.addf %1397, %1398 : vector<2x1xf32>
    %cst_696 = arith.constant 0.000000e+00 : f32
    %1400 = vector.broadcast %cst_696 : f32 to vector<2x1xf32>
    %1401 = arith.maximumf %1399, %1400 : vector<2x1xf32>
    %1402 = vector.extract_strided_slice %1401 {offsets = [0, 0], sizes = [1, 1], strides = [1, 1]} : vector<2x1xf32> to vector<1x1xf32>
    %1403 = vector.extract_strided_slice %1401 {offsets = [1, 0], sizes = [1, 1], strides = [1, 1]} : vector<2x1xf32> to vector<1x1xf32>
    %1404 = arith.maximumf %1402, %1403 : vector<1x1xf32>
    %1405 = arith.subf %1402, %1404 : vector<1x1xf32>
    %1406 = math.exp %1405 : vector<1x1xf32>
    %1407 = arith.subf %1403, %1404 : vector<1x1xf32>
    %1408 = math.exp %1407 : vector<1x1xf32>
    %1409 = arith.addf %1406, %1408 : vector<1x1xf32>
    %cst_697 = arith.constant 1.000000e+00 : f32
    %1410 = vector.broadcast %cst_697 : f32 to vector<1x1xf32>
    %1411 = arith.divf %1410, %1409 : vector<1x1xf32>
    %1412 = arith.mulf %1406, %1411 : vector<1x1xf32>
    %c0_698 = arith.constant 0 : index
    %c0_699 = arith.constant 0 : index
    %c0_700 = arith.constant 0 : index
    %1413 = vector.load %arg14[%c0_698, %c0_699, %c0_700] : memref<1x2x1xf32, #tpu.memory_space<vmem>>, vector<1x1x1xf32>
    %1414 = vector.shape_cast %1413 : vector<1x1x1xf32> to vector<1x1xf32>
    %1415 = vector.shape_cast %1412 : vector<1x1xf32> to vector<1x1x1xf32>
    tpu.vector_store %arg14[%c0_698, %c0_699, %c0_700], %1415 {strides = array<i32>} : memref<1x2x1xf32, #tpu.memory_space<vmem>>, vector<1x1x1xf32>,
    %1416 = arith.mulf %1408, %1411 : vector<1x1xf32>
    %c0_701 = arith.constant 0 : index
    %c1_702 = arith.constant 1 : index
    %c0_703 = arith.constant 0 : index
    %1417 = vector.load %arg14[%c0_701, %c1_702, %c0_703] : memref<1x2x1xf32, #tpu.memory_space<vmem>>, vector<1x1x1xf32>
    %1418 = vector.shape_cast %1417 : vector<1x1x1xf32> to vector<1x1xf32>
    %1419 = vector.shape_cast %1416 : vector<1x1xf32> to vector<1x1x1xf32>
    tpu.vector_store %arg14[%c0_701, %c1_702, %c0_703], %1419 {strides = array<i32>} : memref<1x2x1xf32, #tpu.memory_space<vmem>>, vector<1x1x1xf32>,
    return
  }
  func.func @transform_0(%arg0: i32) -> (i32, i32, i32, i32) {
    %c0_i32 = arith.constant 0 : i32
    %c0_i32_0 = arith.constant 0 : i32
    %c0_i32_1 = arith.constant 0 : i32
    %c0_i32_2 = arith.constant 0 : i32
    return %arg0, %c0_i32, %c0_i32_0, %c0_i32_1 : i32, i32, i32, i32
  }
  func.func @transform_1(%arg0: i32) -> (i32, i32) {
    %c0_i32 = arith.constant 0 : i32
    %c0_i32_0 = arith.constant 0 : i32
    %c0_i32_1 = arith.constant 0 : i32
    return %c0_i32, %c0_i32_0 : i32, i32
  }
  func.func @transform_2(%arg0: i32) -> (i32, i32) {
    %c0_i32 = arith.constant 0 : i32
    %c0_i32_0 = arith.constant 0 : i32
    %c0_i32_1 = arith.constant 0 : i32
    return %c0_i32, %c0_i32_0 : i32, i32
  }
  func.func @transform_3(%arg0: i32) -> (i32, i32, i32) {
    %c0_i32 = arith.constant 0 : i32
    %c0_i32_0 = arith.constant 0 : i32
    %c0_i32_1 = arith.constant 0 : i32
    %c0_i32_2 = arith.constant 0 : i32
    return %c0_i32, %c0_i32_0, %c0_i32_1 : i32, i32, i32
  }
  func.func @transform_4(%arg0: i32) -> (i32, i32, i32) {
    %c0_i32 = arith.constant 0 : i32
    %c0_i32_0 = arith.constant 0 : i32
    %c0_i32_1 = arith.constant 0 : i32
    %c0_i32_2 = arith.constant 0 : i32
    return %c0_i32, %c0_i32_0, %c0_i32_1 : i32, i32, i32
  }
  func.func @transform_5(%arg0: i32) -> (i32, i32) {
    %c0_i32 = arith.constant 0 : i32
    %c0_i32_0 = arith.constant 0 : i32
    %c0_i32_1 = arith.constant 0 : i32
    return %c0_i32, %c0_i32_0 : i32, i32
  }
  func.func @transform_6(%arg0: i32) -> (i32, i32, i32) {
    %c0_i32 = arith.constant 0 : i32
    %c0_i32_0 = arith.constant 0 : i32
    %c0_i32_1 = arith.constant 0 : i32
    %c0_i32_2 = arith.constant 0 : i32
    return %c0_i32, %c0_i32_0, %c0_i32_1 : i32, i32, i32
  }
  func.func @transform_7(%arg0: i32) -> (i32, i32, i32) {
    %c0_i32 = arith.constant 0 : i32
    %c0_i32_0 = arith.constant 0 : i32
    %c0_i32_1 = arith.constant 0 : i32
    %c0_i32_2 = arith.constant 0 : i32
    return %c0_i32, %c0_i32_0, %c0_i32_1 : i32, i32, i32
  }
  func.func @transform_8(%arg0: i32) -> (i32, i32) {
    %c0_i32 = arith.constant 0 : i32
    %c0_i32_0 = arith.constant 0 : i32
    %c0_i32_1 = arith.constant 0 : i32
    return %c0_i32, %c0_i32_0 : i32, i32
  }
  func.func @transform_9(%arg0: i32) -> (i32, i32, i32) {
    %c0_i32 = arith.constant 0 : i32
    %c0_i32_0 = arith.constant 0 : i32
    %c0_i32_1 = arith.constant 0 : i32
    %c0_i32_2 = arith.constant 0 : i32
    return %c0_i32, %c0_i32_0, %c0_i32_1 : i32, i32, i32
  }
  func.func @transform_10(%arg0: i32) -> (i32, i32) {
    %c0_i32 = arith.constant 0 : i32
    %c0_i32_0 = arith.constant 0 : i32
    %c0_i32_1 = arith.constant 0 : i32
    return %c0_i32, %c0_i32_0 : i32, i32
  }
  func.func @transform_11(%arg0: i32) -> (i32, i32) {
    %c0_i32 = arith.constant 0 : i32
    %c0_i32_0 = arith.constant 0 : i32
    %c0_i32_1 = arith.constant 0 : i32
    return %c0_i32, %c0_i32_0 : i32, i32
  }
  func.func @transform_12(%arg0: i32) -> (i32, i32) {
    %c0_i32 = arith.constant 0 : i32
    %c0_i32_0 = arith.constant 0 : i32
    %c0_i32_1 = arith.constant 0 : i32
    return %c0_i32, %c0_i32_0 : i32, i32
  }
  func.func @transform_13(%arg0: i32) -> (i32, i32, i32) {
    %c0_i32 = arith.constant 0 : i32
    %c0_i32_0 = arith.constant 0 : i32
    %c0_i32_1 = arith.constant 0 : i32
    return %arg0, %c0_i32, %c0_i32_0 : i32, i32, i32
  }
}

</mosaic_0001>

<bundles_post_ra>
// kernel: _lambda_.1
= control target key start
LH: loop header
LB: loop body
LE: loop exit
PB: predicated region body
PF: predicated region fallthrough
CT: control target
= control target key end

     0   :  { %s9432_s0 = inlined_call_operand.vmem [shape: f32[2,1,16,16], index: 0, kind: input, shape index: {}]   ;;  %s9433_s1 = inlined_call_operand.vmem [shape: f32[4,9], index: 1, kind: input, shape index: {}]   ;;  %s9434_s2 = inlined_call_operand.vmem [shape: f32[8,36], index: 2, kind: input, shape index: {}]   ;;  %s9435_s3 = inlined_call_operand.vmem [shape: f32[2,14,7], index: 3, kind: input, shape index: {}]   ;;  %s9436_s4 = inlined_call_operand.vmem [shape: f32[2,28,56], index: 4, kind: input, shape index: {}]   ;;  %s9437_s5 = inlined_call_operand.vmem [shape: f32[28,1], index: 5, kind: input, shape index: {}]   ;;  %s9438_s6 = inlined_call_operand.vmem [shape: f32[2,5,2], index: 6, kind: input, shape index: {}]   ;;  %s9439_s7 = inlined_call_operand.vmem [shape: f32[2,16,40], index: 7, kind: input, shape index: {}]   ;;  %s9440_s8 = inlined_call_operand.vmem [shape: f32[16,1], index: 8, kind: input, shape index: {}]   ;;  %s9441_s9 = inlined_call_operand.vmem [shape: f32[2,16,16], index: 9, kind: input, shape index: {}]   ;;  %s9442_s10 = inlined_call_operand.vmem [shape: f32[16,1], index: 10, kind: input, shape index: {}]   ;;  %s9443_s11 = inlined_call_operand.vmem [shape: f32[2,16], index: 11, kind: input, shape index: {}]   ;;  %s9444_s12 = inlined_call_operand.vmem [shape: f32[2,1], index: 12, kind: input, shape index: {}]   ;;  %s9445_s13 = inlined_call_operand.vmem [shape: f32[2,2,1], index: 13, kind: output, shape index: {}]  }
   0x1   :  { %9625 = sst [smem:[#allocation218_spill]] %s9432_s0 }
   0x2   :  { %9626 = sst [smem:[#allocation219_spill]] %s9433_s1 }
   0x3   :  { %9627 = sst [smem:[#allocation220_spill]] %s9434_s2 }
   0x4   :  { %9628 = sst [smem:[#allocation221_spill]] %s9435_s3 }
   0x5   :  { %9629 = sst [smem:[#allocation222_spill]] %s9436_s4 }
   0x6   :  { %9630 = sst [smem:[#allocation223_spill]] %s9437_s5 }
   0x7   :  { %9631 = sst [smem:[#allocation224_spill]] %s9438_s6 }
   0x8   :  { %9632 = sst [smem:[#allocation225_spill]] %s9439_s7 }
   0x9   :  { %9633 = sst [smem:[#allocation226_spill]] %s9440_s8 }
   0xa   :  { %9634 = sst [smem:[#allocation227_spill]] %s9441_s9 }
   0xb   :  { %9635 = sst [smem:[#allocation228_spill]] %s9442_s10 }
   0xc   :  { %9636 = sst [smem:[#allocation229_spill]] %s9443_s11 }
   0xd   :  { %9637 = sst [smem:[#allocation230_spill]] %s9444_s12 }
   0xe   :  { %9638 = sst [smem:[#allocation231_spill]] %s9445_s13 }
   0xf   :  { %18 = vsyncpa [#allocation5], 0 }
  0x10   :  { %19 = vsyncpa [#allocation7], 0  ;;  %s5969_s25 = smov 0  }
  0x11 LB: > { %9639 = sst [smem:[#allocation10_spill]] %s5888_s25  ;;  %s5975_s26 = sadd.s32 4294967295, %s5888_s25   ;;  %s5888_s25 = sphi %s5969_s25, %s25_s25  }
  0x12   : > { %p5095_p0 = scmp.ge.s32.totalorder %s5888_s25, 1  ;;  %p334_p1 = scmp.lt.s32.totalorder %s5888_s25, 3 }
  0x13   : > { %s9640_s1 = sld [smem:[#allocation219_spill]]  ;;  %p9446_p3 = scmp.eq.s32.totalorder %s5975_s26, 0 }
  0x14   : > { %p5982_p2 = pnand %p5095_p0, %p334_p1  ;;  %s9642_s2 = sld [smem:[#allocation220_spill]] }
  0x16   : > { %s9641_s30 = scalar_select %p5982_p2, 1, 0 }
  0x17   : > { %p5803_p4 = pneg %p5982_p2 }
  0x19   : > { %s347_s29 = sshll.u32 %s9640_s1, 4  ;;  %p5994_p5 = pnand %p9446_p3, %p5803_p4  ;;  %s348_s29 = int_to_ptr.vmem [resolvable:$true] %s347_s29 }
  0x1a   : > { %s358_s16 = sshll.u32 %s9642_s2, 4  ;;  %s5844_s18 = scalar_lea.vmem %s348_s29, 64  ;;  %s359_s16 = int_to_ptr.vmem [resolvable:$true] %s358_s16 }
  0x1b   : > { %p5845_p6 = scmp.ne.s32.totalorder %s348_s29, %s5844_s18  ;;  %p5846_p7 = pneg %p5994_p5 }
  0x1c   : > { %p5852_p10 = scmp.lt.s32.totalorder %s348_s29, %s348_s29  ;;  %p5853_p11 = scmp.lt.s32.totalorder %s5844_s18, %s5844_s18 }
  0x1d   : > { %p5847_p8 = pnand %p5846_p7, %p5845_p6 }
  0x1e   : > { %p5854_p12 = por %p5853_p11, %p5852_p10 }
  0x1f   : > { %p5848_p9 = pneg %p5847_p8 }
  0x21   : > { %p5855_p13 = pnand %p5854_p12, %p5848_p9 }
  0x23   : > { %5858 = shalt.err (!%p5855_p13)
}
  0x24   : > { %s5890_s19 = smov [#allocation4]   ;;  %s5859_s20 = scalar_lea.vmem %s359_s16, 128 }
  0x25   : > { %5806 = dma.vmem_to_smem (!%p5994_p5), %s348_s29, 64, %s5890_s19, [#allocation5]  }
  0x26   : > { %p5860_p0 = scmp.ne.s32.totalorder %s359_s16, %s5859_s20  ;;  %p5867_p3 = scmp.lt.s32.totalorder %s359_s16, %s359_s16 }
  0x27   : > { %p5868_p2 = scmp.lt.s32.totalorder %s5859_s20, %s5859_s20 }
  0x28   : > { %p5862_p1 = pnand %p5860_p0, %p5846_p7 }
  0x29   : > { %p5869_p6 = por %p5868_p2, %p5867_p3 }
  0x2a   : > { %p5863_p4 = pneg %p5862_p1 }
  0x2c   : > { %p5870_p8 = pnand %p5869_p6, %p5863_p4 }
  0x2e   : > { %5873 = shalt.err (!%p5870_p8)
}
  0x2f   : > { %s5891_s21 = smov [#allocation6]   ;;  %p9644_p9 = scmp.ne.s32.totalorder %s9641_s30, 0 }
  0x30   : > { %5809 = dma.vmem_to_smem (!%p5994_p5), %s359_s16, 128, %s5891_s21, [#allocation7]  }
  0x31   : > { %409 = sbr.rel (%p9644_p9) target bundleno = 2314 (0x90a), region = 72 }
  0x38   : > { %p9645_p10 = scmp.eq.s32.totalorder %s5975_s26, 0 }
  0x3a   : > { %5879 = dma.done.wait (%p9645_p10), [#allocation5], 64   ;;  %p9646_p11 = pmov %p9645_p10 }
  0x3b   : > { %p9647_p7 = pmov %p9645_p10 }
  0x3c   : > { %5881 = vsyncadd (%p9646_p11), [#allocation5], 4294967232 }
  0x3d   : > { %5883 = dma.done.wait (%p9647_p7), [#allocation7], 128   ;;  %p9648_p2 = pmov %p9647_p7 }
  0x3f   : > { %5885 = vsyncadd (%p9648_p2), [#allocation7], 4294967168 }
  0x40   : > { %419 = sfence }
  0x41   : > { %p457_p3 = scmp.lt.s32.totalorder %s5975_s26, 1  ;;  %s5105_s22 = sld [smem:[#allocation4 + $0x1]]  ;;  %vm506_vm0 = vcmask 1046528   ;;  %vm554_vm1 = vcmask 1045504   ;;  %v9516_v62 = vmov 0.0|0.0   ;;  %vm5895_vm2 = vmmov 1  }
  0x42   : > { %s6015_s23 = sld [smem:[#allocation4 + $0x81]]  ;;  %s6020_s24 = sld [smem:[#allocation4 + $0x2]]  ;;  %5734 = vmatprep.subr.bf16.mxu0 %v9516_v62  ;;  %5738 = vmatprep.subr.bf16.mxu1 %v9516_v62  ;;  %vm5736_vm3 = vmpackc.low %vm554_vm1, %vm5895_vm2  ;;  %vm5896_vm4 = vmmov 0   ;;  %vm596_vm5 = vcmask 113664   ;;  %vm598_vm6 = vcmask 111616   ;;  %vm1234_vm7 = vcmask 457728  }
  0x43   : > { %s10394_s26 = smov (!%p457_p3, %s5975_s26), 1  ;;  %s5108_s28 = sld [smem:[#allocation4 + $0x4]]  ;;  %vm1545_vm8 = vcmask 1040384   ;;  %vm1628_vm9 = vcmask 1041408   ;;  %vm1723_vm10 = vcmask 1042432   ;;  %vm4352_vm11 = vcmask 1044480  }
  0x44   : > { %9649 = sst [smem:[#allocation11_spill]] %s10394_s26  ;;  %s5485_s27 = sshll.u32 %s10394_s26, 4  ;;  %vm1829_vm12 = vcmask 36864   ;;  %vm4336_vm13 = vcmask 39936   ;;  %vm4548_vm14 = vcmask 326656   ;;  %vm4745_vm15 = vcmask 130048  }
  0x45   : > { %s9650_s0 = sld [smem:[#allocation218_spill]]  ;;  %s5109_s15 = sld [smem:[#allocation4 + $0x5]] }
  0x46   : > { %s6030_s16 = sld [smem:[#allocation4 + $0x82]]  ;;  %s6032_s17 = sld [smem:[#allocation4 + $0x84]] }
  0x47   : > { %v473_v1 = vstv %s5105_s22  ;;  %s9450_s18 = smov 127   ;;  %s6044_s19 = sld [smem:[#allocation4 + $0x7]] }
  0x48   : > { %v605_v5 = vstv %s6015_s23  ;;  %v487_v7 = vstv %s6020_s24  ;;  %s9448_s20 = smov 126   ;;  %s5118_s21 = sld [smem:[#allocation4 + $0x85]] }
  0x49   : > { %v515_v9 = vstv %s5108_s28  ;;  %s5112_s22 = sld [smem:[#allocation4 + $0x8]]  ;;  %s6064_s23 = sld [smem:[#allocation4 + $0x101]] }
  0x4a   : > { %s5120_s24 = sld [smem:[#allocation4 + $0x87]]  ;;  %s5121_s28 = sld [smem:[#allocation4 + $0x88]] }
  0x4b   : > { %s461_s14 = scalar_lea.vmem %s9650_s0, %s5485_s27  ;;  %v532_v12 = vstv %s5109_s15  ;;  %s6080_s27 = sld [smem:[#allocation4 + $0x102]] }
  0x4c   : > { %v6026_v0 = vld [vmem:[%s461_s14 + $0x8] sm:$0xff]  ;;  %v6028_v2 = vld [vmem:[%s461_s14] sm:$0xff]  ;;  %v619_v20 = vstv %s6030_s16  ;;  %v646_v21 = vstv %s6032_s17  ;;  %s6088_s29 = sld [smem:[#allocation4 + $0x104]]  ;;  %s9651_s3 = sld [smem:[#allocation221_spill]] }
  0x4d   : > { %v475_v3 = vmul.f32 %v473_v1, %v6026_v0  ;;  %v474_v4 = vmul.f32 %v473_v1, %v6028_v2  ;;  %v606_v6 = vmul.f32 %v605_v5, %v6028_v2  ;;  %v488_v8 = vmul.f32 %v487_v7, %v6028_v2  ;;  %s6105_s17 = sld [smem:[#allocation4 + $0x105]]  ;;  %s5135_s30 = sld [smem:[#allocation4 + $0x184]] }
  0x4e   : > { %v516_v10 = vmul.f32 %v515_v9, %v6028_v2  ;;  %v517_v11 = vmul.f32 %v515_v9, %v6026_v0  ;;  %v533_v13 = vmul.f32 %v532_v12, %v6028_v2  ;;  %v534_v14 = vmul.f32 %v532_v12, %v6026_v0  ;;  %s5136_s14 = sld [smem:[#allocation4 + $0x185]]  ;;  %s5138_s15 = sld [smem:[#allocation4 + $0x187]] }
  0x4f   : > { %480 = vrot.lane.b32.xlu1 %v475_v3, %s9450_s18  ;;  %478 = vrot.lane.b32.xlu0 %v474_v4, %s9450_s18  ;;  %v489_v17 = vmul.f32 %v487_v7, %v6026_v0  ;;  %v620_v23 = vmul.f32 %v619_v20, %v6028_v2  ;;  %v647_v24 = vmul.f32 %v646_v21, %v6028_v2  ;;  %v563_v27 = vstv %s6044_s19  ;;  %s5139_s16 = sld [smem:[#allocation4 + $0x188]]  ;;  %s9652_s4 = sld [smem:[#allocation222_spill]] }
  0x50   : > { %v520_v15 = vrot.slane %v516_v10, 1  ;;  %v521_v16 = vrot.slane %v517_v11, 1  ;;  %v537_v18 = vrot.slane %v533_v13, 1  ;;  %v538_v19 = vrot.slane %v534_v14, 1  ;;  %s6190_s19 = sld [smem:[#allocation4]]  ;;  %s9653_s5 = sld [smem:[#allocation223_spill]] }
  0x51   : > { %v648_v25 = vmul.f32 %v646_v21, %v6026_v0  ;;  %v607_v28 = vmul.f32 %v605_v5, %v6026_v0  ;;  %v651_v29 = vrot.slane %v647_v24, 1  ;;  %v564_v31 = vmul.f32 %v563_v27, %v6028_v2  ;;  %s6499_s0 = sld [smem:[#allocation6 + $0x88]]  ;;  %s6501_s1 = sld [smem:[#allocation6 + $0x7]] }
  0x52   : > { %v522_v22 = vsel %vm506_vm0, %v520_v15, %v521_v16  ;;  %v539_v26 = vsel %vm506_vm0, %v537_v18, %v538_v19  ;;  %v565_v32 = vmul.f32 %v563_v27, %v6026_v0  ;;  %v663_v33 = vstv %s5118_s21  ;;  %v991_v57 = vld [vmem:[%s9651_s3] sm:$0xff]  ;;  %v992_v58 = vld [vmem:[%s9651_s3 + $0x8] sm:$0x3f]  ;;  %v5148_v63 = vld [vmem:[%s9651_s3 + $0x10] sm:$0xff]  ;;  %s5110_s21 = sld [smem:[#allocation4 + $0x6]]  ;;  %s6503_s2 = sld [smem:[#allocation6 + $0x107]] }
  0x53   : > { %610 = vrot.lane.b32.xlu1 %v606_v6, %s9450_s18  ;;  %492 = vrot.lane.b32.xlu0 %v488_v8, %s9448_s20  ;;  %v652_v30 = vrot.slane %v648_v25, 1  ;;  %v621_v35 = vmul.f32 %v619_v20, %v6026_v0  ;;  %v580_v36 = vstv %s5112_s22  ;;  %v568_v37 = vrot.slane %v564_v31, 2  ;;  %v5149_v1 = vld [vmem:[%s9651_s3 + $0x18] sm:$0x3f]  ;;  %s5116_s22 = sld [smem:[#allocation4 + $0x83]]  ;;  %s6505_s3 = sld [smem:[#allocation6 + $0x105]] }
  0x54   : > { %v569_v38 = vrot.slane %v565_v32, 2  ;;  %v664_v39 = vmul.f32 %v663_v33, %v6028_v2  ;;  %v665_v40 = vmul.f32 %v663_v33, %v6026_v0  ;;  %v733_v41 = vstv %s6064_s23  ;;  %s6199_s23 = sld [smem:[#allocation4 + $0x80]]  ;;  %s6521_s25 = sld [smem:[#allocation6 + $0x304]] }
  0x55   : > { %v653_v34 = vsel %vm506_vm0, %v651_v29, %v652_v30  ;;  %v581_v42 = vmul.f32 %v580_v36, %v6028_v2  ;;  %v582_v46 = vmul.f32 %v580_v36, %v6026_v0  ;;  %v734_v47 = vmul.f32 %v733_v41, %v6028_v2  ;;  %s6523_s13 = sld [smem:[#allocation6 + $0x187]]  ;;  %s6527_s12 = sld [smem:[#allocation6 + $0x108]] }
  0x56   : > { %v570_v43 = vsel %vm554_vm1, %v568_v37, %v569_v38  ;;  %v668_v44 = vrot.slane %v664_v39, 1  ;;  %v669_v45 = vrot.slane %v665_v40, 1  ;;  %v693_v51 = vstv %s5120_s24  ;;  %s6127_s24 = sld [smem:[#allocation4 + $0x181]]  ;;  %s6525_s26 = sld [smem:[#allocation6 + $0x207]] }
  0x57   : > { %523 = vrot.lane.b32.xlu1 %v522_v22, %s9450_s18  ;;  %494 = vrot.lane.b32.xlu0 %v489_v17, %s9448_s20  ;;  %v585_v49 = vrot.slane %v581_v42, 2  ;;  %v586_v50 = vrot.slane %v582_v46, 2  ;;  %v747_v53 = vstv %s6080_s27  ;;  %v694_v54 = vmul.f32 %v693_v51, %v6028_v2  ;;  %s5130_s27 = sld [smem:[#allocation4 + $0x108]]  ;;  %s6539_s10 = sld [smem:[#allocation6 + $0x285]] }
  0x58   : > { %v670_v48 = vsel %vm506_vm0, %v668_v44, %v669_v45  ;;  %v695_v55 = vmul.f32 %v693_v51, %v6026_v0  ;;  %v748_v56 = vmul.f32 %v747_v53, %v6028_v2  ;;  %v710_v61 = vstv %s5121_s28  ;;  %s5129_s28 = sld [smem:[#allocation4 + $0x107]]  ;;  %s6537_s11 = sld [smem:[#allocation6 + $0x208]] }
  0x59   : > { %v587_v52 = vsel %vm554_vm1, %v585_v49, %v586_v50  ;;  %v698_v59 = vrot.slane %v694_v54, 2  ;;  %v5735_v3 = vpack.c.bf16 %v992_v58, %v991_v57  ;;  %v711_v4 = vmul.f32 %v710_v61, %v6028_v2  ;;  %s9667_s9 = smov 127   ;;  %s6543_s7 = sld [smem:[#allocation6 + $0x307]] }
  0x5a   : > { %v699_v60 = vrot.slane %v695_v55, 2  ;;  %v712_v5 = vmul.f32 %v710_v61, %v6026_v0  ;;  %v774_v6 = vstv %s6088_s29  ;;  %v5739_v8 = vpack.c.bf16 %v5149_v1, %v5148_v63  ;;  %s6142_s29 = sld [smem:[#allocation4 + $0x182]]  ;;  %9659 = sst [smem:[#allocation16_spill]] %s6521_s25 }
  0x5b   : > { %540 = vrot.lane.b32.xlu1 %v539_v26, %s9448_s20  ;;  %624 = vrot.lane.b32.xlu0 %v620_v23, %s9448_s20  ;;  %v9517_v9 = vmov 0.0   ;;  %v735_v10 = vmul.f32 %v733_v41, %v6026_v0  ;;  %v775_v11 = vmul.f32 %v774_v6, %v6028_v2  ;;  %v715_v12 = vrot.slane %v711_v4, 2  ;;  %9660 = sst [smem:[#allocation17_spill]] %s6523_s13  ;;  %s6547_s6 = sld [smem:[#allocation6 + $0x80]] }
  0x5c   : > { %v700_v7 = vsel %vm554_vm1, %v698_v59, %v699_v60  ;;  %5737 = vmatpush3.bf16.msk.msra.mxu0 %vm5736_vm3, %v5735_v3  ;;  %5741 = vmatpush3.bf16.msk.msra.mxu1 %vm5736_vm3, %v5739_v8  ;;  %v716_v13 = vrot.slane %v712_v5, 2  ;;  %v776_v14 = vmul.f32 %v774_v6, %v6026_v0  ;;  %v791_v15 = vstv %s6105_s17  ;;  %s5107_s17 = sld [smem:[#allocation4 + $0x3]]  ;;  %9661 = sst [smem:[#allocation18_spill]] %s6525_s26 }
  0x5d   : > { %5567 = vmatprep.mubr.msk.f32.mxu0 %vm5896_vm4, %v9517_v9  ;;  %5592 = vmatprep.mubr.msk.f32.mxu1 %vm5896_vm4, %v9517_v9  ;;  %v779_v17 = vrot.slane %v775_v11, 1  ;;  %v792_v20 = vmul.f32 %v791_v15, %v6028_v2  ;;  %v793_v21 = vmul.f32 %v791_v15, %v6026_v0  ;;  %v861_v23 = vstv %s6127_s24  ;;  %s5119_s24 = sld [smem:[#allocation4 + $0x86]]  ;;  %9662 = sst [smem:[#allocation19_spill]] %s6527_s12 }
  0x5e   : > { %v717_v18 = vsel %vm554_vm1, %v715_v12, %v716_v13  ;;  %v862_v26 = vmul.f32 %v861_v23, %v6028_v2  ;;  %v821_v29 = vstv %s5129_s28  ;;  %v966_v58 = vstv %s5139_s16  ;;  %s6227_s28 = sld [smem:[#allocation4 + $0x100]]  ;;  %s5183_s16 = sld [smem:[#allocation6 + $0xe]] }
  0x5f   : > { %525 = vrot.lane.b32.xlu1 %v521_v16, %s9450_s18  ;;  %612 = vrot.lane.b32.xlu0 %v607_v28, %s9450_s18  ;;  %v749_v16 = vmul.f32 %v747_v53, %v6026_v0  ;;  %v796_v24 = vrot.slane %v792_v20, 1  ;;  %v797_v25 = vrot.slane %v793_v21, 1  ;;  %v838_v28 = vstv %s5130_s27  ;;  %s5125_s27 = sld [smem:[#allocation4 + $0x103]]  ;;  %9665 = sst [smem:[#allocation22_spill]] %s6537_s11 }
  0x60   : > { %v840_v31 = vmul.f32 %v838_v28, %v6026_v0  ;;  %v875_v32 = vstv %s6142_s29  ;;  %v822_v33 = vmul.f32 %v821_v29, %v6028_v2  ;;  %v967_v63 = vmul.f32 %v966_v58, %v6028_v2  ;;  %s6230_s29 = sld [smem:[#allocation4 + $0x106]]  ;;  %9666 = sst [smem:[#allocation23_spill]] %s6539_s10 }
  0x61   : > { %v798_v27 = vsel %vm506_vm0, %v796_v24, %v797_v25  ;;  %v876_v36 = vmul.f32 %v875_v32, %v6028_v2  ;;  %v877_v53 = vmul.f32 %v875_v32, %v6026_v0  ;;  %v968_v1 = vmul.f32 %v966_v58, %v6026_v0  ;;  %9668 = sst [smem:[#allocation24_spill]] %s6543_s7  ;;  %s6545_s8 = sld [smem:[#allocation6 + $0x287]] }
  0x62   : > { %v826_v39 = vrot.slane %v822_v33, 2  ;;  %v971_v4 = vrot.slane %v967_v63, 2  ;;  %v469_v8 = vstv %s6190_s19  ;;  %v601_v32 = vstv %s6199_s23  ;;  %s5254_s19 = sld [smem:[#allocation6 + $0x10d]]  ;;  %s5255_s23 = sld [smem:[#allocation6 + $0x10e]] }
  0x63   : > { %654 = vrot.lane.b32.xlu1 %v653_v34, %s9450_s18  ;;  %626 = vrot.lane.b32.xlu0 %v621_v35, %s9448_s20  ;;  %v823_v34 = vmul.f32 %v821_v29, %v6026_v0  ;;  %v902_v35 = vstv %s5135_s30  ;;  %v972_v5 = vrot.slane %v968_v1, 2  ;;  %v470_v12 = vmul.f32 %v469_v8, %v6028_v2  ;;  %s5134_s30 = sld [smem:[#allocation4 + $0x183]]  ;;  %9670 = sst [smem:[#allocation26_spill]] %s6547_s6 }
  0x64   : > { %v903_v41 = vmul.f32 %v902_v35, %v6028_v2  ;;  %v904_v42 = vmul.f32 %v902_v35, %v6026_v0  ;;  %s6559_s7 = sld [smem:[#allocation6 + $0x8a]]  ;;  %s6567_s6 = sld [smem:[#allocation6 + $0x100]] }
  0x65   : > { %v827_v40 = vrot.slane %v823_v34, 2  ;;  %v973_v6 = vsel %vm554_vm1, %v971_v4, %v972_v5  ;;  %s6569_s10 = sld [smem:[#allocation6 + $0xb]] }
  0x66   : > { %v907_v46 = vrot.slane %v903_v41, 1 }
  0x67   : > { %571 = vrot.lane.b32.xlu1 %v570_v43, %s9450_s18  ;;  %542 = vrot.lane.b32.xlu0 %v538_v19, %s9448_s20  ;;  %v780_v19 = vrot.slane %v776_v14, 1  ;;  %v919_v43 = vstv %s5136_s14  ;;  %s6257_s14 = sld [smem:[#allocation4 + $0x180]]  ;;  %9669 = sst [smem:[#allocation25_spill]] %s6545_s8 }
  0x68   : > { %v920_v49 = vmul.f32 %v919_v43, %v6028_v2  ;;  %s6561_s8 = sld [smem:[#allocation6 + $0x288]] }
  0x69   : > { %v781_v22 = vsel %vm506_vm0, %v779_v17, %v780_v19  ;;  %v549_v17 = vstv %s5110_s21  ;;  %s5290_s21 = sld [smem:[#allocation6 + $0x18d]] }
  0x6a   : > { %v924_v54 = vrot.slane %v920_v49, 1  ;;  %9674 = sst [smem:[#allocation30_spill]] %s6559_s7 }
  0x6b   : > { %738 = vrot.lane.b32.xlu1 %v734_v47, %s9450_s18  ;;  %671 = vrot.lane.b32.xlu0 %v670_v48, %s9448_s20  ;;  %v908_v47 = vrot.slane %v904_v42, 1  ;;  %v863_v48 = vmul.f32 %v861_v23, %v6026_v0  ;;  %v6204_v23 = vmul.f32 %v549_v17, %v6026_v0  ;;  %9677 = sst [smem:[#allocation33_spill]] %s6567_s6  ;;  %s6589_s6 = sld [smem:[#allocation6 + $0x300]] }
  0x6c   : > { %9678 = sst [smem:[#allocation34_spill]] %s6569_s10  ;;  %s6583_s10 = sld [smem:[#allocation6 + $0x18b]] }
  0x6d   : > { %v909_v51 = vsel %vm506_vm0, %v907_v46, %v908_v47  ;;  %v556_v29 = vrot.slane %v6204_v23, 2 }
  0x6e   : > { %9675 = sst [smem:[#allocation31_spill]] %s6561_s8 }
  0x6f   : > { %656 = vrot.lane.b32.xlu1 %v652_v30, %s9450_s18  ;;  %588 = vrot.lane.b32.xlu0 %v587_v52, %s9448_s20  ;;  %v839_v30 = vmul.f32 %v838_v28, %v6028_v2  ;;  %v949_v52 = vstv %s5138_s15  ;;  %s5137_s15 = sld [smem:[#allocation4 + $0x186]] }
  0x70   : > { %v951_v57 = vmul.f32 %v949_v52, %v6026_v0 }
  0x71   : > { %v843_v37 = vrot.slane %v839_v30, 2  ;;  %9685 = sst [smem:[#allocation41_spill]] %s6589_s6 }
  0x72   : > { %v955_v61 = vrot.slane %v951_v57, 2  ;;  %9683 = sst [smem:[#allocation39_spill]] %s6583_s10 }
  0x73   : > { %573 = vrot.lane.b32.xlu1 %v569_v38, %s9450_s18  ;;  %752 = vrot.lane.b32.xlu0 %v748_v56, %s9448_s20  ;;  %v844_v38 = vrot.slane %v840_v31, 2  ;;  %v950_v56 = vmul.f32 %v949_v52, %v6028_v2  ;;  %v633_v31 = vstv %s5116_s22  ;;  %s5291_s22 = sld [smem:[#allocation6 + $0x18e]] }
  0x75   : > { %v845_v44 = vsel %vm554_vm1, %v843_v37, %v844_v38  ;;  %v634_v37 = vmul.f32 %v633_v31, %v6028_v2 }
  0x77   : > { %701 = vrot.lane.b32.xlu1 %v700_v7, %s9450_s18  ;;  %673 = vrot.lane.b32.xlu0 %v669_v45, %s9448_s20  ;;  %v828_v45 = vsel %vm554_vm1, %v826_v39, %v827_v40  ;;  %v501_v7 = vstv %s5107_s17  ;;  %v602_v39 = vmul.f32 %v601_v32, %v6028_v2  ;;  %s5219_s17 = sld [smem:[#allocation6 + $0x8e]] }
  0x78   : > { %v502_v11 = vmul.f32 %v501_v7, %v6028_v2 }
  0x7b   : > { %590 = vrot.lane.b32.xlu1 %v586_v50, %s9448_s20  ;;  %740 = vrot.lane.b32.xlu0 %v735_v10, %s9450_s18  ;;  %v921_v50 = vmul.f32 %v919_v43, %v6026_v0  ;;  %v6194_v10 = vmul.f32 %v501_v7, %v6026_v0  ;;  %v680_v43 = vstv %s5119_s24  ;;  %s5326_s24 = sld [smem:[#allocation6 + $0x20d]] }
  0x7c   : > { %v681_v49 = vmul.f32 %v680_v43, %v6028_v2 }
  0x7d   : > { %v925_v55 = vrot.slane %v921_v50, 1  ;;  %v508_v15 = vrot.slane %v6194_v10, 1  ;;  %v6217_v50 = vmul.f32 %v680_v43, %v6026_v0 }
  0x7f   : > { %754 = vrot.lane.b32.xlu1 %v749_v16, %s9448_s20  ;;  %718 = vrot.lane.b32.xlu0 %v717_v18, %s9448_s20  ;;  %v926_v59 = vsel %vm506_vm0, %v924_v54, %v925_v55  ;;  %v507_v16 = vrot.slane %v502_v11, 1  ;;  %v686_v57 = vrot.slane %v6217_v50, 2 }
  0x81   : > { %v509_v21 = vsel %vm506_vm0, %v507_v16, %v508_v15 }
  0x83   : > { %703 = vrot.lane.b32.xlu1 %v699_v60, %s9450_s18  ;;  %782 = vrot.lane.b32.xlu0 %v781_v22, %s9450_s18  ;;  %v954_v60 = vrot.slane %v950_v56, 2  ;;  %v550_v22 = vmul.f32 %v549_v17, %v6028_v2  ;;  %v685_v56 = vrot.slane %v681_v49, 2  ;;  %v603_v17 = vmul.f32 %v601_v32, %v6026_v0 }
  0x84   : > { %v808_v32 = vstv %s6230_s29  ;;  %s5363_s29 = sld [smem:[#allocation6 + $0x28e]] }
  0x85   : > { %v956_v3 = vsel %vm554_vm1, %v954_v60, %v955_v61  ;;  %v555_v28 = vrot.slane %v550_v22, 2  ;;  %v687_v1 = vsel %vm554_vm1, %v685_v56, %v686_v57 }
  0x87   : > { %866 = vrot.lane.b32.xlu1 %v862_v26, %s9450_s18  ;;  %799 = vrot.lane.b32.xlu0 %v798_v27, %s9448_s20  ;;  %v557_v35 = vsel %vm554_vm1, %v555_v28, %v556_v29 }
  0x8b   : > { %784 = vrot.lane.b32.xlu1 %v780_v19, %s9450_s18  ;;  %720 = vrot.lane.b32.xlu0 %v716_v13, %s9448_s20 }
  0x8f   : > { %801 = vrot.lane.b32.xlu1 %v797_v25, %s9448_s20  ;;  %880 = vrot.lane.b32.xlu0 %v876_v36, %s9448_s20 }
  0x93   : > { %846 = vrot.lane.b32.xlu1 %v845_v44, %s9448_s20  ;;  %829 = vrot.lane.b32.xlu0 %v828_v45, %s9450_s18  ;;  %v638_v44 = vrot.slane %v634_v37, 1 }
  0x97   : > { %910 = vrot.lane.b32.xlu1 %v909_v51, %s9450_s18  ;;  %868 = vrot.lane.b32.xlu0 %v863_v48, %s9450_s18 }
  0x9b   : > { %882 = vrot.lane.b32.xlu1 %v877_v53, %s9448_s20  ;;  %831 = vrot.lane.b32.xlu0 %v827_v40, %s9450_s18  ;;  %v471_v53 = vmul.f32 %v469_v8, %v6026_v0 }
  0x9f   : > { %848 = vrot.lane.b32.xlu1 %v844_v38, %s9448_s20  ;;  %927 = vrot.lane.b32.xlu0 %v926_v59, %s9448_s20  ;;  %v6211_v38 = vmul.f32 %v633_v31, %v6026_v0 }
  0xa1   : > { %v639_v45 = vrot.slane %v6211_v38, 1 }
  0xa3   : > { %957 = vrot.lane.b32.xlu1 %v956_v3, %s9450_s18  ;;  %912 = vrot.lane.b32.xlu0 %v908_v47, %s9450_s18  ;;  %v640_v52 = vsel %vm506_vm0, %v638_v44, %v639_v45 }
  0xa7   : > { %974 = vrot.lane.b32.xlu1 %v973_v6, %s9448_s20  ;;  %929 = vrot.lane.b32.xlu0 %v925_v55, %s9448_s20 }
  0xab   : > { %959 = vrot.lane.b32.xlu0 %v955_v61, %s9450_s18  ;;  %976 = vrot.lane.b32.xlu1 %v972_v5, %s9448_s20 }
  0xc1   : > { %v481_v13 = vpop.permute.xlu1 %480  ;;  %v479_v14 = vpop.permute.xlu0 %478 }
  0xc2   : > { %v484_v18 = vadd.f32 %v479_v14, %v470_v12  ;;  %v485_v59 = vadd.f32 %v481_v13, %v471_v53 }
  0xc5   : > { %v611_v19 = vpop.permute.xlu1 %610  ;;  %v493_v20 = vpop.permute.xlu0 %492 }
  0xc6   : > { %v498_v24 = vadd.f32 %v493_v20, %v484_v18  ;;  %v616_v46 = vadd.f32 %v611_v19, %v602_v39  ;;  %v761_v18 = vstv %s5125_s27  ;;  %v729_v19 = vstv %s6227_s28  ;;  %s5362_s27 = sld [smem:[#allocation6 + $0x28d]]  ;;  %s5327_s28 = sld [smem:[#allocation6 + $0x20e]] }
  0xc8   : > { %v512_v25 = vadd.f32 %v509_v21, %v498_v24  ;;  %v6236_v24 = vmul.f32 %v761_v18, %v6026_v0 }
  0xc9   : > { %v524_v26 = vpop.permute.xlu1 %523  ;;  %v495_v27 = vpop.permute.xlu0 %494 }
  0xca   : > { %v529_v30 = vadd.f32 %v524_v26, %v512_v25  ;;  %v499_v3 = vadd.f32 %v495_v27, %v485_v59  ;;  %v730_v26 = vmul.f32 %v729_v19, %v6028_v2 }
  0xcc   : > { %v513_v10 = vadd.f32 %v508_v15, %v499_v3  ;;  %v762_v15 = vmul.f32 %v761_v18, %v6028_v2 }
  0xcd   : > { %v541_v33 = vpop.permute.xlu1 %540  ;;  %v625_v34 = vpop.permute.xlu0 %624 }
  0xce   : > { %v546_v36 = vadd.f32 %v541_v33, %v529_v30  ;;  %v630_v51 = vadd.f32 %v625_v34, %v616_v46  ;;  %v766_v33 = vrot.slane %v762_v15, 1  ;;  %v767_v34 = vrot.slane %v6236_v24, 1 }
  0xd0   : > { %v560_v40 = vadd.f32 %v557_v35, %v546_v36  ;;  %v643_v58 = vadd.f32 %v640_v52, %v630_v51  ;;  %v768_v46 = vsel %vm506_vm0, %v766_v33, %v767_v34 }
  0xd1   : > { %v526_v41 = vpop.permute.xlu1 %525  ;;  %v613_v42 = vpop.permute.xlu0 %612 }
  0xd2   : > { %v530_v12 = vadd.f32 %v526_v41, %v513_v10  ;;  %v617_v25 = vadd.f32 %v613_v42, %v603_v17  ;;  %v6250_v41 = vmul.f32 %v808_v32, %v6026_v0 }
  0xd4   : > { %v814_v52 = vrot.slane %v6250_v41, 2 }
  0xd5   : > { %v655_v47 = vpop.permute.xlu1 %654  ;;  %v627_v48 = vpop.permute.xlu0 %626 }
  0xd6   : > { %v660_v60 = vadd.f32 %v655_v47, %v643_v58 }
  0xd9   : > { %v572_v54 = vpop.permute.xlu1 %571  ;;  %v543_v55 = vpop.permute.xlu0 %542 }
  0xda   : > { %v577_v5 = vadd.f32 %v572_v54, %v560_v40  ;;  %v547_v16 = vadd.f32 %v543_v55, %v530_v12  ;;  %v809_v40 = vmul.f32 %v808_v32, %v6028_v2 }
  0xdc   : > { %v561_v22 = vadd.f32 %v556_v29, %v547_v16  ;;  %v631_v29 = vadd.f32 %v627_v48, %v617_v25  ;;  %v813_v51 = vrot.slane %v809_v40, 2 }
  0xdd   : > { %v739_v61 = vpop.permute.xlu1 %738  ;;  %v672_v63 = vpop.permute.xlu0 %671 }
  0xde   : > { %v677_v4 = vadd.f32 %v672_v63, %v660_v60  ;;  %v744_v35 = vadd.f32 %v739_v61, %v730_v26  ;;  %v644_v42 = vadd.f32 %v639_v45, %v631_v29  ;;  %v815_v56 = vsel %vm554_vm1, %v813_v51, %v814_v52 }
  0xdf   : > { %v731_v61 = vmul.f32 %v729_v19, %v6026_v0  ;;  %v936_v19 = vstv %s5137_s15  ;;  %s5182_s15 = sld [smem:[#allocation6 + $0xd]] }
  0xe0   : > { %v690_v6 = vadd.f32 %v687_v1, %v677_v4 }
  0xe1   : > { %v657_v7 = vpop.permute.xlu1 %656  ;;  %v589_v8 = vpop.permute.xlu0 %588 }
  0xe2   : > { %v594_v11 = vadd.f32 %v589_v8, %v577_v5  ;;  %v661_v47 = vadd.f32 %v657_v7, %v644_v42  ;;  %v889_v5 = vstv %s5134_s30  ;;  %s5398_s30 = sld [smem:[#allocation6 + $0x30d]] }
  0xe3   : > { %v891_v12 = vmul.f32 %v889_v5, %v6026_v0 }
  0xe4   : > { %597 = vst.msk [vmem:[#allocation2] sm:$0xff] %vm596_vm5, %v594_v11  ;;  %v890_v11 = vmul.f32 %v889_v5, %v6028_v2  ;;  %v5162_v5 = vld [vmem:[%s9652_s4 + $0x20] sm:$0xff] }
  0xe5   : > { %v574_v13 = vpop.permute.xlu1 %573  ;;  %v753_v14 = vpop.permute.xlu0 %752 }
  0xe6   : > { %v578_v27 = vadd.f32 %v574_v13, %v561_v22  ;;  %v758_v43 = vadd.f32 %v753_v14, %v744_v35  ;;  %v895_v22 = vrot.slane %v891_v12, 1 }
  0xe8   : > { %v771_v54 = vadd.f32 %v768_v46, %v758_v43 }
  0xe9   : > { %v702_v20 = vpop.permute.xlu1 %701  ;;  %v674_v21 = vpop.permute.xlu0 %673 }
  0xea   : > { %v707_v36 = vadd.f32 %v702_v20, %v690_v6  ;;  %v678_v53 = vadd.f32 %v674_v21, %v661_v47  ;;  %v857_v6 = vstv %s6257_s14  ;;  %v894_v21 = vrot.slane %v890_v11, 1  ;;  %v1441_v11 = vld [vmem:[%s9653_s5 + $0x18] sm:$0xf]  ;;  %s5218_s14 = sld [smem:[#allocation6 + $0x8d]] }
  0xeb   : > { %v984_v23 = vld [vmem:[#allocation2] sm:$0xff]  ;;  %v858_v13 = vmul.f32 %v857_v6, %v6028_v2  ;;  %v859_v32 = vmul.f32 %v857_v6, %v6026_v0  ;;  %v1439_v6 = vld [vmem:[%s9653_s5 + $0x8] sm:$0xff] }
  0xec   : > { %5568 = vmatmul.mubr.msk.f32.vlgmr.msra.gmra.mrb[0].mxu0 %vm596_vm5, %v984_v23  ;;  %5593 = vmatmul.mubr.msk.f32.vlgmr.msra.gmra.mrb[0].mxu1 %vm596_vm5, %v984_v23  ;;  %v691_v58 = vadd.f32 %v686_v57, %v678_v53 }
  0xed   : > { %v591_v28 = vpop.permute.xlu1 %590  ;;  %v741_v30 = vpop.permute.xlu0 %740  ;;  %5570 = vmatprep.mubr.msk.f32.mxu0 %vm5896_vm4, %v9517_v9  ;;  %5595 = vmatprep.mubr.msk.f32.mxu1 %vm5896_vm4, %v9517_v9 }
  0xee   : > { %v595_v31 = vadd.f32 %v591_v28, %v578_v27  ;;  %v745_v57 = vadd.f32 %v741_v30, %v731_v61  ;;  %v937_v27 = vmul.f32 %v936_v19, %v6028_v2  ;;  %v938_v28 = vmul.f32 %v936_v19, %v6026_v0 }
  0xf0   : > { %599 = vst.msk [vmem:[#allocation2 + $0x8] sm:$0x3f] %vm598_vm6, %v595_v31  ;;  %v896_v31 = vsel %vm506_vm0, %v894_v21, %v895_v22  ;;  %v941_v35 = vrot.slane %v937_v27, 2  ;;  %vm5010_vm0 = vcmask 0  }
  0xf1   : > { %v755_v37 = vpop.permute.xlu1 %754  ;;  %v719_v39 = vpop.permute.xlu0 %718 }
  0xf2   : > { %v724_v44 = vadd.f32 %v719_v39, %v707_v36  ;;  %v759_v10 = vadd.f32 %v755_v37, %v745_v57  ;;  %v942_v36 = vrot.slane %v938_v28, 2  ;;  %v1230_v57 = vld [vmem:[%s9652_s4] sm:$0xff] }
  0xf4   : > { %726 = vst.msk [vmem:[#allocation2 + $0xe] sm:$0xff] %vm596_vm5, %v724_v44  ;;  %v772_v17 = vadd.f32 %v767_v34, %v759_v10  ;;  %v943_v46 = vsel %vm554_vm1, %v941_v35, %v942_v36  ;;  %v1440_v10 = vld [vmem:[%s9653_s5 + $0x10] sm:$0xff]  ;;  %vm5016_vm1 = vcmask 1025  }
  0xf5   : > { %v704_v48 = vpop.permute.xlu1 %703  ;;  %v783_v49 = vpop.permute.xlu0 %782 }
  0xf6   : > { %v788_v55 = vadd.f32 %v783_v49, %v771_v54  ;;  %v708_v63 = vadd.f32 %v704_v48, %v691_v58 }
  0xf9   : > { %v867_v38 = vpop.permute.xlu1 %866  ;;  %v800_v45 = vpop.permute.xlu0 %799 }
  0xfa   : > { %v805_v59 = vadd.f32 %v800_v45, %v788_v55  ;;  %v872_v23 = vadd.f32 %v867_v38, %v858_v13 }
  0xfb   : > { %v985_v60 = vld [vmem:[#allocation2 + $0x8] sm:$0xff] }
  0xfc   : > { %5571 = vmatmul.mubr.msk.f32.gmra.mrb[2].mxu0 %vm596_vm5, %v985_v60  ;;  %5596 = vmatmul.mubr.msk.f32.gmra.mrb[2].mxu1 %vm596_vm5, %v985_v60  ;;  %v818_v1 = vadd.f32 %v815_v56, %v805_v59 }
  0xfd   : > { %v785_v3 = vpop.permute.xlu1 %784  ;;  %v721_v4 = vpop.permute.xlu0 %720  ;;  %5573 = vmatprep.mubr.msk.f32.mxu0 %vm5896_vm4, %v9517_v9  ;;  %5598 = vmatprep.mubr.msk.f32.mxu1 %vm5896_vm4, %v9517_v9 }
  0xfe   : > { %v725_v50 = vadd.f32 %v721_v4, %v708_v63  ;;  %v789_v15 = vadd.f32 %v785_v3, %v772_v17 }
 0x100   : > { %727 = vst.msk [vmem:[#allocation2 + $0x16] sm:$0x3f] %vm598_vm6, %v725_v50 }
 0x101   : > { %v802_v7 = vpop.permute.xlu1 %801  ;;  %v881_v8 = vpop.permute.xlu0 %880 }
 0x102   : > { %v806_v30 = vadd.f32 %v802_v7, %v789_v15  ;;  %v886_v29 = vadd.f32 %v881_v8, %v872_v23  ;;  %v1438_v7 = vld [vmem:[%s9653_s5] sm:$0xff]  ;;  %v5898_v8 = vmov 0   ;;  %s9658_s5 = smov 126  }
 0x103   : > { %5832 = vset.pattern.permute.xlu1 %v5898_v8  ;;  %5831 = vset.pattern.permute.xlu0 %v5898_v8 }
 0x104   : > { %v899_v37 = vadd.f32 %v896_v31, %v886_v29  ;;  %v819_v39 = vadd.f32 %v814_v52, %v806_v30  ;;  %1449 = vperm.xlu1 %5832, %v1439_v6   ;;  %1444 = vperm.xlu0 %5831, %v1438_v7  }
 0x105   : > { %v847_v14 = vpop.permute.xlu1 %846  ;;  %v830_v16 = vpop.permute.xlu0 %829 }
 0x106   : > { %v835_v18 = vadd.f32 %v830_v16, %v818_v1 }
 0x107   : > { %v986_v20 = vld [vmem:[#allocation2 + $0x10] sm:$0xff] }
 0x108   : > { %v852_v24 = vadd.f32 %v847_v14, %v835_v18  ;;  %5574 = vmatmul.mubr.msk.f32.gmra.mrb[4].mxu0 %vm596_vm5, %v986_v20  ;;  %5599 = vmatmul.mubr.msk.f32.gmra.mrb[4].mxu1 %vm596_vm5, %v986_v20 }
 0x109   : > { %v911_v25 = vpop.permute.xlu1 %910  ;;  %v869_v26 = vpop.permute.xlu0 %868  ;;  %5576 = vmatprep.mubr.msk.f32.mxu0 %vm5896_vm4, %v9517_v9  ;;  %5601 = vmatprep.mubr.msk.f32.mxu1 %vm5896_vm4, %v9517_v9 }
 0x10a   : > { %854 = vst.msk [vmem:[#allocation2 + $0x1c] sm:$0xff] %vm596_vm5, %v852_v24  ;;  %v916_v40 = vadd.f32 %v911_v25, %v899_v37  ;;  %v873_v41 = vadd.f32 %v869_v26, %v859_v32  ;;  %1454 = vperm.xlu1 %5832, %v1440_v10   ;;  %1459 = vperm.xlu0 %5831, %v1441_v11  }
 0x10d   : > { %v883_v33 = vpop.permute.xlu1 %882  ;;  %v832_v34 = vpop.permute.xlu0 %831 }
 0x10e   : > { %v836_v42 = vadd.f32 %v832_v34, %v819_v39  ;;  %v887_v47 = vadd.f32 %v883_v33, %v873_v41 }
 0x110   : > { %v900_v53 = vadd.f32 %v895_v22, %v887_v47 }
 0x111   : > { %v849_v2 = vpop.permute.xlu1 %848  ;;  %v928_v43 = vpop.permute.xlu0 %927  ;;  %v987_v44 = vld [vmem:[#allocation2 + $0x18] sm:$0xff] }
 0x112   : > { %v853_v48 = vadd.f32 %v849_v2, %v836_v42  ;;  %v933_v49 = vadd.f32 %v928_v43, %v916_v40  ;;  %5577 = vmatmul.mubr.msk.f32.gmra.mrb[6].mxu0 %vm596_vm5, %v987_v44  ;;  %5602 = vmatmul.mubr.msk.f32.gmra.mrb[6].mxu1 %vm596_vm5, %v987_v44 }
 0x113   : > { %5579 = vmatprep.mubr.msk.f32.mxu0 %vm5896_vm4, %v9517_v9  ;;  %5604 = vmatprep.mubr.msk.f32.mxu1 %vm5896_vm4, %v9517_v9 }
 0x114   : > { %855 = vst.msk [vmem:[#allocation2 + $0x24] sm:$0x3f] %vm598_vm6, %v853_v48  ;;  %v946_v0 = vadd.f32 %v943_v46, %v933_v49 }
 0x115   : > { %v958_v51 = vpop.permute.xlu1 %957  ;;  %v913_v52 = vpop.permute.xlu0 %912 }
 0x116   : > { %v963_v54 = vadd.f32 %v958_v51, %v946_v0  ;;  %v917_v55 = vadd.f32 %v913_v52, %v900_v53  ;;  %v1231_v51 = vld [vmem:[%s9652_s4 + $0x8] sm:$0xff]  ;;  %v1232_v53 = vld [vmem:[%s9652_s4 + $0x10] sm:$0xff] }
 0x117   : > { %v5163_v52 = vld [vmem:[%s9652_s4 + $0x28] sm:$0xff] }
 0x119   : > { %v975_v38 = vpop.permute.xlu1 %974  ;;  %v930_v45 = vpop.permute.xlu0 %929 }
 0x11a   : > { %v980_v56 = vadd.f32 %v975_v38, %v963_v54  ;;  %v934_v58 = vadd.f32 %v930_v45, %v917_v55  ;;  %v5164_v54 = vld [vmem:[%s9652_s4 + $0x30] sm:$0xff]  ;;  %v1233_v55 = vld [vmem:[%s9652_s4 + $0x18] sm:$0xf] }
 0x11b   : > { %v988_v59 = vld [vmem:[#allocation2 + $0x20] sm:$0xff]  ;;  %v5165_v38 = vld [vmem:[%s9652_s4 + $0x38] sm:$0xf]  ;;  %s6517_s4 = sld [smem:[#allocation6 + $0x204]] }
 0x11c   : > { %982 = vst.msk [vmem:[#allocation2 + $0x2a] sm:$0xff] %vm596_vm5, %v980_v56  ;;  %5580 = vmatmul.mubr.msk.f32.gmra.mrb[8].mxu0 %vm596_vm5, %v988_v59  ;;  %5605 = vmatmul.mubr.msk.f32.gmra.mrb[8].mxu1 %vm596_vm5, %v988_v59  ;;  %v947_v60 = vadd.f32 %v942_v36, %v934_v58 }
 0x11d   : > { %v960_v61 = vpop.permute.xlu0 %959  ;;  %v977_v63 = vpop.permute.xlu1 %976  ;;  %5582 = vmatprep.mubr.msk.f32.mxu0 %vm5896_vm4, %v9517_v9  ;;  %5607 = vmatprep.mubr.msk.f32.mxu1 %vm5896_vm4, %v9517_v9 }
 0x11e   : > { %v964_v1 = vadd.f32 %v960_v61, %v947_v60 }
 0x120   : > { %v981_v3 = vadd.f32 %v977_v63, %v964_v1 }
 0x121   : > { %9657 = sst [smem:[#allocation15_spill]] %s6517_s4 }
 0x122   : > { %983 = vst.msk [vmem:[#allocation2 + $0x32] sm:$0x3f] %vm598_vm6, %v981_v3 }
 0x123   : > { %v989_v4 = vld [vmem:[#allocation2 + $0x28] sm:$0xff] }
 0x124   : > { %5583 = vmatmul.mubr.msk.f32.gmra.mrb[10].mxu0 %vm596_vm5, %v989_v4  ;;  %5608 = vmatmul.mubr.msk.f32.gmra.mrb[10].mxu1 %vm596_vm5, %v989_v4 }
 0x125   : > { %5585 = vmatprep.mubr.msk.f32.mxu0 %vm5896_vm4, %v9517_v9  ;;  %5610 = vmatprep.mubr.msk.f32.mxu1 %vm5896_vm4, %v9517_v9 }
 0x129   : > { %v990_v50 = vld [vmem:[#allocation2 + $0x30] sm:$0xff] }
 0x12a   : > { %5586 = vmatmul.mubr.msk.f32.gmra.mrb[12].mxu0 %vm596_vm5, %v990_v50  ;;  %5611 = vmatmul.mubr.msk.f32.gmra.mrb[12].mxu1 %vm596_vm5, %v990_v50  ;;  %v1942_v50 = vstv %s5218_s14  ;;  %s5434_s14 = sld [smem:[#allocation6 + $0x38d]] }
 0x12b   : > { %5627 = vmatprep.mubr.msk.f32.mxu0 %vm1234_vm7, %v1230_v57  ;;  %5647 = vmatprep.mubr.msk.f32.mxu1 %vm1234_vm7, %v5162_v5  ;;  %v1582_v57 = vstv %s5182_s15  ;;  %s5399_s15 = sld [smem:[#allocation6 + $0x30e]] }
 0x183   : > { %v1450_v61 = vpop.permute.xlu1 %1449 }
 0x1bf   : > { %v1083_v12 = vpop.f32.mrb[0].mxu0  ;;  %v1189_v13 = vpop.f32.mrb[0].mxu1 }
 0x1c0   : > { %v1223_v14 = vmax.f32 %v1083_v12, %v1189_v13  ;;  %v5569_v16 = vpop.f32.mrb[1].mxu0  ;;  %v5594_v17 = vpop.f32.mrb[1].mxu1  ;;  %v1590_v13 = vstv %s5183_s16  ;;  %s5435_s16 = sld [smem:[#allocation6 + $0x38e]] }
 0x1cf   : > { %v1088_v18 = vpop.f32.mrb[2].mxu0  ;;  %v1194_v19 = vpop.f32.mrb[2].mxu1 }
 0x1d0   : > { %v1224_v20 = vmax.f32 %v1088_v18, %v1194_v19  ;;  %v5572_v21 = vpop.f32.mrb[3].mxu0  ;;  %v5597_v22 = vpop.f32.mrb[3].mxu1  ;;  %v2299_v18 = vstv %s5254_s19  ;;  %v2656_v19 = vstv %s5290_s21  ;;  %s5170_s19 = sld [smem:[#allocation6 + $0x1]]  ;;  %s5207_s21 = sld [smem:[#allocation6 + $0x82]] }
 0x1d1   : > { %v2664_v22 = vstv %s5291_s22  ;;  %s5171_s22 = sld [smem:[#allocation6 + $0x2]] }
 0x1d2   : > { %v5742_v23 = vpack.c.bf16 %v1224_v20, %v1223_v14  ;;  %v1950_v14 = vstv %s5219_s17  ;;  %s5206_s17 = sld [smem:[#allocation6 + $0x81]] }
 0x1d4   : > { %5743 = vmatprep.subr.bf16.mxu0 %v5742_v23  ;;  %5755 = vmatprep.subr.bf16.mxu1 %v5742_v23 }
 0x1d5   : > { %5745 = vmatpush3.bf16.msra.mxu0 %v5742_v23  ;;  %5757 = vmatpush3.bf16.msra.mxu1 %v5742_v23  ;;  %v2307_v23 = vstv %s5255_s23  ;;  %s5278_s23 = sld [smem:[#allocation6 + $0x181]] }
 0x1db   : > { %v1093_v15 = vpop.f32.mrb[4].mxu0  ;;  %v1199_v24 = vpop.f32.mrb[4].mxu1 }
 0x1dc   : > { %v1225_v25 = vmax.f32 %v1093_v15, %v1199_v24  ;;  %v5575_v26 = vpop.f32.mrb[5].mxu0  ;;  %v5600_v27 = vpop.f32.mrb[5].mxu1 }
 0x1dd   : > { %v3370_v26 = vstv %s5362_s27  ;;  %s5279_s27 = sld [smem:[#allocation6 + $0x182]] }
 0x1e5   : > { %v1098_v28 = vpop.f32.mrb[6].mxu0  ;;  %v1204_v30 = vpop.f32.mrb[6].mxu1 }
 0x1e6   : > { %v1226_v29 = vmax.f32 %v1098_v28, %v1204_v30  ;;  %v5578_v31 = vpop.f32.mrb[7].mxu0  ;;  %v5603_v32 = vpop.f32.mrb[7].mxu1  ;;  %v3021_v30 = vstv %s5327_s28  ;;  %s5243_s28 = sld [smem:[#allocation6 + $0x102]] }
 0x1e8   : > { %v5746_v33 = vpack.c.bf16 %v1226_v29, %v1225_v25  ;;  %v3013_v25 = vstv %s5326_s24  ;;  %v3378_v29 = vstv %s5363_s29  ;;  %s5242_s24 = sld [smem:[#allocation6 + $0x101]]  ;;  %s5315_s29 = sld [smem:[#allocation6 + $0x202]] }
 0x1ea   : > { %5747 = vmatprep.subr.bf16.mxu0 %v5746_v33  ;;  %5759 = vmatprep.subr.bf16.mxu1 %v5746_v33 }
 0x1eb   : > { %5749 = vmatpush3.bf16.msra.mxu0 %v5746_v33  ;;  %5761 = vmatpush3.bf16.msra.mxu1 %v5746_v33  ;;  %v1445_v33 = vpop.permute.xlu0 %1444 }
 0x1ef   : > { %v1103_v34 = vpop.f32.mrb[8].mxu0  ;;  %v1209_v35 = vpop.f32.mrb[8].mxu1 }
 0x1f0   : > { %v1227_v36 = vmax.f32 %v1103_v34, %v1209_v35  ;;  %v5581_v37 = vpop.f32.mrb[9].mxu0  ;;  %v5606_v39 = vpop.f32.mrb[9].mxu1  ;;  %v3727_v34 = vstv %s5398_s30  ;;  %v4084_v35 = vstv %s5434_s14  ;;  %s5314_s30 = sld [smem:[#allocation6 + $0x201]] }
 0x1f1   : > { %s5386_s14 = sld [smem:[#allocation6 + $0x301]] }
 0x1f7   : > { %v1108_v40 = vpop.f32.mrb[10].mxu0  ;;  %v1214_v41 = vpop.f32.mrb[10].mxu1 }
 0x1f8   : > { %v1228_v42 = vmax.f32 %v1108_v40, %v1214_v41  ;;  %v5584_v2 = vpop.f32.mrb[11].mxu0  ;;  %v5609_v43 = vpop.f32.mrb[11].mxu1  ;;  %v3735_v40 = vstv %s5399_s15  ;;  %v4092_v41 = vstv %s5435_s16  ;;  %s5350_s15 = sld [smem:[#allocation6 + $0x281]]  ;;  %s5351_s16 = sld [smem:[#allocation6 + $0x282]] }
 0x1fa   : > { %v5750_v44 = vpack.c.bf16 %v1228_v42, %v1227_v36 }
 0x1fc   : > { %5751 = vmatprep.subr.bf16.mxu0 %v5750_v44  ;;  %5763 = vmatprep.subr.bf16.mxu1 %v5750_v44 }
 0x1fd   : > { %v1113_v46 = vpop.f32.mrb[12].mxu0  ;;  %v1219_v47 = vpop.f32.mrb[12].mxu1  ;;  %5753 = vmatpush3.bf16.msra.mxu0 %v5750_v44  ;;  %5765 = vmatpush3.bf16.msra.mxu1 %v5750_v44  ;;  %v1835_v44 = vstv %s5206_s17  ;;  %s5387_s17 = sld [smem:[#allocation6 + $0x302]] }
 0x1fe   : > { %v1229_v48 = vmax.f32 %v1113_v46, %v1219_v47  ;;  %v5587_v49 = vpop.f32.mrb[13].mxu0  ;;  %v5612_v0 = vpop.f32.mrb[13].mxu1  ;;  %v1474_v46 = vstv %s5170_s19  ;;  %s5221_s19 = sld [smem:[#allocation6 + $0x90]] }
 0x1ff   : > { %v1843_v49 = vstv %s5207_s21  ;;  %v1482_v0 = vstv %s5171_s22  ;;  %s5422_s21 = sld [smem:[#allocation6 + $0x381]] }
 0x200   : > { %5625 = vmatprep.subr.mxu0 %v1229_v48  ;;  %5645 = vmatprep.subr.mxu1 %v1229_v48  ;;  %s5186_s22 = sld [smem:[#allocation6 + $0x11]] }
 0x201   : > { %5626 = vmatpush3.msra.mxu0 %v1229_v48  ;;  %5646 = vmatpush3.msra.mxu1 %v1229_v48 }
 0x202   : > { %5628 = vmatmul.mubr.msk.f32.vlgmr.msra.gmra.mrb[14].mxu0 %vm1234_vm7, %v1231_v51  ;;  %5648 = vmatmul.mubr.msk.f32.vlgmr.msra.gmra.mrb[14].mxu1 %vm1234_vm7, %v5163_v52 }
 0x203   : > { %5630 = vmatprep.mubr.msk.f32.mxu0 %vm1234_vm7, %v1232_v53  ;;  %5650 = vmatprep.mubr.msk.f32.mxu1 %vm1234_vm7, %v5164_v54  ;;  %v2549_v53 = vstv %s5278_s23  ;;  %v2192_v54 = vstv %s5242_s24  ;;  %s5423_s23 = sld [smem:[#allocation6 + $0x382]]  ;;  %s5257_s24 = sld [smem:[#allocation6 + $0x110]] }
 0x204   : > { %5653 = vmatprep.subr.mxu0 %v9517_v9  ;;  %5670 = vmatprep.subr.mxu1 %v9517_v9 }
 0x206   : > { %5631 = vmatmul.mubr.msk.f32.gmra.mrb[16].mxu0 %vm1234_vm7, %v1233_v55  ;;  %5651 = vmatmul.mubr.msk.f32.gmra.mrb[16].mxu1 %vm1234_vm7, %v5165_v38 }
 0x207   : > { %5655 = vmatprep.mubr.msk.f32.mxu0 %vm5896_vm4, %v9517_v9  ;;  %5672 = vmatprep.mubr.msk.f32.mxu1 %vm5896_vm4, %v9517_v9 }
 0x2d5   : > { %v5629_v45 = vpop.f32.mrb[14].mxu0  ;;  %v5649_v56 = vpop.f32.mrb[14].mxu1 }
 0x2d6   : > { %v1435_v58 = vmax.f32 %v5629_v45, %v5649_v56  ;;  %v6359_v59 = vpop.f32.mrb[15].mxu0  ;;  %v6361_v60 = vpop.f32.mrb[15].mxu1  ;;  %v2557_v45 = vstv %s5279_s27  ;;  %v2200_v56 = vstv %s5243_s28  ;;  %s5185_s27 = sld [smem:[#allocation6 + $0x10]]  ;;  %s5294_s28 = sld [smem:[#allocation6 + $0x191]] }
 0x2d7   : > { %v1434_v63 = vmax.f32 %v6359_v59, %v6361_v60  ;;  %v2914_v60 = vstv %s5315_s29  ;;  %s5222_s29 = sld [smem:[#allocation6 + $0x91]] }
 0x2d8   : > { %v1463_v1 = vadd.f32 %v1450_v61, %v1435_v58  ;;  %v2906_v61 = vstv %s5314_s30  ;;  %s5329_s30 = sld [smem:[#allocation6 + $0x210]] }
 0x2d9   : > { %v6365_v3 = vpop.f32.mrb[16].mxu0  ;;  %v6367_v4 = vpop.f32.mrb[16].mxu1  ;;  %v1462_v36 = vadd.f32 %v1445_v33, %v1434_v63 }
 0x2da   : > { %v6369_v5 = vmax.f32 %v1463_v1, 0.0  ;;  %v1437_v6 = vmax.f32 %v6365_v3, %v6367_v4  ;;  %v6373_v7 = vpop.f32.mrb[17].mxu0  ;;  %v6375_v8 = vpop.f32.mrb[17].mxu1 }
 0x2db   : > { %v1436_v10 = vmax.f32 %v6373_v7, %v6375_v8  ;;  %v6407_v42 = vmax.f32 %v1462_v36, 0.0 }
 0x2dc   : > { %v1943_v11 = vmul.f32 %v1942_v50, %v6369_v5  ;;  %v1583_v12 = vmul.f32 %v1582_v57, %v6369_v5  ;;  %v1591_v16 = vmul.f32 %v1590_v13, %v6369_v5  ;;  %v1951_v17 = vmul.f32 %v1950_v14, %v6369_v5 }
 0x2dd   : > { %v2300_v20 = vmul.f32 %v2299_v18, %v6369_v5  ;;  %v2657_v21 = vmul.f32 %v2656_v19, %v6369_v5  ;;  %v2665_v15 = vmul.f32 %v2664_v22, %v6369_v5  ;;  %v2308_v24 = vmul.f32 %v2307_v23, %v6369_v5 }
 0x2de   : > { %1945 = vrot.lane.b32.xlu0 %v1943_v11, %s9450_s18  ;;  %1585 = vrot.lane.b32.xlu1 %v1583_v12, %s9450_s18  ;;  %v3014_v27 = vmul.f32 %v3013_v25, %v6369_v5  ;;  %v3371_v28 = vmul.f32 %v3370_v26, %v6369_v5  ;;  %v3022_v31 = vmul.f32 %v3021_v30, %v6369_v5  ;;  %v3620_v50 = vstv %s5386_s14  ;;  %s5293_s14 = sld [smem:[#allocation6 + $0x190]] }
 0x2df   : > { %v3379_v32 = vmul.f32 %v3378_v29, %v6369_v5  ;;  %v3728_v37 = vmul.f32 %v3727_v34, %v6369_v5  ;;  %v4085_v39 = vmul.f32 %v4084_v35, %v6369_v5  ;;  %v3736_v2 = vmul.f32 %v3735_v40, %v6369_v5 }
 0x2e0   : > { %v4093_v43 = vmul.f32 %v4092_v41, %v6369_v5  ;;  %v1836_v47 = vmul.f32 %v1835_v44, %v6407_v42  ;;  %v1475_v48 = vmul.f32 %v1474_v46, %v6407_v42  ;;  %v1844_v51 = vmul.f32 %v1843_v49, %v6407_v42 }
 0x2e1   : > { %v1483_v52 = vmul.f32 %v1482_v0, %v6407_v42  ;;  %v2550_v55 = vmul.f32 %v2549_v53, %v6407_v42  ;;  %v2193_v38 = vmul.f32 %v2192_v54, %v6407_v42  ;;  %v2558_v58 = vmul.f32 %v2557_v45, %v6407_v42 }
 0x2e2   : > { %1593 = vrot.lane.b32.xlu0 %v1591_v16, %s9448_s20  ;;  %1953 = vrot.lane.b32.xlu1 %v1951_v17, %s9448_s20  ;;  %v2201_v59 = vmul.f32 %v2200_v56, %v6407_v42  ;;  %v2915_v63 = vmul.f32 %v2914_v60, %v6407_v42  ;;  %v2907_v1 = vmul.f32 %v2906_v61, %v6407_v42  ;;  %v3263_v57 = vstv %s5350_s15  ;;  %s6449_s15 = sld [smem:[#allocation6 + $0x211]] }
 0x2e3   : > { %v3621_v11 = vmul.f32 %v3620_v50, %v6407_v42  ;;  %v3264_v12 = vmul.f32 %v3263_v57, %v6407_v42  ;;  %v3271_v13 = vstv %s5351_s16  ;;  %v3628_v14 = vstv %s5387_s17  ;;  %s6451_s16 = sld [smem:[#allocation6 + $0x111]]  ;;  %s6457_s17 = sld [smem:[#allocation6 + $0x310]] }
 0x2e4   : > { %v1965_v16 = vstv %s5221_s19  ;;  %v3272_v17 = vmul.f32 %v3271_v13, %v6407_v42  ;;  %v3629_v18 = vmul.f32 %v3628_v14, %v6407_v42  ;;  %v2322_v25 = vstv %s5257_s24  ;;  %s6459_s19 = sld [smem:[#allocation6 + $0x290]] }
 0x2e5   : > { %v1966_v19 = vmul.f32 %v1965_v16, %v6369_v5  ;;  %v1605_v26 = vstv %s5185_s27  ;;  %v2323_v30 = vmul.f32 %v2322_v25, %v6369_v5  ;;  %s6473_s24 = sld [smem:[#allocation6 + $0x390]]  ;;  %s6477_s27 = sld [smem:[#allocation6 + $0x85]] }
 0x2e6   : > { %2302 = vrot.lane.b32.xlu0 %v2300_v20, %s9450_s18  ;;  %2659 = vrot.lane.b32.xlu1 %v2657_v21, %s9450_s18  ;;  %v3977_v20 = vstv %s5422_s21  ;;  %v1614_v21 = vstv %s5186_s22  ;;  %v1606_v29 = vmul.f32 %v1605_v26, %v6369_v5  ;;  %s6465_s21 = sld [smem:[#allocation6 + $0x311]] }
 0x2e7   : > { %v1968_v22 = vrot.slane %v1966_v19, 1  ;;  %v3978_v23 = vmul.f32 %v3977_v20, %v6407_v42  ;;  %v2325_v33 = vrot.slane %v2323_v30, 1  ;;  %s6467_s22 = sld [smem:[#allocation6 + $0x291]]  ;;  %v1892_v30 = vstv %s6499_s0 }
 0x2e8   : > { %v1608_v34 = vrot.slane %v1606_v29, 1  ;;  %v3045_v44 = vstv %s6449_s15  ;;  %s6489_s15 = sld [smem:[#allocation6 + $0x5]]  ;;  %v1522_v29 = vstv %s6501_s1  ;;  %s6627_s1 = sld [smem:[#allocation6 + $0x28a]] }
 0x2e9   : > { %v2331_v46 = vstv %s6451_s16  ;;  %v3046_v49 = vmul.f32 %v3045_v44, %v6369_v5  ;;  %s6493_s16 = sld [smem:[#allocation6 + $0x185]]  ;;  %v2954_v44 = vstv %s6525_s26  ;;  %s6667_s26 = sld [smem:[#allocation6 + $0x219]] }
 0x2ea   : > { %2667 = vrot.lane.b32.xlu0 %v2665_v15, %s9448_s20  ;;  %2310 = vrot.lane.b32.xlu1 %v2308_v24, %s9448_s20  ;;  %v1615_v15 = vmul.f32 %v1614_v21, %v6369_v5  ;;  %v3985_v24 = vstv %s5423_s23  ;;  %s6471_s23 = sld [smem:[#allocation6 + $0x84]]  ;;  %v2332_v0 = vmul.f32 %v2331_v46, %v6369_v5  ;;  %v2249_v46 = vstv %s6527_s12  ;;  %s6657_s12 = sld [smem:[#allocation6 + $0x119]] }
 0x2eb   : > { %v3048_v53 = vrot.slane %v3046_v49, 1  ;;  %v1867_v13 = vstv %s6477_s27  ;;  %s6575_s27 = sld [smem:[#allocation6 + $0x10a]]  ;;  %v2963_v49 = vstv %s6537_s11 }
 0x2ec   : > { %v2334_v54 = vrot.slane %v2332_v0, 1  ;;  %v3759_v45 = vstv %s6465_s21  ;;  %s6531_s21 = sld [smem:[#allocation6 + $0x305]]  ;;  %s6665_s11 = sld [smem:[#allocation6 + $0x19a]] }
 0x2ed   : > { %v3402_v56 = vstv %s6467_s22  ;;  %v3760_v60 = vmul.f32 %v3759_v45, %v6369_v5  ;;  %s6533_s22 = sld [smem:[#allocation6 + $0x284]] }
 0x2ee   : > { %3016 = vrot.lane.b32.xlu0 %v3014_v27, %s9450_s18  ;;  %3373 = vrot.lane.b32.xlu1 %v3371_v28, %s9450_s18  ;;  %v1617_v27 = vrot.slane %v1615_v15, 1  ;;  %v3986_v28 = vmul.f32 %v3985_v24, %v6407_v42  ;;  %v3403_v61 = vmul.f32 %v3402_v56, %v6369_v5  ;;  %v1506_v26 = vstv %s6489_s15  ;;  %9697 = sst [smem:[#allocation52_spill]] %s6627_s1  ;;  %s6629_s15 = sld [smem:[#allocation6 + $0x28b]] }
 0x2ef   : > { %v3762_v50 = vrot.slane %v3760_v60, 1  ;;  %s9703_s1 = sld [smem:[#allocation25_spill]]  ;;  %9716 = sst [smem:[#allocation63_spill]] %s6667_s26  ;;  %v1912_v60 = vstv %s6559_s7 }
 0x2f0   : > { %v3405_v57 = vrot.slane %v3403_v61, 1  ;;  %9711 = sst [smem:[#allocation60_spill]] %s6657_s12  ;;  %v3320_v61 = vstv %s6561_s8  ;;  %s6803_s26 = sld [smem:[#allocation6 + $0x16]] }
 0x2f1   : > { %9680 = sst [smem:[#allocation36_spill]] %s6575_s27  ;;  %s6591_s27 = sld [smem:[#allocation6 + $0x280]] }
 0x2f2   : > { %3024 = vrot.lane.b32.xlu0 %v3022_v31, %s9448_s20  ;;  %3381 = vrot.lane.b32.xlu1 %v3379_v32, %s9448_s20  ;;  %v2688_v31 = vstv %s5294_s28  ;;  %v1974_v32 = vstv %s5222_s29  ;;  %s6479_s28 = sld [smem:[#allocation6 + $0x391]]  ;;  %s6481_s29 = sld [smem:[#allocation6 + $0x104]] }
 0x2f3   : > { %v2689_v35 = vmul.f32 %v2688_v31, %v6369_v5  ;;  %v1975_v36 = vmul.f32 %v1974_v32, %v6369_v5  ;;  %9663 = sst [smem:[#allocation20_spill]] %s6531_s21  ;;  %s6549_s21 = sld [smem:[#allocation6]]  ;;  %v2240_v31 = vstv %s6503_s2  ;;  %v2224_v32 = vstv %s6505_s3 }
 0x2f4   : > { %9664 = sst [smem:[#allocation21_spill]] %s6533_s22  ;;  %s9696_s0 = sld [smem:[#allocation20_spill]] }
 0x2f5   : > { %v2691_v40 = vrot.slane %v2689_v35, 1  ;;  %v1977_v41 = vrot.slane %v1975_v36, 1  ;;  %9698 = sst [smem:[#allocation53_spill]] %s6629_s15  ;;  %s9705_s15 = sld [smem:[#allocation26_spill]] }
 0x2f6   : > { %3730 = vrot.lane.b32.xlu0 %v3728_v37, %s9450_s18  ;;  %4087 = vrot.lane.b32.xlu1 %v4085_v39, %s9450_s18  ;;  %v3036_v37 = vstv %s5329_s30  ;;  %v2679_v39 = vstv %s5293_s14  ;;  %s6483_s30 = sld [smem:[#allocation6 + $0x4]]  ;;  %s6487_s14 = sld [smem:[#allocation6 + $0x87]] }
 0x2f7   : > { %9686 = sst [smem:[#allocation42_spill]] %s6591_s27  ;;  %s6689_s8 = sld [smem:[#allocation6 + $0x31a]] }
 0x2f8   : > { %v4116_v14 = vstv %s6479_s28  ;;  %s6577_s28 = sld [smem:[#allocation6 + $0x387]]  ;;  %v2215_v20 = vstv %s6481_s29  ;;  %s6593_s29 = sld [smem:[#allocation6 + $0x20a]] }
 0x2f9   : > { %9671 = sst [smem:[#allocation27_spill]] %s6549_s21  ;;  %s6565_s21 = sld [smem:[#allocation6 + $0x180]]  ;;  %v4117_v19 = vmul.f32 %v4116_v14, %v6369_v5  ;;  %v2216_v15 = vmul.f32 %v2215_v20, %v6407_v42 }
 0x2fa   : > { %3738 = vrot.lane.b32.xlu0 %v3736_v2, %s9448_s20  ;;  %4095 = vrot.lane.b32.xlu1 %v4093_v43, %s9448_s20  ;;  %v3037_v2 = vmul.f32 %v3036_v37, %v6369_v5  ;;  %v2680_v43 = vmul.f32 %v2679_v39, %v6369_v5  ;;  %s6607_s27 = sld [smem:[#allocation6 + $0x380]]  ;;  %v1507_v39 = vmul.f32 %v1506_v26, %v6407_v42  ;;  %9715 = sst [smem:[#allocation62_spill]] %s6665_s11 }
 0x2fb   : > { %v2218_v35 = vrot.slane %v2216_v15, 1  ;;  %v1832_v45 = vstv %s9705_s15  ;;  %s6683_s15 = sld [smem:[#allocation6 + $0x319]]  ;;  %s9726_s7 = sld [smem:[#allocation42_spill]]  ;;  %v6715_v15 = vpop.permute.xlu1 %1454 }
 0x2fc   : > { %v1497_v21 = vstv %s6483_s30  ;;  %s6597_s30 = sld [smem:[#allocation6 + $0xa]]  ;;  %v1883_v25 = vstv %s6487_s14  ;;  %s6623_s14 = sld [smem:[#allocation6 + $0x10b]] }
 0x2fd   : > { %v1498_v24 = vmul.f32 %v1497_v21, %v6407_v42  ;;  %v1884_v37 = vmul.f32 %v1883_v25, %v6407_v42  ;;  %9727 = sst [smem:[#allocation69_spill]] %s6689_s8  ;;  %v3617_v21 = vstv %s6589_s6  ;;  %s6809_s11 = sld [smem:[#allocation6 + $0x206]] }
 0x2fe   : > { %1838 = vrot.lane.b32.xlu0 %v1836_v47, %s9450_s18  ;;  %1477 = vrot.lane.b32.xlu1 %v1475_v48, %s9450_s18  ;;  %v3039_v47 = vrot.slane %v3037_v2, 1  ;;  %v2682_v48 = vrot.slane %v2680_v43, 1  ;;  %9681 = sst [smem:[#allocation37_spill]] %s6577_s28  ;;  %v3643_v2 = vstv %s6521_s25  ;;  %v2597_v43 = vstv %s6523_s13  ;;  %s6651_s13 = sld [smem:[#allocation6 + $0x1a]] }
 0x2ff   : > { %9676 = sst [smem:[#allocation32_spill]] %s6565_s21  ;;  %s6581_s21 = sld [smem:[#allocation6 + $0x200]]  ;;  %v1500_v36 = vrot.slane %v1498_v24, 1  ;;  %v6717_v24 = vpop.permute.xlu0 %1459 }
 0x300   : > { %9687 = sst [smem:[#allocation43_spill]] %s6593_s29  ;;  %s6605_s29 = sld [smem:[#allocation6 + $0x8b]] }
 0x301   : > { %9691 = sst [smem:[#allocation47_spill]] %s6607_s27  ;;  %s7039_s2 = sld [smem:[#allocation6 + $0x19c]] }
 0x302   : > { %1846 = vrot.lane.b32.xlu0 %v1844_v51, %s9448_s20  ;;  %1485 = vrot.lane.b32.xlu1 %v1483_v52, %s9448_s20  ;;  %v3750_v51 = vstv %s6457_s17  ;;  %v3393_v52 = vstv %s6459_s19  ;;  %s6509_s17 = sld [smem:[#allocation6 + $0x205]]  ;;  %s6511_s19 = sld [smem:[#allocation6 + $0x8]] }
 0x303   : > { %9688 = sst [smem:[#allocation44_spill]] %s6597_s30 }
 0x304   : > { %s6613_s30 = sld [smem:[#allocation6 + $0x30a]]  ;;  %9695 = sst [smem:[#allocation51_spill]] %s6623_s14 }
 0x305   : > { %9682 = sst [smem:[#allocation38_spill]] %s6581_s21  ;;  %s9702_s14 = sld [smem:[#allocation24_spill]] }
 0x306   : > { %2552 = vrot.lane.b32.xlu0 %v2550_v55, %s9450_s18  ;;  %2195 = vrot.lane.b32.xlu1 %v2193_v38, %s9450_s18  ;;  %v3751_v55 = vmul.f32 %v3750_v51, %v6369_v5  ;;  %v3394_v38 = vmul.f32 %v3393_v52, %v6369_v5  ;;  %9690 = sst [smem:[#allocation46_spill]] %s6605_s29  ;;  %v1886_v51 = vrot.slane %v1884_v37, 2  ;;  %v1509_v52 = vrot.slane %v1507_v39, 1  ;;  %s9732_s8 = sld [smem:[#allocation44_spill]] }
 0x307   : > { %9708 = sst [smem:[#allocation58_spill]] %s6651_s13  ;;  %s6673_s13 = sld [smem:[#allocation6 + $0x19]] }
 0x308   : > { %9654 = sst [smem:[#allocation12_spill]] %s6509_s17 }
 0x309   : > { %9655 = sst [smem:[#allocation13_spill]] %s6511_s19 }
 0x30a   : > { %2560 = vrot.lane.b32.xlu0 %v2558_v58, %s9448_s20  ;;  %2203 = vrot.lane.b32.xlu1 %v2201_v59, %s9448_s20  ;;  %v3753_v58 = vrot.slane %v3751_v55, 1  ;;  %v3396_v59 = vrot.slane %v3394_v38, 1  ;;  %9692 = sst [smem:[#allocation48_spill]] %s6613_s30  ;;  %v3311_v38 = vstv %s9703_s1  ;;  %s6697_s1 = sld [smem:[#allocation6 + $0x3]] }
 0x30b   : > { %v3668_v55 = vstv %s9702_s14  ;;  %9723 = sst [smem:[#allocation67_spill]] %s6683_s15  ;;  %s6703_s14 = sld [smem:[#allocation6 + $0x86]] }
 0x30c   : > { %9774 = sst [smem:[#allocation93_spill]] %s6803_s26  ;;  %s6865_s15 = sld [smem:[#allocation6 + $0x314]] }
 0x30d   : > { %9719 = sst [smem:[#allocation64_spill]] %s6673_s13  ;;  %s6819_s26 = sld [smem:[#allocation6 + $0x197]] }
 0x30e   : > { %2917 = vrot.lane.b32.xlu0 %v2915_v63, %s9448_s20  ;;  %2909 = vrot.lane.b32.xlu1 %v2907_v1, %s9450_s18  ;;  %v1858_v63 = vstv %s6471_s23  ;;  %v4107_v1 = vstv %s6473_s24  ;;  %s6553_s23 = sld [smem:[#allocation6 + $0x308]]  ;;  %s6555_s24 = sld [smem:[#allocation6 + $0x384]] }
 0x30f   : > { %9775 = sst [smem:[#allocation94_spill]] %s6809_s11  ;;  %s6825_s13 = sld [smem:[#allocation6 + $0x283]] }
 0x310   : > { %9730 = sst [smem:[#allocation71_spill]] %s6697_s1  ;;  %s6855_s1 = sld [smem:[#allocation6 + $0x286]] }
 0x311   : > { %9731 = sst [smem:[#allocation72_spill]] %s6703_s14  ;;  %s6939_s11 = sld [smem:[#allocation6 + $0xc]] }
 0x312   : > { %3623 = vrot.lane.b32.xlu0 %v3621_v11, %s9450_s18  ;;  %3266 = vrot.lane.b32.xlu1 %v3264_v12, %s9450_s18  ;;  %v1859_v11 = vmul.f32 %v1858_v63, %v6407_v42  ;;  %v4108_v12 = vmul.f32 %v4107_v1, %v6369_v5  ;;  %s6847_s14 = sld [smem:[#allocation6 + $0x306]]  ;;  %9799 = sst [smem:[#allocation103_spill]] %s6865_s15 }
 0x313   : > { %9780 = sst [smem:[#allocation16_spill]] %s6819_s26  ;;  %s6941_s26 = sld [smem:[#allocation6 + $0x317]] }
 0x314   : > { %9672 = sst [smem:[#allocation28_spill]] %s6553_s23  ;;  %s6571_s23 = sld [smem:[#allocation6 + $0x385]]  ;;  %v1861_v16 = vrot.slane %v1859_v11, 1  ;;  %v1893_v11 = vmul.f32 %v1892_v30, %v6407_v42  ;;  %v1552_v30 = vstv %s9732_s8 }
 0x315   : > { %9673 = sst [smem:[#allocation29_spill]] %s6555_s24  ;;  %s9709_s25 = sld [smem:[#allocation28_spill]] }
 0x316   : > { %3274 = vrot.lane.b32.xlu0 %v3272_v17, %s9448_s20  ;;  %3631 = vrot.lane.b32.xlu1 %v3629_v18, %s9448_s20  ;;  %v4110_v17 = vrot.slane %v4108_v12, 1  ;;  %v1868_v18 = vmul.f32 %v1867_v13, %v6407_v42  ;;  %v1523_v12 = vmul.f32 %v1522_v29, %v6407_v42  ;;  %v1895_v25 = vrot.slane %v1893_v11, 2  ;;  %s6771_s8 = sld [smem:[#allocation6 + $0x94]]  ;;  %9784 = sst [smem:[#allocation17_spill]] %s6825_s13 }
 0x317   : > { %9794 = sst [smem:[#allocation18_spill]] %s6855_s1  ;;  %s6961_s13 = sld [smem:[#allocation6 + $0x297]] }
 0x318   : > { %v1525_v26 = vrot.slane %v1523_v12, 2  ;;  %9790 = sst [smem:[#allocation100_spill]] %s6847_s14  ;;  %s6971_s1 = sld [smem:[#allocation6 + $0x189]] }
 0x319   : > { %9821 = sst [smem:[#allocation112_spill]] %s6941_s26  ;;  %s7069_s26 = sld [smem:[#allocation6 + $0x20]] }
 0x31a   : > { %1969 = vrot.lane.b32.xlu0 %v1968_v22, %s9450_s18  ;;  %3980 = vrot.lane.b32.xlu1 %v3978_v23, %s9450_s18  ;;  %9679 = sst [smem:[#allocation35_spill]] %s6571_s23  ;;  %s6587_s23 = sld [smem:[#allocation6 + $0x388]]  ;;  %v1870_v22 = vrot.slane %v1868_v18, 1  ;;  %v4119_v23 = vrot.slane %v4117_v19, 1  ;;  %v2903_v18 = vstv %s6581_s21  ;;  %v2639_v19 = vstv %s6583_s10 }
 0x31b   : > { %s9718_s12 = sld [smem:[#allocation35_spill]]  ;;  %s6727_s10 = sld [smem:[#allocation6 + $0x113]] }
 0x31c   : > { %9761 = sst [smem:[#allocation86_spill]] %s6771_s8  ;;  %s6903_s8 = sld [smem:[#allocation6 + $0x1c]] }
 0x31d   : > { %s6955_s14 = sld [smem:[#allocation6 + $0x8c]]  ;;  %9845 = sst [smem:[#allocation31_spill]] %s7039_s2 }
 0x31e   : > { %1618 = vrot.lane.b32.xlu0 %v1617_v27, %s9448_s20  ;;  %3988 = vrot.lane.b32.xlu1 %v3986_v28, %s9448_s20  ;;  %v2581_v27 = vstv %s6493_s16  ;;  %s9699_s16 = sld [smem:[#allocation23_spill]]  ;;  %s6977_s15 = sld [smem:[#allocation6 + $0x11c]] }
 0x31f   : > { %9820 = sst [smem:[#allocation23_spill]] %s6939_s11 }
 0x320   : > { %9684 = sst [smem:[#allocation40_spill]] %s6587_s23  ;;  %s6599_s23 = sld [smem:[#allocation6 + $0x20b]] }
 0x321   : > { %v4009_v14 = vstv %s9718_s12  ;;  %9742 = sst [smem:[#allocation77_spill]] %s6727_s10  ;;  %s6743_s10 = sld [smem:[#allocation6 + $0x96]] }
 0x322   : > { %2326 = vrot.lane.b32.xlu0 %v2325_v33, %s9450_s18  ;;  %1609 = vrot.lane.b32.xlu1 %v1608_v34, %s9450_s18  ;;  %v2938_v33 = vstv %s6509_s17  ;;  %v1531_v34 = vstv %s6511_s19  ;;  %s6635_s19 = sld [smem:[#allocation6 + $0x38a]]  ;;  %s6637_s17 = sld [smem:[#allocation6 + $0x38b]] }
 0x323   : > { %v2939_v11 = vmul.f32 %v2938_v33, %v6407_v42  ;;  %v1532_v12 = vmul.f32 %v1531_v34, %v6407_v42  ;;  %9825 = sst [smem:[#allocation116_spill]] %s6955_s14  ;;  %s7025_s11 = sld [smem:[#allocation6 + $0x19d]] }
 0x324   : > { %v3295_v0 = vstv %s9699_s16  ;;  %s9714_s16 = sld [smem:[#allocation33_spill]]  ;;  %9849 = sst [smem:[#allocation35_spill]] %s7069_s26 }
 0x325   : > { %v2941_v34 = vrot.slane %v2939_v11, 1  ;;  %v1534_v33 = vrot.slane %v1532_v12, 2  ;;  %v3644_v11 = vmul.f32 %v3643_v2, %v6407_v42  ;;  %v3312_v12 = vmul.f32 %v3311_v38, %v6407_v42 }
 0x326   : > { %2692 = vrot.lane.b32.xlu0 %v2691_v40, %s9448_s20  ;;  %1978 = vrot.lane.b32.xlu1 %v1977_v41, %s9448_s20  ;;  %s6495_s20 = sld [smem:[#allocation6 + $0x184]]  ;;  %9689 = sst [smem:[#allocation45_spill]] %s6599_s23  ;;  %v2929_v41 = vstv %s6517_s4  ;;  %v1914_v38 = vmul.f32 %v1912_v60, %v6369_v5 }
 0x327   : > { %s6615_s23 = sld [smem:[#allocation6 + $0x18a]]  ;;  %s9707_s4 = sld [smem:[#allocation27_spill]]  ;;  %v2930_v9 = vmul.f32 %v2929_v41, %v6407_v42  ;;  %v3646_v2 = vrot.slane %v3644_v11, 1 }
 0x328   : > { %9700 = sst [smem:[#allocation54_spill]] %s6635_s19  ;;  %s9734_s12 = sld [smem:[#allocation45_spill]] }
 0x329   : > { %9701 = sst [smem:[#allocation55_spill]] %s6637_s17  ;;  %s6817_s17 = sld [smem:[#allocation6 + $0x114]] }
 0x32a   : > { %3040 = vrot.lane.b32.xlu0 %v3039_v47, %s9450_s18  ;;  %2683 = vrot.lane.b32.xlu1 %v2682_v48, %s9450_s18  ;;  %s6515_s18 = sld [smem:[#allocation6 + $0x188]]  ;;  %v3652_v47 = vstv %s9696_s0  ;;  %v3286_v48 = vstv %s6533_s22  ;;  %s9712_s0 = sld [smem:[#allocation32_spill]] }
 0x32b   : > { %s6659_s22 = sld [smem:[#allocation6 + $0x93]]  ;;  %v2189_v1 = vstv %s9714_s16  ;;  %s9728_s16 = sld [smem:[#allocation43_spill]]  ;;  %v3287_v62 = vmul.f32 %v3286_v48, %v6407_v42 }
 0x32c   : > { %v2572_v28 = vstv %s6495_s20  ;;  %s6621_s20 = sld [smem:[#allocation6 + $0x30b]]  ;;  %s6895_s19 = sld [smem:[#allocation6 + $0x316]] }
 0x32d   : > { %9693 = sst [smem:[#allocation49_spill]] %s6615_s23  ;;  %s6645_s23 = sld [smem:[#allocation6 + $0x83]]  ;;  %v1471_v56 = vstv %s9707_s4  ;;  %v3289_v48 = vrot.slane %v3287_v62, 1 }
 0x32e   : > { %3049 = vrot.lane.b32.xlu0 %v3048_v53, %s9658_s5  ;;  %2335 = vrot.lane.b32.xlu1 %v2334_v54, %s9658_s5  ;;  %v2582_v53 = vmul.f32 %v2581_v27, %v6407_v42  ;;  %v2573_v54 = vmul.f32 %v2572_v28, %v6407_v42  ;;  %s6681_s4 = sld [smem:[#allocation6 + $0x9a]]  ;;  %s9737_s21 = sld [smem:[#allocation49_spill]]  ;;  %v2241_v27 = vmul.f32 %v2240_v31, %v6407_v42  ;;  %v2996_v29 = vstv %s9734_s12 }
 0x32f   : > { %v2225_v28 = vmul.f32 %v2224_v32, %v6407_v42  ;;  %v3697_v31 = vstv %s6613_s30  ;;  %9749 = sst [smem:[#allocation13_spill]] %s6743_s10  ;;  %s6751_s12 = sld [smem:[#allocation6 + $0x194]] }
 0x330   : > { %9656 = sst [smem:[#allocation14_spill]] %s6515_s18  ;;  %v2606_v40 = vstv %s6515_s18  ;;  %s6653_s18 = sld [smem:[#allocation6 + $0x103]]  ;;  %v2546_v63 = vstv %s9712_s0 }
 0x331   : > { %9713 = sst [smem:[#allocation61_spill]] %s6659_s22  ;;  %s9720_s22 = sld [smem:[#allocation36_spill]] }
 0x332   : > { %3754 = vrot.lane.b32.xlu0 %v3753_v58, %s9667_s9  ;;  %3397 = vrot.lane.b32.xlu1 %v3396_v59, %s9667_s9  ;;  %9694 = sst [smem:[#allocation50_spill]] %s6621_s20  ;;  %s6643_s20 = sld [smem:[#allocation6 + $0x99]]  ;;  %v3677_v58 = vstv %s9709_s25  ;;  %v4000_v59 = vstv %s6555_s24 }
 0x333   : > { %9706 = sst [smem:[#allocation57_spill]] %s6645_s23  ;;  %s6675_s23 = sld [smem:[#allocation6 + $0x21a]]  ;;  %v4001_v11 = vmul.f32 %v4000_v59, %v6407_v42  ;;  %v1918_v59 = vrot.slane %v1914_v38, 7 }
 0x334   : > { %9722 = sst [smem:[#allocation66_spill]] %s6681_s4  ;;  %s9724_s24 = sld [smem:[#allocation40_spill]]  ;;  %v2626_v32 = vstv %s9737_s21 }
 0x335   : > { %s6687_s25 = sld [smem:[#allocation6 + $0x199]]  ;;  %s6695_s0 = sld [smem:[#allocation6 + $0x11a]]  ;;  %v2627_v8 = vmul.f32 %v2626_v32, %v6407_v42 }
 0x336   : > { %3763 = vrot.lane.b32.xlu0 %v3762_v50, %s9658_s5  ;;  %3406 = vrot.lane.b32.xlu1 %v3405_v57, %s9658_s5  ;;  %9710 = sst [smem:[#allocation59_spill]] %s6653_s18  ;;  %s9717_s18 = sld [smem:[#allocation34_spill]]  ;;  %v2584_v50 = vrot.slane %v2582_v53, 1  ;;  %v2575_v57 = vrot.slane %v2573_v54, 1 }
 0x337   : > { %s9738_s6 = sld [smem:[#allocation50_spill]]  ;;  %9752 = sst [smem:[#allocation81_spill]] %s6751_s12 }
 0x338   : > { %9704 = sst [smem:[#allocation56_spill]] %s6643_s20  ;;  %s6773_s12 = sld [smem:[#allocation6 + $0x213]] }
 0x339   : > { %9721 = sst [smem:[#allocation65_spill]] %s6675_s23  ;;  %s6789_s20 = sld [smem:[#allocation6 + $0x186]] }
 0x33a   : > { %1862 = vrot.lane.b32.xlu0 %v1861_v16, %s9667_s9  ;;  %4111 = vrot.lane.b32.xlu1 %v4110_v17, %s9667_s9  ;;  %v2269_v16 = vstv %s9720_s22  ;;  %v4025_v17 = vstv %s6577_s28  ;;  %s6711_s28 = sld [smem:[#allocation6 + $0x299]]  ;;  %s6713_s22 = sld [smem:[#allocation6 + $0x29a]] }
 0x33b   : > { %9725 = sst [smem:[#allocation68_spill]] %s6687_s25  ;;  %s6705_s25 = sld [smem:[#allocation6 + $0x14]]  ;;  %v4034_v20 = vstv %s9724_s24  ;;  %v2270_v7 = vmul.f32 %v2269_v16, %v6407_v42 }
 0x33c   : > { %v1565_v13 = vstv %s9717_s18  ;;  %9729 = sst [smem:[#allocation70_spill]] %s6695_s0  ;;  %s6725_s24 = sld [smem:[#allocation6 + $0x183]] }
 0x33d   : > { %v3710_v37 = vstv %s9738_s6  ;;  %s6763_s18 = sld [smem:[#allocation6 + $0x13]]  ;;  %s6801_s6 = sld [smem:[#allocation6 + $0x116]] }
 0x33e   : > { %1871 = vrot.lane.b32.xlu0 %v1870_v22, %s9658_s5  ;;  %4120 = vrot.lane.b32.xlu1 %v4119_v23, %s9658_s5  ;;  %v3260_v22 = vstv %s9726_s7  ;;  %v2983_v23 = vstv %s9728_s16  ;;  %s9739_s7 = sld [smem:[#allocation51_spill]]  ;;  %s6765_s16 = sld [smem:[#allocation6 + $0x17]] }
 0x33f   : > { %9762 = sst [smem:[#allocation87_spill]] %s6773_s12  ;;  %s6841_s21 = sld [smem:[#allocation6 + $0x196]] }
 0x340   : > { %9735 = sst [smem:[#allocation74_spill]] %s6711_s28  ;;  %s6735_s28 = sld [smem:[#allocation6 + $0x6]] }
 0x341   : > { %9733 = sst [smem:[#allocation73_spill]] %s6705_s25  ;;  %s6839_s0 = sld [smem:[#allocation6 + $0x313]] }
 0x342   : > { %2219 = vrot.lane.b32.xlu0 %v2218_v35, %s9667_s9  ;;  %1501 = vrot.lane.b32.xlu1 %v1500_v36, %s9667_s9  ;;  %9736 = sst [smem:[#allocation75_spill]] %s6713_s22  ;;  %v1925_v35 = vstv %s6605_s29  ;;  %v3974_v36 = vstv %s6607_s27  ;;  %s6749_s29 = sld [smem:[#allocation6 + $0x106]] }
 0x343   : > { %9740 = sst [smem:[#allocation76_spill]] %s6725_s24  ;;  %s6733_s22 = sld [smem:[#allocation6 + $0x399]] }
 0x344   : > { %s6741_s24 = sld [smem:[#allocation6 + $0x39a]]  ;;  %v2282_v39 = vstv %s9739_s7  ;;  %9758 = sst [smem:[#allocation84_spill]] %s6763_s18 }
 0x345   : > { %9759 = sst [smem:[#allocation85_spill]] %s6765_s16  ;;  %s6779_s18 = sld [smem:[#allocation6 + $0x203]] }
 0x346   : > { %1887 = vrot.lane.b32.xlu0 %v1886_v51, %s9667_s9  ;;  %1510 = vrot.lane.b32.xlu1 %v1509_v52, %s9658_s5  ;;  %9745 = sst [smem:[#allocation79_spill]] %s6735_s28  ;;  %s6781_s16 = sld [smem:[#allocation6 + $0x193]]  ;;  %v1566_v52 = vmul.f32 %v1565_v13, %v6407_v42 }
 0x347   : > { %s6787_s27 = sld [smem:[#allocation6 + $0x303]]  ;;  %9768 = sst [smem:[#allocation89_spill]] %s6789_s20 }
 0x348   : > { %9751 = sst [smem:[#allocation80_spill]] %s6749_s29  ;;  %s6811_s7 = sld [smem:[#allocation6 + $0x214]] }
 0x349   : > { %9744 = sst [smem:[#allocation78_spill]] %s6733_s22  ;;  %s6849_s30 = sld [smem:[#allocation6 + $0x216]] }
 0x34a   : > { %2585 = vrot.lane.b32.xlu0 %v2584_v50, %s9658_s5  ;;  %2576 = vrot.lane.b32.xlu1 %v2575_v57, %s9667_s9  ;;  %9748 = sst [smem:[#allocation12_spill]] %s6741_s24  ;;  %v2243_v50 = vrot.slane %v2241_v27, 2  ;;  %v2227_v57 = vrot.slane %v2225_v28, 1  ;;  %v2607_v27 = vmul.f32 %v2606_v40, %v6407_v42  ;;  %v2932_v40 = vrot.slane %v2930_v9, 1  ;;  %s6863_s4 = sld [smem:[#allocation6 + $0x383]] }
 0x34b   : > { %9765 = sst [smem:[#allocation14_spill]] %s6779_s18  ;;  %s6877_s29 = sld [smem:[#allocation6 + $0x293]]  ;;  %v3296_v28 = vmul.f32 %v3295_v0, %v6407_v42  ;;  %v3669_v0 = vmul.f32 %v3668_v55, %v6407_v42  ;;  %v3314_v55 = vrot.slane %v3312_v12, 2  ;;  %v3321_v12 = vmul.f32 %v3320_v61, %v6407_v42 }
 0x34c   : > { %9766 = sst [smem:[#allocation15_spill]] %s6781_s16  ;;  %v2609_v41 = vrot.slane %v2607_v27, 2  ;;  %s6879_s24 = sld [smem:[#allocation6 + $0x89]] }
 0x34d   : > { %9767 = sst [smem:[#allocation88_spill]] %s6787_s27  ;;  %s6885_s10 = sld [smem:[#allocation6 + $0x217]]  ;;  %v3298_v62 = vrot.slane %v3296_v28, 1  ;;  %v3671_v28 = vrot.slane %v3669_v0, 2 }
 0x34e   : > { %1896 = vrot.lane.b32.xlu0 %v1895_v25, %s9658_s5  ;;  %1526 = vrot.lane.b32.xlu1 %v1525_v26, %s9667_s9  ;;  %9773 = sst [smem:[#allocation92_spill]] %s6801_s6  ;;  %v2598_v26 = vmul.f32 %v2597_v43, %v6407_v42  ;;  %v2955_v43 = vmul.f32 %v2954_v44, %v6407_v42  ;;  %v2250_v25 = vmul.f32 %v2249_v46, %v6407_v42  ;;  %s6887_s28 = sld [smem:[#allocation6 + $0x294]] }
 0x34f   : > { %9776 = sst [smem:[#allocation95_spill]] %s6811_s7  ;;  %s6827_s7 = sld [smem:[#allocation6 + $0x97]] }
 0x350   : > { %v6753_v53 = vpop.permute.xlu0 %1945  ;;  %v6755_v54 = vpop.permute.xlu1 %1585  ;;  %9787 = sst [smem:[#allocation98_spill]] %s6839_s0  ;;  %s6857_s0 = sld [smem:[#allocation6 + $0x117]]  ;;  %v2600_v9 = vrot.slane %v2598_v26, 2  ;;  %v2957_v44 = vrot.slane %v2955_v43, 2  ;;  %v2252_v46 = vrot.slane %v2250_v25, 2  ;;  %v3653_v26 = vmul.f32 %v3652_v47, %v6407_v42 }
 0x351   : > { %9753 = vst [vmem:[#allocation82_spill] sm:$0xff] %v6753_v53  ;;  %9755 = vst [vmem:[#allocation83_spill] sm:$0xff] %v6755_v54  ;;  %9788 = sst [smem:[#allocation99_spill]] %s6841_s21  ;;  %s6893_s22 = sld [smem:[#allocation6 + $0x109]]  ;;  %v2964_v25 = vmul.f32 %v2963_v49, %v6407_v42  ;;  %v1913_v43 = vmul.f32 %v1912_v60, %v6407_v42  ;;  %v1567_v60 = vmul.f32 %v1565_v13, %v6369_v5 }
 0x352   : > { %2244 = vrot.lane.b32.xlu0 %v2243_v50, %s9667_s9  ;;  %2228 = vrot.lane.b32.xlu1 %v2227_v57, %s9658_s5  ;;  %9791 = sst [smem:[#allocation101_spill]] %s6849_s30  ;;  %s9810_s23 = sld [smem:[#allocation95_spill]]  ;;  %v3655_v47 = vrot.slane %v3653_v26, 1  ;;  %v1464_v13 = vadd.f32 %v6715_v15, %v1436_v10  ;;  %v1570_v15 = vrot.slane %v1566_v52, 7  ;;  %v2640_v52 = vmul.f32 %v2639_v19, %v6407_v42 }
 0x353   : > { %9798 = sst [smem:[#allocation102_spill]] %s6863_s4  ;;  %s6901_s12 = sld [smem:[#allocation6 + $0x9c]]  ;;  %v2966_v49 = vrot.slane %v2964_v25, 2  ;;  %v3678_v25 = vmul.f32 %v3677_v58, %v6407_v42  ;;  %v1917_v51 = vrot.slane %v1913_v43, 7  ;;  %v3711_v58 = vmul.f32 %v3710_v37, %v6407_v42 }
 0x354   : > { %v6791_v50 = vpop.permute.xlu0 %1593  ;;  %v6793_v57 = vpop.permute.xlu1 %1953  ;;  %9802 = sst [smem:[#allocation106_spill]] %s6879_s24  ;;  %s6915_s6 = sld [smem:[#allocation6 + $0x386]]  ;;  %v7099_v61 = vmax.f32 %v1464_v13, 0.0 }
 0x355   : > { %9769 = vst [vmem:[#allocation90_spill] sm:$0xff] %v6791_v50  ;;  %9771 = vst [vmem:[#allocation91_spill] sm:$0xff] %v6793_v57  ;;  %9804 = sst [smem:[#allocation107_spill]] %s6885_s10  ;;  %s6917_s27 = sld [smem:[#allocation6 + $0x296]]  ;;  %v1919_v10 = vsel %vm1545_vm8, %v1917_v51, %v1918_v59  ;;  %v4026_v51 = vmul.f32 %v4025_v17, %v6407_v42  ;;  %v7113_v59 = vmul.f32 %v1832_v45, %v6407_v42  ;;  %v2274_v45 = vrot.slane %v2270_v7, 7 }
 0x356   : > { %2942 = vrot.lane.b32.xlu0 %v2941_v34, %s9658_s5  ;;  %1535 = vrot.lane.b32.xlu1 %v1534_v33, %s9658_s5  ;;  %9796 = sst [smem:[#allocation19_spill]] %s6857_s0  ;;  %s6923_s18 = sld [smem:[#allocation6 + $0x393]]  ;;  %v2984_v17 = vmul.f32 %v2983_v23, %v6407_v42  ;;  %v2997_v7 = vmul.f32 %v2996_v29, %v6407_v42 }
 0x357   : > { %9805 = sst [smem:[#allocation108_spill]] %s6887_s28  ;;  %s6925_s16 = sld [smem:[#allocation6 + $0x209]] }
 0x358   : > { %v6829_v33 = vpop.permute.xlu0 %2302  ;;  %v6831_v34 = vpop.permute.xlu1 %2659  ;;  %9808 = sst [smem:[#allocation20_spill]] %s6893_s22  ;;  %s6931_s21 = sld [smem:[#allocation6 + $0x1d]]  ;;  %v2988_v4 = vrot.slane %v2984_v17, 7  ;;  %v7172_v17 = vmul.f32 %v3617_v21, %v6407_v42  ;;  %v1927_v21 = vmul.f32 %v1925_v35, %v6369_v5 }
 0x359   : > { %9785 = vst [vmem:[#allocation96_spill] sm:$0xff] %v6829_v33  ;;  %9786 = vst [vmem:[#allocation97_spill] sm:$0xff] %v6831_v34  ;;  %9809 = sst [smem:[#allocation21_spill]] %s6895_s19  ;;  %s6953_s30 = sld [smem:[#allocation6 + $0x20c]] }
 0x35a   : > { %2610 = vrot.lane.b32.xlu0 %v2609_v41, %s9658_s5  ;;  %2933 = vrot.lane.b32.xlu1 %v2932_v40, %s9667_s9  ;;  %9815 = sst [smem:[#allocation95_spill]] %s6915_s6  ;;  %s6969_s20 = sld [smem:[#allocation6 + $0x9d]]  ;;  %9874 = vst [vmem:[#allocation132_spill] sm:$0xff] %v7172_v17 }
 0x35b   : > { %9816 = sst [smem:[#allocation111_spill]] %s6917_s27  ;;  %s6933_s27 = sld [smem:[#allocation6 + $0x9]] }
 0x35c   : > { %v6867_v40 = vpop.permute.xlu0 %2667  ;;  %v6869_v41 = vpop.permute.xlu1 %2310  ;;  %s6963_s25 = sld [smem:[#allocation6 + $0x309]]  ;;  %s6979_s0 = sld [smem:[#allocation6 + $0x18c]] }
 0x35d   : > { %9800 = vst [vmem:[#allocation104_spill] sm:$0xff] %v6867_v40  ;;  %9801 = vst [vmem:[#allocation105_spill] sm:$0xff] %v6869_v41  ;;  %s6991_s19 = sld [smem:[#allocation6 + $0x394]]  ;;  %s7005_s24 = sld [smem:[#allocation6 + $0x289]] }
 0x35e   : > { %3647 = vrot.lane.b32.xlu0 %v3646_v2, %s9667_s9  ;;  %2601 = vrot.lane.b32.xlu1 %v2600_v9, %s9667_s9  ;;  %s6997_s22 = sld [smem:[#allocation6 + $0x30c]]  ;;  %s7011_s6 = sld [smem:[#allocation6 + $0x9f]] }
 0x35f   : > { %9824 = sst [smem:[#allocation115_spill]] %s6953_s30  ;;  %s7003_s10 = sld [smem:[#allocation6 + $0x10c]] }
 0x360   : > { %v6905_v9 = vpop.permute.xlu0 %3016  ;;  %v6907_v2 = vpop.permute.xlu1 %3373  ;;  %s7013_s4 = sld [smem:[#allocation6 + $0x28c]]  ;;  %9842 = sst [smem:[#allocation122_spill]] %s7025_s11 }
 0x361   : > { %9811 = vst [vmem:[#allocation109_spill] sm:$0xff] %v6905_v9  ;;  %9812 = vst [vmem:[#allocation110_spill] sm:$0xff] %v6907_v2  ;;  %9819 = sst [smem:[#allocation22_spill]] %s6933_s27  ;;  %s7041_s27 = sld [smem:[#allocation6 + $0x389]] }
 0x362   : > { %2958 = vrot.lane.b32.xlu0 %v2957_v44, %s9667_s9  ;;  %2253 = vrot.lane.b32.xlu1 %v2252_v46, %s9658_s5  ;;  %9829 = sst [smem:[#allocation24_spill]] %s6979_s0  ;;  %s9884_s28 = sld [smem:[#allocation53_spill]] }
 0x363   : > { %9832 = sst [smem:[#allocation25_spill]] %s6991_s19  ;;  %s9885_s3 = sld [smem:[#allocation54_spill]] }
 0x364   : > { %v6943_v44 = vpop.permute.xlu0 %3024  ;;  %v6945_v46 = vpop.permute.xlu1 %3381  ;;  %9833 = sst [smem:[#allocation119_spill]] %s6997_s22  ;;  %s9892_s11 = sld [smem:[#allocation55_spill]] }
 0x365   : > { %9822 = vst [vmem:[#allocation113_spill] sm:$0xff] %v6943_v44  ;;  %9823 = vst [vmem:[#allocation114_spill] sm:$0xff] %v6945_v46  ;;  %9837 = sst [smem:[#allocation28_spill]] %s7003_s10  ;;  %s7224_s0 = sld [smem:[#allocation6 + $0x1f]] }
 0x366   : > { %3656 = vrot.lane.b32.xlu0 %v3655_v47, %s9658_s5  ;;  %3290 = vrot.lane.b32.xlu1 %v3289_v48, %s9667_s9  ;;  %9838 = sst [smem:[#allocation29_spill]] %s7005_s24  ;;  %s9883_s24 = sld [smem:[#allocation52_spill]] }
 0x367   : > { %9839 = sst [smem:[#allocation30_spill]] %s7013_s4  ;;  %s9898_s22 = sld [smem:[#allocation56_spill]] }
 0x368   : > { %v6981_v47 = vpop.permute.xlu0 %3730  ;;  %v6983_v48 = vpop.permute.xlu1 %4087  ;;  %9846 = sst [smem:[#allocation34_spill]] %s7041_s27  ;;  %s7251_s10 = sld [smem:[#allocation6 + $0x21c]] }
 0x369   : > { %9830 = vst [vmem:[#allocation117_spill] sm:$0xff] %v6981_v47  ;;  %9831 = vst [vmem:[#allocation118_spill] sm:$0xff] %v6983_v48  ;;  %s9901_s4 = sld [smem:[#allocation58_spill]]  ;;  %s9905_s27 = sld [smem:[#allocation64_spill]] }
 0x36a   : > { %2967 = vrot.lane.b32.xlu0 %v2966_v49, %s9658_s5  ;;  %3299 = vrot.lane.b32.xlu1 %v3298_v62, %s9658_s5  ;;  %s9907_s26 = sld [smem:[#allocation65_spill]]  ;;  %s9911_s19 = sld [smem:[#allocation66_spill]] }
 0x36b   : > { %9886 = sst [smem:[#allocation36_spill]] %s7224_s0  ;;  %s9908_s2 = sld [smem:[#allocation57_spill]] }
 0x36c   : > { %v7015_v62 = vpop.permute.xlu0 %3738  ;;  %v7017_v49 = vpop.permute.xlu1 %4095  ;;  %s9912_s14 = sld [smem:[#allocation59_spill]]  ;;  %s9913_s30 = sld [smem:[#allocation61_spill]] }
 0x36d   : > { %9840 = vst [vmem:[#allocation120_spill] sm:$0xff] %v7015_v62  ;;  %9841 = vst [vmem:[#allocation121_spill] sm:$0xff] %v7017_v49  ;;  %v9891_v49 = vstv %s9884_s28  ;;  %s7267_s28 = sld [smem:[#allocation6 + $0x11d]]  ;;  %s9923_s0 = sld [smem:[#allocation72_spill]] }
 0x36e   : > { %3672 = vrot.lane.b32.xlu0 %v3671_v28, %s9667_s9  ;;  %3315 = vrot.lane.b32.xlu1 %v3314_v55, %s9667_s9  ;;  %v3680_v28 = vrot.slane %v3678_v25, 2  ;;  %v4003_v55 = vrot.slane %v4001_v11, 1  ;;  %v1465_v11 = vadd.f32 %v6717_v24, %v1437_v6  ;;  %v3323_v25 = vrot.slane %v3321_v12, 2 }
 0x36f   : > { %v2271_v6 = vmul.f32 %v2269_v16, %v6369_v5  ;;  %v2641_v16 = vmul.f32 %v2639_v19, %v6369_v5  ;;  %v7128_v19 = vmul.f32 %v1471_v56, %v6407_v42  ;;  %v4035_v56 = vmul.f32 %v4034_v20, %v6407_v42 }
 0x370   : > { %v7047_v0 = vpop.permute.xlu0 %1838  ;;  %v7049_v26 = vpop.permute.xlu1 %1477  ;;  %v7093_v12 = vmax.f32 %v1465_v11, 0.0  ;;  %v9893_v48 = vmov %v9891_v49 }
 0x371   : > { %v2275_v43 = vrot.slane %v2271_v6, 7  ;;  %v4028_v6 = vrot.slane %v4026_v51, 2  ;;  %v2998_v51 = vmul.f32 %v2996_v29, %v6369_v5  ;;  %v4037_v29 = vrot.slane %v4035_v56, 2 }
 0x372   : > { %3681 = vrot.lane.b32.xlu0 %v3680_v28, %s9658_s5  ;;  %4004 = vrot.lane.b32.xlu1 %v4003_v55, %s9667_s9  ;;  %v4010_v28 = vmul.f32 %v4009_v14, %v6407_v42  ;;  %v1571_v55 = vrot.slane %v1567_v60, 7  ;;  %v3699_v56 = vmul.f32 %v3697_v31, %v6369_v5 }
 0x373   : > { %v3002_v14 = vrot.slane %v2998_v51, 7 }
 0x374   : > { %v7078_v24 = vpop.permute.xlu0 %1846  ;;  %v7080_v38 = vpop.permute.xlu1 %1485  ;;  %v4012_v13 = vrot.slane %v4010_v28, 1  ;;  %v7134_v28 = vmul.f32 %v2546_v63, %v6407_v42  ;;  %v1554_v63 = vmul.f32 %v1552_v30, %v6369_v5  ;;  %v3703_v51 = vrot.slane %v3699_v56, 7 }
 0x375   : > { %9850 = vst [vmem:[#allocation123_spill] sm:$0xff] %v7078_v24  ;;  %9852 = vst [vmem:[#allocation124_spill] sm:$0xff] %v7080_v38 }
 0x376   : > { %1920 = vrot.lane.b32.xlu0 %v1919_v10, %s9667_s9  ;;  %3324 = vrot.lane.b32.xlu1 %v3323_v25, %s9658_s5  ;;  %v2985_v25 = vmul.f32 %v2983_v23, %v6369_v5  ;;  %v1572_v10 = vsel %vm1545_vm8, %v1570_v15, %v1571_v55  ;;  %9863 = vst [vmem:[#allocation127_spill] sm:$0xff] %v7134_v28  ;;  %v2644_v15 = vrot.slane %v2640_v52, 7  ;;  %v2645_v55 = vrot.slane %v2641_v16, 7 }
 0x377   : > { %v1553_v23 = vmul.f32 %v1552_v30, %v6407_v42  ;;  %v7161_v52 = vmul.f32 %v2189_v1, %v6407_v42  ;;  %v2276_v30 = vsel %vm1545_vm8, %v2274_v45, %v2275_v43  ;;  %v7167_v16 = vmul.f32 %v2903_v18, %v6407_v42 }
 0x378   : > { %v7115_v60 = vpop.permute.xlu0 %2552  ;;  %v7117_v11 = vpop.permute.xlu1 %2195  ;;  %v2989_v20 = vrot.slane %v2985_v25, 7  ;;  %v7179_v1 = vmul.f32 %v3260_v22, %v6407_v42  ;;  %v1926_v18 = vmul.f32 %v1925_v35, %v6407_v42  ;;  %v1558_v25 = vrot.slane %v1554_v63, 7 }
 0x379   : > { %9860 = vst [vmem:[#allocation125_spill] sm:$0xff] %v7115_v60  ;;  %9861 = vst [vmem:[#allocation126_spill] sm:$0xff] %v7117_v11  ;;  %v1557_v43 = vrot.slane %v1553_v23, 7  ;;  %v3698_v45 = vmul.f32 %v3697_v31, %v6407_v42  ;;  %v2646_v23 = vsel %vm1545_vm8, %v2644_v15, %v2645_v55  ;;  %v7202_v35 = vmul.f32 %v3974_v36, %v6407_v42 }
 0x37a   : > { %1573 = vrot.lane.b32.xlu0 %v1572_v10, %s9658_s5  ;;  %4013 = vrot.lane.b32.xlu1 %v4012_v13, %s9658_s5  ;;  %9872 = vst [vmem:[#allocation130_spill] sm:$0xff] %v7161_v52  ;;  %9873 = vst [vmem:[#allocation131_spill] sm:$0xff] %v7167_v16  ;;  %v2990_v63 = vsel %vm1545_vm8, %v2988_v4, %v2989_v20  ;;  %v2628_v31 = vmul.f32 %v2626_v32, %v6369_v5  ;;  %v1930_v4 = vrot.slane %v1926_v18, 7 }
 0x37b   : > { %9877 = vst [vmem:[#allocation133_spill] sm:$0xff] %v7179_v1  ;;  %9882 = vst [vmem:[#allocation136_spill] sm:$0xff] %v7202_v35  ;;  %v3712_v36 = vmul.f32 %v3710_v37, %v6369_v5  ;;  %v2284_v32 = vmul.f32 %v2282_v39, %v6369_v5  ;;  %v1559_v15 = vsel %vm1545_vm8, %v1557_v43, %v1558_v25  ;;  %v1931_v55 = vrot.slane %v1927_v21, 7 }
 0x37c   : > { %v7148_v10 = vpop.permute.xlu0 %2560  ;;  %v7150_v13 = vpop.permute.xlu1 %2203  ;;  %v3702_v20 = vrot.slane %v3698_v45, 7  ;;  %v9889_v37 = vstv %s9883_s24  ;;  %v3355_v43 = vmul.f32 %v9893_v48, %v6369_v5  ;;  %v2631_v25 = vrot.slane %v2627_v8, 7  ;;  %s9902_s24 = sld [smem:[#allocation60_spill]] }
 0x37d   : > { %9869 = vst [vmem:[#allocation128_spill] sm:$0xff] %v7148_v10  ;;  %9870 = vst [vmem:[#allocation129_spill] sm:$0xff] %v7150_v13  ;;  %v9890_v3 = vmov %v9889_v37  ;;  %v2632_v21 = vrot.slane %v2628_v31, 7  ;;  %v9894_v45 = vstv %s9885_s3  ;;  %v1932_v8 = vsel %vm1545_vm8, %v1930_v4, %v1931_v55  ;;  %s9903_s3 = sld [smem:[#allocation62_spill]] }
 0x37e   : > { %2277 = vrot.lane.b32.xlu0 %v2276_v30, %s9667_s9  ;;  %4029 = vrot.lane.b32.xlu1 %v4028_v6, %s9667_s9  ;;  %v3001_v30 = vrot.slane %v2997_v7, 7  ;;  %v2283_v7 = vmul.f32 %v2282_v39, %v6407_v42  ;;  %v3342_v27 = vmul.f32 %v9890_v3, %v6369_v5  ;;  %v3354_v39 = vmul.f32 %v9891_v49, %v6407_v42 }
 0x37f   : > { %v4055_v56 = vmul.f32 %v9894_v45, %v6407_v42  ;;  %v9895_v46 = vmov %v9894_v45  ;;  %v3715_v3 = vrot.slane %v3711_v58, 7  ;;  %v2288_v49 = vrot.slane %v2284_v32, 7 }
 0x380   : > { %v7193_v22 = vpop.permute.xlu0 %2917  ;;  %v7195_v6 = vpop.permute.xlu1 %2909  ;;  %v4056_v2 = vmul.f32 %v9895_v46, %v6369_v5  ;;  %v2287_v62 = vrot.slane %v2283_v7, 7  ;;  %v3003_v48 = vsel %vm1545_vm8, %v3001_v30, %v3002_v14  ;;  %v9896_v31 = vstv %s9892_s11  ;;  %s9904_s11 = sld [smem:[#allocation63_spill]] }
 0x381   : > { %9880 = vst [vmem:[#allocation134_spill] sm:$0xff] %v7193_v22  ;;  %9881 = vst [vmem:[#allocation135_spill] sm:$0xff] %v7195_v6  ;;  %v4068_v45 = vmul.f32 %v9896_v31, %v6407_v42  ;;  %v9897_v47 = vmov %v9896_v31  ;;  %v3346_v7 = vrot.slane %v3342_v27, 7  ;;  %v3358_v32 = vrot.slane %v3354_v39, 7 }
 0x382   : > { %2647 = vrot.lane.b32.xlu0 %v2646_v23, %s9658_s5  ;;  %4038 = vrot.lane.b32.xlu1 %v4037_v29, %s9658_s5  ;;  %v3341_v23 = vmul.f32 %v9889_v37, %v6407_v42  ;;  %v3716_v37 = vrot.slane %v3712_v36, 7  ;;  %v4069_v46 = vmul.f32 %v9897_v47, %v6369_v5  ;;  %v3359_v14 = vrot.slane %v3355_v43, 7 }
 0x383   : > { %v3704_v30 = vsel %vm1545_vm8, %v3702_v20, %v3703_v51  ;;  %v2633_v4 = vsel %vm1545_vm8, %v2631_v25, %v2632_v21  ;;  %v4060_v55 = vrot.slane %v4056_v2, 7  ;;  %v2289_v27 = vsel %vm1545_vm8, %v2287_v62, %v2288_v49 }
 0x384   : > { %v7227_v29 = vpop.permute.xlu0 %3623  ;;  %v7229_v18 = vpop.permute.xlu1 %3266  ;;  %v3345_v36 = vrot.slane %v3341_v23, 7  ;;  %v3717_v47 = vsel %vm1545_vm8, %v3715_v3, %v3716_v37  ;;  %v9906_v23 = vstv %s9898_s22  ;;  %v9909_v2 = vstv %s9901_s4  ;;  %s9916_s22 = sld [smem:[#allocation67_spill]]  ;;  %s9917_s4 = sld [smem:[#allocation71_spill]] }
 0x385   : > { %9887 = vst [vmem:[#allocation137_spill] sm:$0xff] %v7227_v29  ;;  %9888 = vst [vmem:[#allocation138_spill] sm:$0xff] %v7229_v18  ;;  %v2062_v20 = vmul.f32 %v9906_v23, %v7099_v61  ;;  %v7280_v39 = vmul.f32 %v9909_v2, %v7099_v61  ;;  %v9910_v43 = vstv %s9902_s24  ;;  %v4072_v21 = vrot.slane %v4068_v45, 7  ;;  %s9921_s24 = sld [smem:[#allocation68_spill]] }
 0x386   : > { %2991 = vrot.lane.b32.xlu0 %v2990_v63, %s9667_s9  ;;  %1560 = vrot.lane.b32.xlu1 %v1559_v15, %s9667_s9  ;;  %v4059_v15 = vrot.slane %v4055_v56, 7  ;;  %v7285_v25 = vmul.f32 %v9910_v43, %v7099_v61  ;;  %v4073_v56 = vrot.slane %v4069_v46, 7  ;;  %v3347_v37 = vsel %vm1545_vm8, %v3345_v36, %v3346_v7 }
 0x387   : > { %v7293_v49 = vsel %vm1545_vm8, %v3358_v32, %v3359_v14  ;;  %v9919_v31 = vstv %s9904_s11  ;;  %v9920_v23 = vstv %s9905_s27  ;;  %v9922_v7 = vstv %s9907_s26  ;;  %s9928_s27 = sld [smem:[#allocation69_spill]]  ;;  %s9930_s26 = sld [smem:[#allocation70_spill]] }
 0x388   : > { %v7261_v63 = vpop.permute.xlu0 %3274  ;;  %v7263_v58 = vpop.permute.xlu1 %3631  ;;  %v7303_v45 = vmul.f32 %v9919_v31, %v7099_v61  ;;  %v7306_v46 = vsel %vm1545_vm8, %v4059_v15, %v4060_v55  ;;  %v7311_v36 = vmul.f32 %v9920_v23, %v7099_v61  ;;  %v7316_v32 = vmul.f32 %v9922_v7, %v7099_v61  ;;  %s9946_s11 = sld [smem:[#allocation77_spill]] }
 0x389   : > { %9899 = vst [vmem:[#allocation139_spill] sm:$0xff] %v7261_v63  ;;  %9900 = vst [vmem:[#allocation140_spill] sm:$0xff] %v7263_v58  ;;  %v9924_v14 = vstv %s9908_s2  ;;  %v9927_v15 = vstv %s9911_s19  ;;  %v9929_v43 = vstv %s9912_s14  ;;  %v9932_v31 = vstv %s9913_s30  ;;  %s9937_s19 = sld [smem:[#allocation74_spill]]  ;;  %s9938_s14 = sld [smem:[#allocation76_spill]] }
 0x38a   : > { %3004 = vrot.lane.b32.xlu0 %v3003_v48, %s9658_s5  ;;  %1933 = vrot.lane.b32.xlu1 %v1932_v8, %s9658_s5  ;;  %v9918_v48 = vstv %s9903_s3  ;;  %s9925_s3 = sld [smem:[#allocation73_spill]]  ;;  %v7321_v2 = vmul.f32 %v9924_v14, %v6407_v42  ;;  %v7328_v55 = vmul.f32 %v9927_v15, %v7099_v61  ;;  %v1996_v23 = vmul.f32 %v9932_v31, %v7099_v61  ;;  %s9943_s2 = sld [smem:[#allocation75_spill]] }
 0x38b   : > { %v7298_v8 = vmul.f32 %v9918_v48, %v7099_v61  ;;  %v7333_v48 = vmul.f32 %v9929_v43, %v6407_v42  ;;  %v7340_v14 = vsel %vm1545_vm8, %v4072_v21, %v4073_v56  ;;  %v9934_v15 = vstv %s9917_s4  ;;  %s9950_s30 = sld [smem:[#allocation78_spill]]  ;;  %s9954_s4 = sld [smem:[#allocation81_spill]] }
 0x38c   : > { %v7287_v62 = vpop.permute.xlu0 %1969  ;;  %v7289_v3 = vpop.permute.xlu1 %3980  ;;  %9926 = vst [vmem:[#allocation143_spill] sm:$0xff] %v7321_v2  ;;  %v7350_v51 = vmul.f32 %v9934_v15, %v6407_v42  ;;  %v9936_v41 = vmov %v9932_v31  ;;  %v9941_v21 = vstv %s9921_s24  ;;  %s9959_s24 = sld [smem:[#allocation84_spill]] }
 0x38d   : > { %9914 = vst [vmem:[#allocation141_spill] sm:$0xff] %v7287_v62  ;;  %9915 = vst [vmem:[#allocation142_spill] sm:$0xff] %v7289_v3  ;;  %v1995_v43 = vmul.f32 %v9936_v41, %v6369_v5  ;;  %v7362_v56 = vmul.f32 %v9941_v21, %v7099_v61  ;;  %v9948_v9 = vstv %s9928_s27  ;;  %v9949_v21 = vstv %s9930_s26  ;;  %s9963_s27 = sld [smem:[#allocation85_spill]]  ;;  %s9970_s26 = sld [smem:[#allocation80_spill]] }
 0x38e   : > { %3705 = vrot.lane.b32.xlu0 %v3704_v30, %s9667_s9  ;;  %2634 = vrot.lane.b32.xlu1 %v2633_v4, %s9667_s9  ;;  %9931 = vst [vmem:[#allocation144_spill] sm:$0xff] %v7333_v48  ;;  %v9933_v30 = vstv %s9916_s22  ;;  %9935 = vst [vmem:[#allocation145_spill] sm:$0xff] %v7350_v51  ;;  %v7379_v40 = vmul.f32 %v9948_v9, %v7099_v61  ;;  %v7384_v34 = vmul.f32 %v9949_v21, %v7099_v61  ;;  %s9952_s22 = sld [smem:[#allocation13_spill]] }
 0x38f   : > { %v7345_v4 = vmul.f32 %v9933_v30, %v7099_v61  ;;  %v9942_v30 = vstv %s9923_s0  ;;  %s9951_s0 = sld [smem:[#allocation79_spill]]  ;;  %v9955_v21 = vstv %s9938_s14  ;;  %s9977_s14 = sld [smem:[#allocation87_spill]] }
 0x390   : > { %v7355_v44 = vpop.permute.xlu0 %1618  ;;  %v7357_v31 = vpop.permute.xlu1 %3988  ;;  %v7367_v7 = vmul.f32 %v9942_v30, %v6407_v42  ;;  %v9945_v15 = vstv %s9925_s3  ;;  %v9957_v50 = vstv %s9943_s2  ;;  %v9958_v30 = vstv %s9946_s11  ;;  %s9962_s3 = sld [smem:[#allocation12_spill]]  ;;  %s9981_s2 = sld [smem:[#allocation15_spill]] }
 0x391   : > { %9939 = vst [vmem:[#allocation146_spill] sm:$0xff] %v7355_v44  ;;  %9940 = vst [vmem:[#allocation147_spill] sm:$0xff] %v7357_v31  ;;  %v1649_v62 = vmul.f32 %v9945_v15, %v6369_v5  ;;  %v9947_v41 = vmov %v9945_v15  ;;  %v2000_v15 = vrot.slane %v1996_v23, 6  ;;  %v7398_v44 = vmul.f32 %v9955_v21, %v6407_v42  ;;  %s9989_s11 = sld [smem:[#allocation14_spill]] }
 0x392   : > { %9944 = vst [vmem:[#allocation148_spill] sm:$0xff] %v7367_v7  ;;  %v1650_v33 = vmul.f32 %v9947_v41, %v7099_v61  ;;  %3718 = vrot.lane.b32.xlu0 %v3717_v47, %s9658_s5  ;;  %2290 = vrot.lane.b32.xlu1 %v2289_v27, %s9658_s5  ;;  %v9953_v41 = vstv %s9937_s19  ;;  %v1999_v47 = vrot.slane %v1995_v43, 6  ;;  %v7404_v27 = vmul.f32 %v9957_v50, %v7099_v61  ;;  %s9976_s19 = sld [smem:[#allocation86_spill]] }
 0x393   : > { %v7393_v9 = vmul.f32 %v9953_v41, %v7099_v61  ;;  %9956 = vst [vmem:[#allocation149_spill] sm:$0xff] %v7398_v44  ;;  %v2352_v23 = vmul.f32 %v9958_v30, %v6369_v5  ;;  %v1653_v54 = vrot.slane %v1649_v62, 6  ;;  %v9964_v57 = vmov %v9958_v30 }
 0x394   : > { %v7409_v53 = vpop.permute.xlu0 %2326  ;;  %v7411_v41 = vpop.permute.xlu1 %1609  ;;  %v1654_v43 = vrot.slane %v1650_v33, 6  ;;  %v2353_v50 = vmul.f32 %v9964_v57, %v7099_v61  ;;  %v9965_v31 = vstv %s9950_s30  ;;  %v9969_v21 = vstv %s9954_s4  ;;  %s9992_s30 = sld [smem:[#allocation88_spill]] }
 0x395   : > { %9960 = vst [vmem:[#allocation150_spill] sm:$0xff] %v7409_v53  ;;  %9961 = vst [vmem:[#allocation151_spill] sm:$0xff] %v7411_v41  ;;  %v7420_v3 = vmul.f32 %v9965_v31, %v7099_v61  ;;  %v9966_v30 = vstv %s9951_s0  ;;  %v9968_v53 = vstv %s9952_s22  ;;  %v2723_v62 = vmul.f32 %v9969_v21, %v7099_v61  ;;  %s9994_s0 = sld [smem:[#allocation89_spill]]  ;;  %s9996_s22 = sld [smem:[#allocation92_spill]] }
 0x396   : > { %v7425_v35 = vmul.f32 %v9966_v30, %v6407_v42  ;;  %v2033_v41 = vmul.f32 %v9968_v53, %v7099_v61  ;;  %3348 = vrot.lane.b32.xlu1 %v3347_v37, %s9667_s9  ;;  %2064 = vrot.lane.b32.xlu0 %v2062_v20, %s9667_s9  ;;  %v7436_v57 = vsel %vm1628_vm9, %v1999_v47, %v2000_v15  ;;  %v2356_v63 = vrot.slane %v2352_v23, 6 }
 0x397   : > { %v9971_v31 = vmov %v9968_v53  ;;  %v9972_v53 = vstv %s9959_s24  ;;  %v9973_v21 = vstv %s9962_s3  ;;  %v9974_v37 = vstv %s9954_s4  ;;  %s9997_s4 = sld [smem:[#allocation93_spill]]  ;;  %s10012_s3 = sld [smem:[#allocation94_spill]] }
 0x398   : > { %9967 = vst [vmem:[#allocation152_spill] sm:$0xff] %v7425_v35  ;;  %v2032_v30 = vmul.f32 %v9971_v31, %v6369_v5  ;;  %v1637_v7 = vmul.f32 %v9972_v53, %v7099_v61  ;;  %v7448_v58 = vmul.f32 %v9973_v21, %v7099_v61  ;;  %v2722_v20 = vmul.f32 %v9974_v37, %v6369_v5  ;;  %v7456_v33 = vpop.permute.xlu0 %2692  ;;  %v7458_v18 = vpop.permute.xlu1 %1978 }
 0x399   : > { %v9975_v15 = vstv %s9963_s27  ;;  %9978 = vst [vmem:[#allocation153_spill] sm:$0xff] %v7456_v33  ;;  %9979 = vst [vmem:[#allocation154_spill] sm:$0xff] %v7458_v18  ;;  %v7461_v31 = vsel %vm1628_vm9, %v1653_v54, %v1654_v43  ;;  %v2357_v23 = vrot.slane %v2353_v50, 6  ;;  %v9980_v53 = vstv %s9970_s26  ;;  %s10018_s27 = sld [smem:[#allocation98_spill]]  ;;  %s10031_s26 = sld [smem:[#allocation100_spill]] }
 0x39a   : > { %v1687_v47 = vmul.f32 %v9975_v15, %v7099_v61  ;;  %v7466_v21 = vmul.f32 %v9980_v53, %v6407_v42  ;;  %v9983_v37 = vstv %s9959_s24  ;;  %v2037_v29 = vrot.slane %v2033_v41, 7  ;;  %3361 = vrot.lane.b32.xlu1 %v7293_v49, %s9658_s5  ;;  %1713 = vrot.lane.b32.xlu0 %v7280_v39, %s9658_s5  ;;  %s10011_s24 = sld [smem:[#allocation16_spill]] }
 0x39b   : > { %v1636_v1 = vmul.f32 %v9983_v37, %v6369_v5  ;;  %v2727_v17 = vrot.slane %v2723_v62, 6  ;;  %v9984_v33 = vmov %v9975_v15  ;;  %v2036_v54 = vrot.slane %v2032_v30, 7 }
 0x39c   : > { %9982 = vst [vmem:[#allocation155_spill] sm:$0xff] %v7466_v21  ;;  %v1686_v18 = vmul.f32 %v9984_v33, %v6369_v5  ;;  %v1641_v43 = vrot.slane %v1637_v7, 6  ;;  %v9985_v50 = vstv %s9976_s19  ;;  %v9986_v37 = vstv %s9977_s14  ;;  %v7491_v44 = vpop.permute.xlu0 %3040  ;;  %v7493_v39 = vpop.permute.xlu1 %2683  ;;  %s10035_s19 = sld [smem:[#allocation19_spill]]  ;;  %s10036_s14 = sld [smem:[#allocation103_spill]] }
 0x39d   : > { %v2009_v53 = vmul.f32 %v9985_v50, %v7099_v61  ;;  %v3067_v41 = vmul.f32 %v9986_v37, %v7099_v61  ;;  %v2726_v62 = vrot.slane %v2722_v20, 6  ;;  %v1691_v15 = vrot.slane %v1687_v47, 7  ;;  %9990 = vst [vmem:[#allocation156_spill] sm:$0xff] %v7491_v44  ;;  %9991 = vst [vmem:[#allocation157_spill] sm:$0xff] %v7493_v39 }
 0x39e   : > { %v9987_v33 = vmov %v9985_v50  ;;  %v9988_v22 = vstv %s9981_s2  ;;  %v7496_v7 = vsel %vm1628_vm9, %v2356_v63, %v2357_v23  ;;  %v1640_v50 = vrot.slane %v1636_v1, 6  ;;  %4062 = vrot.lane.b32.xlu1 %v7306_v46, %s9667_s9  ;;  %2421 = vrot.lane.b32.xlu0 %v7285_v25, %s9667_s9 }
 0x39f   : > { %v2008_v35 = vmul.f32 %v9987_v33, %v6369_v5  ;;  %v2710_v49 = vmul.f32 %v9988_v22, %v7099_v61  ;;  %v9993_v20 = vmov %v9986_v37  ;;  %v7503_v37 = vsel %vm1545_vm8, %v2036_v54, %v2037_v29 }
 0x3a0   : > { %v3066_v47 = vmul.f32 %v9993_v20, %v6369_v5  ;;  %v7506_v33 = vsel %vm1628_vm9, %v2726_v62, %v2727_v17  ;;  %v1690_v22 = vrot.slane %v1686_v18, 7  ;;  %v9995_v44 = vstv %s9981_s2  ;;  %s10037_s2 = sld [smem:[#allocation106_spill]] }
 0x3a1   : > { %v2709_v63 = vmul.f32 %v9995_v44, %v6369_v5  ;;  %v7516_v1 = vsel %vm1628_vm9, %v1640_v50, %v1641_v43  ;;  %v2013_v17 = vrot.slane %v2009_v53, 6  ;;  %v9998_v29 = vstv %s9989_s11  ;;  %v7531_v43 = vpop.permute.xlu0 %3049  ;;  %v7533_v50 = vpop.permute.xlu1 %2335  ;;  %s10044_s11 = sld [smem:[#allocation18_spill]] }
 0x3a2   : > { %v7521_v18 = vmul.f32 %v9998_v29, %v6407_v42  ;;  %v3071_v23 = vrot.slane %v3067_v41, 6  ;;  %v7524_v44 = vsel %vm1545_vm8, %v1690_v22, %v1691_v15  ;;  %v2012_v54 = vrot.slane %v2008_v35, 6  ;;  %10002 = vst [vmem:[#allocation160_spill] sm:$0xff] %v7531_v43  ;;  %10003 = vst [vmem:[#allocation161_spill] sm:$0xff] %v7533_v50  ;;  %4075 = vrot.lane.b32.xlu1 %v7340_v14, %s9658_s5 }
 0x3a3   : > { %v2714_v46 = vrot.slane %v2710_v49, 6  ;;  %v10000_v62 = vstv %s9992_s30  ;;  %v3070_v53 = vrot.slane %v3066_v47, 6  ;;  %v10004_v20 = vstv %s9994_s0  ;;  %2786 = vrot.lane.b32.xlu0 %v7298_v8, %s9658_s5  ;;  %s10051_s30 = sld [smem:[#allocation107_spill]]  ;;  %s10054_s0 = sld [smem:[#allocation102_spill]] }
 0x3a4   : > { %9999 = vst [vmem:[#allocation158_spill] sm:$0xff] %v7521_v18  ;;  %v7529_v25 = vmul.f32 %v10000_v62, %v6407_v42  ;;  %v7538_v29 = vmul.f32 %v10004_v20, %v6407_v42  ;;  %v10006_v15 = vstv %s9996_s22  ;;  %v10007_v41 = vstv %s9997_s4  ;;  %s10058_s22 = sld [smem:[#allocation108_spill]]  ;;  %s10067_s4 = sld [smem:[#allocation21_spill]] }
 0x3a5   : > { %v2390_v35 = vmul.f32 %v10006_v15, %v7099_v61  ;;  %v1674_v49 = vmul.f32 %v10007_v41, %v7099_v61  ;;  %v2713_v22 = vrot.slane %v2709_v63, 6  ;;  %v10008_v62 = vmov %v10006_v15  ;;  %v7579_v63 = vpop.permute.xlu0 %3754 }
 0x3a6   : > { %10001 = vst [vmem:[#allocation159_spill] sm:$0xff] %v7529_v25  ;;  %10005 = vst [vmem:[#allocation162_spill] sm:$0xff] %v7538_v29  ;;  %v2389_v30 = vmul.f32 %v10008_v62, %v6369_v5  ;;  %v10009_v43 = vstv %s9810_s23  ;;  %v10010_v47 = vstv %s6817_s17  ;;  %v7560_v20 = vsel %vm1628_vm9, %v2012_v54, %v2013_v17  ;;  %1705 = vrot.lane.b32.xlu1 %v7311_v36, %s9667_s9 }
 0x3a7   : > { %v3080_v50 = vmul.f32 %v10009_v43, %v7099_v61  ;;  %v2366_v39 = vmul.f32 %v10010_v47, %v7099_v61  ;;  %v7564_v15 = vsel %vm1628_vm9, %v3070_v53, %v3071_v23  ;;  %v10013_v43 = vmov %v10007_v41  ;;  %10016 = vst [vmem:[#allocation163_spill] sm:$0xff] %v7579_v63  ;;  %v7581_v23 = vpop.permute.xlu1 %3397 }
 0x3a8   : > { %v1673_v41 = vmul.f32 %v10013_v43, %v6369_v5  ;;  %v7570_v62 = vsel %vm1628_vm9, %v2713_v22, %v2714_v46  ;;  %v10014_v47 = vstv %s9810_s23  ;;  %v10015_v17 = vstv %s6817_s17  ;;  %10017 = vst [vmem:[#allocation164_spill] sm:$0xff] %v7581_v23  ;;  %s10022_s17 = sld [smem:[#allocation99_spill]]  ;;  %3135 = vrot.lane.b32.xlu0 %v7303_v45, %s9667_s9  ;;  %s10025_s23 = sld [smem:[#allocation17_spill]] }
 0x3a9   : > { %v3079_v8 = vmul.f32 %v10014_v47, %v6369_v5  ;;  %v2365_v54 = vmul.f32 %v10015_v17, %v6369_v5  ;;  %v2394_v46 = vrot.slane %v2390_v35, 7  ;;  %v1678_v22 = vrot.slane %v1674_v49, 7  ;;  %v7611_v36 = vpop.permute.xlu0 %3763 }
 0x3aa   : > { %v10019_v43 = vstv %s10011_s24  ;;  %v2393_v21 = vrot.slane %v2389_v30, 7  ;;  %v10020_v47 = vstv %s10012_s3  ;;  %v3084_v17 = vrot.slane %v3080_v50, 6  ;;  %10029 = vst [vmem:[#allocation166_spill] sm:$0xff] %v7611_v36  ;;  %2072 = vrot.lane.b32.xlu1 %v7328_v55, %s9658_s5  ;;  %s10068_s24 = sld [smem:[#allocation111_spill]]  ;;  %s10128_s3 = sld [smem:[#allocation31_spill]] }
 0x3ab   : > { %v2760_v14 = vmul.f32 %v10019_v43, %v7099_v61  ;;  %v7590_v25 = vmul.f32 %v10020_v47, %v6407_v42  ;;  %v2370_v18 = vrot.slane %v2366_v39, 6  ;;  %v1677_v35 = vrot.slane %v1673_v41, 7  ;;  %v7613_v41 = vpop.permute.xlu1 %3406 }
 0x3ac   : > { %v10023_v49 = vmov %v10019_v43  ;;  %v10024_v43 = vstv %s6827_s7  ;;  %v3083_v50 = vrot.slane %v3079_v8, 6  ;;  %v2369_v39 = vrot.slane %v2365_v54, 6  ;;  %10030 = vst [vmem:[#allocation167_spill] sm:$0xff] %v7613_v41  ;;  %s10032_s7 = sld [smem:[#allocation101_spill]]  ;;  %3143 = vrot.lane.b32.xlu0 %v7316_v32, %s9658_s5 }
 0x3ad   : > { %10021 = vst [vmem:[#allocation165_spill] sm:$0xff] %v7590_v25  ;;  %v2759_v53 = vmul.f32 %v10023_v49, %v6369_v5  ;;  %v2045_v30 = vmul.f32 %v10024_v43, %v6369_v5  ;;  %v10026_v47 = vmov %v10024_v43  ;;  %v10027_v63 = vstv %s10018_s27  ;;  %v7651_v55 = vpop.permute.xlu0 %1862  ;;  %s10134_s27 = sld [smem:[#allocation35_spill]] }
 0x3ae   : > { %v2046_v23 = vmul.f32 %v10026_v47, %v7099_v61  ;;  %v3780_v29 = vmul.f32 %v10027_v63, %v6369_v5  ;;  %v10028_v45 = vmov %v10027_v63  ;;  %v7616_v49 = vsel %vm1545_vm8, %v2393_v21, %v2394_v46  ;;  %10042 = vst [vmem:[#allocation169_spill] sm:$0xff] %v7651_v55  ;;  %2778 = vrot.lane.b32.xlu1 %v7362_v56, %s9667_s9 }
 0x3af   : > { %v3781_v48 = vmul.f32 %v10028_v45, %v7099_v61  ;;  %v7619_v43 = vsel %vm1545_vm8, %v1677_v35, %v1678_v22  ;;  %v2764_v8 = vrot.slane %v2760_v14, 7  ;;  %v10033_v54 = vstv %s10022_s17  ;;  %s10136_s17 = sld [smem:[#allocation119_spill]] }
 0x3b0   : > { %v2747_v63 = vmul.f32 %v10033_v54, %v7099_v61  ;;  %v7626_v45 = vsel %vm1628_vm9, %v3083_v50, %v3084_v17  ;;  %v7629_v36 = vsel %vm1628_vm9, %v2369_v39, %v2370_v18  ;;  %v10034_v21 = vstv %s10025_s23  ;;  %3849 = vrot.lane.b32.xlu0 %v7345_v4, %s9667_s9  ;;  %s10137_s23 = sld [smem:[#allocation28_spill]] }
 0x3b1   : > { %v7634_v46 = vmul.f32 %v10034_v21, %v6407_v42  ;;  %v2763_v14 = vrot.slane %v2759_v53, 7  ;;  %v2049_v22 = vrot.slane %v2045_v30, 7  ;;  %v2050_v18 = vrot.slane %v2046_v23, 7  ;;  %v7653_v53 = vpop.permute.xlu1 %4111 }
 0x3b2   : > { %v10038_v17 = vmov %v10033_v54  ;;  %v3784_v50 = vrot.slane %v3780_v29, 6  ;;  %v3785_v39 = vrot.slane %v3781_v48, 6  ;;  %v10039_v54 = vstv %s10031_s26  ;;  %10043 = vst [vmem:[#allocation170_spill] sm:$0xff] %v7653_v53  ;;  %2429 = vrot.lane.b32.xlu1 %v7384_v34, %s9658_s5  ;;  %s10140_s26 = sld [smem:[#allocation36_spill]] }
 0x3b3   : > { %v2746_v35 = vmul.f32 %v10038_v17, %v6369_v5  ;;  %v7646_v21 = vmul.f32 %v10039_v54, %v6407_v42  ;;  %v10041_v32 = vstv %s10032_s7  ;;  %v7656_v23 = vsel %vm1545_vm8, %v2763_v14, %v2764_v8  ;;  %s8023_s7 = sld [smem:[#allocation6 + $0x396]] }
 0x3b4   : > { %v3104_v47 = vmul.f32 %v10041_v32, %v7099_v61  ;;  %v2751_v30 = vrot.slane %v2747_v63, 7  ;;  %v10045_v48 = vstv %s10035_s19  ;;  %v10046_v17 = vstv %s10036_s14  ;;  %3857 = vrot.lane.b32.xlu0 %v7379_v40, %s9658_s5  ;;  %s8029_s19 = sld [smem:[#allocation6 + $0x21d]]  ;;  %s8035_s14 = sld [smem:[#allocation6 + $0xa0]] }
 0x3b5   : > { %10040 = vst [vmem:[#allocation168_spill] sm:$0xff] %v7646_v21  ;;  %v2403_v29 = vmul.f32 %v10045_v48, %v7099_v61  ;;  %v3794_v54 = vmul.f32 %v10046_v17, %v7099_v61  ;;  %v10047_v41 = vmov %v10041_v32  ;;  %v10048_v25 = vstv %s6877_s29 }
 0x3b6   : > { %v3103_v32 = vmul.f32 %v10047_v41, %v6369_v5  ;;  %v3424_v55 = vmul.f32 %v10048_v25, %v7099_v61  ;;  %v10049_v53 = vstv %s10037_s2  ;;  %v7681_v63 = vsel %vm1545_vm8, %v2049_v22, %v2050_v18  ;;  %v7700_v18 = vpop.permute.xlu0 %1871  ;;  %3492 = vrot.lane.b32.xlu1 %v7393_v9, %s9667_s9  ;;  %s8037_s2 = sld [smem:[#allocation6 + $0xa2]] }
 0x3b7   : > { %v1902_v6 = vmul.f32 %v10049_v53, %v6407_v42  ;;  %v10050_v8 = vmov %v10049_v53  ;;  %v2750_v41 = vrot.slane %v2746_v35, 7  ;;  %v2402_v25 = vmul.f32 %v10045_v48, %v6369_v5  ;;  %10056 = vst [vmem:[#allocation172_spill] sm:$0xff] %v7700_v18  ;;  %v7702_v35 = vpop.permute.xlu1 %4120 }
 0x3b8   : > { %v1903_v14 = vmul.f32 %v10050_v8, %v6369_v5  ;;  %v3793_v53 = vmul.f32 %v10046_v17, %v6369_v5  ;;  %v7690_v16 = vsel %vm1628_vm9, %v3784_v50, %v3785_v39  ;;  %v10052_v8 = vstv %s10044_s11  ;;  %10057 = vst [vmem:[#allocation173_spill] sm:$0xff] %v7702_v35  ;;  %2002 = vrot.lane.b32.xlu0 %v7436_v57, %s9667_s9  ;;  %s10156_s11 = sld [smem:[#allocation30_spill]] }
 0x3b9   : > { %v7695_v13 = vmul.f32 %v10052_v8, %v6407_v42  ;;  %v3108_v4 = vrot.slane %v3104_v47, 7  ;;  %v10055_v56 = vstv %s6877_s29  ;;  %v7705_v48 = vsel %vm1545_vm8, %v2750_v41, %v2751_v30  ;;  %s10064_s29 = sld [smem:[#allocation20_spill]] }
 0x3ba   : > { %v3423_v22 = vmul.f32 %v10055_v56, %v6369_v5  ;;  %v2407_v17 = vrot.slane %v2403_v29, 7  ;;  %v3798_v50 = vrot.slane %v3794_v54, 6  ;;  %v10059_v39 = vstv %s10051_s30  ;;  %3500 = vrot.lane.b32.xlu1 %v7404_v27, %s9658_s5  ;;  %s10157_s30 = sld [smem:[#allocation34_spill]] }
 0x3bb   : > { %10053 = vst [vmem:[#allocation171_spill] sm:$0xff] %v7695_v13  ;;  %v3117_v8 = vmul.f32 %v10059_v39, %v7099_v61  ;;  %v3107_v10 = vrot.slane %v3103_v32, 7  ;;  %v3428_v47 = vrot.slane %v3424_v55, 6  ;;  %v1906_v11 = vrot.slane %v1902_v6, 7 }
 0x3bc   : > { %v1907_v52 = vrot.slane %v1903_v14, 7  ;;  %v2406_v30 = vrot.slane %v2402_v25, 7  ;;  %v10060_v29 = vstv %s10054_s0  ;;  %v3797_v54 = vrot.slane %v3793_v53, 6  ;;  %v7733_v53 = vpop.permute.xlu1 %1501  ;;  %1656 = vrot.lane.b32.xlu0 %v7461_v31, %s9658_s5  ;;  %s8043_s0 = sld [smem:[#allocation6 + $0x38c]] }
 0x3bd   : > { %v7717_v41 = vmul.f32 %v10060_v29, %v6407_v42  ;;  %v10061_v56 = vmov %v10059_v39  ;;  %v7723_v6 = vsel %vm1545_vm8, %v3107_v10, %v3108_v4  ;;  %v3427_v40 = vrot.slane %v3423_v22, 6  ;;  %v7731_v39 = vpop.permute.xlu0 %2219  ;;  %10066 = vst [vmem:[#allocation175_spill] sm:$0xff] %v7733_v53 }
 0x3be   : > { %v3116_v55 = vmul.f32 %v10061_v56, %v6369_v5  ;;  %v10062_v32 = vstv %s10058_s22  ;;  %10065 = vst [vmem:[#allocation174_spill] sm:$0xff] %v7731_v39  ;;  %v7736_v29 = vsel %vm1545_vm8, %v2406_v30, %v2407_v17  ;;  %v7739_v10 = vsel %vm1628_vm9, %v3797_v54, %v3798_v50  ;;  %4206 = vrot.lane.b32.xlu1 %v7420_v3, %s9667_s9  ;;  %s8067_s22 = sld [smem:[#allocation6 + $0x397]] }
 0x3bf   : > { %v3436_v34 = vmul.f32 %v10062_v32, %v6369_v5  ;;  %v10063_v14 = vmov %v10062_v32  ;;  %v3121_v4 = vrot.slane %v3117_v8, 7  ;;  %v10069_v22 = vstv %s6901_s12  ;;  %s10090_s12 = sld [smem:[#allocation22_spill]] }
 0x3c0   : > { %v3437_v25 = vmul.f32 %v10063_v14, %v7099_v61  ;;  %v2089_v56 = vmul.f32 %v10069_v22, %v7099_v61  ;;  %v7745_v32 = vsel %vm1628_vm9, %v3427_v40, %v3428_v47  ;;  %v7748_v14 = vsel %vm1545_vm8, %v1906_v11, %v1907_v52  ;;  %v7777_v18 = vpop.permute.xlu1 %1510  ;;  %2359 = vrot.lane.b32.xlu0 %v7496_v7, %s9667_s9 }
 0x3c1   : > { %10070 = vst [vmem:[#allocation176_spill] sm:$0xff] %v7748_v14  ;;  %v10071_v35 = vmov %v10069_v22  ;;  %v10072_v17 = vstv %s6903_s8  ;;  %v3120_v50 = vrot.slane %v3116_v55, 7  ;;  %v10074_v52 = vstv %s10064_s29  ;;  %v7775_v55 = vpop.permute.xlu0 %1887  ;;  %10079 = vst [vmem:[#allocation178_spill] sm:$0xff] %v7777_v18  ;;  %s10087_s8 = sld [smem:[#allocation95_spill]]  ;;  %s8111_s29 = sld [smem:[#allocation6 + $0x31c]] }
 0x3c2   : > { %v2090_v39 = vmul.f32 %v10071_v35, %v7093_v12  ;;  %v1731_v30 = vmul.f32 %v10072_v17, %v7099_v61  ;;  %v10073_v8 = vmov %v10072_v17  ;;  %v2259_v35 = vmul.f32 %v10074_v52, %v6407_v42  ;;  %10078 = vst [vmem:[#allocation177_spill] sm:$0xff] %v7775_v55  ;;  %4214 = vrot.lane.b32.xlu1 %v7448_v58, %s9658_s5 }
 0x3c3   : > { %v1732_v11 = vmul.f32 %v10073_v8, %v7093_v12  ;;  %v10075_v47 = vmov %v10074_v52  ;;  %v3440_v40 = vrot.slane %v3436_v34, 6  ;;  %v3441_v22 = vrot.slane %v3437_v25, 6 }
 0x3c4   : > { %v2260_v54 = vmul.f32 %v10075_v47, %v6369_v5  ;;  %v10076_v57 = vstv %s10067_s4  ;;  %v10077_v9 = vstv %s10068_s24  ;;  %v7780_v8 = vsel %vm1545_vm8, %v3120_v50, %v3121_v4  ;;  %v7809_v24 = vpop.permute.xlu1 %2576  ;;  %2039 = vrot.lane.b32.xlu0 %v7503_v37, %s9667_s9 }
 0x3c5   : > { %v3818_v17 = vmul.f32 %v10076_v57, %v7099_v61  ;;  %v3461_v14 = vmul.f32 %v10077_v9, %v7099_v61  ;;  %v2093_v52 = vrot.slane %v2089_v56, 5  ;;  %v10080_v53 = vstv %s6931_s21  ;;  %s10096_s21 = sld [smem:[#allocation23_spill]] }
 0x3c6   : > { %v1744_v34 = vmul.f32 %v10080_v53, %v7099_v61  ;;  %v10081_v25 = vmov %v10080_v53  ;;  %v2094_v57 = vrot.slane %v2090_v39, 5  ;;  %v10082_v60 = vstv %s10067_s4  ;;  %1643 = vrot.lane.b32.xlu1 %v7516_v1, %s9667_s9  ;;  %s8113_s4 = sld [smem:[#allocation6 + $0x22]] }
 0x3c7   : > { %v1745_v47 = vmul.f32 %v10081_v25, %v7093_v12  ;;  %v3817_v9 = vmul.f32 %v10082_v60, %v6369_v5  ;;  %v10083_v55 = vstv %s10068_s24  ;;  %v10084_v18 = vstv %s6923_s18  ;;  %s10091_s18 = sld [smem:[#allocation112_spill]]  ;;  %s8127_s24 = sld [smem:[#allocation6 + $0x23]] }
 0x3c8   : > { %v3460_v28 = vmul.f32 %v10083_v55, %v6369_v5  ;;  %v4138_v4 = vmul.f32 %v10084_v18, %v7099_v61  ;;  %v1735_v53 = vrot.slane %v1731_v30, 5  ;;  %v1736_v56 = vrot.slane %v1732_v11, 5  ;;  %2729 = vrot.lane.b32.xlu0 %v7506_v33, %s9658_s5 }
 0x3c9   : > { %v2263_v50 = vrot.slane %v2259_v35, 7  ;;  %v2264_v39 = vrot.slane %v2260_v54, 7  ;;  %v3822_v25 = vrot.slane %v3818_v17, 7  ;;  %v3465_v51 = vrot.slane %v3461_v14, 7 }
 0x3ca   : > { %v10085_v60 = vmov %v10084_v18  ;;  %v10086_v55 = vstv %s6925_s16  ;;  %v7807_v18 = vpop.permute.xlu0 %2585  ;;  %v7812_v27 = vsel %vm1628_vm9, %v3440_v40, %v3441_v22  ;;  %v1748_v31 = vrot.slane %v1744_v34, 5  ;;  %s7941_s16 = sld [smem:[#allocation6 + $0x11f]]  ;;  %2015 = vrot.lane.b32.xlu1 %v7560_v20, %s9658_s5 }
 0x3cb   : > { %v4137_v2 = vmul.f32 %v10085_v60, %v6369_v5  ;;  %v2973_v38 = vmul.f32 %v10086_v55, %v6407_v42  ;;  %10088 = vst [vmem:[#allocation179_spill] sm:$0xff] %v7807_v18  ;;  %v1749_v30 = vrot.slane %v1745_v47, 5  ;;  %v10089_v11 = vmov %v10086_v55 }
 0x3cc   : > { %v2974_v35 = vmul.f32 %v10089_v11, %v6369_v5  ;;  %v7818_v14 = vsel %vm1723_vm10, %v2093_v52, %v2094_v57  ;;  %v3821_v54 = vrot.slane %v3817_v9, 7  ;;  %v3464_v17 = vrot.slane %v3460_v28, 7  ;;  %1693 = vrot.lane.b32.xlu0 %v7524_v44, %s9658_s5 }
 0x3cd   : > { %v4142_v60 = vrot.slane %v4138_v4, 6  ;;  %v7826_v22 = vsel %vm1723_vm10, %v1735_v53, %v1736_v56  ;;  %v7829_v52 = vsel %vm1545_vm8, %v2263_v50, %v2264_v39  ;;  %v10093_v28 = vstv %s10087_s8  ;;  %v7844_v4 = vpop.permute.xlu1 %1526  ;;  %s8137_s8 = sld [smem:[#allocation6 + $0x120]] }
 0x3ce   : > { %10092 = vst [vmem:[#allocation180_spill] sm:$0xff] %v7829_v52  ;;  %v7834_v34 = vmul.f32 %v10093_v28, %v6407_v42  ;;  %v7837_v3 = vsel %vm1545_vm8, %v3821_v54, %v3822_v25  ;;  %v7840_v7 = vsel %vm1545_vm8, %v3464_v17, %v3465_v51  ;;  %v4141_v47 = vrot.slane %v4137_v2, 6  ;;  %v7842_v9 = vpop.permute.xlu0 %1896  ;;  %10097 = vst [vmem:[#allocation183_spill] sm:$0xff] %v7844_v4 }
 0x3cf   : > { %v2977_v57 = vrot.slane %v2973_v38, 7  ;;  %10095 = vst [vmem:[#allocation182_spill] sm:$0xff] %v7842_v9  ;;  %v7847_v53 = vsel %vm1723_vm10, %v1748_v31, %v1749_v30  ;;  %v2978_v56 = vrot.slane %v2974_v35, 7  ;;  %v10098_v50 = vstv %s10090_s12  ;;  %2716 = vrot.lane.b32.xlu1 %v7570_v62, %s9667_s9  ;;  %s8164_s12 = sld [smem:[#allocation6 + $0x8f]] }
 0x3d0   : > { %10094 = vst [vmem:[#allocation181_spill] sm:$0xff] %v7834_v34  ;;  %v1541_v51 = vmul.f32 %v10098_v50, %v6407_v42  ;;  %v10099_v2 = vmov %v10098_v50  ;;  %v7856_v38 = vsel %vm1628_vm9, %v4141_v47, %v4142_v60  ;;  %v10100_v25 = vstv %s10091_s18  ;;  %3073 = vrot.lane.b32.xlu0 %v7564_v15, %s9667_s9  ;;  %s8171_s18 = sld [smem:[#allocation6 + $0x92]] }
 0x3d1   : > { %v1542_v39 = vmul.f32 %v10099_v2, %v6369_v5  ;;  %v3830_v55 = vmul.f32 %v10100_v25, %v6369_v5  ;;  %v10101_v11 = vmov %v10100_v25  ;;  %v10102_v31 = vstv %s6969_s20  ;;  %v7897_v52 = vpop.permute.xlu1 %2228  ;;  %s10116_s20 = sld [smem:[#allocation115_spill]] }
 0x3d2   : > { %v3831_v54 = vmul.f32 %v10101_v11, %v7099_v61  ;;  %v2102_v30 = vmul.f32 %v10102_v31, %v7099_v61  ;;  %v10103_v17 = vmov %v10102_v31  ;;  %v10104_v28 = vstv %s6977_s15  ;;  %v7895_v21 = vpop.permute.xlu0 %2244  ;;  %10112 = vst [vmem:[#allocation186_spill] sm:$0xff] %v7897_v52  ;;  %s10127_s15 = sld [smem:[#allocation122_spill]] }
 0x3d3   : > { %v2103_v60 = vmul.f32 %v10103_v17, %v7093_v12  ;;  %v2446_v47 = vmul.f32 %v10104_v28, %v7099_v61  ;;  %v10105_v50 = vmov %v10104_v28  ;;  %v10106_v25 = vstv %s10096_s21  ;;  %10111 = vst [vmem:[#allocation185_spill] sm:$0xff] %v7895_v21  ;;  %1680 = vrot.lane.b32.xlu1 %v7619_v43, %s9667_s9  ;;  %s8173_s21 = sld [smem:[#allocation6 + $0x21f]] }
 0x3d4   : > { %v2447_v2 = vmul.f32 %v10105_v50, %v7093_v12  ;;  %v7884_v11 = vmul.f32 %v10106_v25, %v6369_v5  ;;  %v10108_v58 = vstv %s6961_s13  ;;  %v10109_v37 = vstv %s6963_s25  ;;  %s10118_s25 = sld [smem:[#allocation116_spill]]  ;;  %2396 = vrot.lane.b32.xlu0 %v7616_v49, %s9667_s9 }
 0x3d5   : > { %v3474_v31 = vmul.f32 %v10108_v58, %v7099_v61  ;;  %v3687_v35 = vmul.f32 %v10109_v37, %v6407_v42  ;;  %v10110_v40 = vmov %v10109_v37  ;;  %v1546_v28 = vrot.slane %v1541_v51, 7 }
 0x3d6   : > { %10107 = vst [vmem:[#allocation184_spill] sm:$0xff] %v7884_v11  ;;  %v3688_v17 = vmul.f32 %v10110_v40, %v6369_v5  ;;  %v1547_v9 = vrot.slane %v1542_v39, 7  ;;  %v10113_v50 = vstv %s6971_s1  ;;  %v7906_v58 = vsel %vm1545_vm8, %v2977_v57, %v2978_v56  ;;  %v7918_v52 = vpop.permute.xlu0 %2942  ;;  %s10124_s1 = sld [smem:[#allocation25_spill]] }
 0x3d7   : > { %v2616_v25 = vmul.f32 %v10113_v50, %v6407_v42  ;;  %v10114_v11 = vmov %v10113_v50  ;;  %10115 = vst [vmem:[#allocation187_spill] sm:$0xff] %v7906_v58  ;;  %v3834_v37 = vrot.slane %v3830_v55, 7  ;;  %v3835_v18 = vrot.slane %v3831_v54, 7  ;;  %10120 = vst [vmem:[#allocation188_spill] sm:$0xff] %v7918_v52  ;;  %2372 = vrot.lane.b32.xlu1 %v7629_v36, %s9658_s5 }
 0x3d8   : > { %v2617_v4 = vmul.f32 %v10114_v11, %v6369_v5  ;;  %v10117_v40 = vstv %s6961_s13  ;;  %v2106_v51 = vrot.slane %v2102_v30, 5  ;;  %v2107_v39 = vrot.slane %v2103_v60, 5  ;;  %s10121_s13 = sld [smem:[#allocation24_spill]]  ;;  %3086 = vrot.lane.b32.xlu0 %v7626_v45, %s9658_s5 }
 0x3d9   : > { %v3473_v21 = vmul.f32 %v10117_v40, %v6369_v5  ;;  %v2450_v11 = vrot.slane %v2446_v47, 5  ;;  %v2451_v50 = vrot.slane %v2447_v2, 5  ;;  %v3478_v57 = vrot.slane %v3474_v31, 7  ;;  %v7920_v40 = vpop.permute.xlu1 %1535 }
 0x3da   : > { %v3691_v56 = vrot.slane %v3687_v35, 7  ;;  %v3692_v55 = vrot.slane %v3688_v17, 7  ;;  %v10119_v54 = vstv %s7011_s6  ;;  %v7923_v33 = vsel %vm1545_vm8, %v1546_v28, %v1547_v9  ;;  %s10129_s6 = sld [smem:[#allocation29_spill]] }
 0x3db   : > { %v2126_v58 = vmul.f32 %v10119_v54, %v7099_v61  ;;  %v10122_v1 = vstv %s10116_s20  ;;  %v2620_v60 = vrot.slane %v2616_v25, 7  ;;  %v2621_v47 = vrot.slane %v2617_v4, 7  ;;  %2052 = vrot.lane.b32.xlu1 %v7681_v63, %s9658_s5  ;;  %s8186_s20 = sld [smem:[#allocation6 + $0x29c]] }
 0x3dc   : > { %v7928_v30 = vmul.f32 %v10122_v1, %v6369_v5  ;;  %v7931_v35 = vsel %vm1545_vm8, %v3834_v37, %v3835_v18  ;;  %v10125_v2 = vstv %s10118_s25  ;;  %v3477_v17 = vrot.slane %v3473_v21, 7  ;;  %2766 = vrot.lane.b32.xlu0 %v7656_v23, %s9658_s5  ;;  %s8221_s25 = sld [smem:[#allocation6 + $0x31d]] }
 0x3dd   : > { %v7936_v31 = vmul.f32 %v10125_v2, %v6369_v5  ;;  %v2127_v9 = vmul.f32 %v10119_v54, %v7093_v12  ;;  %v7949_v21 = vsel %vm1723_vm10, %v2106_v51, %v2107_v39  ;;  %v7952_v4 = vsel %vm1723_vm10, %v2450_v11, %v2451_v50  ;;  %v7968_v39 = vpop.permute.xlu0 %2610  ;;  %v7970_v11 = vpop.permute.xlu1 %2933 }
 0x3de   : > { %10123 = vst [vmem:[#allocation189_spill] sm:$0xff] %v7928_v30  ;;  %v10130_v28 = vstv %s10121_s13  ;;  %v7960_v44 = vsel %vm1545_vm8, %v3477_v17, %v3478_v57  ;;  %v7963_v20 = vsel %vm1545_vm8, %v3691_v56, %v3692_v55  ;;  %v2130_v37 = vrot.slane %v2126_v58, 6  ;;  %10135 = vst [vmem:[#allocation193_spill] sm:$0xff] %v7968_v39  ;;  %s8228_s13 = sld [smem:[#allocation6 + $0xa3]] }
 0x3df   : > { %10126 = vst [vmem:[#allocation190_spill] sm:$0xff] %v7936_v31  ;;  %v7957_v25 = vmul.f32 %v10130_v28, %v6369_v5  ;;  %10132 = vst [vmem:[#allocation192_spill] sm:$0xff] %v7963_v20  ;;  %v10133_v1 = vstv %s10124_s1  ;;  %v7973_v50 = vsel %vm1545_vm8, %v2620_v60, %v2621_v47  ;;  %v10141_v58 = vstv %s10127_s15  ;;  %2753 = vrot.lane.b32.xlu1 %v7705_v48, %s9667_s9  ;;  %s8242_s1 = sld [smem:[#allocation6 + $0x122]] }
 0x3e0   : > { %v4150_v51 = vmul.f32 %v10133_v1, %v6369_v5  ;;  %10138 = vst [vmem:[#allocation194_spill] sm:$0xff] %v7973_v50  ;;  %v10139_v57 = vmov %v10133_v1  ;;  %v2816_v55 = vmul.f32 %v10141_v58, %v7099_v61  ;;  %v10142_v2 = vmov %v10141_v58  ;;  %3787 = vrot.lane.b32.xlu0 %v7690_v16, %s9667_s9  ;;  %s8247_s15 = sld [smem:[#allocation6 + $0x112]] }
 0x3e1   : > { %10131 = vst [vmem:[#allocation191_spill] sm:$0xff] %v7957_v25  ;;  %v4151_v56 = vmul.f32 %v10139_v57, %v7099_v61  ;;  %v2817_v17 = vmul.f32 %v10142_v2, %v7093_v12  ;;  %v2131_v54 = vrot.slane %v2127_v9, 6  ;;  %v10143_v28 = vstv %s10128_s3  ;;  %s8265_s3 = sld [smem:[#allocation6 + $0x29d]] }
 0x3e2   : > { %v2803_v1 = vmul.f32 %v10143_v28, %v7099_v61  ;;  %v10144_v18 = vmov %v10143_v28  ;;  %v10145_v60 = vstv %s10129_s6  ;;  %v10147_v2 = vstv %s10134_s27  ;;  %s8288_s6 = sld [smem:[#allocation6 + $0x220]]  ;;  %s8295_s27 = sld [smem:[#allocation6 + $0x1a2]] }
 0x3e3   : > { %v2804_v20 = vmul.f32 %v10144_v18, %v7093_v12  ;;  %v3330_v47 = vmul.f32 %v10145_v60, %v6407_v42  ;;  %v10146_v58 = vmov %v10145_v60  ;;  %v1781_v28 = vmul.f32 %v10147_v2, %v7099_v61  ;;  %2409 = vrot.lane.b32.xlu1 %v7736_v29, %s9658_s5 }
 0x3e4   : > { %v3331_v9 = vmul.f32 %v10146_v58, %v6369_v5  ;;  %v10148_v13 = vmov %v10147_v2  ;;  %v10149_v30 = vstv %s10136_s17  ;;  %v10151_v15 = vstv %s10137_s23  ;;  %v8025_v2 = vpop.permute.xlu0 %3647  ;;  %3110 = vrot.lane.b32.xlu0 %v7723_v6, %s9667_s9  ;;  %s8337_s17 = sld [smem:[#allocation6 + $0xf]]  ;;  %s8339_s23 = sld [smem:[#allocation6 + $0x1a3]] }
 0x3e5   : > { %v1782_v18 = vmul.f32 %v10148_v13, %v7093_v12  ;;  %v8010_v60 = vmul.f32 %v10149_v30, %v6369_v5  ;;  %v8015_v25 = vmul.f32 %v10151_v15, %v6369_v5  ;;  %v10153_v62 = vstv %s10140_s26  ;;  %10155 = vst [vmem:[#allocation197_spill] sm:$0xff] %v8025_v2  ;;  %v8027_v13 = vpop.permute.xlu1 %2601  ;;  %s8347_s26 = sld [smem:[#allocation6 + $0x12]] }
 0x3e6   : > { %v1768_v57 = vmul.f32 %v10153_v62, %v7099_v61  ;;  %v10154_v58 = vmov %v10153_v62  ;;  %v4154_v50 = vrot.slane %v4150_v51, 6  ;;  %v4155_v39 = vrot.slane %v4151_v56, 6 }
 0x3e7   : > { %10150 = vst [vmem:[#allocation195_spill] sm:$0xff] %v8010_v60  ;;  %10152 = vst [vmem:[#allocation196_spill] sm:$0xff] %v8015_v25  ;;  %v1769_v31 = vmul.f32 %v10154_v58, %v7093_v12  ;;  %v2820_v30 = vrot.slane %v2816_v55, 5  ;;  %v2821_v60 = vrot.slane %v2817_v17, 5  ;;  %v8032_v15 = vsel %vm1628_vm9, %v2130_v37, %v2131_v54  ;;  %3430 = vrot.lane.b32.xlu1 %v7745_v32, %s9667_s9 }
 0x3e8   : > { %v2807_v62 = vrot.slane %v2803_v1, 5  ;;  %v2808_v25 = vrot.slane %v2804_v20, 5  ;;  %v2482_v58 = vstv %s7941_s16  ;;  %v3334_v51 = vrot.slane %v3330_v47, 7  ;;  %v8051_v52 = vpop.permute.xlu0 %2958  ;;  %3800 = vrot.lane.b32.xlu0 %v7739_v10, %s9658_s5  ;;  %s8259_s16 = sld [smem:[#allocation6 + $0x10f]] }
 0x3e9   : > { %v3335_v56 = vrot.slane %v3331_v9, 7  ;;  %v1785_v37 = vrot.slane %v1781_v28, 6  ;;  %v1786_v55 = vrot.slane %v1782_v18, 6  ;;  %v1772_v20 = vrot.slane %v1768_v57, 6  ;;  %10160 = vst [vmem:[#allocation198_spill] sm:$0xff] %v8051_v52  ;;  %v8053_v43 = vpop.permute.xlu1 %2253 }
 0x3ea   : > { %v1773_v17 = vrot.slane %v1769_v31, 6  ;;  %v10158_v54 = vstv %s7251_s10  ;;  %10161 = vst [vmem:[#allocation199_spill] sm:$0xff] %v8053_v43  ;;  %v8056_v47 = vsel %vm1628_vm9, %v4154_v50, %v4155_v39  ;;  %v8059_v9 = vsel %vm1723_vm10, %v2820_v30, %v2821_v60  ;;  %s8093_s10 = sld [smem:[#allocation6 + $0x1a0]] }
 0x3eb   : > { %v3160_v1 = vmul.f32 %v10158_v54, %v7099_v61  ;;  %v10159_v49 = vmov %v10158_v54  ;;  %v10162_v28 = vstv %s7267_s28  ;;  %v8070_v54 = vsel %vm1723_vm10, %v2807_v62, %v2808_v25  ;;  %s8101_s28 = sld [smem:[#allocation6 + $0x19f]]  ;;  %3443 = vrot.lane.b32.xlu1 %v7812_v27, %s9658_s5 }
 0x3ec   : > { %v3161_v2 = vmul.f32 %v10159_v49, %v7093_v12  ;;  %v2459_v57 = vmul.f32 %v10162_v28, %v7099_v61  ;;  %v10163_v31 = vmov %v10162_v28  ;;  %v10164_v49 = vstv %s10156_s11  ;;  %3123 = vrot.lane.b32.xlu0 %v7780_v8, %s9658_s5  ;;  %s8435_s11 = sld [smem:[#allocation6 + $0x20f]] }
 0x3ed   : > { %v2460_v18 = vmul.f32 %v10163_v31, %v7093_v12  ;;  %v8075_v43 = vmul.f32 %v10164_v49, %v6369_v5  ;;  %v10166_v39 = vstv %s10157_s30  ;;  %v8089_v62 = vsel %vm1545_vm8, %v3334_v51, %v3335_v56  ;;  %v8103_v51 = vpop.permute.xlu0 %3656  ;;  %v8105_v56 = vpop.permute.xlu1 %3290  ;;  %s8437_s30 = sld [smem:[#allocation6 + $0x212]] }
 0x3ee   : > { %v4044_v50 = vmul.f32 %v10166_v39, %v6407_v42  ;;  %v10167_v60 = vmov %v10166_v39  ;;  %10168 = vst [vmem:[#allocation201_spill] sm:$0xff] %v8089_v62  ;;  %v2483_v28 = vmul.f32 %v2482_v58, %v7099_v61  ;;  %v2484_v42 = vmul.f32 %v2482_v58, %v7093_v12  ;;  %10169 = vst [vmem:[#allocation202_spill] sm:$0xff] %v8103_v51 }
 0x3ef   : > { %10165 = vst [vmem:[#allocation200_spill] sm:$0xff] %v8075_v43  ;;  %v4045_v30 = vmul.f32 %v10167_v60, %v6369_v5  ;;  %v8096_v45 = vsel %vm1628_vm9, %v1785_v37, %v1786_v55  ;;  %v8099_v31 = vsel %vm1628_vm9, %v1772_v20, %v1773_v17  ;;  %v3164_v36 = vrot.slane %v3160_v1, 5  ;;  %10170 = vst [vmem:[#allocation203_spill] sm:$0xff] %v8105_v56 }
 0x3f0   : > { %v3165_v49 = vrot.slane %v3161_v2, 5  ;;  %v2463_v39 = vrot.slane %v2459_v57, 5  ;;  %v2464_v58 = vrot.slane %v2460_v18, 5  ;;  %v4173_v60 = vstv %s8023_s7  ;;  %2096 = vrot.lane.b32.xlu0 %v7818_v14, %s9667_s9  ;;  %1738 = vrot.lane.b32.xlu1 %v7826_v22, %s9667_s9  ;;  %s8351_s7 = sld [smem:[#allocation6 + $0x123]] }
 0x3f1   : > { %v3172_v25 = vstv %s8029_s19  ;;  %v4048_v43 = vrot.slane %v4044_v50, 7  ;;  %v4049_v34 = vrot.slane %v4045_v30, 7  ;;  %v2138_v37 = vstv %s8035_s14  ;;  %v8129_v23 = vpop.permute.xlu0 %2967  ;;  %v8131_v63 = vpop.permute.xlu1 %3299  ;;  %s8384_s19 = sld [smem:[#allocation6 + $0x95]]  ;;  %s8386_s14 = sld [smem:[#allocation6 + $0x31f]] }
 0x3f2   : > { %v2162_v55 = vstv %s8037_s2  ;;  %v2487_v2 = vrot.slane %v2483_v28, 6  ;;  %v2488_v20 = vrot.slane %v2484_v42, 6  ;;  %v4175_v17 = vmul.f32 %v4173_v60, %v7099_v61  ;;  %10171 = vst [vmem:[#allocation204_spill] sm:$0xff] %v8129_v23  ;;  %10172 = vst [vmem:[#allocation205_spill] sm:$0xff] %v8131_v63  ;;  %s8404_s2 = sld [smem:[#allocation6 + $0x29f]] }
 0x3f3   : > { %v4080_v1 = vstv %s8043_s0  ;;  %v8122_v57 = vsel %vm1723_vm10, %v3164_v36, %v3165_v49  ;;  %v4174_v18 = vmul.f32 %v4173_v60, %v6369_v5  ;;  %v3173_v50 = vmul.f32 %v3172_v25, %v7099_v61  ;;  %s8454_s0 = sld [smem:[#allocation6 + $0x192]] }
 0x3f4   : > { %v3174_v30 = vmul.f32 %v3172_v25, %v7093_v12  ;;  %v2139_v28 = vmul.f32 %v2138_v37, %v7099_v61  ;;  %v2140_v42 = vmul.f32 %v2138_v37, %v7093_v12  ;;  %v2163_v36 = vmul.f32 %v2162_v55, %v7099_v61  ;;  %3824 = vrot.lane.b32.xlu0 %v7837_v3, %s9667_s9 }
 0x3f5   : > { %v4186_v49 = vstv %s8067_s22  ;;  %v8140_v60 = vsel %vm1723_vm10, %v2463_v39, %v2464_v58  ;;  %v8143_v25 = vsel %vm1545_vm8, %v4048_v43, %v4049_v34  ;;  %v8146_v62 = vmul.f32 %v4080_v1, %v6369_v5  ;;  %v8162_v16 = vpop.permute.xlu1 %3315  ;;  %3467 = vrot.lane.b32.xlu1 %v7840_v7, %s9667_s9  ;;  %s8478_s22 = sld [smem:[#allocation6 + $0x18f]] }
 0x3f6   : > { %10173 = vst [vmem:[#allocation206_spill] sm:$0xff] %v8143_v25  ;;  %v2164_v63 = vmul.f32 %v2162_v55, %v7093_v12  ;;  %v8154_v37 = vsel %vm1628_vm9, %v2487_v2, %v2488_v20  ;;  %v4179_v56 = vrot.slane %v4175_v17, 7  ;;  %v4188_v39 = vmul.f32 %v4186_v49, %v7099_v61  ;;  %10176 = vst [vmem:[#allocation209_spill] sm:$0xff] %v8162_v16 }
 0x3f7   : > { %10174 = vst [vmem:[#allocation207_spill] sm:$0xff] %v8146_v62  ;;  %v2852_v34 = vstv %s8093_s10  ;;  %v3177_v43 = vrot.slane %v3173_v50, 5  ;;  %v3178_v58 = vrot.slane %v3174_v30, 5  ;;  %v4187_v1 = vmul.f32 %v4186_v49, %v6369_v5  ;;  %v8160_v62 = vpop.permute.xlu0 %3672  ;;  %s8488_s10 = sld [smem:[#allocation6 + $0x222]] }
 0x3f8   : > { %v2839_v55 = vstv %s8101_s28  ;;  %10175 = vst [vmem:[#allocation208_spill] sm:$0xff] %v8160_v62  ;;  %v4178_v25 = vrot.slane %v4174_v18, 7  ;;  %v2143_v48 = vrot.slane %v2139_v28, 6  ;;  %v2144_v51 = vrot.slane %v2140_v42, 6  ;;  %1751 = vrot.lane.b32.xlu0 %v7847_v53, %s9658_s5  ;;  %s8502_s28 = sld [smem:[#allocation6 + $0x39c]] }
 0x3f9   : > { %v2167_v2 = vrot.slane %v2163_v36, 7  ;;  %v2168_v20 = vrot.slane %v2164_v63, 7  ;;  %v8167_v17 = vmul.f32 %v2852_v34, %v7099_v61  ;;  %v3873_v50 = vstv %s8111_s29  ;;  %v8195_v29 = vpop.permute.xlu1 %4004  ;;  %4144 = vrot.lane.b32.xlu1 %v7856_v38, %s9667_s9  ;;  %s8515_s29 = sld [smem:[#allocation6 + $0x15]] }
 0x3fa   : > { %v1804_v30 = vstv %s8113_s4  ;;  %v8180_v18 = vsel %vm1545_vm8, %v4178_v25, %v4179_v56  ;;  %v4192_v63 = vrot.slane %v4188_v39, 7  ;;  %v2854_v28 = vmul.f32 %v2852_v34, %v7093_v12  ;;  %10178 = vst [vmem:[#allocation211_spill] sm:$0xff] %v8195_v29  ;;  %s8525_s4 = sld [smem:[#allocation6 + $0x320]] }
 0x3fb   : > { %v8184_v42 = vmul.f32 %v2839_v55, %v7099_v61  ;;  %v8189_v36 = vsel %vm1723_vm10, %v3177_v43, %v3178_v58  ;;  %v4191_v49 = vrot.slane %v4187_v1, 7  ;;  %v2841_v6 = vmul.f32 %v2839_v55, %v7093_v12  ;;  %v8193_v62 = vpop.permute.xlu0 %3681 }
 0x3fc   : > { %v1817_v16 = vstv %s8127_s24  ;;  %10177 = vst [vmem:[#allocation210_spill] sm:$0xff] %v8193_v62  ;;  %v3874_v56 = vmul.f32 %v3873_v50, %v7099_v61  ;;  %v3875_v25 = vmul.f32 %v3873_v50, %v7093_v12  ;;  %v1805_v39 = vmul.f32 %v1804_v30, %v7099_v61  ;;  %3837 = vrot.lane.b32.xlu0 %v7931_v35, %s9658_s5  ;;  %s8546_s24 = sld [smem:[#allocation6 + $0x18]] }
 0x3fd   : > { %v2495_v34 = vstv %s8137_s8  ;;  %v8202_v23 = vsel %vm1628_vm9, %v2143_v48, %v2144_v51  ;;  %v8205_v43 = vsel %vm1545_vm8, %v2167_v2, %v2168_v20  ;;  %v2857_v58 = vrot.slane %v8167_v17, 6  ;;  %2109 = vrot.lane.b32.xlu1 %v7949_v21, %s9658_s5  ;;  %s8552_s8 = sld [smem:[#allocation6 + $0x2a0]] }
 0x3fe   : > { %v1806_v1 = vmul.f32 %v1804_v30, %v7093_v12  ;;  %v8214_v55 = vsel %vm1545_vm8, %v4191_v49, %v4192_v63  ;;  %v2858_v50 = vrot.slane %v2854_v28, 6  ;;  %v2844_v51 = vrot.slane %v8184_v42, 6  ;;  %v8225_v30 = vpop.permute.xlu1 %3324 }
 0x3ff   : > { %v1818_v48 = vmul.f32 %v1817_v16, %v7099_v61  ;;  %v2845_v2 = vrot.slane %v2841_v6, 6  ;;  %v1819_v20 = vmul.f32 %v1817_v16, %v7093_v12  ;;  %v2496_v17 = vmul.f32 %v2495_v34, %v7099_v61  ;;  %v8223_v32 = vpop.permute.xlu0 %1920  ;;  %10179 = vst [vmem:[#allocation212_spill] sm:$0xff] %v8225_v30 }
 0x400   : > { %v2497_v10 = vmul.f32 %v2495_v34, %v7093_v12  ;;  %v3878_v63 = vrot.slane %v3874_v56, 5  ;;  %v3879_v28 = vrot.slane %v3875_v25, 5  ;;  %v1809_v42 = vrot.slane %v1805_v39, 7  ;;  %2453 = vrot.lane.b32.xlu0 %v7952_v4, %s9667_s9 }
 0x401   : > { %v1958_v49 = vstv %s8164_s12  ;;  %v1841_v16 = vadd.f32 %v7047_v0, %v7113_v59  ;;  %v1810_v6 = vrot.slane %v1806_v1, 7  ;;  %v1983_v29 = vstv %s8171_s18  ;;  %3480 = vrot.lane.b32.xlu1 %v7960_v44, %s9658_s5  ;;  %s8585_s12 = sld [smem:[#allocation6 + $0x115]]  ;;  %s8605_s18 = sld [smem:[#allocation6 + $0x223]] }
 0x402   : > { %v3196_v62 = vstv %s8173_s21  ;;  %v1480_v34 = vadd.f32 %v7049_v26, %v7128_v19  ;;  %v1822_v56 = vrot.slane %v1818_v48, 7  ;;  %v1985_v25 = vmul.f32 %v1983_v29, %v7099_v61  ;;  %v8251_v19 = vpop.permute.xlu1 %4013  ;;  %s8621_s21 = sld [smem:[#allocation6 + $0x39d]] }
 0x403   : > { %v3516_v39 = vstv %s8186_s20  ;;  %v1823_v30 = vrot.slane %v1819_v20, 7  ;;  %v2500_v0 = vrot.slane %v2496_v17, 6  ;;  %v2501_v59 = vrot.slane %v2497_v10, 6  ;;  %v8249_v26 = vpop.permute.xlu0 %1573  ;;  %10182 = vst [vmem:[#allocation215_spill] sm:$0xff] %v8251_v19  ;;  %v10183_v17 = vld [vmem:[#allocation123_spill] sm:$0xff]  ;;  %s8652_s20 = sld [smem:[#allocation6 + $0x98]] }
 0x404   : > { %v8245_v1 = vmul.f32 %v1958_v49, %v6369_v5  ;;  %10181 = vst [vmem:[#allocation214_spill] sm:$0xff] %v8249_v26  ;;  %v8254_v8 = vsel %vm1628_vm9, %v2857_v58, %v2858_v50  ;;  %v1984_v27 = vmul.f32 %v1983_v29, %v6369_v5  ;;  %v3197_v48 = vmul.f32 %v3196_v62, %v7099_v61  ;;  %v10184_v49 = vld [vmem:[#allocation124_spill] sm:$0xff] }
 0x405   : > { %v3198_v20 = vmul.f32 %v3196_v62, %v7093_v12  ;;  %v1849_v10 = vadd.f32 %v10183_v17, %v1841_v16  ;;  %v1488_v52 = vadd.f32 %v10184_v49, %v1480_v34  ;;  %v3517_v26 = vmul.f32 %v3516_v39, %v7099_v61  ;;  %2133 = vrot.lane.b32.xlu0 %v8032_v15, %s9667_s9 }
 0x406   : > { %10180 = vst [vmem:[#allocation213_spill] sm:$0xff] %v8245_v1  ;;  %v3518_v19 = vmul.f32 %v3516_v39, %v7093_v12  ;;  %v8272_v62 = vsel %vm1628_vm9, %v2844_v51, %v2845_v2  ;;  %v8275_v29 = vsel %vm1723_vm10, %v3878_v63, %v3879_v28  ;;  %v8278_v58 = vsel %vm1545_vm8, %v1809_v42, %v1810_v6  ;;  %v8292_v51 = vpop.permute.xlu1 %4029 }
 0x407   : > { %v1989_v50 = vrot.slane %v1985_v25, 6  ;;  %v8281_v16 = vsel %vm1545_vm8, %v1822_v56, %v1823_v30  ;;  %v8284_v34 = vsel %vm1628_vm9, %v2500_v0, %v2501_v59  ;;  %v3886_v39 = vstv %s8221_s25  ;;  %v8290_v22 = vpop.permute.xlu0 %2277  ;;  %10188 = vst [vmem:[#allocation217_spill] sm:$0xff] %v8292_v51  ;;  %v10189_v30 = vld [vmem:[#allocation143_spill] sm:$0xff]  ;;  %v10191_v25 = vld [vmem:[#allocation145_spill] sm:$0xff]  ;;  %4157 = vrot.lane.b32.xlu1 %v8056_v47, %s9658_s5  ;;  %s8665_s25 = sld [smem:[#allocation6 + $0x322]] }
 0x408   : > { %10185 = vst [vmem:[#allocation123_spill] sm:$0xff] %v8281_v16  ;;  %10186 = vst [vmem:[#allocation124_spill] sm:$0xff] %v8284_v34  ;;  %v1988_v2 = vrot.slane %v1984_v27, 6  ;;  %v3201_v63 = vrot.slane %v3197_v48, 6  ;;  %v3202_v28 = vrot.slane %v3198_v20, 6  ;;  %v2175_v42 = vstv %s8228_s13  ;;  %v10236_v47 = vld [vmem:[#allocation147_spill] sm:$0xff] }
 0x409   : > { %10187 = vst [vmem:[#allocation216_spill] sm:$0xff] %v8290_v22  ;;  %v10190_v6 = vrot.slane %v10189_v30, 1  ;;  %v10192_v0 = vrot.slane %v10191_v25, 1  ;;  %v3521_v17 = vrot.slane %v3517_v26, 5  ;;  %v3522_v49 = vrot.slane %v3518_v19, 5  ;;  %v10195_v30 = vld [vmem:[#allocation125_spill] sm:$0xff]  ;;  %2823 = vrot.lane.b32.xlu0 %v8059_v9, %s9658_s5 }
 0x40a   : > { %v8310_v27 = vsel %vm1628_vm9, %v1988_v2, %v1989_v50  ;;  %v3887_v48 = vmul.f32 %v3886_v39, %v7099_v61  ;;  %v3888_v20 = vmul.f32 %v3886_v39, %v7093_v12  ;;  %v2176_v19 = vmul.f32 %v2175_v42, %v7099_v61  ;;  %v10196_v25 = vld [vmem:[#allocation130_spill] sm:$0xff]  ;;  %v8324_v50 = vpop.permute.xlu1 %4038  ;;  %s8677_s13 = sld [smem:[#allocation6 + $0x2a2]] }
 0x40b   : > { %v8299_v56 = vadd.f32 %v10190_v6, %v1849_v10  ;;  %v8303_v59 = vadd.f32 %v10192_v0, %v1488_v52  ;;  %10193 = vst [vmem:[#allocation143_spill] sm:$0xff] %v8310_v27  ;;  %v2519_v10 = vstv %s8242_s1  ;;  %v10194_v52 = vld [vmem:[#allocation127_spill] sm:$0xff]  ;;  %v2177_v6 = vmul.f32 %v2175_v42, %v7093_v12  ;;  %v10197_v0 = vld [vmem:[#allocation126_spill] sm:$0xff]  ;;  %v8322_v14 = vpop.permute.xlu0 %2647  ;;  %10198 = vst [vmem:[#allocation145_spill] sm:$0xff] %v8324_v50  ;;  %s8709_s1 = sld [smem:[#allocation6 + $0x30f]] }
 0x40c   : > { %v2555_v26 = vadd.f32 %v10195_v30, %v10194_v52  ;;  %v2340_v3 = vstv %s8247_s15  ;;  %v2198_v7 = vadd.f32 %v10197_v0, %v10196_v25  ;;  %v8327_v2 = vsel %vm1628_vm9, %v3201_v63, %v3202_v28  ;;  %v10201_v25 = vld [vmem:[#allocation128_spill] sm:$0xff]  ;;  %2810 = vrot.lane.b32.xlu1 %v8070_v54, %s9667_s9  ;;  %s8711_s15 = sld [smem:[#allocation6 + $0x312]] }
 0x40d   : > { %10199 = vst [vmem:[#allocation127_spill] sm:$0xff] %v8327_v2  ;;  %v2315_v39 = vstv %s8259_s16  ;;  %v2342_v51 = vmul.f32 %v2340_v3, %v7099_v61  ;;  %v8332_v52 = vsel %vm1723_vm10, %v3521_v17, %v3522_v49  ;;  %v2520_v42 = vmul.f32 %v2519_v10, %v7099_v61  ;;  %v10202_v49 = vld [vmem:[#allocation129_spill] sm:$0xff]  ;;  %1788 = vrot.lane.b32.xlu0 %v8096_v45, %s9658_s5  ;;  %s8747_s16 = sld [smem:[#allocation6 + $0x195]] }
 0x40e   : > { %10200 = vst [vmem:[#allocation125_spill] sm:$0xff] %v8332_v52  ;;  %v2521_v30 = vmul.f32 %v2519_v10, %v7093_v12  ;;  %v3529_v27 = vstv %s8265_s3  ;;  %v2563_v0 = vadd.f32 %v10201_v25, %v2555_v26  ;;  %v3891_v63 = vrot.slane %v3887_v48, 5  ;;  %v10203_v26 = vld [vmem:[#allocation131_spill] sm:$0xff]  ;;  %v8357_v22 = vpop.permute.xlu1 %1560  ;;  %s9114_s3 = sld [smem:[#allocation6 + $0x19b]] }
 0x40f   : > { %v3892_v28 = vrot.slane %v3888_v20, 5  ;;  %v2341_v17 = vmul.f32 %v2340_v3, %v6369_v5  ;;  %v2206_v10 = vadd.f32 %v10202_v49, %v2198_v7  ;;  %v2180_v50 = vrot.slane %v2176_v19, 7  ;;  %v10204_v25 = vld [vmem:[#allocation135_spill] sm:$0xff]  ;;  %v8355_v2 = vpop.permute.xlu0 %2991 }
 0x410   : > { %v2181_v1 = vrot.slane %v2177_v6, 7  ;;  %v3209_v52 = vstv %s8288_s6  ;;  %v2912_v53 = vadd.f32 %v10204_v25, %v10203_v26  ;;  %v2346_v38 = vrot.slane %v2342_v51, 6  ;;  %v10207_v25 = vld [vmem:[#allocation144_spill] sm:$0xff]  ;;  %1775 = vrot.lane.b32.xlu1 %v8099_v31, %s9667_s9  ;;  %s9116_s6 = sld [smem:[#allocation6 + $0x21]] }
 0x411   : > { %v3530_v48 = vmul.f32 %v3529_v27, %v7099_v61  ;;  %v2876_v20 = vstv %s8295_s27  ;;  %v8362_v3 = vmul.f32 %v2315_v39, %v6369_v5  ;;  %v2524_v7 = vrot.slane %v2520_v42, 7  ;;  %3167 = vrot.lane.b32.xlu0 %v8122_v57, %s9667_s9  ;;  %s10292_s27 = sld [smem:[#allocation224_spill]] }
 0x412   : > { %v2525_v19 = vrot.slane %v2521_v30, 7  ;;  %v3531_v6 = vmul.f32 %v3529_v27, %v7093_v12  ;;  %v8370_v49 = vsel %vm1723_vm10, %v3891_v63, %v3892_v28  ;;  %v2345_v51 = vrot.slane %v2341_v17, 6  ;;  %v10209_v27 = vld [vmem:[#allocation149_spill] sm:$0xff]  ;;  %v10211_v28 = vld [vmem:[#allocation134_spill] sm:$0xff] }
 0x413   : > { %10205 = vst [vmem:[#allocation130_spill] sm:$0xff] %v8362_v3  ;;  %10206 = vst [vmem:[#allocation126_spill] sm:$0xff] %v8370_v49  ;;  %v3210_v26 = vmul.f32 %v3209_v52, %v7099_v61  ;;  %v3211_v39 = vmul.f32 %v3209_v52, %v7093_v12  ;;  %v10208_v42 = vrot.slane %v10207_v25, 1  ;;  %v10210_v34 = vrot.slane %v10209_v27, 1  ;;  %v8389_v52 = vpop.permute.xlu0 %3004  ;;  %v8391_v25 = vpop.permute.xlu1 %1933 }
 0x414   : > { %v2877_v21 = vmul.f32 %v2876_v20, %v7099_v61  ;;  %v2878_v63 = vmul.f32 %v2876_v20, %v7093_v12  ;;  %v2920_v17 = vadd.f32 %v10211_v28, %v2912_v53  ;;  %10212 = vst [vmem:[#allocation128_spill] sm:$0xff] %v8389_v52  ;;  %v8400_v20 = vsel %vm1545_vm8, %v2524_v7, %v2525_v19  ;;  %v10216_v53 = vld [vmem:[#allocation132_spill] sm:$0xff]  ;;  %v10217_v28 = vld [vmem:[#allocation137_spill] sm:$0xff] }
 0x415   : > { %v8376_v30 = vadd.f32 %v10208_v42, %v2206_v10  ;;  %v8380_v35 = vadd.f32 %v10210_v34, %v2563_v0  ;;  %v8394_v10 = vsel %vm1545_vm8, %v2180_v50, %v2181_v1  ;;  %v8397_v34 = vsel %vm1628_vm9, %v2345_v51, %v2346_v38  ;;  %10215 = vst [vmem:[#allocation135_spill] sm:$0xff] %v8400_v20  ;;  %v10218_v51 = vld [vmem:[#allocation133_spill] sm:$0xff] }
 0x416   : > { %10213 = vst [vmem:[#allocation129_spill] sm:$0xff] %v8394_v10  ;;  %10214 = vst [vmem:[#allocation131_spill] sm:$0xff] %v8397_v34  ;;  %v3534_v0 = vrot.slane %v3530_v48, 5  ;;  %v3535_v42 = vrot.slane %v3531_v6, 5  ;;  %v1598_v27 = vstv %s8337_s17  ;;  %v2889_v49 = vstv %s8339_s23  ;;  %v10219_v34 = vld [vmem:[#allocation138_spill] sm:$0xff]  ;;  %2466 = vrot.lane.b32.xlu1 %v8140_v60, %s9658_s5  ;;  %2490 = vrot.lane.b32.xlu0 %v8154_v37, %s9667_s9  ;;  %s9127_s17 = sld [smem:[#allocation6 + $0xa1]] }
 0x417   : > { %v3626_v52 = vadd.f32 %v10217_v28, %v10216_v53  ;;  %v3214_v1 = vrot.slane %v3210_v26, 6  ;;  %v3215_v50 = vrot.slane %v3211_v39, 6  ;;  %v1623_v38 = vstv %s8347_s26  ;;  %v8417_v10 = vpop.permute.xlu0 %3705  ;;  %v8419_v53 = vpop.permute.xlu1 %2634  ;;  %v10221_v39 = vld [vmem:[#allocation140_spill] sm:$0xff]  ;;  %s8787_s26 = sld [smem:[#allocation6 + $0x2a3]]  ;;  %s9135_s23 = sld [smem:[#allocation6 + $0x11e]] }
 0x418   : > { %v2881_v48 = vrot.slane %v2877_v21, 7  ;;  %v2882_v7 = vrot.slane %v2878_v63, 7  ;;  %v1625_v19 = vmul.f32 %v1623_v38, %v7099_v61  ;;  %v2532_v6 = vstv %s8351_s7  ;;  %10220 = vst [vmem:[#allocation144_spill] sm:$0xff] %v8417_v10  ;;  %v10222_v63 = vld [vmem:[#allocation158_spill] sm:$0xff]  ;;  %s8796_s7 = sld [smem:[#allocation6 + $0x198]] }
 0x419   : > { %v3269_v20 = vadd.f32 %v10219_v34, %v10218_v51  ;;  %v8422_v4 = vmul.f32 %v1598_v27, %v6369_v5  ;;  %v2890_v44 = vmul.f32 %v2889_v49, %v7099_v61  ;;  %v2891_v26 = vmul.f32 %v2889_v49, %v7093_v12  ;;  %v10224_v27 = vld [vmem:[#allocation139_spill] sm:$0xff] }
 0x41a   : > { %v3634_v21 = vadd.f32 %v10221_v39, %v3626_v52  ;;  %v10223_v28 = vrot.slane %v10222_v63, 1  ;;  %v8432_v34 = vsel %vm1723_vm10, %v3534_v0, %v3535_v42  ;;  %v1624_v51 = vmul.f32 %v1623_v38, %v6369_v5  ;;  %4181 = vrot.lane.b32.xlu1 %v8180_v18, %s9667_s9  ;;  %3180 = vrot.lane.b32.xlu0 %v8189_v36, %s9658_s5  ;;  %v10255_v36 = vld [vmem:[#allocation188_spill] sm:$0xff] }
 0x41b   : > { %v3277_v10 = vadd.f32 %v10224_v27, %v3269_v20  ;;  %v2533_v52 = vmul.f32 %v2532_v6, %v7099_v61  ;;  %v8450_v0 = vsel %vm1545_vm8, %v2881_v48, %v2882_v7  ;;  %v1630_v42 = vrot.slane %v1625_v19, 6  ;;  %v8456_v15 = vpop.permute.xlu0 %3718  ;;  %v8458_v39 = vpop.permute.xlu1 %2290 }
 0x41c   : > { %v8429_v16 = vadd.f32 %v10223_v28, %v2920_v17  ;;  %v8446_v17 = vsel %vm1628_vm9, %v3214_v1, %v3215_v50  ;;  %10225 = vst [vmem:[#allocation149_spill] sm:$0xff] %v8450_v0  ;;  %v2020_v38 = vstv %s8384_s19  ;;  %v3910_v20 = vstv %s8386_s14  ;;  %v10226_v28 = vld [vmem:[#allocation159_spill] sm:$0xff]  ;;  %s8809_s19 = sld [smem:[#allocation6 + $0x39f]]  ;;  %s8845_s14 = sld [smem:[#allocation6 + $0x215]] }
 0x41d   : > { %v2894_v63 = vrot.slane %v2890_v44, 7  ;;  %v2895_v1 = vrot.slane %v2891_v26, 7  ;;  %v2534_v50 = vmul.f32 %v2532_v6, %v7093_v12  ;;  %v10227_v27 = vrot.slane %v10226_v28, 1 }
 0x41e   : > { %v1629_v48 = vrot.slane %v1624_v51, 6  ;;  %v2022_v7 = vmul.f32 %v2020_v38, %v7099_v61  ;;  %v3553_v19 = vstv %s8404_s2  ;;  %v10228_v3 = vrot.slane %v7634_v46, 1  ;;  %v10230_v51 = vld [vmem:[#allocation142_spill] sm:$0xff]  ;;  %2146 = vrot.lane.b32.xlu1 %v8202_v23, %s9658_s5  ;;  %2170 = vrot.lane.b32.xlu0 %v8205_v43, %s9667_s9  ;;  %s8881_s2 = sld [smem:[#allocation6 + $0x118]] }
 0x41f   : > { %v8464_v49 = vadd.f32 %v10227_v27, %v3634_v21  ;;  %v2537_v44 = vrot.slane %v2533_v52, 7  ;;  %v2021_v6 = vmul.f32 %v2020_v38, %v6369_v5  ;;  %v3911_v26 = vmul.f32 %v3910_v20, %v7099_v61  ;;  %v10229_v21 = vld [vmem:[#allocation136_spill] sm:$0xff]  ;;  %v8490_v52 = vpop.permute.xlu1 %3348  ;;  %v8492_v38 = vpop.permute.xlu0 %2064 }
 0x420   : > { %v8470_v0 = vadd.f32 %v10228_v3, %v3277_v10  ;;  %v3983_v46 = vadd.f32 %v10230_v51, %v10229_v21  ;;  %v10231_v3 = vld [vmem:[#allocation175_spill] sm:$0xff]  ;;  %v8485_v9 = vsel %vm1628_vm9, %v1629_v48, %v1630_v42  ;;  %v3912_v54 = vmul.f32 %v3910_v20, %v7093_v12  ;;  %10232 = vst [vmem:[#allocation134_spill] sm:$0xff] %v8490_v52  ;;  %v10235_v51 = vld [vmem:[#allocation178_spill] sm:$0xff] }
 0x421   : > { %v1504_v10 = vadd.f32 %v10231_v3, %v8303_v59  ;;  %10233 = vst [vmem:[#allocation132_spill] sm:$0xff] %v8492_v38  ;;  %v8495_v28 = vsel %vm1545_vm8, %v2894_v63, %v2895_v1  ;;  %v2538_v27 = vrot.slane %v2534_v50, 7  ;;  %v3554_v21 = vmul.f32 %v3553_v19, %v7099_v61 }
 0x422   : > { %10234 = vst [vmem:[#allocation137_spill] sm:$0xff] %v8495_v28  ;;  %v3555_v59 = vmul.f32 %v3553_v19, %v7093_v12  ;;  %v2026_v48 = vrot.slane %v2022_v7, 7  ;;  %v3029_v3 = vstv %s8435_s11  ;;  %v3054_v20 = vstv %s8437_s30  ;;  %v10237_v19 = vld [vmem:[#allocation169_spill] sm:$0xff]  ;;  %4194 = vrot.lane.b32.xlu1 %v8214_v55, %s9658_s5  ;;  %2860 = vrot.lane.b32.xlu0 %v8254_v8, %s9658_s5  ;;  %s8887_s11 = sld [smem:[#allocation6 + $0x3a0]]  ;;  %s8905_s30 = sld [smem:[#allocation6 + $0x323]] }
 0x423   : > { %v1513_v42 = vadd.f32 %v10235_v51, %v1504_v10  ;;  %v3991_v52 = vadd.f32 %v10236_v47, %v3983_v46  ;;  %v2025_v63 = vrot.slane %v2021_v6, 7  ;;  %v3915_v1 = vrot.slane %v3911_v26, 6  ;;  %v8517_v47 = vpop.permute.xlu1 %3361  ;;  %v8519_v45 = vpop.permute.xlu0 %1713  ;;  %v10262_v55 = vld [vmem:[#allocation165_spill] sm:$0xff] }
 0x424   : > { %v3056_v50 = vmul.f32 %v3054_v20, %v7099_v61  ;;  %v1865_v10 = vadd.f32 %v10237_v19, %v8299_v56  ;;  %v2579_v7 = vadd.f32 %v7809_v24, %v8380_v35  ;;  %v3916_v51 = vrot.slane %v3912_v54, 6  ;;  %10238 = vst [vmem:[#allocation133_spill] sm:$0xff] %v8519_v45  ;;  %v10239_v24 = vld [vmem:[#allocation172_spill] sm:$0xff] }
 0x425   : > { %v2697_v38 = vstv %s8454_s0  ;;  %v3558_v31 = vrot.slane %v3554_v21, 6  ;;  %v3559_v6 = vrot.slane %v3555_v59, 6  ;;  %v8522_v26 = vmul.f32 %v3029_v3, %v6369_v5  ;;  %v10240_v35 = vld [vmem:[#allocation152_spill] sm:$0xff]  ;;  %s8914_s0 = sld [smem:[#allocation6 + $0x28f]] }
 0x426   : > { %v3055_v46 = vmul.f32 %v3054_v20, %v6369_v5  ;;  %v1874_v56 = vadd.f32 %v10239_v24, %v1865_v10  ;;  %v10241_v54 = vrot.slane %v10240_v35, 2  ;;  %v8531_v28 = vsel %vm1545_vm8, %v2537_v44, %v2538_v27  ;;  %v10243_v44 = vld [vmem:[#allocation179_spill] sm:$0xff]  ;;  %v10246_v35 = vld [vmem:[#allocation148_spill] sm:$0xff]  ;;  %2847 = vrot.lane.b32.xlu1 %v8272_v62, %s9667_s9  ;;  %3881 = vrot.lane.b32.xlu0 %v8275_v29, %s9667_s9 }
 0x427   : > { %v8534_v45 = vsel %vm1545_vm8, %v2025_v63, %v2026_v48  ;;  %v10242_v21 = vrot.slane %v7717_v41, 1  ;;  %v3060_v3 = vrot.slane %v3056_v50, 6  ;;  %v2672_v20 = vstv %s8478_s22  ;;  %v10244_v48 = vld [vmem:[#allocation183_spill] sm:$0xff]  ;;  %v8554_v57 = vpop.permute.xlu1 %4062  ;;  %v8556_v10 = vpop.permute.xlu0 %2421  ;;  %v10275_v29 = vld [vmem:[#allocation83_spill] sm:$0xff]  ;;  %s8935_s22 = sld [smem:[#allocation6 + $0x292]] }
 0x428   : > { %v1520_v19 = vadd.f32 %v10241_v54, %v1513_v42  ;;  %v2698_v42 = vmul.f32 %v2697_v38, %v6369_v5  ;;  %v2588_v27 = vadd.f32 %v10243_v44, %v2579_v7  ;;  %v2699_v41 = vmul.f32 %v2697_v38, %v7099_v61  ;;  %10245 = vst [vmem:[#allocation138_spill] sm:$0xff] %v8556_v10 }
 0x429   : > { %v8538_v59 = vadd.f32 %v10242_v21, %v3991_v52  ;;  %v3233_v52 = vstv %s8488_s10  ;;  %v8559_v60 = vsel %vm1628_vm9, %v3915_v1, %v3916_v51  ;;  %v8562_v50 = vsel %vm1628_vm9, %v3558_v31, %v3559_v6  ;;  %s8950_s10 = sld [smem:[#allocation6 + $0x3a3]] }
 0x42a   : > { %v1529_v63 = vadd.f32 %v10244_v48, %v1520_v19  ;;  %v3059_v24 = vrot.slane %v3055_v46, 6  ;;  %v10247_v54 = vrot.slane %v10246_v35, 2  ;;  %v8569_v21 = vmul.f32 %v2672_v20, %v6369_v5  ;;  %1812 = vrot.lane.b32.xlu1 %v8278_v58, %s9667_s9 }
 0x42b   : > { %v4230_v44 = vstv %s8502_s28  ;;  %v2702_v51 = vrot.slane %v2698_v42, 6  ;;  %v3234_v31 = vmul.f32 %v3233_v52, %v7099_v61  ;;  %v3235_v6 = vmul.f32 %v3233_v52, %v7093_v12  ;;  %v8589_v18 = vpop.permute.xlu1 %4075  ;;  %s8968_s28 = sld [smem:[#allocation6 + $0x3a2]] }
 0x42c   : > { %v1881_v38 = vadd.f32 %v10247_v54, %v1874_v56  ;;  %v1538_v19 = vadd.f32 %v7920_v40, %v1529_v63  ;;  %v8577_v1 = vsel %vm1628_vm9, %v3059_v24, %v3060_v3  ;;  %v10248_v40 = vld [vmem:[#allocation177_spill] sm:$0xff]  ;;  %v10249_v56 = vld [vmem:[#allocation162_spill] sm:$0xff]  ;;  %v2703_v63 = vrot.slane %v2699_v41, 6  ;;  %v8591_v3 = vpop.permute.xlu0 %2786 }
 0x42d   : > { %v10250_v20 = vrot.slane %v10249_v56, 2  ;;  %v1661_v35 = vstv %s8515_s29  ;;  %v2936_v37 = vadd.f32 %v7970_v11, %v8429_v16  ;;  %10251 = vst [vmem:[#allocation140_spill] sm:$0xff] %v8591_v3  ;;  %v8594_v42 = vmul.f32 %v4230_v44, %v7099_v61  ;;  %v10252_v41 = vld [vmem:[#allocation174_spill] sm:$0xff]  ;;  %v10300_v3 = vld [vmem:[#allocation189_spill] sm:$0xff]  ;;  %s8986_s29 = sld [smem:[#allocation6 + $0x38f]] }
 0x42e   : > { %v1890_v46 = vadd.f32 %v10248_v40, %v1881_v38  ;;  %v8597_v52 = vmul.f32 %v4230_v44, %v7093_v12  ;;  %v2222_v24 = vadd.f32 %v10252_v41, %v8376_v30  ;;  %v10253_v54 = vld [vmem:[#allocation182_spill] sm:$0xff]  ;;  %v1550_v16 = vadd.f32 %v7923_v33, %v1538_v19 }
 0x42f   : > { %v2595_v48 = vadd.f32 %v10250_v20, %v2588_v27  ;;  %v3923_v27 = vstv %s8525_s4  ;;  %v3238_v44 = vrot.slane %v3234_v31, 7  ;;  %v3239_v40 = vrot.slane %v3235_v6, 7  ;;  %v10254_v20 = vld [vmem:[#allocation186_spill] sm:$0xff]  ;;  %v8626_v23 = vpop.permute.xlu1 %1705  ;;  %s9018_s4 = sld [smem:[#allocation6 + $0x315]] }
 0x430   : > { %v1899_v38 = vadd.f32 %v10253_v54, %v1890_v46  ;;  %v8612_v56 = vmul.f32 %v1661_v35, %v6369_v5  ;;  %v1698_v30 = vstv %s8546_s24  ;;  %v2231_v46 = vadd.f32 %v10254_v20, %v2222_v24  ;;  %v8624_v41 = vpop.permute.xlu0 %3135  ;;  %s9020_s24 = sld [smem:[#allocation6 + $0x295]] }
 0x431   : > { %v2604_v11 = vadd.f32 %v8027_v13, %v2595_v48  ;;  %v1563_v13 = vadd.f32 %v8357_v22, %v1550_v16  ;;  %v8618_v33 = vsel %vm1628_vm9, %v2702_v51, %v2703_v63  ;;  %v3566_v19 = vstv %s8552_s8  ;;  %10256 = vst [vmem:[#allocation158_spill] sm:$0xff] %v8624_v41  ;;  %v10257_v22 = vld [vmem:[#allocation193_spill] sm:$0xff]  ;;  %v10258_v51 = vld [vmem:[#allocation176_spill] sm:$0xff]  ;;  %s9037_s8 = sld [smem:[#allocation6 + $0x392]] }
 0x432   : > { %v2945_v48 = vadd.f32 %v10255_v36, %v2936_v37  ;;  %v4235_v31 = vrot.slane %v8594_v42, 5  ;;  %v1663_v6 = vmul.f32 %v1661_v35, %v7099_v61  ;;  %v3924_v24 = vmul.f32 %v3923_v27, %v7099_v61 }
 0x433   : > { %v2613_v54 = vadd.f32 %v10257_v22, %v2604_v11  ;;  %v1910_v63 = vadd.f32 %v10258_v51, %v1899_v38  ;;  %v4236_v16 = vrot.slane %v8597_v52, 5  ;;  %v8635_v20 = vmul.f32 %v1698_v30, %v7099_v61  ;;  %v10259_v52 = vld [vmem:[#allocation155_spill] sm:$0xff]  ;;  %v10261_v22 = vld [vmem:[#allocation214_spill] sm:$0xff] }
 0x434   : > { %v8642_v37 = vsel %vm1545_vm8, %v3238_v44, %v3239_v40  ;;  %v1666_v35 = vrot.slane %v8612_v56, 7  ;;  %v3925_v42 = vmul.f32 %v3923_v27, %v7093_v12  ;;  %v3567_v38 = vmul.f32 %v3566_v19, %v7099_v61  ;;  %v8656_v7 = vpop.permute.xlu0 %3143  ;;  %v8658_v56 = vpop.permute.xlu1 %2072 }
 0x435   : > { %v10260_v11 = vrot.slane %v10259_v52, 2  ;;  %v1923_v36 = vadd.f32 %v8223_v32, %v1910_v63  ;;  %v1576_v43 = vadd.f32 %v10261_v22, %v1563_v13  ;;  %v2377_v51 = vstv %s8585_s12  ;;  %10264 = vst [vmem:[#allocation139_spill] sm:$0xff] %v8656_v7  ;;  %10265 = vst [vmem:[#allocation159_spill] sm:$0xff] %v8658_v56  ;;  %v10266_v32 = vld [vmem:[#allocation194_spill] sm:$0xff]  ;;  %s9278_s12 = sld [smem:[#allocation6 + $0x39b]] }
 0x436   : > { %v10263_v44 = vrot.slane %v10262_v55, 2  ;;  %v1667_v27 = vrot.slane %v1663_v6, 7  ;;  %v3928_v41 = vrot.slane %v3924_v24, 6  ;;  %v3568_v52 = vmul.f32 %v3566_v19, %v7093_v12  ;;  %v10267_v22 = vld [vmem:[#allocation198_spill] sm:$0xff] }
 0x437   : > { %v2238_v30 = vadd.f32 %v10260_v11, %v2231_v46  ;;  %v1936_v46 = vadd.f32 %v8391_v25, %v1923_v36  ;;  %v2624_v63 = vadd.f32 %v10266_v32, %v2613_v54  ;;  %v2379_v13 = vmul.f32 %v2377_v51, %v7099_v61  ;;  %v10268_v25 = vld [vmem:[#allocation185_spill] sm:$0xff]  ;;  %v10269_v54 = vld [vmem:[#allocation184_spill] sm:$0xff] }
 0x438   : > { %v2952_v40 = vadd.f32 %v10263_v44, %v2945_v48  ;;  %v3246_v11 = vstv %s8605_s18  ;;  %v3929_v6 = vrot.slane %v3925_v42, 6  ;;  %v3571_v24 = vrot.slane %v3567_v38, 6  ;;  %v8680_v7 = vpop.permute.xlu0 %3849  ;;  %v8682_v8 = vpop.permute.xlu1 %2778  ;;  %s9286_s18 = sld [smem:[#allocation6 + $0x2a1]] }
 0x439   : > { %v2378_v19 = vmul.f32 %v2377_v51, %v6369_v5  ;;  %v2247_v36 = vadd.f32 %v10268_v25, %v2238_v30  ;;  %v1580_v55 = vadd.f32 %v10269_v54, %v1576_v43  ;;  %v2637_v44 = vadd.f32 %v8419_v53, %v2624_v63  ;;  %10271 = vst [vmem:[#allocation136_spill] sm:$0xff] %v8680_v7  ;;  %v10273_v30 = vld [vmem:[#allocation199_spill] sm:$0xff]  ;;  %v10274_v53 = vld [vmem:[#allocation190_spill] sm:$0xff] }
 0x43a   : > { %v2961_v48 = vadd.f32 %v10267_v22, %v2952_v40  ;;  %v4243_v32 = vstv %s8621_s21  ;;  %v10270_v40 = vld [vmem:[#allocation204_spill] sm:$0xff]  ;;  %10272 = vst [vmem:[#allocation142_spill] sm:$0xff] %v8682_v8  ;;  %v3572_v62 = vrot.slane %v3568_v52, 6  ;;  %v8685_v42 = vmul.f32 %v3246_v11, %v7099_v61  ;;  %s10370_s21 = sld [smem:[#allocation226_spill]] }
 0x43b   : > { %v8688_v38 = vmul.f32 %v3246_v11, %v7093_v12  ;;  %v2256_v43 = vadd.f32 %v10273_v30, %v2247_v36  ;;  %v1940_v51 = vadd.f32 %v10274_v53, %v1936_v46  ;;  %v8693_v63 = vsel %vm1723_vm10, %v4235_v31, %v4236_v16  ;;  %v10276_v36 = vld [vmem:[#allocation187_spill] sm:$0xff]  ;;  %v10279_v30 = vld [vmem:[#allocation180_spill] sm:$0xff] }
 0x43c   : > { %v2970_v22 = vadd.f32 %v10270_v40, %v2961_v48  ;;  %v2383_v48 = vrot.slane %v2379_v13, 7  ;;  %v8701_v11 = vsel %vm1545_vm8, %v1666_v35, %v1667_v27  ;;  %v8704_v25 = vsel %vm1628_vm9, %v3928_v41, %v3929_v6  ;;  %v8717_v27 = vpop.permute.xlu0 %3857  ;;  %v8719_v41 = vpop.permute.xlu1 %2429  ;;  %v10280_v53 = vld [vmem:[#allocation82_spill] sm:$0xff] }
 0x43d   : > { %v8707_v46 = vmul.f32 %v4243_v32, %v7099_v61  ;;  %v1588_v31 = vadd.f32 %v10275_v29, %v1580_v55  ;;  %v2650_v58 = vadd.f32 %v8322_v14, %v2637_v44  ;;  %v2382_v16 = vrot.slane %v2378_v19, 7  ;;  %10277 = vst [vmem:[#allocation175_spill] sm:$0xff] %v8717_v27  ;;  %10278 = vst [vmem:[#allocation178_spill] sm:$0xff] %v8719_v41 }
 0x43e   : > { %v2981_v35 = vadd.f32 %v10276_v36, %v2970_v22  ;;  %v8722_v6 = vsel %vm1628_vm9, %v3571_v24, %v3572_v62  ;;  %v2267_v55 = vadd.f32 %v10279_v30, %v2256_v43  ;;  %v1948_v14 = vadd.f32 %v10280_v53, %v1940_v51  ;;  %v10281_v22 = vld [vmem:[#allocation197_spill] sm:$0xff]  ;;  %v10282_v24 = vld [vmem:[#allocation123_spill] sm:$0xff]  ;;  %v10283_v62 = vld [vmem:[#allocation124_spill] sm:$0xff] }
 0x43f   : > { %v8729_v19 = vsel %vm1545_vm8, %v2382_v16, %v2383_v48  ;;  %v3947_v44 = vstv %s8665_s25  ;;  %v3650_v29 = vadd.f32 %v10281_v22, %v8464_v49  ;;  %1825 = vrot.lane.b32.xlu0 %v10282_v24, %s9658_s5  ;;  %2503 = vrot.lane.b32.xlu1 %v10283_v62, %s9658_s5  ;;  %v8740_v52 = vmul.f32 %v4243_v32, %v7093_v12  ;;  %v10284_v51 = vld [vmem:[#allocation216_spill] sm:$0xff]  ;;  %v10285_v16 = vld [vmem:[#allocation90_spill] sm:$0xff]  ;;  %v10286_v53 = vld [vmem:[#allocation191_spill] sm:$0xff]  ;;  %s9307_s25 = sld [smem:[#allocation6 + $0x39e]] }
 0x440   : > { %v2994_v36 = vadd.f32 %v8355_v2, %v2981_v35  ;;  %v4248_v43 = vrot.slane %v8707_v46, 5  ;;  %v2280_v48 = vadd.f32 %v10284_v51, %v2267_v55  ;;  %v1596_v30 = vadd.f32 %v10285_v16, %v1588_v31  ;;  %v10287_v2 = vld [vmem:[#allocation202_spill] sm:$0xff]  ;;  %v10288_v22 = vld [vmem:[#allocation128_spill] sm:$0xff]  ;;  %v8751_v62 = vpop.permute.xlu0 %2002  ;;  %v8753_v32 = vpop.permute.xlu1 %3492  ;;  %v10290_v31 = vld [vmem:[#allocation203_spill] sm:$0xff] }
 0x441   : > { %v2654_v13 = vadd.f32 %v10286_v53, %v2650_v58  ;;  %v3590_v49 = vstv %s8677_s13  ;;  %v3659_v35 = vadd.f32 %v10287_v2, %v3650_v29  ;;  %10289 = vst [vmem:[#allocation147_spill] sm:$0xff] %v8753_v32  ;;  %v3948_v46 = vmul.f32 %v3947_v44, %v7099_v61  ;;  %v10291_v51 = vld [vmem:[#allocation91_spill] sm:$0xff]  ;;  %v4335_v29 = vld [vmem:[%s10292_s27] sm:$0x1f]  ;;  %s5232_s13 = sld [smem:[#allocation6 + $0x9b]] }
 0x442   : > { %v3007_v24 = vadd.f32 %v10288_v22, %v2994_v36  ;;  %v3949_v55 = vmul.f32 %v3947_v44, %v7093_v12  ;;  %v3293_v58 = vadd.f32 %v10290_v31, %v8470_v0  ;;  %v1956_v16 = vadd.f32 %v10291_v51, %v1948_v14  ;;  %v5463_v36 = vld [vmem:[%s10292_s27 + $0x8] sm:$0x1f]  ;;  %v10293_v2 = vld [vmem:[#allocation127_spill] sm:$0xff]  ;;  %v10294_v44 = vld [vmem:[#allocation125_spill] sm:$0xff]  ;;  %5654 = vmatpush3.msk.msra.mxu0 %vm4352_vm11, %v4335_v29 }
 0x443   : > { %v2293_v53 = vadd.f32 %v8458_v39, %v2280_v48  ;;  %3204 = vrot.lane.b32.xlu0 %v10293_v2, %s9667_s9  ;;  %3524 = vrot.lane.b32.xlu1 %v10294_v44, %s9667_s9  ;;  %v3591_v0 = vmul.f32 %v3590_v49, %v7099_v61  ;;  %v3592_v14 = vmul.f32 %v3590_v49, %v7093_v12  ;;  %v3743_v39 = vstv %s8709_s1  ;;  %v10295_v22 = vld [vmem:[#allocation205_spill] sm:$0xff]  ;;  %v10296_v51 = vld [vmem:[#allocation97_spill] sm:$0xff]  ;;  %s5199_s1 = sld [smem:[#allocation6 + $0x1e]] }
 0x444   : > { %v3768_v48 = vstv %s8711_s15  ;;  %v3302_v31 = vadd.f32 %v10295_v22, %v3293_v58  ;;  %v2662_v54 = vadd.f32 %v10296_v51, %v2654_v13  ;;  %v10297_v40 = vrot.slane %v8422_v4, 1  ;;  %5671 = vmatpush3.msk.msra.mxu1 %vm4352_vm11, %v5463_v36  ;;  %v10298_v2 = vld [vmem:[#allocation168_spill] sm:$0xff]  ;;  %v8783_v10 = vpop.permute.xlu1 %3500  ;;  %v8785_v49 = vpop.permute.xlu0 %1656  ;;  %v10308_v36 = vld [vmem:[#allocation171_spill] sm:$0xff]  ;;  %v10310_v51 = vld [vmem:[#allocation104_spill] sm:$0xff]  ;;  %s9105_s15 = sld [smem:[#allocation6 + $0x9e]] }
 0x445   : > { %v4249_v7 = vrot.slane %v8740_v52, 5  ;;  %v10299_v32 = vrot.slane %v10298_v2, 2  ;;  %v3011_v41 = vadd.f32 %v10300_v3, %v3007_v24  ;;  %10301 = vst [vmem:[#allocation169_spill] sm:$0xff] %v8783_v10  ;;  %v3952_v8 = vrot.slane %v3948_v46, 7  ;;  %v10302_v4 = vld [vmem:[#allocation196_spill] sm:$0xff]  ;;  %v10307_v46 = vld [vmem:[#allocation129_spill] sm:$0xff] }
 0x446   : > { %v1603_v27 = vadd.f32 %v10297_v40, %v1596_v30  ;;  %v3953_v58 = vrot.slane %v3949_v55, 7  ;;  %v2297_v13 = vadd.f32 %v10302_v4, %v2293_v53  ;;  %v10303_v40 = vld [vmem:[#allocation213_spill] sm:$0xff]  ;;  %v8793_v29 = vmul.f32 %v3743_v39, %v6369_v5  ;;  %v10305_v3 = vld [vmem:[#allocation208_spill] sm:$0xff]  ;;  %v10311_v4 = vld [vmem:[#allocation151_spill] sm:$0xff] }
 0x447   : > { %v3666_v44 = vadd.f32 %v10299_v32, %v3659_v35  ;;  %v10304_v52 = vrot.slane %v10303_v40, 1  ;;  %v3769_v35 = vmul.f32 %v3768_v48, %v6369_v5  ;;  %v10306_v32 = vld [vmem:[#allocation126_spill] sm:$0xff]  ;;  %2183 = vrot.lane.b32.xlu1 %v10307_v46, %s9658_s5  ;;  %v3595_v55 = vrot.slane %v3591_v0, 7  ;;  %v10317_v46 = vld [vmem:[#allocation96_spill] sm:$0xff] }
 0x448   : > { %3894 = vrot.lane.b32.xlu0 %v10306_v32, %s9658_s5  ;;  %v3596_v53 = vrot.slane %v3592_v14, 7  ;;  %v10309_v39 = vrot.slane %v10308_v36, 2  ;;  %v2670_v2 = vadd.f32 %v10310_v51, %v2662_v54  ;;  %v1612_v40 = vadd.f32 %v10311_v4, %v1603_v27  ;;  %v10313_v32 = vld [vmem:[#allocation109_spill] sm:$0xff]  ;;  %v8813_v56 = vpop.permute.xlu1 %4206  ;;  %v8815_v0 = vpop.permute.xlu0 %2359 }
 0x449   : > { %v1963_v30 = vadd.f32 %v10304_v52, %v1956_v16  ;;  %v3675_v24 = vadd.f32 %v10305_v3, %v3666_v44  ;;  %v3770_v16 = vmul.f32 %v3768_v48, %v7099_v61  ;;  %v2734_v52 = vstv %s8747_s16  ;;  %v10312_v44 = vld [vmem:[#allocation210_spill] sm:$0xff]  ;;  %s9107_s16 = sld [smem:[#allocation6 + $0x11b]] }
 0x44a   : > { %v3309_v22 = vadd.f32 %v10309_v39, %v3302_v31  ;;  %v3019_v10 = vadd.f32 %v10313_v32, %v3011_v41  ;;  %v10314_v14 = vrot.slane %v8688_v38, 7  ;;  %v10315_v48 = vrot.slane %v8685_v42, 7  ;;  %v10319_v38 = vld [vmem:[#allocation135_spill] sm:$0xff] }
 0x44b   : > { %v3684_v3 = vadd.f32 %v10312_v44, %v3675_v24  ;;  %v10316_v27 = vstv %s8652_s20  ;;  %v2305_v36 = vadd.f32 %v10317_v46, %v2297_v13  ;;  %v10318_v24 = vld [vmem:[#allocation141_spill] sm:$0xff]  ;;  %v8832_v41 = vsel %vm1723_vm10, %v4248_v43, %v4249_v7  ;;  %3537 = vrot.lane.b32.xlu1 %v8432_v34, %s9658_s5  ;;  %v10321_v43 = vld [vmem:[#allocation146_spill] sm:$0xff]  ;;  %s9305_s20 = sld [smem:[#allocation6 + $0x321]] }
 0x44c   : > { %v8822_v31 = vsel %vm1545_vm8, %v10315_v48, %v10314_v14  ;;  %v8827_v54 = vmul.f32 %v10316_v27, %v7099_v61  ;;  %v1972_v39 = vadd.f32 %v10318_v24, %v1963_v30  ;;  %v8835_v51 = vsel %vm1545_vm8, %v3952_v8, %v3953_v58  ;;  %2527 = vrot.lane.b32.xlu0 %v10319_v38, %s9667_s9  ;;  %v10320_v7 = vld [vmem:[#allocation209_spill] sm:$0xff]  ;;  %v8856_v27 = vpop.permute.xlu1 %4214  ;;  %v8858_v46 = vpop.permute.xlu0 %2039  ;;  %v10326_v38 = vld [vmem:[#allocation212_spill] sm:$0xff] }
 0x44d   : > { %v3773_v4 = vrot.slane %v3769_v35, 6  ;;  %v3774_v44 = vrot.slane %v3770_v16, 6  ;;  %v8843_v13 = vmul.f32 %v2734_v52, %v6369_v5  ;;  %v3318_v8 = vadd.f32 %v10320_v7, %v3309_v22  ;;  %v10323_v34 = vld [vmem:[#allocation113_spill] sm:$0xff]  ;;  %v10324_v35 = vld [vmem:[#allocation192_spill] sm:$0xff]  ;;  %10325 = vst [vmem:[#allocation172_spill] sm:$0xff] %v8856_v27  ;;  %v10327_v7 = vld [vmem:[#allocation105_spill] sm:$0xff] }
 0x44e   : > { %v1621_v58 = vadd.f32 %v10321_v43, %v1612_v40  ;;  %v10322_v30 = vrot.slane %v8569_v21, 1  ;;  %v8852_v14 = vsel %vm1545_vm8, %v3595_v55, %v3596_v53  ;;  %v3027_v48 = vadd.f32 %v10323_v34, %v3019_v10  ;;  %v10329_v53 = vld [vmem:[#allocation211_spill] sm:$0xff]  ;;  %v10331_v34 = vld [vmem:[#allocation149_spill] sm:$0xff] }
 0x44f   : > { %v3695_v16 = vadd.f32 %v10324_v35, %v3684_v3  ;;  %v2736_v24 = vmul.f32 %v2734_v52, %v7099_v61  ;;  %v3603_v22 = vstv %s8787_s26  ;;  %v3327_v40 = vadd.f32 %v10326_v38, %v3318_v8  ;;  %2884 = vrot.lane.b32.xlu1 %v10331_v34, %s9667_s9  ;;  %v10337_v34 = vld [vmem:[#allocation130_spill] sm:$0xff]  ;;  %s9142_s26 = sld [smem:[#allocation6 + $0x218]] }
 0x450   : > { %v2677_v32 = vadd.f32 %v10322_v30, %v2670_v2  ;;  %v2313_v21 = vadd.f32 %v10327_v7, %v2305_v36  ;;  %v10328_v2 = vld [vmem:[#allocation154_spill] sm:$0xff]  ;;  %v2771_v55 = vstv %s8796_s7  ;;  %v4007_v10 = vadd.f32 %v10329_v53, %v8538_v59  ;;  %v10330_v30 = vld [vmem:[#allocation144_spill] sm:$0xff]  ;;  %3217 = vrot.lane.b32.xlu0 %v8446_v17, %s9658_s5  ;;  %v1644_v53 = vpop.permute.xlu1 %1643  ;;  %s9147_s7 = sld [smem:[#allocation6 + $0x19e]] }
 0x451   : > { %v1981_v43 = vadd.f32 %v10328_v2, %v1972_v39  ;;  %v3708_v3 = vadd.f32 %v10330_v30, %v3695_v16  ;;  %v8874_v52 = vsel %vm1628_vm9, %v3773_v4, %v3774_v44  ;;  %v2739_v8 = vrot.slane %v8843_v13, 7  ;;  %v10332_v39 = vld [vmem:[#allocation157_spill] sm:$0xff]  ;;  %v10333_v16 = vld [vmem:[#allocation215_spill] sm:$0xff]  ;;  %v2730_v2 = vpop.permute.xlu0 %2729 }
 0x452   : > { %v1633_v36 = vadd.f32 %v8485_v9, %v1621_v58  ;;  %v2686_v35 = vadd.f32 %v10332_v39, %v2677_v32  ;;  %v3604_v38 = vmul.f32 %v3603_v22, %v7099_v61  ;;  %v4267_v59 = vstv %s8809_s19  ;;  %v10335_v9 = vld [vmem:[#allocation201_spill] sm:$0xff]  ;;  %v10336_v32 = vld [vmem:[#allocation143_spill] sm:$0xff]  ;;  %s9151_s19 = sld [smem:[#allocation6 + $0x21b]] }
 0x453   : > { %v4016_v7 = vadd.f32 %v10333_v16, %v4007_v10  ;;  %v3721_v17 = vadd.f32 %v8456_v15, %v3708_v3  ;;  %v10334_v4 = vrot.slane %v8522_v26, 1  ;;  %v2740_v13 = vrot.slane %v2736_v24, 7  ;;  %v10339_v10 = vld [vmem:[#allocation137_spill] sm:$0xff]  ;;  %2540 = vrot.lane.b32.xlu1 %v8531_v28, %s9658_s5 }
 0x454   : > { %v3338_v58 = vadd.f32 %v10335_v9, %v3327_v40  ;;  %v1992_v30 = vadd.f32 %v10336_v32, %v1981_v43  ;;  %v10338_v39 = vrot.slane %v10337_v34, 1  ;;  %v1646_v27 = vadd.f32 %v1644_v53, %v1633_v36  ;;  %2897 = vrot.lane.b32.xlu0 %v10339_v10, %s9658_s5  ;;  %v10340_v40 = vld [vmem:[#allocation134_spill] sm:$0xff]  ;;  %v10341_v36 = vld [vmem:[#allocation153_spill] sm:$0xff]  ;;  %v10344_v9 = vld [vmem:[#allocation195_spill] sm:$0xff]  ;;  %v2016_v34 = vpop.permute.xlu1 %2015 }
 0x455   : > { %v3034_v44 = vadd.f32 %v10334_v4, %v3027_v48  ;;  %v3605_v15 = vmul.f32 %v3603_v22, %v7093_v12  ;;  %v4268_v26 = vmul.f32 %v4267_v59, %v7099_v61  ;;  %v4269_v48 = vmul.f32 %v4267_v59, %v7093_v12  ;;  %v10342_v53 = vld [vmem:[#allocation181_spill] sm:$0xff]  ;;  %v1694_v32 = vpop.permute.xlu0 %1693 }
 0x456   : > { %v2320_v42 = vadd.f32 %v10338_v39, %v2313_v21  ;;  %v3091_v24 = vstv %s8845_s14  ;;  %v3351_v3 = vadd.f32 %v10340_v40, %v3338_v58  ;;  %v2005_v43 = vadd.f32 %v8751_v62, %v1992_v30  ;;  %v10345_v39 = vld [vmem:[#allocation156_spill] sm:$0xff]  ;;  %v10347_v40 = vld [vmem:[#allocation217_spill] sm:$0xff]  ;;  %s9173_s14 = sld [smem:[#allocation6 + $0x121]] }
 0x457   : > { %v1659_v21 = vadd.f32 %v8785_v49, %v1646_v27  ;;  %v2695_v16 = vadd.f32 %v10341_v36, %v2686_v35  ;;  %v10343_v4 = vrot.slane %v10342_v53, 2  ;;  %v3725_v22 = vadd.f32 %v10344_v9, %v3721_v17  ;;  %v10346_v49 = vld [vmem:[#allocation150_spill] sm:$0xff]  ;;  %3561 = vrot.lane.b32.xlu1 %v8562_v50, %s9667_s9  ;;  %v10349_v36 = vld [vmem:[#allocation160_spill] sm:$0xff] }
 0x458   : > { %v3043_v59 = vadd.f32 %v10345_v39, %v3034_v44  ;;  %v8912_v58 = vmul.f32 %v2771_v55, %v7099_v61  ;;  %v3364_v62 = vadd.f32 %v8517_v47, %v3351_v3  ;;  %v2329_v27 = vadd.f32 %v10346_v49, %v2320_v42  ;;  %3918 = vrot.lane.b32.xlu0 %v8559_v60, %s9667_s9  ;;  %v10348_v60 = vld [vmem:[#allocation117_spill] sm:$0xff] }
 0x459   : > { %v4023_v28 = vadd.f32 %v10343_v4, %v4016_v7  ;;  %v2018_v35 = vadd.f32 %v2016_v34, %v2005_v43  ;;  %v3608_v30 = vrot.slane %v3604_v38, 7  ;;  %v8923_v7 = vsel %vm1545_vm8, %v2739_v8, %v2740_v13  ;;  %v3074_v53 = vpop.permute.xlu0 %3073  ;;  %v2717_v8 = vpop.permute.xlu1 %2716  ;;  %v10351_v4 = vld [vmem:[#allocation161_spill] sm:$0xff] }
 0x45a   : > { %v3609_v55 = vrot.slane %v3605_v15, 7  ;;  %v4272_v17 = vrot.slane %v4268_v26, 6  ;;  %v8926_v44 = vmul.f32 %v3091_v24, %v6369_v5  ;;  %v2706_v42 = vadd.f32 %v8618_v33, %v2695_v16  ;;  %v10350_v15 = vld [vmem:[#allocation200_spill] sm:$0xff] }
 0x45b   : > { %v2029_v47 = vadd.f32 %v8534_v45, %v2018_v35  ;;  %v4273_v38 = vrot.slane %v4269_v48, 6  ;;  %v2414_v10 = vstv %s8881_s2  ;;  %v4032_v3 = vadd.f32 %v10347_v40, %v4023_v28  ;;  %v10352_v48 = vld [vmem:[#allocation145_spill] sm:$0xff]  ;;  %4238 = vrot.lane.b32.xlu1 %v8693_v63, %s9667_s9  ;;  %s9176_s2 = sld [smem:[#allocation6 + $0x318]] }
 0x45c   : > { %v3733_v43 = vadd.f32 %v10348_v60, %v3725_v22  ;;  %v3052_v50 = vadd.f32 %v10349_v36, %v3043_v59  ;;  %v4280_v13 = vstv %s8887_s11  ;;  %v3368_v26 = vadd.f32 %v10350_v15, %v3364_v62  ;;  %3241 = vrot.lane.b32.xlu0 %v8642_v37, %s9667_s9  ;;  %v10353_v62 = vld [vmem:[#allocation120_spill] sm:$0xff]  ;;  %s9180_s11 = sld [smem:[#allocation6 + $0x1a1]] }
 0x45d   : > { %v2338_v45 = vadd.f32 %v10351_v4, %v2329_v27  ;;  %v2719_v9 = vadd.f32 %v2717_v8, %v2706_v42  ;;  %v2042_v33 = vadd.f32 %v8858_v46, %v2029_v47  ;;  %v4041_v16 = vadd.f32 %v10352_v48, %v4032_v3  ;;  %v2397_v63 = vpop.permute.xlu0 %2396  ;;  %v1681_v27 = vpop.permute.xlu1 %1680  ;;  %v10356_v42 = vld [vmem:[#allocation206_spill] sm:$0xff] }
 0x45e   : > { %v8946_v28 = vsel %vm1545_vm8, %v3608_v30, %v3609_v55  ;;  %v3093_v22 = vmul.f32 %v3091_v24, %v7099_v61  ;;  %v3096_v34 = vrot.slane %v8926_v44, 7  ;;  %v1670_v46 = vadd.f32 %v8701_v11, %v1659_v21  ;;  %v10354_v55 = vld [vmem:[#allocation110_spill] sm:$0xff] }
 0x45f   : > { %v8952_v39 = vadd.f32 %v2730_v2, %v2719_v9  ;;  %v8956_v59 = vmul.f32 %v2414_v10, %v7099_v61  ;;  %v3960_v37 = vstv %s8905_s30  ;;  %v3741_v49 = vadd.f32 %v10353_v62, %v3733_v43  ;;  %v10355_v2 = vld [vmem:[#allocation131_spill] sm:$0xff]  ;;  %3574 = vrot.lane.b32.xlu1 %v8722_v6, %s9658_s5  ;;  %s9182_s30 = sld [smem:[#allocation6 + $0x298]] }
 0x460   : > { %v8961_v35 = vsel %vm1628_vm9, %v4272_v17, %v4273_v38  ;;  %v4281_v24 = vmul.f32 %v4280_v13, %v7099_v61  ;;  %v3386_v30 = vstv %s8914_s0  ;;  %v3376_v44 = vadd.f32 %v10354_v55, %v3368_v26  ;;  %3931 = vrot.lane.b32.xlu0 %v8704_v25, %s9658_s5  ;;  %s9187_s0 = sld [smem:[#allocation6 + $0x395]] }
 0x461   : > { %v2349_v47 = vadd.f32 %v10355_v2, %v2338_v45  ;;  %v3063_v11 = vadd.f32 %v8577_v1, %v3052_v50  ;;  %v1683_v21 = vadd.f32 %v1681_v27, %v1670_v46  ;;  %v4052_v10 = vadd.f32 %v10356_v42, %v4041_v16  ;;  %v3087_v50 = vpop.permute.xlu0 %3086  ;;  %v2373_v8 = vpop.permute.xlu1 %2372 }
 0x462   : > { %v3097_v17 = vrot.slane %v3093_v22, 7  ;;  %v4282_v38 = vmul.f32 %v4280_v13, %v7093_v12  ;;  %v3961_v40 = vmul.f32 %v3960_v37, %v7099_v61  ;;  %v3387_v43 = vmul.f32 %v3386_v30, %v6369_v5  ;;  %v10358_v13 = vld [vmem:[#allocation114_spill] sm:$0xff] }
 0x463   : > { %v2362_v3 = vadd.f32 %v8815_v0, %v2349_v47  ;;  %v3076_v1 = vadd.f32 %v3074_v53, %v3063_v11  ;;  %v1696_v60 = vadd.f32 %v1694_v32, %v1683_v21  ;;  %v4065_v36 = vadd.f32 %v8554_v57, %v4052_v10  ;;  %4251 = vrot.lane.b32.xlu1 %v8832_v41, %s9658_s5 }
 0x464   : > { %v10357_v25 = vrot.slane %v8793_v29, 1  ;;  %v3962_v6 = vmul.f32 %v3960_v37, %v7093_v12  ;;  %v3411_v26 = vstv %s8935_s22  ;;  %v3384_v4 = vadd.f32 %v10358_v13, %v3376_v44  ;;  %3254 = vrot.lane.b32.xlu0 %v8822_v31, %s9658_s5  ;;  %v10359_v31 = vld [vmem:[#allocation163_spill] sm:$0xff]  ;;  %s9206_s22 = sld [smem:[#allocation6 + $0x21e]] }
 0x465   : > { %v1700_v45 = vadd.f32 %v8635_v20, %v1696_v60  ;;  %v3089_v0 = vadd.f32 %v3087_v50, %v3076_v1  ;;  %v2375_v53 = vadd.f32 %v2373_v8, %v2362_v3  ;;  %v3098_v57 = vsel %vm1545_vm8, %v3096_v34, %v3097_v17  ;;  %v2767_v46 = vpop.permute.xlu0 %2766  ;;  %v2053_v37 = vpop.permute.xlu1 %2052  ;;  %v10360_v44 = vld [vmem:[#allocation207_spill] sm:$0xff]  ;;  %v10364_v50 = vld [vmem:[#allocation118_spill] sm:$0xff] }
 0x466   : > { %v3748_v15 = vadd.f32 %v10357_v25, %v3741_v49  ;;  %v4285_v29 = vrot.slane %v4281_v24, 6  ;;  %v4286_v32 = vrot.slane %v4282_v38, 6  ;;  %v4317_v9 = vstv %s8950_s10  ;;  %s9208_s10 = sld [smem:[#allocation6 + $0x29b]] }
 0x467   : > { %v4078_v48 = vadd.f32 %v8589_v18, %v4065_v36  ;;  %v2386_v20 = vadd.f32 %v8729_v19, %v2375_v53  ;;  %v3389_v16 = vrot.slane %v3387_v43, 1  ;;  %v8997_v22 = vadd.f32 %v8626_v23, %v1700_v45  ;;  %3598 = vrot.lane.b32.xlu1 %v8852_v14, %s9667_s9 }
 0x468   : > { %v3757_v62 = vadd.f32 %v10359_v31, %v3748_v15  ;;  %v3965_v49 = vrot.slane %v3961_v40, 7  ;;  %v3966_v41 = vrot.slane %v3962_v6, 7  ;;  %v3412_v34 = vmul.f32 %v3411_v26, %v6369_v5  ;;  %3955 = vrot.lane.b32.xlu0 %v8835_v51, %s9667_s9  ;;  %v10361_v51 = vld [vmem:[#allocation166_spill] sm:$0xff]  ;;  %v10365_v6 = vld [vmem:[#allocation159_spill] sm:$0xff] }
 0x469   : > { %v2055_v27 = vadd.f32 %v2053_v37, %v2042_v33  ;;  %v2399_v24 = vadd.f32 %v2397_v63, %v2386_v20  ;;  %v3391_v30 = vadd.f32 %v3389_v16, %v3384_v4  ;;  %v4304_v55 = vstv %s8968_s28  ;;  %v3788_v21 = vpop.permute.xlu0 %3787  ;;  %v2754_v14 = vpop.permute.xlu1 %2753  ;;  %s9219_s28 = sld [smem:[#allocation6 + $0x31b]] }
 0x46a   : > { %v3413_v18 = vmul.f32 %v3411_v26, %v7099_v61  ;;  %v4318_v23 = vmul.f32 %v4317_v9, %v7099_v61  ;;  %v4319_v19 = vmul.f32 %v4317_v9, %v7093_v12  ;;  %v4082_v2 = vadd.f32 %v10360_v44, %v4078_v48  ;;  %v10366_v48 = vld [vmem:[#allocation167_spill] sm:$0xff] }
 0x46b   : > { %v2059_v33 = vadd.f32 %v8827_v54, %v2055_v27  ;;  %v2743_v63 = vadd.f32 %v8923_v7, %v8952_v39  ;;  %v4287_v47 = vsel %vm1628_vm9, %v4285_v29, %v4286_v32  ;;  %v3766_v11 = vadd.f32 %v10361_v51, %v3757_v62  ;;  %v10362_v54 = vld [vmem:[#allocation132_spill] sm:$0xff]  ;;  %4275 = vrot.lane.b32.xlu1 %v8961_v35, %s9667_s9 }
 0x46c   : > { %v3967_v42 = vsel %vm1545_vm8, %v3965_v49, %v3966_v41  ;;  %v4305_v10 = vmul.f32 %v4304_v55, %v7099_v61  ;;  %v4306_v17 = vmul.f32 %v4304_v55, %v7093_v12  ;;  %v10363_v7 = vld [vmem:[#allocation164_spill] sm:$0xff]  ;;  %v4100_v3 = vstv %s8986_s29  ;;  %3611 = vrot.lane.b32.xlu0 %v8946_v28, %s9658_s5  ;;  %s9227_s29 = sld [smem:[#allocation6 + $0x398]] }
 0x46d   : > { %v2067_v38 = vadd.f32 %v10362_v54, %v2059_v33  ;;  %v2756_v40 = vadd.f32 %v2754_v14, %v2743_v63  ;;  %v3400_v39 = vadd.f32 %v10363_v7, %v3391_v30  ;;  %v3416_v1 = vrot.slane %v3412_v34, 6  ;;  %v3111_v4 = vpop.permute.xlu0 %3110  ;;  %v2410_v45 = vpop.permute.xlu1 %2409  ;;  %v4716_v33 = vld [vmem:[%s10370_s21] sm:$0xff] }
 0x46e   : > { %v3417_v60 = vrot.slane %v3413_v18, 6  ;;  %v4322_v43 = vrot.slane %v4318_v23, 7  ;;  %v4323_v36 = vrot.slane %v4319_v19, 7  ;;  %v4090_v8 = vadd.f32 %v10364_v50, %v4082_v2  ;;  %v4717_v2 = vld [vmem:[%s10370_s21 + $0x8] sm:$0xff] }
 0x46f   : > { %v2769_v25 = vadd.f32 %v2767_v46, %v2756_v40  ;;  %v3100_v15 = vadd.f32 %v3098_v57, %v3089_v0  ;;  %v9031_v26 = vadd.f32 %v10365_v6, %v2067_v38  ;;  %v3777_v13 = vadd.f32 %v8874_v52, %v3766_v11  ;;  %3968 = vrot.lane.b32.xlu1 %v3967_v42, %s9658_s5  ;;  %v10367_v0 = vld [vmem:[#allocation121_spill] sm:$0xff] }
 0x470   : > { %v4309_v53 = vrot.slane %v4305_v10, 7  ;;  %v4310_v28 = vrot.slane %v4306_v17, 7  ;;  %v4101_v29 = vmul.f32 %v4100_v3, %v6369_v5  ;;  %v2412_v9 = vadd.f32 %v2410_v45, %v2399_v24  ;;  %4288 = vrot.lane.b32.xlu0 %v4287_v47, %s9658_s5  ;;  %v10369_v24 = vld [vmem:[#allocation138_spill] sm:$0xff] }
 0x471   : > { %v2773_v35 = vadd.f32 %v8912_v58, %v2769_v25  ;;  %v3113_v32 = vadd.f32 %v3111_v4, %v3100_v15  ;;  %v3409_v20 = vadd.f32 %v10366_v48, %v3400_v39  ;;  %v3418_v52 = vsel %vm1628_vm9, %v3416_v1, %v3417_v60  ;;  %v10368_v58 = vld [vmem:[#allocation142_spill] sm:$0xff]  ;;  %v3801_v31 = vpop.permute.xlu0 %3800  ;;  %v3431_v62 = vpop.permute.xlu1 %3430  ;;  %v10373_v4 = vld [vmem:[#allocation173_spill] sm:$0xff] }
 0x472   : > { %v4098_v57 = vadd.f32 %v10367_v0, %v4090_v8  ;;  %v3790_v16 = vadd.f32 %v3788_v21, %v3777_v13  ;;  %v2416_v46 = vadd.f32 %v8956_v59, %v2412_v9  ;;  %v4324_v49 = vsel %vm1545_vm8, %v4322_v43, %v4323_v36  ;;  %v10371_v47 = vld [vmem:[#allocation178_spill] sm:$0xff] }
 0x473   : > { %v9045_v37 = vadd.f32 %v10368_v58, %v2773_v35  ;;  %v4311_v41 = vsel %vm1545_vm8, %v4309_v53, %v4310_v28  ;;  %v3805_v34 = vstv %s9018_s4  ;;  %v3448_v27 = vstv %s9020_s24  ;;  %v10372_v39 = vld [vmem:[#allocation170_spill] sm:$0xff]  ;;  %s9249_s4 = sld [smem:[#allocation6 + $0x29e]]  ;;  %s9255_s24 = sld [smem:[#allocation6 + $0x221]] }
 0x474   : > { %v2424_v30 = vadd.f32 %v10369_v24, %v2416_v46  ;;  %v3803_v55 = vadd.f32 %v3801_v31, %v3790_v16  ;;  %v3420_v18 = vadd.f32 %v3418_v52, %v3409_v20  ;;  %v4103_v23 = vrot.slane %v4101_v29, 1  ;;  %4325 = vrot.lane.b32.xlu0 %v4324_v49, %s9658_s5  ;;  %4312 = vrot.lane.b32.xlu1 %v4311_v41, %s9667_s9  ;;  %s5196_s5 = sld [smem:[#allocation6 + $0x1b]] }
 0x475   : > { %v3807_v59 = vmul.f32 %v3805_v34, %v7099_v61  ;;  %v3450_v19 = vmul.f32 %v3448_v27, %v7099_v61  ;;  %v3124_v11 = vpop.permute.xlu0 %3123  ;;  %v3444_v21 = vpop.permute.xlu1 %3443  ;;  %v3806_v14 = vmul.f32 %v3805_v34, %v6369_v5  ;;  %v3449_v42 = vmul.f32 %v3448_v27, %v6369_v5 }
 0x476   : > { %v3433_v44 = vadd.f32 %v3431_v62, %v3420_v18  ;;  %v4105_v63 = vadd.f32 %v4103_v23, %v4098_v57  ;;  %v9063_v51 = vadd.f32 %v10371_v47, %v2424_v30  ;;  %v9067_v10 = vadd.f32 %v3124_v11, %v3113_v32 }
 0x477   : > { %v4125_v54 = vstv %s9037_s8  ;;  %v3811_v38 = vrot.slane %v3807_v59, 7  ;;  %v3454_v40 = vrot.slane %v3450_v19, 7  ;;  %v3810_v43 = vrot.slane %v3806_v14, 7  ;;  %s9272_s8 = sld [smem:[#allocation6 + $0x31e]] }
 0x478   : > { %v3446_v17 = vadd.f32 %v3444_v21, %v3433_v44  ;;  %4725 = vperm.xlu0 %5831, %v4717_v2   ;;  %4720 = vperm.xlu1 %5832, %v4716_v33   ;;  %v4127_v7 = vmul.f32 %v4125_v54, %v7099_v61  ;;  %v4114_v3 = vadd.f32 %v10372_v39, %v4105_v63  ;;  %v3453_v36 = vrot.slane %v3449_v42, 7  ;;  %v10374_v44 = vld [vmem:[#allocation133_spill] sm:$0xff] }
 0x479   : > { %v9072_v1 = vpop.permute.xlu0 %2096  ;;  %v1739_v60 = vpop.permute.xlu1 %1738  ;;  %v4126_v50 = vmul.f32 %v4125_v54, %v6369_v5  ;;  %v3812_v8 = vsel %vm1545_vm8, %v3810_v43, %v3811_v38  ;;  %v2077_v23 = vstv %s5232_s13  ;;  %v1716_v2 = vadd.f32 %v10374_v44, %v8997_v22  ;;  %s10390_s13 = sld [smem:[#allocation11_spill]] }
 0x47a   : > { %v3455_v25 = vsel %vm1545_vm8, %v3453_v36, %v3454_v40  ;;  %v4131_v15 = vrot.slane %v4127_v7, 6  ;;  %v3814_v6 = vadd.f32 %v3812_v8, %v3803_v55  ;;  %v4123_v45 = vadd.f32 %v10373_v4, %v4114_v3 }
 0x47b   : > { %v3457_v13 = vadd.f32 %v3455_v25, %v3446_v17  ;;  %v4130_v29 = vrot.slane %v4126_v50, 6  ;;  %v1718_v41 = vstv %s5196_s5  ;;  %v1756_v33 = vstv %s5199_s1  ;;  %s9334_s5 = sld [smem:[#allocation6 + $0x3a1]] }
 0x47c   : > { %v1719_v24 = vmul.f32 %v1718_v41, %v7099_v61  ;;  %v1720_v30 = vmul.f32 %v1718_v41, %v7093_v12  ;;  %v2078_v11 = vmul.f32 %v2077_v23, %v7099_v61  ;;  %v2079_v21 = vmul.f32 %v2077_v23, %v7093_v12 }
 0x47d   : > { %v3825_v53 = vpop.permute.xlu0 %3824  ;;  %v3468_v28 = vpop.permute.xlu1 %3467  ;;  %v4132_v9 = vsel %vm1628_vm9, %v4130_v29, %v4131_v15  ;;  %v1757_v14 = vmul.f32 %v1756_v33, %v7099_v61  ;;  %v1758_v42 = vmul.f32 %v1756_v33, %v7093_v12  ;;  %v2114_v50 = vstv %s9105_s15  ;;  %s10384_s15 = sld [smem:[#allocation225_spill]] }
 0x47e   : > { %v3827_v35 = vadd.f32 %v3825_v53, %v3814_v6  ;;  %v9078_v32 = vadd.f32 %v3468_v28, %v3457_v13  ;;  %v4134_v48 = vadd.f32 %v4132_v9, %v4123_v45  ;;  %v1724_v59 = vrot.slane %v1719_v24, 5 }
 0x47f   : > { %v1725_v19 = vrot.slane %v1720_v30, 5  ;;  %v2082_v7 = vrot.slane %v2078_v11, 5  ;;  %v2083_v39 = vrot.slane %v2079_v21, 5  ;;  %v1761_v3 = vrot.slane %v1757_v14, 6  ;;  %s5104_s1 = sshll.u32 %s10390_s13, 1 }
 0x480   : > { %v1762_v43 = vrot.slane %v1758_v42, 6  ;;  %v2434_v8 = vstv %s9107_s16  ;;  %v2791_v6 = vstv %s9114_s3  ;;  %v1793_v13 = vstv %s9116_s6  ;;  %s10391_s6 = sld [smem:[#allocation231_spill]] }
 0x481   : > { %v1752_v20 = vpop.permute.xlu0 %1751  ;;  %v4145_v52 = vpop.permute.xlu1 %4144  ;;  %v1726_v22 = vsel %vm1723_vm10, %v1724_v59, %v1725_v19  ;;  %v2084_v4 = vsel %vm1723_vm10, %v2082_v7, %v2083_v39  ;;  %v2116_v45 = vmul.f32 %v2114_v50, %v7093_v12  ;;  %v2435_v29 = vmul.f32 %v2434_v8, %v7099_v61 }
 0x482   : > { %v9081_v0 = vadd.f32 %v4145_v52, %v4134_v48  ;;  %v1728_v17 = vadd.f32 %v1726_v22, %v1716_v2  ;;  %v1763_v53 = vsel %vm1628_vm9, %v1761_v3, %v1762_v43  ;;  %v2086_v28 = vadd.f32 %v2084_v4, %v9031_v26 }
 0x483   : > { %v2792_v48 = vmul.f32 %v2791_v6, %v7099_v61  ;;  %v1794_v26 = vmul.f32 %v1793_v13, %v7099_v61  ;;  %v1795_v41 = vmul.f32 %v1793_v13, %v7093_v12  ;;  %v2120_v59 = vrot.slane %v2116_v45, 6 }
 0x484   : > { %v1741_v40 = vadd.f32 %v1739_v60, %v1728_v17  ;;  %v2115_v60 = vmul.f32 %v2114_v50, %v7099_v61  ;;  %v2099_v24 = vadd.f32 %v9072_v1, %v2086_v28  ;;  %v2439_v44 = vrot.slane %v2435_v29, 5  ;;  %v10375_v1 = vld [vmem:[#allocation140_spill] sm:$0xff] }
 0x485   : > { %v3838_v57 = vpop.permute.xlu0 %3837  ;;  %v9083_v16 = vpop.permute.xlu1 %2109  ;;  %v2151_v33 = vstv %s9127_s17  ;;  %v2796_v11 = vrot.slane %v2792_v48, 5  ;;  %v1798_v42 = vrot.slane %v1794_v26, 7  ;;  %v1799_v17 = vrot.slane %v1795_v41, 7 }
 0x486   : > { %v9085_v46 = vadd.f32 %v3838_v57, %v3827_v35  ;;  %v1754_v36 = vadd.f32 %v1752_v20, %v1741_v40  ;;  %v2436_v35 = vmul.f32 %v2434_v8, %v7093_v12  ;;  %v2793_v20 = vmul.f32 %v2791_v6, %v7093_v12  ;;  %s465_s17 = scalar_lea.vmem %s10391_s6, %s5104_s1 }
 0x487   : > { %v2119_v23 = vrot.slane %v2115_v60, 6  ;;  %v2112_v19 = vadd.f32 %v9083_v16, %v2099_v24  ;;  %v2471_v16 = vstv %s9135_s23  ;;  %v2152_v39 = vmul.f32 %v2151_v33, %v7099_v61 }
 0x488   : > { %v1765_v9 = vadd.f32 %v1763_v53, %v1754_v36  ;;  %v2440_v2 = vrot.slane %v2436_v35, 5  ;;  %v2797_v21 = vrot.slane %v2793_v20, 5  ;;  %v2153_v3 = vmul.f32 %v2151_v33, %v7093_v12 }
 0x489   : > { %v9087_v58 = vpop.permute.xlu0 %2453  ;;  %v9089_v31 = vpop.permute.xlu1 %3480  ;;  %v2121_v7 = vsel %vm1628_vm9, %v2119_v23, %v2120_v59  ;;  %v3128_v43 = vstv %s9142_s26  ;;  %v2828_v8 = vstv %s9147_s7  ;;  %v2472_v6 = vmul.f32 %v2471_v16, %v7099_v61 }
 0x48a   : > { %v2441_v36 = vsel %vm1723_vm10, %v2439_v44, %v2440_v2  ;;  %v2123_v50 = vadd.f32 %v2121_v7, %v2112_v19  ;;  %v1800_v4 = vsel %vm1545_vm8, %v1798_v42, %v1799_v17  ;;  %v2473_v28 = vmul.f32 %v2471_v16, %v7093_v12 }
 0x48b   : > { %v2156_v35 = vrot.slane %v2152_v39, 7  ;;  %v2829_v48 = vmul.f32 %v2828_v8, %v7099_v61  ;;  %v2830_v20 = vmul.f32 %v2828_v8, %v7093_v12  ;;  %v2443_v26 = vadd.f32 %v2441_v36, %v9063_v51 }
 0x48c   : > { %v2476_v51 = vrot.slane %v2472_v6, 6  ;;  %v2508_v42 = vstv %s9173_s14  ;;  %v3842_v16 = vstv %s9176_s2  ;;  %v3485_v7 = vstv %s9182_s30  ;;  %s10386_s14 = sld [smem:[#allocation227_spill]] }
 0x48d   : > { %v9091_v62 = vpop.permute.xlu0 %2133  ;;  %v9093_v49 = vpop.permute.xlu1 %4157  ;;  %v2456_v2 = vadd.f32 %v9087_v58, %v2443_v26  ;;  %v4162_v39 = vstv %s9187_s0  ;;  %v3486_v26 = vmul.f32 %v3485_v7, %v7099_v61 }
 0x48e   : > { %v2136_v45 = vadd.f32 %v9091_v62, %v2123_v50  ;;  %v3129_v62 = vmul.f32 %v3128_v43, %v7099_v61 }
 0x491   : > { %v9095_v34 = vpop.permute.xlu0 %2823  ;;  %v9097_v27 = vpop.permute.xlu1 %2810 }
 0x495   : > { %v9101_v55 = vpop.permute.xlu0 %1788  ;;  %v1776_v18 = vpop.permute.xlu1 %1775 }
 0x496   : > { %v1778_v30 = vadd.f32 %v1776_v18, %v1765_v9  ;;  %v2789_v18 = vadd.f32 %v10375_v1, %v9045_v37  ;;  %v2798_v37 = vsel %vm1723_vm10, %v2796_v11, %v2797_v21  ;;  %v2157_v9 = vrot.slane %v2153_v3, 7 }
 0x497   : > { %v2833_v11 = vrot.slane %v2829_v48, 6  ;;  %v2834_v21 = vrot.slane %v2830_v20, 6 }
 0x498   : > { %v1791_v40 = vadd.f32 %v9101_v55, %v1778_v30  ;;  %v3148_v55 = vstv %s9151_s19  ;;  %v2800_v53 = vadd.f32 %v2798_v37, %v2789_v18  ;;  %v2158_v33 = vsel %vm1545_vm8, %v2156_v35, %v2157_v9 }
 0x499   : > { %v9109_v63 = vpop.permute.xlu0 %3167  ;;  %v9111_v47 = vpop.permute.xlu1 %2466  ;;  %v3149_v23 = vmul.f32 %v3148_v55, %v7099_v61  ;;  %v3150_v59 = vmul.f32 %v3148_v55, %v7093_v12  ;;  %v2865_v18 = vstv %s9180_s11  ;;  %v2835_v8 = vsel %vm1628_vm9, %v2833_v11, %v2834_v21 }
 0x49a   : > { %v1802_v29 = vadd.f32 %v1800_v4, %v1791_v40  ;;  %v2813_v41 = vadd.f32 %v9097_v27, %v2800_v53  ;;  %v2477_v27 = vrot.slane %v2473_v28, 6  ;;  %v2469_v1 = vadd.f32 %v9111_v47, %v2456_v2  ;;  %v10376_v53 = vld [vmem:[#allocation158_spill] sm:$0xff] }
 0x49b   : > { %v3130_v40 = vadd.f32 %v3129_v62, %v9067_v10  ;;  %v3153_v36 = vrot.slane %v3149_v23, 5  ;;  %v3154_v50 = vrot.slane %v3150_v59, 5  ;;  %v4164_v47 = vmul.f32 %v4162_v39, %v7099_v61 }
 0x49c   : > { %v2826_v17 = vadd.f32 %v9095_v34, %v2813_v41  ;;  %v2478_v34 = vsel %vm1628_vm9, %v2476_v51, %v2477_v27  ;;  %v2509_v10 = vmul.f32 %v2508_v42, %v7099_v61  ;;  %v2510_v37 = vmul.f32 %v2508_v42, %v7093_v12  ;;  %v10377_v51 = vld [vmem:[#allocation139_spill] sm:$0xff] }
 0x49d   : > { %v9122_v54 = vpop.permute.xlu0 %2490  ;;  %v9124_v38 = vpop.permute.xlu1 %4181  ;;  %v2866_v55 = vmul.f32 %v2865_v18, %v7099_v61  ;;  %v2480_v6 = vadd.f32 %v2478_v34, %v2469_v1  ;;  %v3138_v28 = vadd.f32 %v10376_v53, %v3130_v40  ;;  %v3483_v35 = vadd.f32 %v9089_v31, %v9078_v32 }
 0x49e   : > { %v4163_v9 = vmul.f32 %v4162_v39, %v6369_v5  ;;  %v3155_v41 = vsel %vm1723_vm10, %v3153_v36, %v3154_v50  ;;  %v3185_v62 = vstv %s9206_s22  ;;  %v3505_v23 = vstv %s9208_s10 }
 0x49f   : > { %v2513_v59 = vrot.slane %v2509_v10, 7  ;;  %v2493_v32 = vadd.f32 %v9122_v54, %v2480_v6  ;;  %v2514_v5 = vrot.slane %v2510_v37, 7  ;;  %v2870_v31 = vrot.slane %v2866_v55, 7 }
 0x4a0   : > { %v3487_v2 = vadd.f32 %v3486_v26, %v3483_v35  ;;  %v3146_v27 = vadd.f32 %v10377_v51, %v3138_v28  ;;  %v4160_v54 = vadd.f32 %v9093_v49, %v9081_v0  ;;  %v4199_v21 = vstv %s9227_s29  ;;  %v10379_v35 = vld [vmem:[#allocation136_spill] sm:$0xff]  ;;  %s10387_s29 = sld [smem:[#allocation228_spill]] }
 0x4a1   : > { %v9130_v25 = vpop.permute.xlu0 %3180  ;;  %v9132_v15 = vpop.permute.xlu1 %2146  ;;  %v3506_v40 = vmul.f32 %v3505_v23, %v7099_v61  ;;  %v3507_v7 = vmul.f32 %v3505_v23, %v7093_v12  ;;  %v2515_v0 = vsel %vm1545_vm8, %v2513_v59, %v2514_v5 }
 0x4a2   : > { %v2149_v24 = vadd.f32 %v9132_v15, %v2136_v45  ;;  %v2867_v45 = vmul.f32 %v2865_v18, %v7093_v12  ;;  %v3187_v18 = vmul.f32 %v3185_v62, %v7093_v12  ;;  %v3157_v36 = vadd.f32 %v3155_v41, %v3146_v27 }
 0x4a3   : > { %v3511_v26 = vrot.slane %v3507_v7, 5 }
 0x4a4   : > { %v2160_v58 = vadd.f32 %v2158_v33, %v2149_v24  ;;  %v3170_v55 = vadd.f32 %v9109_v63, %v3157_v36 }
 0x4a5   : > { %v9153_v52 = vpop.permute.xlu0 %2170  ;;  %v9155_v57 = vpop.permute.xlu1 %4194 }
 0x4a6   : > { %v2173_v4 = vadd.f32 %v9153_v52, %v2160_v58  ;;  %v3186_v58 = vmul.f32 %v3185_v62, %v7099_v61 }
 0x4a8   : > { %v3190_v6 = vrot.slane %v3186_v58, 6 }
 0x4a9   : > { %v9162_v22 = vpop.permute.xlu0 %2860  ;;  %v9164_v14 = vpop.permute.xlu1 %2847 }
 0x4ad   : > { %v9189_v13 = vpop.permute.xlu0 %3881  ;;  %v1813_v60 = vpop.permute.xlu1 %1812 }
 0x4ae   : > { %v1815_v30 = vadd.f32 %v1813_v60, %v1802_v29  ;;  %v2837_v60 = vadd.f32 %v2835_v8, %v2826_v17  ;;  %v3843_v29 = vmul.f32 %v3842_v16, %v7099_v61 }
 0x4b0   : > { %v2850_v52 = vadd.f32 %v9164_v14, %v2837_v60  ;;  %v3862_v14 = vstv %s9219_s28 }
 0x4b1   : > { %v1826_v19 = vpop.permute.xlu0 %1825  ;;  %v9202_v44 = vpop.permute.xlu1 %2503  ;;  %v9267_v16 = vmul.f32 %v3862_v14, %v7099_v61  ;;  %v3864_v8 = vmul.f32 %v3862_v14, %v7093_v12 }
 0x4b2   : > { %v1828_v15 = vadd.f32 %v1826_v19, %v1815_v30  ;;  %v4168_v30 = vrot.slane %v4164_v47, 7  ;;  %v2871_v19 = vrot.slane %v2867_v45, 7  ;;  %v2863_v42 = vadd.f32 %v9162_v22, %v2850_v52 }
 0x4b3   : > { %v2506_v17 = vadd.f32 %v9202_v44, %v2493_v32  ;;  %v3844_v22 = vadd.f32 %v3843_v29, %v9085_v46  ;;  %v10378_v44 = vld [vmem:[#allocation147_spill] sm:$0xff]  ;;  %v3191_v46 = vrot.slane %v3187_v18, 6  ;;  %v3542_v29 = vstv %s9249_s4 }
 0x4b4   : > { %1830 = vst.msk [vmem:[#allocation3] sm:$0x1f] %vm1829_vm12, %v1828_v15  ;;  %v4167_v15 = vrot.slane %v4163_v9, 7  ;;  %v2872_v49 = vsel %vm1545_vm8, %v2870_v31, %v2871_v19  ;;  %v3495_v39 = vadd.f32 %v10378_v44, %v3487_v2  ;;  %v4200_v32 = vmul.f32 %v4199_v21, %v7099_v61 }
 0x4b5   : > { %v9221_v3 = vpop.permute.xlu0 %3204  ;;  %v9223_v43 = vpop.permute.xlu1 %3524  ;;  %v2517_v10 = vadd.f32 %v2515_v0, %v2506_v17  ;;  %v2874_v37 = vadd.f32 %v2872_v49, %v2863_v42  ;;  %v3852_v9 = vadd.f32 %v10379_v35, %v3844_v22  ;;  %v3543_v5 = vmul.f32 %v3542_v29, %v7099_v61  ;;  %v10382_v42 = vld [vmem:[#allocation175_spill] sm:$0xff] }
 0x4b6   : > { %v4169_v1 = vsel %vm1545_vm8, %v4167_v15, %v4168_v30  ;;  %v10381_v30 = vmov 0.0   ;;  %v3544_v31 = vmul.f32 %v3542_v29, %v7093_v12  ;;  %v3867_v19 = vrot.slane %v9267_v16, 5 }
 0x4b7   : > { %v4171_v47 = vadd.f32 %v4169_v1, %v4160_v54  ;;  %v3868_v2 = vrot.slane %v3864_v8, 5  ;;  %v3192_v51 = vsel %vm1628_vm9, %v3190_v6, %v3191_v46  ;;  %v4219_v54 = vstv %s9278_s12 }
 0x4b8   : > { %v3860_v17 = vadd.f32 %v10382_v42, %v3852_v9  ;;  %v3547_v16 = vrot.slane %v3543_v5, 6  ;;  %v3548_v7 = vrot.slane %v3544_v31, 6  ;;  %v3579_v44 = vstv %s9286_s18  ;;  %s10388_s18 = sld [smem:[#allocation229_spill]] }
 0x4b9   : > { %v2184_v20 = vpop.permute.xlu1 %2183  ;;  %v4184_v45 = vadd.f32 %v9124_v38, %v4171_v47  ;;  %v3183_v38 = vadd.f32 %v9130_v25, %v3170_v55  ;;  %v3899_v25 = vstv %s9272_s8  ;;  %v3869_v0 = vsel %vm1723_vm10, %v3867_v19, %v3868_v2 }
 0x4ba   : > { %v9240_v48 = vpop.permute.xlu0 %3894  ;;  %v2186_v24 = vadd.f32 %v2184_v20, %v2173_v4  ;;  %v3510_v4 = vrot.slane %v3506_v40, 5  ;;  %v10380_v20 = vld [vmem:[#allocation169_spill] sm:$0xff]  ;;  %v3900_v18 = vmul.f32 %v3899_v25, %v7099_v61  ;;  %v3901_v40 = vmul.f32 %v3899_v25, %v7093_v12 }
 0x4bb   : > { %v3503_v63 = vadd.f32 %v10380_v20, %v3495_v39  ;;  %v4197_v62 = vadd.f32 %v9155_v57, %v4184_v45  ;;  %v3194_v1 = vadd.f32 %v3192_v51, %v3183_v38  ;;  %v4220_v47 = vmul.f32 %v4219_v54, %v7099_v61 }
 0x4bc   : > { %2187 = vst.msk [vmem:[#allocation3 + $0x5] sm:$0x1f] %vm1829_vm12, %v2186_v24  ;;  %v3222_v24 = vstv %s9255_s24  ;;  %v3512_v57 = vsel %vm1723_vm10, %v3510_v4, %v3511_v26  ;;  %v4221_v8 = vmul.f32 %v4219_v54, %v7093_v12  ;;  %v3871_v55 = vadd.f32 %v3869_v0, %v3860_v17 }
 0x4bd   : > { %v9253_v11 = vpop.permute.xlu1 %3537  ;;  %v3223_v14 = vmul.f32 %v3222_v24, %v7099_v61  ;;  %v4201_v21 = vadd.f32 %v4200_v32, %v4197_v62  ;;  %v3514_v58 = vadd.f32 %v3512_v57, %v3503_v63  ;;  %v3207_v49 = vadd.f32 %v9221_v3, %v3194_v1 }
 0x4be   : > { %v2528_v33 = vpop.permute.xlu0 %2527  ;;  %v3904_v46 = vrot.slane %v3900_v18, 6  ;;  %v3549_v4 = vsel %vm1628_vm9, %v3547_v16, %v3548_v7  ;;  %v3884_v45 = vadd.f32 %v9189_v13, %v3871_v55  ;;  %v4225_v29 = vrot.slane %v4221_v8, 5 }
 0x4bf   : > { %v2530_v53 = vadd.f32 %v2528_v33, %v2517_v10  ;;  %v3224_v33 = vmul.f32 %v3222_v24, %v7093_v12  ;;  %v3527_v22 = vadd.f32 %v9223_v43, %v3514_v58  ;;  %v3227_v39 = vrot.slane %v3223_v14, 7 }
 0x4c0   : > { %v3905_v43 = vrot.slane %v3901_v40, 6  ;;  %v3581_v20 = vmul.f32 %v3579_v44, %v7093_v12  ;;  %v3897_v13 = vadd.f32 %v9240_v48, %v3884_v45  ;;  %v4293_v42 = vstv %s9334_s5  ;;  %s10389_s5 = sld [smem:[#allocation230_spill]] }
 0x4c1   : > { %v2885_v34 = vpop.permute.xlu1 %2884  ;;  %v3228_v36 = vrot.slane %v3224_v33, 7  ;;  %v3540_v6 = vadd.f32 %v9253_v11, %v3527_v22  ;;  %v4294_v22 = vmul.f32 %v4293_v42, %v7099_v61 }
 0x4c2   : > { %v9276_v50 = vpop.permute.xlu0 %3217  ;;  %v2887_v28 = vadd.f32 %v2885_v34, %v2874_v37  ;;  %v4209_v37 = vadd.f32 %v8813_v56, %v4201_v21  ;;  %v4256_v56 = vstv %s9307_s25  ;;  %v3906_v24 = vsel %vm1628_vm9, %v3904_v46, %v3905_v43 }
 0x4c3   : > { %v4330_v60 = vld [vmem:[#allocation3] sm:$0xff]  ;;  %v3220_v3 = vadd.f32 %v9276_v50, %v3207_v49  ;;  %v3229_v11 = vsel %vm1545_vm8, %v3227_v39, %v3228_v36  ;;  %v4224_v50 = vrot.slane %v4220_v47, 5  ;;  %v3551_v63 = vadd.f32 %v3549_v4, %v3540_v6 }
 0x4c4   : > { %5656 = vmatmul.mubr.msk.f32.vlgmr.msra.gmra.mrb[18].mxu0 %vm4336_vm13, %v4330_v60  ;;  %5673 = vmatmul.mubr.msk.f32.vlgmr.msra.gmra.mrb[18].mxu1 %vm4336_vm13, %v4330_v60  ;;  %v3585_v2 = vrot.slane %v3581_v20, 7  ;;  %v4257_v48 = vmul.f32 %v4256_v56, %v7099_v61  ;;  %v4258_v51 = vmul.f32 %v4256_v56, %v7093_v12  ;;  %v3908_v25 = vadd.f32 %v3906_v24, %v3897_v13  ;;  %v5472_v20 = vld [vmem:[%s10384_s15 + $0x10] sm:$0xff] }
 0x4c5   : > { %v2541_v52 = vpop.permute.xlu1 %2540  ;;  %5658 = vmatprep.mubr.msk.f32.mxu0 %vm5896_vm4, %v10381_v30  ;;  %5675 = vmatprep.mubr.msk.f32.mxu1 %vm5896_vm4, %v10381_v30  ;;  %v3231_v26 = vadd.f32 %v3229_v11, %v3220_v3  ;;  %v4226_v5 = vsel %vm1723_vm10, %v4224_v50, %v4225_v29  ;;  %v4298_v6 = vrot.slane %v4294_v22, 7 }
 0x4c6   : > { %v2898_v41 = vpop.permute.xlu0 %2897  ;;  %v2543_v59 = vadd.f32 %v2541_v52, %v2530_v53  ;;  %v3936_v53 = vstv %s9305_s20  ;;  %v4261_v40 = vrot.slane %v4257_v48, 6  ;;  %v4262_v16 = vrot.slane %v4258_v51, 6 }
 0x4c7   : > { %v2900_v23 = vadd.f32 %v2898_v41, %v2887_v28  ;;  %v3580_v28 = vmul.f32 %v3579_v44, %v7099_v61  ;;  %v10383_v41 = vld [vmem:[#allocation172_spill] sm:$0xff]  ;;  %v3937_v38 = vmul.f32 %v3936_v53, %v7099_v61  ;;  %v4295_v44 = vmul.f32 %v4293_v42, %v7093_v12 }
 0x4c8   : > { %2544 = vst.msk [vmem:[#allocation3 + $0xa] sm:$0x1f] %vm1829_vm12, %v2543_v59  ;;  %v4217_v52 = vadd.f32 %v10383_v41, %v4209_v37  ;;  %v3938_v59 = vmul.f32 %v3936_v53, %v7093_v12 }
 0x4c9   : > { %2901 = vst.msk [vmem:[#allocation3 + $0xf] sm:$0x1f] %vm1829_vm12, %v2900_v23  ;;  %v3562_v15 = vpop.permute.xlu1 %3561  ;;  %v3584_v32 = vrot.slane %v3580_v28, 7  ;;  %v3941_v21 = vrot.slane %v3937_v38, 7  ;;  %v4299_v3 = vrot.slane %v4295_v44, 7 }
 0x4ca   : > { %v9310_v27 = vpop.permute.xlu0 %3918  ;;  %v3564_v62 = vadd.f32 %v3562_v15, %v3551_v63  ;;  %v4228_v57 = vadd.f32 %v4226_v5, %v4217_v52  ;;  %v3942_v17 = vrot.slane %v3938_v59, 7 }
 0x4cb   : > { %v3921_v15 = vadd.f32 %v9310_v27, %v3908_v25  ;;  %v3586_v58 = vsel %vm1545_vm8, %v3584_v32, %v3585_v2  ;;  %v4300_v45 = vsel %vm1545_vm8, %v4298_v6, %v4299_v3 }
 0x4cc   : > { %v3943_v39 = vsel %vm1545_vm8, %v3941_v21, %v3942_v17 }
 0x4cd   : > { %v4239_v10 = vpop.permute.xlu1 %4238 }
 0x4ce   : > { %v3242_v34 = vpop.permute.xlu0 %3241  ;;  %v4241_v54 = vadd.f32 %v4239_v10, %v4228_v57 }
 0x4cf   : > { %v3244_v23 = vadd.f32 %v3242_v34, %v3231_v26  ;;  %v4263_v34 = vsel %vm1628_vm9, %v4261_v40, %v4262_v16  ;;  %v10385_v40 = vmov 0.0|0.0  }
 0x4d0   : > { %v4331_v60 = vld [vmem:[#allocation3 + $0x8] sm:$0xff] }
 0x4d1   : > { %5659 = vmatmul.mubr.msk.f32.gmra.mrb[20].mxu0 %vm4336_vm13, %v4331_v60  ;;  %5676 = vmatmul.mubr.msk.f32.gmra.mrb[20].mxu1 %vm4336_vm13, %v4331_v60  ;;  %v3575_v9 = vpop.permute.xlu1 %3574 }
 0x4d2   : > { %v3932_v35 = vpop.permute.xlu0 %3931  ;;  %5661 = vmatprep.mubr.msk.f32.mxu0 %vm5896_vm4, %v10381_v30  ;;  %5678 = vmatprep.mubr.msk.f32.mxu1 %vm5896_vm4, %v10381_v30  ;;  %v3577_v14 = vadd.f32 %v3575_v9, %v3564_v62  ;;  %v4546_v9 = vld [vmem:[%s10384_s15] sm:$0xff] }
 0x4d3   : > { %v3934_v7 = vadd.f32 %v3932_v35, %v3921_v15 }
 0x4d4   : > { %v3588_v49 = vadd.f32 %v3586_v58, %v3577_v14  ;;  %v4547_v58 = vld [vmem:[%s10384_s15 + $0x8] sm:$0xff] }
 0x4d5   : > { %v4252_v19 = vpop.permute.xlu1 %4251  ;;  %v3945_v8 = vadd.f32 %v3943_v39, %v3934_v7 }
 0x4d6   : > { %v3255_v31 = vpop.permute.xlu0 %3254  ;;  %v4254_v0 = vadd.f32 %v4252_v19, %v4241_v54 }
 0x4d7   : > { %v3257_v33 = vadd.f32 %v3255_v31, %v3244_v23 }
 0x4d8   : > { %v4265_v37 = vadd.f32 %v4263_v34, %v4254_v0  ;;  %v5476_v34 = vld [vmem:[%s10386_s14 + $0x10] sm:$0xff] }
 0x4d9   : > { %3258 = vst.msk [vmem:[#allocation3 + $0x14] sm:$0x1f] %vm1829_vm12, %v3257_v33  ;;  %v3599_v18 = vpop.permute.xlu1 %3598 }
 0x4da   : > { %v3956_v1 = vpop.permute.xlu0 %3955  ;;  %v3601_v27 = vadd.f32 %v3599_v18, %v3588_v49  ;;  %v5473_v18 = vld [vmem:[%s10384_s15 + $0x18] sm:$0xff] }
 0x4db   : > { %v3958_v46 = vadd.f32 %v3956_v1, %v3945_v8 }
 0x4dd   : > { %v4276_v47 = vpop.permute.xlu1 %4275 }
 0x4de   : > { %v3612_v36 = vpop.permute.xlu0 %3611  ;;  %v4278_v43 = vadd.f32 %v4276_v47, %v4265_v37 }
 0x4df   : > { %v3614_v10 = vadd.f32 %v3612_v36, %v3601_v27 }
 0x4e0   : > { %v4332_v55 = vld [vmem:[#allocation3 + $0x10] sm:$0xff] }
 0x4e1   : > { %3615 = vst.msk [vmem:[#allocation3 + $0x19] sm:$0x1f] %vm1829_vm12, %v3614_v10  ;;  %5662 = vmatmul.mubr.msk.f32.gmra.mrb[22].mxu0 %vm4336_vm13, %v4332_v55  ;;  %5679 = vmatmul.mubr.msk.f32.gmra.mrb[22].mxu1 %vm4336_vm13, %v4332_v55  ;;  %v3969_v12 = vpop.permute.xlu1 %3968 }
 0x4e2   : > { %v4289_v61 = vpop.permute.xlu0 %4288  ;;  %5664 = vmatprep.mubr.msk.f32.mxu0 %vm5896_vm4, %v10381_v30  ;;  %5681 = vmatprep.mubr.msk.f32.mxu1 %vm5896_vm4, %v10381_v30  ;;  %v3971_v60 = vadd.f32 %v3969_v12, %v3958_v46  ;;  %v4733_v12 = vld [vmem:[%s10386_s14 + $0x8] sm:$0xff] }
 0x4e3   : > { %v4291_v4 = vadd.f32 %v4289_v61, %v4278_v43  ;;  %v5477_v43 = vld [vmem:[%s10386_s14 + $0x18] sm:$0xff]  ;;  %v4732_v61 = vld [vmem:[%s10386_s14] sm:$0xff] }
 0x4e4   : > { %3972 = vst.msk [vmem:[#allocation3 + $0x1e] sm:$0x1f] %vm1829_vm12, %v3971_v60  ;;  %v4908_v60 = vld [vmem:[%s10387_s29] sm:$0xff] }
 0x4e5   : > { %v4302_v53 = vadd.f32 %v4300_v45, %v4291_v4  ;;  %v4909_v4 = vld [vmem:[%s10387_s29 + $0x8] sm:$0xff] }
 0x4e6   : > { %v4313_v28 = vpop.permute.xlu1 %4312  ;;  %v4326_v11 = vpop.permute.xlu0 %4325 }
 0x4e7   : > { %v4315_v56 = vadd.f32 %v4313_v28, %v4302_v53 }
 0x4e9   : > { %v4328_v50 = vadd.f32 %v4326_v11, %v4315_v56 }
 0x4eb   : > { %4329 = vst.msk [vmem:[#allocation3 + $0x23] sm:$0x1f] %vm1829_vm12, %v4328_v50  ;;  %v4333_v29 = vld [vmem:[#allocation3 + $0x18] sm:$0xff] }
 0x4ec   : > { %5665 = vmatmul.mubr.msk.f32.gmra.mrb[24].mxu0 %vm4336_vm13, %v4333_v29  ;;  %5682 = vmatmul.mubr.msk.f32.gmra.mrb[24].mxu1 %vm4336_vm13, %v4333_v29 }
 0x4ed   : > { %5667 = vmatprep.mubr.msk.f32.mxu0 %vm5896_vm4, %v10381_v30  ;;  %5684 = vmatprep.mubr.msk.f32.mxu1 %vm5896_vm4, %v10381_v30 }
 0x4f2   : > { %v4334_v35 = vld [vmem:[#allocation3 + $0x20] sm:$0xff] }
 0x4f3   : > { %5668 = vmatmul.mubr.msk.f32.gmra.mrb[26].mxu0 %vm4336_vm13, %v4334_v35  ;;  %5685 = vmatmul.mubr.msk.f32.gmra.mrb[26].mxu1 %vm4336_vm13, %v4334_v35  ;;  %v4914_v35 = vld [vmem:[%s10388_s18] sm:$0x3] }
 0x4f4   : > { %5697 = vmatprep.mubr.msk.f32.mxu0 %vm4548_vm14, %v4546_v9  ;;  %5710 = vmatprep.mubr.msk.f32.mxu1 %vm4548_vm14, %v5472_v20  ;;  %v4915_v9 = vld [vmem:[%s10389_s5] sm:$0x3] }
 0x4f7   : > { %v4726_v44 = vpop.permute.xlu0 %4725  ;;  %v4721_v39 = vpop.permute.xlu1 %4720 }
 0x597   : > { %v4422_v13 = vpop.f32.mrb[18].mxu0  ;;  %v4517_v63 = vpop.f32.mrb[18].mxu1 }
 0x598   : > { %v4541_v26 = vmax.f32 %v4422_v13, %v4517_v63  ;;  %v5657_v41 = vpop.f32.mrb[19].mxu0  ;;  %v5674_v52 = vpop.f32.mrb[19].mxu1 }
 0x5a4   : > { %v4427_v24 = vpop.f32.mrb[20].mxu0  ;;  %v4522_v38 = vpop.f32.mrb[20].mxu1 }
 0x5a5   : > { %v4542_v62 = vmax.f32 %v4427_v24, %v4522_v38  ;;  %v5660_v23 = vpop.f32.mrb[21].mxu0  ;;  %v5677_v59 = vpop.f32.mrb[21].mxu1 }
 0x5a7   : > { %v5766_v32 = vpack.c.bf16 %v4542_v62, %v4541_v26 }
 0x5a9   : > { %5767 = vmatprep.subr.bf16.mxu0 %v5766_v32  ;;  %5775 = vmatprep.subr.bf16.mxu1 %v5766_v32 }
 0x5aa   : > { %5769 = vmatpush3.bf16.msra.mxu0 %v5766_v32  ;;  %5777 = vmatpush3.bf16.msra.mxu1 %v5766_v32 }
 0x5b4   : > { %v4432_v5 = vpop.f32.mrb[22].mxu0  ;;  %v4527_v31 = vpop.f32.mrb[22].mxu1 }
 0x5b5   : > { %v4543_v19 = vmax.f32 %v4432_v5, %v4527_v31  ;;  %v5663_v2 = vpop.f32.mrb[23].mxu0  ;;  %v5680_v48 = vpop.f32.mrb[23].mxu1 }
 0x5bf   : > { %v4437_v51 = vpop.f32.mrb[24].mxu0  ;;  %v4532_v25 = vpop.f32.mrb[24].mxu1 }
 0x5c0   : > { %v4544_v57 = vmax.f32 %v4437_v51, %v4532_v25  ;;  %v5666_v14 = vpop.f32.mrb[25].mxu0  ;;  %v5683_v33 = vpop.f32.mrb[25].mxu1 }
 0x5c2   : > { %v5770_v15 = vpack.c.bf16 %v4544_v57, %v4543_v19 }
 0x5c4   : > { %5771 = vmatprep.subr.bf16.mxu0 %v5770_v15  ;;  %5779 = vmatprep.subr.bf16.mxu1 %v5770_v15 }
 0x5c5   : > { %5773 = vmatpush3.bf16.msra.mxu0 %v5770_v15  ;;  %5781 = vmatpush3.bf16.msra.mxu1 %v5770_v15 }
 0x5c6   : > { %v4442_v54 = vpop.f32.mrb[26].mxu0  ;;  %v4537_v21 = vpop.f32.mrb[26].mxu1 }
 0x5c7   : > { %v4545_v42 = vmax.f32 %v4442_v54, %v4537_v21  ;;  %v5669_v17 = vpop.f32.mrb[27].mxu0  ;;  %v5686_v1 = vpop.f32.mrb[27].mxu1 }
 0x5c9   : > { %5695 = vmatprep.subr.mxu0 %v4545_v42  ;;  %5708 = vmatprep.subr.mxu1 %v4545_v42 }
 0x5ca   : > { %5696 = vmatpush3.msra.mxu0 %v4545_v42  ;;  %5709 = vmatpush3.msra.mxu1 %v4545_v42 }
 0x5cb   : > { %5698 = vmatmul.mubr.msk.f32.vlgmr.msra.gmra.mrb[28].mxu0 %vm4548_vm14, %v4547_v58  ;;  %5711 = vmatmul.mubr.msk.f32.vlgmr.msra.gmra.mrb[28].mxu1 %vm4548_vm14, %v5473_v18 }
 0x5cc   : > { %5790 = vmatprep.subr.bf16.mxu1 %v10385_v40  ;;  %5731 = vmatprep.mubr.msk.f32.mxu1 %vm5896_vm4, %v10381_v30 }
 0x5cd   : > { %5717 = vmatprep.mubr.msk.f32.mxu0 %vm4745_vm15, %v5476_v34 }
 0x69e   : > { %v5699_v16 = vpop.f32.mrb[28].mxu0  ;;  %v5712_v7 = vpop.f32.mrb[28].mxu1 }
 0x69f   : > { %v4715_v0 = vmax.f32 %v5699_v16, %v5712_v7  ;;  %v4621_v49 = vpop.f32.mrb[29].mxu0  ;;  %v4705_v22 = vpop.f32.mrb[29].mxu1 }
 0x6a0   : > { %v4714_v27 = vmax.f32 %v4621_v49, %v4705_v22 }
 0x6a1   : > { %v4729_v36 = vadd.f32 %v4726_v44, %v4715_v0 }
 0x6a2   : > { %v4728_v47 = vadd.f32 %v4721_v39, %v4714_v27 }
 0x6a3   : > { %v4731_v8 = vmax.f32 %v4729_v36, 0.0 }
 0x6a4   : > { %v4730_v10 = vmax.f32 %v4728_v47, 0.0 }
 0x6a6   : > { %v5833_v30 = vpack.i.bf16 %v4731_v8, %v4730_v10  ;;  %v5786_v37 = vpack.c.bf16 %v4731_v8, %v4730_v10 }
 0x6a8   : > { %5834 = vrot.lane.b32.xlu1 %v5833_v30, %s9667_s9 }
 0x71a   : > { %v5835_v55 = vpop.permute.xlu1 %5834 }
 0x71b   : > { %v5837_v6 = vunpack.i.h.bf16 %v5835_v55  ;;  %v5836_v3 = vunpack.i.l.bf16 %v5835_v55 }
 0x71d   : > { %v5782_v46 = vpack.c.bf16 %v5837_v6, %v5836_v3 }
 0x71f   : > { %5783 = vmatprep.subr.bf16.mxu0 %v5782_v46 }
 0x720   : > { %5785 = vmatpush3.bf16.msra.mxu0 %v5782_v46 }
 0x721   : > { %5787 = vmatprep.subr.bf16.mxu0 %v5786_v37 }
 0x723   : > { %5718 = vmatmul.mubr.msk.f32.vlgmr.msra.gmra.mrb[30].mxu0 %vm4745_vm15, %v5477_v43 }
 0x724   : > { %5789 = vmatpush3.bf16.msra.mxu0 %v5786_v37  ;;  %5724 = vmatprep.mubr.msk.f32.mxu0 %vm4745_vm15, %v4732_v61 }
 0x72b   : > { %5725 = vmatmul.mubr.msk.f32.vlgmr.msra.gmra.mrb[30].mxu0 %vm4745_vm15, %v4733_v12 }
 0x7fe   : > { %v5726_v45 = vpop.f32.mrb[30].mxu0 }
 0x7ff   : > { %v4911_v53 = vadd.f32 %v5726_v45, %v4909_v4  ;;  %v4899_v28 = vpop.f32.mrb[31].mxu0 }
 0x800   : > { %v4910_v56 = vadd.f32 %v4908_v60, %v4899_v28 }
 0x801   : > { %v4913_v11 = vmax.f32 %v4911_v53, 0.0 }
 0x802   : > { %v4912_v50 = vmax.f32 %v4910_v56, 0.0 }
 0x804   : > { %v5791_v29 = vpack.c.bf16 %v4913_v11, %v4912_v50 }
 0x806   : > { %5792 = vmatpush3.bf16.msra.mxu1 %v5791_v29 }
 0x809   : > { %5732 = vmatmul.mubr.msk.f32.vlgmr.msra.gmra.mrb[30].mxu1 %vm4745_vm15, %v4914_v35 }
 0x8dc   : > { %v4985_v20 = vpop.f32.mrb[30].mxu1 }
 0x8dd   : > { %v4986_v13 = vadd.f32 %v4985_v20, %v4915_v9  ;;  %v5733_v63 = vpop.f32.mrb[31].mxu1 }
 0x8df   : > { %v4989_v26 = vmax.f32 %v4986_v13, 0.0 }
 0x8e1   : > { %v4991_v41 = vrot.slane %v4989_v26, 1 }
 0x8e3   : > { %v4993_v52 = vmax.f32 %v4989_v26, %v4991_v41 }
 0x8e5   : > { %v4994_v24 = vsub.f32 %v4989_v26, %v4993_v52  ;;  %v4998_v38 = vrot.slane %v4993_v52, 7 }
 0x8e7   : > { %v5000_v62 = vsub.f32 %v4989_v26, %v4998_v38  ;;  %v4995_v23 = vmul.f32 1.442695, %v4994_v24 }
 0x8e9   : > { %v5001_v59 = vmul.f32 1.442695, %v5000_v62 }
 0x8eb   : > { %5838 = vpow2.f32 %v5001_v59 }
 0x8ec   : > { %5840 = vpow2.f32 %v4995_v23 }
 0x8f5   : > { %v5839_v32 = vpop.eup %5838 }
 0x8f6   : > { %v5004_v5 = vrot.slane %v5839_v32, 1  ;;  %v5841_v31 = vpop.eup %5840 }
 0x8f8   : > { %v5006_v19 = vadd.f32 %v5841_v31, %v5004_v5 }
 0x8fa   : > { %5842 = vrcp.f32 %v5006_v19 }
 0x904   : > { %v5843_v2 = vpop.eup %5842 }
 0x905   : > { %v5009_v48 = vmul.f32 %v5843_v2, %v5841_v31  ;;  %v5013_v51 = vrot.slane %v5843_v2, 7 }
 0x907   : > { %5011 = vst.msk [vmem:[%s465_s17] sm:$0x1] %vm5010_vm0, %v5009_v48  ;;  %v5015_v25 = vmul.f32 %v5839_v32, %v5013_v51 }
 0x909   : > { %5017 = vst.msk [vmem:[%s465_s17] sm:$0x2] %vm5016_vm1, %v5015_v25 }
 0x90a PF: > { %s10392_s23 = sld [smem:[#allocation10_spill]] }
 0x910   : > { %s25_s25 = sadd.s32 1, %s10392_s23  }
 0x911   : > { %p22_p5 = scmp.ge.s32.totalorder %s25_s25, 4  }
 0x913   :  { %24 = sbr.rel (!%p22_p5) target bundleno = 17 (0x11), region = 116 }
 0x91a   :  { %5037 = vsyncpa [#allocation5], 1 }
 0x91b   :  { %5039 = vsyncpa [#allocation5 + $0x1], 1 }
 0x91c   :  { %5040 = vsyncpa [#allocation7], 1 }

</bundles_post_ra>
